<compile_context>
chip_gen: v6e
topology: v6e:2x2x1
jax: 0.10.0
libtpu: 0.0.40
codegen_flags: <defaults>
</compile_context>

<pallas_src>
import functools

import jax
import jax.numpy as jnp
from jax.experimental import pallas as pl
from jax.experimental.pallas import tpu as pltpu


# ---------------------------------------------------------------------------
# Pallas kernels
# ---------------------------------------------------------------------------
def _stem_kernel(xt_ref, w_ref, s_ref, b_ref, o_ref, *, H, W):
    # xt_ref: (1, H, W, Kp) im2col taps (tiny, Cin=4), w_ref: (Kp, Cout)
    P = H * W
    Cout = w_ref.shape[1]
    lhs = xt_ref[0].reshape(P, xt_ref.shape[3])
    y = jnp.dot(lhs, w_ref[...], preferred_element_type=jnp.float32)
    y = jnp.maximum(y * s_ref[...] + b_ref[...], 0.0)
    o_ref[0] = y.reshape(H, W, Cout).astype(o_ref.dtype)


def _block_identity_kernel(xp_ref, w1_ref, s1_ref, b1_ref,
                           w2_ref, s2_ref, b2_ref, o_ref, mid_ref, *, H, W):
    # xp_ref: (1, H+2, W+2, C) padded NHWC input (bf16), identity shortcut block.
    C = xp_ref.shape[3]
    Cout = w1_ref.shape[1]
    P = H * W

    xp = xp_ref[0].astype(jnp.float32)                      # (H+2, W+2, C)

    # conv1 (3x3, stride 1) as one deep matmul: contraction = 9*C.
    taps = [xp[i:i + H, j:j + W, :] for i in range(3) for j in range(3)]
    lhs1 = jnp.concatenate(taps, axis=-1).reshape(P, 9 * C).astype(jnp.bfloat16)
    y1 = jnp.dot(lhs1, w1_ref[...], preferred_element_type=jnp.float32)
    y1 = jnp.maximum(y1 * s1_ref[...] + b1_ref[...], 0.0)

    # Stage mid into a zero-padded VMEM scratch (never touches HBM).
    # Interior placed at sublane-aligned column offset 8.
    mid_ref[...] = jnp.zeros_like(mid_ref)
    mid_ref[1:1 + H, 8:8 + W, :] = y1.reshape(H, W, Cout)

    mp = mid_ref[...]                                       # (H+2, W+16, Cout)
    taps2 = [mp[i:i + H, 7 + j:7 + j + W, :] for i in range(3) for j in range(3)]
    lhs2 = jnp.concatenate(taps2, axis=-1).reshape(P, 9 * Cout).astype(jnp.bfloat16)
    y2 = jnp.dot(lhs2, w2_ref[...], preferred_element_type=jnp.float32)
    y2 = y2 * s2_ref[...] + b2_ref[...]

    sc = xp[1:1 + H, 1:1 + W, :].reshape(P, C)              # identity shortcut
    o_ref[0] = jnp.maximum(y2 + sc, 0.0).reshape(H, W, Cout).astype(o_ref.dtype)


def _block_proj_kernel(xt_ref, w1_ref, s1_ref, b1_ref,
                       w2_ref, s2_ref, b2_ref,
                       ws_ref, ss_ref, bs_ref, o_ref, mid_ref, *, Ho, Wo, Cin):
    # xt_ref: (1, Ho, Wo, 9*Cin) stride-2 taps (built in the wrapper for the single
    # stride-2 conv); projection shortcut block (Cin -> Cout, stride 2).
    Cout = w1_ref.shape[1]
    P = Ho * Wo

    xt = xt_ref[0].astype(jnp.float32)                      # (Ho, Wo, 9*Cin)

    lhs1 = xt.reshape(P, 9 * Cin).astype(jnp.bfloat16)
    y1 = jnp.dot(lhs1, w1_ref[...], preferred_element_type=jnp.float32)
    y1 = jnp.maximum(y1 * s1_ref[...] + b1_ref[...], 0.0)

    mid_ref[...] = jnp.zeros_like(mid_ref)
    mid_ref[1:1 + Ho, 8:8 + Wo, :] = y1.reshape(Ho, Wo, Cout)

    mp = mid_ref[...]
    taps2 = [mp[i:i + Ho, 7 + j:7 + j + Wo, :] for i in range(3) for j in range(3)]
    lhs2 = jnp.concatenate(taps2, axis=-1).reshape(P, 9 * Cout).astype(jnp.bfloat16)
    y2 = jnp.dot(lhs2, w2_ref[...], preferred_element_type=jnp.float32)
    y2 = y2 * s2_ref[...] + b2_ref[...]

    # 1x1 stride-2 projection shortcut == matmul on the centre tap (k = 4).
    xc = xt[:, :, 4 * Cin:5 * Cin].reshape(P, Cin).astype(jnp.bfloat16)
    ysc = jnp.dot(xc, ws_ref[...], preferred_element_type=jnp.float32)
    ysc = ysc * ss_ref[...] + bs_ref[...]

    o_ref[0] = jnp.maximum(y2 + ysc, 0.0).reshape(Ho, Wo, Cout).astype(o_ref.dtype)


# ---------------------------------------------------------------------------
# Wrappers (pure data-movement glue + pallas_call plumbing)
# ---------------------------------------------------------------------------
def _extract_taps(x, stride):
    """x: (N,H,W,C) -> (N,Ho,Wo,9*C): 3x3 (strided) taps, channel-contiguous per tap."""
    N, H, W, C = x.shape
    Ho = (H - 1) // stride + 1
    Wo = (W - 1) // stride + 1
    xp = jnp.pad(x, ((0, 0), (1, 1), (1, 1), (0, 0)))
    taps = [xp[:, i:i + stride * (Ho - 1) + 1:stride,
               j:j + stride * (Wo - 1) + 1:stride, :]
            for i in range(3) for j in range(3)]
    return jnp.concatenate(taps, axis=-1)


def _bcast_spec(cout):
    return pl.BlockSpec((1, cout), lambda n: (0, 0))


def stem_conv(x, w, scale, bias):
    """x: (N, H, W, Cin) bf16. 3x3 stride-1 conv + folded BN + ReLU."""
    N, H, W, Cin = x.shape
    Cout = w.shape[3]
    K = 9 * Cin
    Kp = -(-K // 8) * 8                                     # pad contraction to mult of 8
    xt = _extract_taps(x, 1)                                # (N, H, W, 9*Cin)
    if Kp != K:
        xt = jnp.pad(xt, ((0, 0), (0, 0), (0, 0), (0, Kp - K)))
    w2 = w.reshape(K, Cout)
    if Kp != K:
        w2 = jnp.pad(w2, ((0, Kp - K), (0, 0)))
    w2 = w2.astype(jnp.bfloat16)
    s2 = scale.reshape(1, Cout).astype(jnp.float32)
    b2 = bias.reshape(1, Cout).astype(jnp.float32)

    return pl.pallas_call(
        functools.partial(_stem_kernel, H=H, W=W),
        out_shape=jax.ShapeDtypeStruct((N, H, W, Cout), jnp.bfloat16),
        grid=(N,),
        in_specs=[
            pl.BlockSpec((1, H, W, Kp), lambda n: (n, 0, 0, 0)),
            pl.BlockSpec((Kp, Cout), lambda n: (0, 0)),
            _bcast_spec(Cout),
            _bcast_spec(Cout),
        ],
        out_specs=pl.BlockSpec((1, H, W, Cout), lambda n: (n, 0, 0, 0)),
        compiler_params=pltpu.CompilerParams(dimension_semantics=("parallel",)),
        cost_estimate=pl.CostEstimate(
            flops=2 * N * H * W * Kp * Cout, transcendentals=0,
            bytes_accessed=xt.size * 2 + w2.size * 2 + N * H * W * Cout * 2),
    )(xt, w2, s2, b2)


def basic_block(x, p, stride):
    """x: (N, H, W, Cin) bf16. One fused pallas_call per BasicBlock."""
    N, H, W, Cin = x.shape
    Cout = p["w1"].shape[3]
    Ho = (H - 1) // stride + 1
    Wo = (W - 1) // stride + 1
    P = Ho * Wo

    w1 = p["w1"].reshape(9 * Cin, Cout).astype(jnp.bfloat16)
    w2 = p["w2"].reshape(9 * Cout, Cout).astype(jnp.bfloat16)
    s1 = p["s1"].reshape(1, Cout).astype(jnp.float32)
    b1 = p["b1"].reshape(1, Cout).astype(jnp.float32)
    s2 = p["s2"].reshape(1, Cout).astype(jnp.float32)
    b2 = p["b2"].reshape(1, Cout).astype(jnp.float32)

    scratch = [pltpu.VMEM((Ho + 2, Wo + 16, Cout), jnp.float32)]
    cparams = pltpu.CompilerParams(dimension_semantics=("parallel",))
    out_shape = jax.ShapeDtypeStruct((N, Ho, Wo, Cout), jnp.bfloat16)
    out_spec = pl.BlockSpec((1, Ho, Wo, Cout), lambda n: (n, 0, 0, 0))

    if "ws" in p:  # projection shortcut block (stride 2 here)
        xt = _extract_taps(x, stride)                       # (N, Ho, Wo, 9*Cin)
        ws = p["ws"].reshape(Cin, Cout).astype(jnp.bfloat16)
        ss = p["ss"].reshape(1, Cout).astype(jnp.float32)
        bs = p["bs"].reshape(1, Cout).astype(jnp.float32)
        flops = 2 * N * P * Cout * (9 * Cin + 9 * Cout + Cin)
        bytes_acc = (xt.size + w1.size + w2.size + ws.size + N * P * Cout) * 2
        return pl.pallas_call(
            functools.partial(_block_proj_kernel, Ho=Ho, Wo=Wo, Cin=Cin),
            out_shape=out_shape,
            grid=(N,),
            in_specs=[
                pl.BlockSpec((1, Ho, Wo, 9 * Cin), lambda n: (n, 0, 0, 0)),
                pl.BlockSpec((9 * Cin, Cout), lambda n: (0, 0)),
                _bcast_spec(Cout), _bcast_spec(Cout),
                pl.BlockSpec((9 * Cout, Cout), lambda n: (0, 0)),
                _bcast_spec(Cout), _bcast_spec(Cout),
                pl.BlockSpec((Cin, Cout), lambda n: (0, 0)),
                _bcast_spec(Cout), _bcast_spec(Cout),
            ],
            out_specs=out_spec,
            scratch_shapes=scratch,
            compiler_params=cparams,
            cost_estimate=pl.CostEstimate(flops=flops, transcendentals=0,
                                          bytes_accessed=bytes_acc),
        )(xt, w1, s1, b1, w2, s2, b2, ws, ss, bs)

    # identity shortcut block (stride 1, Cin == Cout): pass the padded image once,
    # taps are built in-kernel (no im2col materialization in HBM).
    xp = jnp.pad(x, ((0, 0), (1, 1), (1, 1), (0, 0)))       # (N, H+2, W+2, Cin)
    flops = 2 * N * P * Cout * (9 * Cin + 9 * Cout)
    bytes_acc = (xp.size + w1.size + w2.size + N * P * Cout) * 2
    return pl.pallas_call(
        functools.partial(_block_identity_kernel, H=H, W=W),
        out_shape=out_shape,
        grid=(N,),
        in_specs=[
            pl.BlockSpec((1, H + 2, W + 2, Cin), lambda n: (n, 0, 0, 0)),
            pl.BlockSpec((9 * Cin, Cout), lambda n: (0, 0)),
            _bcast_spec(Cout), _bcast_spec(Cout),
            pl.BlockSpec((9 * Cout, Cout), lambda n: (0, 0)),
            _bcast_spec(Cout), _bcast_spec(Cout),
        ],
        out_specs=out_spec,
        scratch_shapes=scratch,
        compiler_params=cparams,
        cost_estimate=pl.CostEstimate(flops=flops, transcendentals=0,
                                      bytes_accessed=bytes_acc),
    )(xp, w1, s1, b1, w2, s2, b2)


def encoder_forward(x_nchw, params):
    x = jnp.transpose(x_nchw, (0, 2, 3, 1)).astype(jnp.bfloat16)   # NCHW -> NHWC, bf16
    out = stem_conv(x, params["conv1_w"], params["bn1_s"], params["bn1_b"])
    out = basic_block(out, params["l1b0"], 1)
    out = basic_block(out, params["l1b1"], 1)
    out = basic_block(out, params["l2b0"], 2)
    out = basic_block(out, params["l2b1"], 1)
    return jnp.transpose(out.astype(jnp.float32), (0, 3, 1, 2))    # NHWC -> NCHW


# ---------------------------------------------------------------------------
# Deterministic parameter initialization (shapes match the PyTorch __init__)
# TODO(synk): BatchNorm is realized in inference mode (folded running stats);
#             training-mode batch statistics are not reproduced.
# ---------------------------------------------------------------------------
def _fold_bn(gamma, beta, mean, var, eps=1e-5):
    scale = gamma / jnp.sqrt(var + eps)
    return scale, beta - mean * scale


def _init_conv(key, kh, kw, cin, cout):
    fan_in = kh * kw * cin
    return jax.random.normal(key, (kh, kw, cin, cout), jnp.float32) / jnp.sqrt(float(fan_in))


def _init_bn(key, c):
    k1, k2, k3, k4 = jax.random.split(key, 4)
    gamma = 1.0 + 0.1 * jax.random.normal(k1, (c,), jnp.float32)
    beta = 0.1 * jax.random.normal(k2, (c,), jnp.float32)
    mean = 0.1 * jax.random.normal(k3, (c,), jnp.float32)
    var = 1.0 + 0.1 * jnp.abs(jax.random.normal(k4, (c,), jnp.float32))
    return _fold_bn(gamma, beta, mean, var)


def make_params(channels):
    keys = iter(jax.random.split(jax.random.PRNGKey(0), 64))

    def block_params(cin, cout, stride):
        p = {}
        p["w1"] = _init_conv(next(keys), 3, 3, cin, cout)
        p["s1"], p["b1"] = _init_bn(next(keys), cout)
        p["w2"] = _init_conv(next(keys), 3, 3, cout, cout)
        p["s2"], p["b2"] = _init_bn(next(keys), cout)
        if stride != 1 or cin != cout:
            p["ws"] = _init_conv(next(keys), 1, 1, cin, cout)
            p["ss"], p["bs"] = _init_bn(next(keys), cout)
        return p

    params = {}
    params["conv1_w"] = _init_conv(next(keys), 3, 3, channels, 64)
    params["bn1_s"], params["bn1_b"] = _init_bn(next(keys), 64)
    params["l1b0"] = block_params(64, 64, 1)
    params["l1b1"] = block_params(64, 64, 1)
    params["l2b0"] = block_params(64, 128, 2)
    params["l2b1"] = block_params(128, 128, 1)
    return params


# ---------------------------------------------------------------------------
# Pure-JAX reference (lax.conv) — mirrors the kernel's bf16 operand quantization
# so the comparison only differs by f32 accumulation order.
# ---------------------------------------------------------------------------
def _ref_conv(x, w, stride=1, pad=1):
    return jax.lax.conv_general_dilated(
        x.astype(jnp.bfloat16), w.astype(jnp.bfloat16),
        (stride, stride), [(pad, pad), (pad, pad)],
        dimension_numbers=("NHWC", "HWIO", "NHWC"),
        preferred_element_type=jnp.float32)


def _ref_block(x, p, stride):
    y1 = jnp.maximum(_ref_conv(x, p["w1"], stride) * p["s1"] + p["b1"], 0.0)
    y1 = y1.astype(jnp.bfloat16)
    y2 = _ref_conv(y1, p["w2"], 1) * p["s2"] + p["b2"]
    if "ws" in p:
        sc = _ref_conv(x, p["ws"], stride, pad=0) * p["ss"] + p["bs"]
    else:
        sc = x.astype(jnp.float32)
    return jnp.maximum(y2 + sc, 0.0).astype(jnp.bfloat16)


def _ref_encoder(x_nchw, params):
    x = jnp.transpose(x_nchw, (0, 2, 3, 1)).astype(jnp.bfloat16)
    out = jnp.maximum(
        _ref_conv(x, params["conv1_w"], 1) * params["bn1_s"] + params["bn1_b"], 0.0)
    out = out.astype(jnp.bfloat16)
    out = _ref_block(out, params["l1b0"], 1)
    out = _ref_block(out, params["l1b1"], 1)
    out = _ref_block(out, params["l2b0"], 2)
    out = _ref_block(out, params["l2b1"], 1)
    return jnp.transpose(out.astype(jnp.float32), (0, 3, 1, 2))


if __name__ == "__main__":
    B, C, H, W = 2, 4, 16, 16  # small NCHW input, matching the PyTorch interface
    params = make_params(C)
    x = jax.random.normal(jax.random.PRNGKey(0), (B, C, H, W), jnp.float32)

    fwd = jax.jit(functools.partial(encoder_forward, params=params))
    out = jax.block_until_ready(fwd(x))

    assert out.shape == (B, 128, H // 2, W // 2), out.shape
    ref = _ref_encoder(x, params)
    max_err = float(jnp.max(jnp.abs(out - ref)))
    assert jnp.allclose(out, ref, atol=5e-2, rtol=2e-2), max_err

    print("KERNEL_OK")
</pallas_src>

<mosaic_0001>
module attributes {stable_mosaic.version = 11 : i64} {
  func.func @_stem_kernel(%arg0: i32, %arg1: memref<1x16x16x40xbf16, #tpu.memory_space<vmem>>, %arg2: memref<40x64xbf16, #tpu.memory_space<vmem>>, %arg3: memref<1x64xf32, #tpu.memory_space<vmem>>, %arg4: memref<1x64xf32, #tpu.memory_space<vmem>>, %arg5: memref<1x16x16x64xbf16, #tpu.memory_space<vmem>>) attributes {dimension_semantics = [#tpu.dimension_semantics<parallel>], iteration_bounds = array<i64: 2>, scalar_prefetch = 0 : i64, scratch_operands = 0 : i64, tpu.core_type = #tpu.core_type<tc>, window_params = [{transform_indices = @transform_0, window_bounds = array<i64: 1, 16, 16, 40>}, {pipeline_mode = #tpu.pipeline_mode<synchronous>, transform_indices = @transform_1, window_bounds = array<i64: 40, 64>}, {pipeline_mode = #tpu.pipeline_mode<synchronous>, transform_indices = @transform_2, window_bounds = array<i64: 1, 64>}, {pipeline_mode = #tpu.pipeline_mode<synchronous>, transform_indices = @transform_3, window_bounds = array<i64: 1, 64>}, {transform_indices = @transform_4, window_bounds = array<i64: 1, 16, 16, 64>}]} {
    %c0 = arith.constant 0 : index
    %c0_0 = arith.constant 0 : index
    %c0_1 = arith.constant 0 : index
    %c0_2 = arith.constant 0 : index
    %0 = vector.load %arg1[%c0, %c0_0, %c0_1, %c0_2] : memref<1x16x16x40xbf16, #tpu.memory_space<vmem>>, vector<1x16x16x40xbf16>
    %1 = vector.shape_cast %0 : vector<1x16x16x40xbf16> to vector<16x16x40xbf16>
    %2 = vector.shape_cast %1 : vector<16x16x40xbf16> to vector<256x40xbf16>
    %c0_3 = arith.constant 0 : index
    %c0_4 = arith.constant 0 : index
    %3 = vector.load %arg2[%c0_3, %c0_4] : memref<40x64xbf16, #tpu.memory_space<vmem>>, vector<40x64xbf16>
    %cst = arith.constant dense<0.000000e+00> : vector<256x64xf32>
    %4 = tpu.matmul %2, %3, %cst {dimension_numbers = #tpu.dot_dimension_numbers<[1], [0], [0], [1], [0, 0, 1, 1], [], []>} : vector<256x40xbf16>, vector<40x64xbf16>, vector<256x64xf32> -> vector<256x64xf32>
    %c0_5 = arith.constant 0 : index
    %c0_6 = arith.constant 0 : index
    %5 = vector.load %arg3[%c0_5, %c0_6] : memref<1x64xf32, #tpu.memory_space<vmem>>, vector<1x64xf32>
    %6 = vector.broadcast %5 : vector<1x64xf32> to vector<256x64xf32>
    %7 = arith.mulf %4, %6 : vector<256x64xf32>
    %c0_7 = arith.constant 0 : index
    %c0_8 = arith.constant 0 : index
    %8 = vector.load %arg4[%c0_7, %c0_8] : memref<1x64xf32, #tpu.memory_space<vmem>>, vector<1x64xf32>
    %9 = vector.broadcast %8 : vector<1x64xf32> to vector<256x64xf32>
    %10 = arith.addf %7, %9 : vector<256x64xf32>
    %cst_9 = arith.constant 0.000000e+00 : f32
    %11 = vector.broadcast %cst_9 : f32 to vector<256x64xf32>
    %12 = arith.maximumf %10, %11 : vector<256x64xf32>
    %13 = vector.shape_cast %12 : vector<256x64xf32> to vector<16x16x64xf32>
    %14 = arith.truncf %13 : vector<16x16x64xf32> to vector<16x16x64xbf16>
    %c0_10 = arith.constant 0 : index
    %c0_11 = arith.constant 0 : index
    %c0_12 = arith.constant 0 : index
    %c0_13 = arith.constant 0 : index
    %15 = vector.load %arg5[%c0_10, %c0_11, %c0_12, %c0_13] : memref<1x16x16x64xbf16, #tpu.memory_space<vmem>>, vector<1x16x16x64xbf16>
    %16 = vector.shape_cast %15 : vector<1x16x16x64xbf16> to vector<16x16x64xbf16>
    %17 = vector.shape_cast %14 : vector<16x16x64xbf16> to vector<1x16x16x64xbf16>
    tpu.vector_store %arg5[%c0_10, %c0_11, %c0_12, %c0_13], %17 {strides = array<i32>} : memref<1x16x16x64xbf16, #tpu.memory_space<vmem>>, vector<1x16x16x64xbf16>,
    return
  }
  func.func @transform_0(%arg0: i32) -> (i32, i32, i32, i32) {
    %c0_i32 = arith.constant 0 : i32
    %c0_i32_0 = arith.constant 0 : i32
    %c0_i32_1 = arith.constant 0 : i32
    %c0_i32_2 = arith.constant 0 : i32
    return %arg0, %c0_i32, %c0_i32_0, %c0_i32_1 : i32, i32, i32, i32
  }
  func.func @transform_1(%arg0: i32) -> (i32, i32) {
    %c0_i32 = arith.constant 0 : i32
    %c0_i32_0 = arith.constant 0 : i32
    %c0_i32_1 = arith.constant 0 : i32
    return %c0_i32, %c0_i32_0 : i32, i32
  }
  func.func @transform_2(%arg0: i32) -> (i32, i32) {
    %c0_i32 = arith.constant 0 : i32
    %c0_i32_0 = arith.constant 0 : i32
    %c0_i32_1 = arith.constant 0 : i32
    return %c0_i32, %c0_i32_0 : i32, i32
  }
  func.func @transform_3(%arg0: i32) -> (i32, i32) {
    %c0_i32 = arith.constant 0 : i32
    %c0_i32_0 = arith.constant 0 : i32
    %c0_i32_1 = arith.constant 0 : i32
    return %c0_i32, %c0_i32_0 : i32, i32
  }
  func.func @transform_4(%arg0: i32) -> (i32, i32, i32, i32) {
    %c0_i32 = arith.constant 0 : i32
    %c0_i32_0 = arith.constant 0 : i32
    %c0_i32_1 = arith.constant 0 : i32
    %c0_i32_2 = arith.constant 0 : i32
    return %arg0, %c0_i32, %c0_i32_0, %c0_i32_1 : i32, i32, i32, i32
  }
}

module attributes {stable_mosaic.version = 11 : i64} {
  func.func @_block_identity_kernel(%arg0: i32, %arg1: memref<1x18x18x64xbf16, #tpu.memory_space<vmem>>, %arg2: memref<576x64xbf16, #tpu.memory_space<vmem>>, %arg3: memref<1x64xf32, #tpu.memory_space<vmem>>, %arg4: memref<1x64xf32, #tpu.memory_space<vmem>>, %arg5: memref<576x64xbf16, #tpu.memory_space<vmem>>, %arg6: memref<1x64xf32, #tpu.memory_space<vmem>>, %arg7: memref<1x64xf32, #tpu.memory_space<vmem>>, %arg8: memref<1x16x16x64xbf16, #tpu.memory_space<vmem>>, %arg9: memref<18x32x64xf32, #tpu.memory_space<vmem>>) attributes {dimension_semantics = [#tpu.dimension_semantics<parallel>], iteration_bounds = array<i64: 2>, scalar_prefetch = 0 : i64, scratch_operands = 1 : i64, tpu.core_type = #tpu.core_type<tc>, window_params = [{transform_indices = @transform_0, window_bounds = array<i64: 1, 18, 18, 64>}, {pipeline_mode = #tpu.pipeline_mode<synchronous>, transform_indices = @transform_1, window_bounds = array<i64: 576, 64>}, {pipeline_mode = #tpu.pipeline_mode<synchronous>, transform_indices = @transform_2, window_bounds = array<i64: 1, 64>}, {pipeline_mode = #tpu.pipeline_mode<synchronous>, transform_indices = @transform_3, window_bounds = array<i64: 1, 64>}, {pipeline_mode = #tpu.pipeline_mode<synchronous>, transform_indices = @transform_4, window_bounds = array<i64: 576, 64>}, {pipeline_mode = #tpu.pipeline_mode<synchronous>, transform_indices = @transform_5, window_bounds = array<i64: 1, 64>}, {pipeline_mode = #tpu.pipeline_mode<synchronous>, transform_indices = @transform_6, window_bounds = array<i64: 1, 64>}, {transform_indices = @transform_7, window_bounds = array<i64: 1, 16, 16, 64>}]} {
    %c0 = arith.constant 0 : index
    %c0_0 = arith.constant 0 : index
    %c0_1 = arith.constant 0 : index
    %c0_2 = arith.constant 0 : index
    %0 = vector.load %arg1[%c0, %c0_0, %c0_1, %c0_2] : memref<1x18x18x64xbf16, #tpu.memory_space<vmem>>, vector<1x18x18x64xbf16>
    %1 = vector.shape_cast %0 : vector<1x18x18x64xbf16> to vector<18x18x64xbf16>
    %2 = arith.extf %1 : vector<18x18x64xbf16> to vector<18x18x64xf32>
    %3 = vector.extract_strided_slice %2 {offsets = [0, 0, 0], sizes = [16, 16, 64], strides = [1, 1, 1]} : vector<18x18x64xf32> to vector<16x16x64xf32>
    %4 = vector.extract_strided_slice %2 {offsets = [0, 1, 0], sizes = [16, 16, 64], strides = [1, 1, 1]} : vector<18x18x64xf32> to vector<16x16x64xf32>
    %5 = vector.extract_strided_slice %2 {offsets = [0, 2, 0], sizes = [16, 16, 64], strides = [1, 1, 1]} : vector<18x18x64xf32> to vector<16x16x64xf32>
    %6 = vector.extract_strided_slice %2 {offsets = [1, 0, 0], sizes = [16, 16, 64], strides = [1, 1, 1]} : vector<18x18x64xf32> to vector<16x16x64xf32>
    %7 = vector.extract_strided_slice %2 {offsets = [1, 1, 0], sizes = [16, 16, 64], strides = [1, 1, 1]} : vector<18x18x64xf32> to vector<16x16x64xf32>
    %8 = vector.extract_strided_slice %2 {offsets = [1, 2, 0], sizes = [16, 16, 64], strides = [1, 1, 1]} : vector<18x18x64xf32> to vector<16x16x64xf32>
    %9 = vector.extract_strided_slice %2 {offsets = [2, 0, 0], sizes = [16, 16, 64], strides = [1, 1, 1]} : vector<18x18x64xf32> to vector<16x16x64xf32>
    %10 = vector.extract_strided_slice %2 {offsets = [2, 1, 0], sizes = [16, 16, 64], strides = [1, 1, 1]} : vector<18x18x64xf32> to vector<16x16x64xf32>
    %11 = vector.extract_strided_slice %2 {offsets = [2, 2, 0], sizes = [16, 16, 64], strides = [1, 1, 1]} : vector<18x18x64xf32> to vector<16x16x64xf32>
    %12 = tpu.concatenate %3, %4, %5, %6, %7, %8, %9, %10, %11 in 2 : vector<16x16x64xf32>, vector<16x16x64xf32>, vector<16x16x64xf32>, vector<16x16x64xf32>, vector<16x16x64xf32>, vector<16x16x64xf32>, vector<16x16x64xf32>, vector<16x16x64xf32>, vector<16x16x64xf32> -> vector<16x16x576xf32>
    %13 = vector.shape_cast %12 : vector<16x16x576xf32> to vector<256x576xf32>
    %14 = arith.truncf %13 : vector<256x576xf32> to vector<256x576xbf16>
    %c0_3 = arith.constant 0 : index
    %c0_4 = arith.constant 0 : index
    %15 = vector.load %arg2[%c0_3, %c0_4] : memref<576x64xbf16, #tpu.memory_space<vmem>>, vector<576x64xbf16>
    %cst = arith.constant dense<0.000000e+00> : vector<256x64xf32>
    %16 = tpu.matmul %14, %15, %cst {dimension_numbers = #tpu.dot_dimension_numbers<[1], [0], [0], [1], [0, 0, 1, 1], [], []>} : vector<256x576xbf16>, vector<576x64xbf16>, vector<256x64xf32> -> vector<256x64xf32>
    %c0_5 = arith.constant 0 : index
    %c0_6 = arith.constant 0 : index
    %17 = vector.load %arg3[%c0_5, %c0_6] : memref<1x64xf32, #tpu.memory_space<vmem>>, vector<1x64xf32>
    %18 = vector.broadcast %17 : vector<1x64xf32> to vector<256x64xf32>
    %19 = arith.mulf %16, %18 : vector<256x64xf32>
    %c0_7 = arith.constant 0 : index
    %c0_8 = arith.constant 0 : index
    %20 = vector.load %arg4[%c0_7, %c0_8] : memref<1x64xf32, #tpu.memory_space<vmem>>, vector<1x64xf32>
    %21 = vector.broadcast %20 : vector<1x64xf32> to vector<256x64xf32>
    %22 = arith.addf %19, %21 : vector<256x64xf32>
    %cst_9 = arith.constant 0.000000e+00 : f32
    %23 = vector.broadcast %cst_9 : f32 to vector<256x64xf32>
    %24 = arith.maximumf %22, %23 : vector<256x64xf32>
    %cst_10 = arith.constant 0.000000e+00 : f32
    %25 = vector.broadcast %cst_10 : f32 to vector<18x32x64xf32>
    %c0_11 = arith.constant 0 : index
    %c0_12 = arith.constant 0 : index
    %c0_13 = arith.constant 0 : index
    %26 = vector.load %arg9[%c0_11, %c0_12, %c0_13] : memref<18x32x64xf32, #tpu.memory_space<vmem>>, vector<18x32x64xf32>
    tpu.vector_store %arg9[%c0_11, %c0_12, %c0_13], %25 {strides = array<i32>} : memref<18x32x64xf32, #tpu.memory_space<vmem>>, vector<18x32x64xf32>,
    %27 = vector.shape_cast %24 : vector<256x64xf32> to vector<16x16x64xf32>
    %c1 = arith.constant 1 : index
    %c8 = arith.constant 8 : index
    %c0_14 = arith.constant 0 : index
    %28 = vector.load %arg9[%c1, %c8, %c0_14] : memref<18x32x64xf32, #tpu.memory_space<vmem>>, vector<16x16x64xf32>
    tpu.vector_store %arg9[%c1, %c8, %c0_14], %27 {strides = array<i32>} : memref<18x32x64xf32, #tpu.memory_space<vmem>>, vector<16x16x64xf32>,
    %c0_15 = arith.constant 0 : index
    %c0_16 = arith.constant 0 : index
    %c0_17 = arith.constant 0 : index
    %29 = vector.load %arg9[%c0_15, %c0_16, %c0_17] : memref<18x32x64xf32, #tpu.memory_space<vmem>>, vector<18x32x64xf32>
    %30 = vector.extract_strided_slice %29 {offsets = [0, 7, 0], sizes = [16, 16, 64], strides = [1, 1, 1]} : vector<18x32x64xf32> to vector<16x16x64xf32>
    %31 = vector.extract_strided_slice %29 {offsets = [0, 8, 0], sizes = [16, 16, 64], strides = [1, 1, 1]} : vector<18x32x64xf32> to vector<16x16x64xf32>
    %32 = vector.extract_strided_slice %29 {offsets = [0, 9, 0], sizes = [16, 16, 64], strides = [1, 1, 1]} : vector<18x32x64xf32> to vector<16x16x64xf32>
    %33 = vector.extract_strided_slice %29 {offsets = [1, 7, 0], sizes = [16, 16, 64], strides = [1, 1, 1]} : vector<18x32x64xf32> to vector<16x16x64xf32>
    %34 = vector.extract_strided_slice %29 {offsets = [1, 8, 0], sizes = [16, 16, 64], strides = [1, 1, 1]} : vector<18x32x64xf32> to vector<16x16x64xf32>
    %35 = vector.extract_strided_slice %29 {offsets = [1, 9, 0], sizes = [16, 16, 64], strides = [1, 1, 1]} : vector<18x32x64xf32> to vector<16x16x64xf32>
    %36 = vector.extract_strided_slice %29 {offsets = [2, 7, 0], sizes = [16, 16, 64], strides = [1, 1, 1]} : vector<18x32x64xf32> to vector<16x16x64xf32>
    %37 = vector.extract_strided_slice %29 {offsets = [2, 8, 0], sizes = [16, 16, 64], strides = [1, 1, 1]} : vector<18x32x64xf32> to vector<16x16x64xf32>
    %38 = vector.extract_strided_slice %29 {offsets = [2, 9, 0], sizes = [16, 16, 64], strides = [1, 1, 1]} : vector<18x32x64xf32> to vector<16x16x64xf32>
    %39 = tpu.concatenate %30, %31, %32, %33, %34, %35, %36, %37, %38 in 2 : vector<16x16x64xf32>, vector<16x16x64xf32>, vector<16x16x64xf32>, vector<16x16x64xf32>, vector<16x16x64xf32>, vector<16x16x64xf32>, vector<16x16x64xf32>, vector<16x16x64xf32>, vector<16x16x64xf32> -> vector<16x16x576xf32>
    %40 = vector.shape_cast %39 : vector<16x16x576xf32> to vector<256x576xf32>
    %41 = arith.truncf %40 : vector<256x576xf32> to vector<256x576xbf16>
    %c0_18 = arith.constant 0 : index
    %c0_19 = arith.constant 0 : index
    %42 = vector.load %arg5[%c0_18, %c0_19] : memref<576x64xbf16, #tpu.memory_space<vmem>>, vector<576x64xbf16>
    %cst_20 = arith.constant dense<0.000000e+00> : vector<256x64xf32>
    %43 = tpu.matmul %41, %42, %cst_20 {dimension_numbers = #tpu.dot_dimension_numbers<[1], [0], [0], [1], [0, 0, 1, 1], [], []>} : vector<256x576xbf16>, vector<576x64xbf16>, vector<256x64xf32> -> vector<256x64xf32>
    %c0_21 = arith.constant 0 : index
    %c0_22 = arith.constant 0 : index
    %44 = vector.load %arg6[%c0_21, %c0_22] : memref<1x64xf32, #tpu.memory_space<vmem>>, vector<1x64xf32>
    %45 = vector.broadcast %44 : vector<1x64xf32> to vector<256x64xf32>
    %46 = arith.mulf %43, %45 : vector<256x64xf32>
    %c0_23 = arith.constant 0 : index
    %c0_24 = arith.constant 0 : index
    %47 = vector.load %arg7[%c0_23, %c0_24] : memref<1x64xf32, #tpu.memory_space<vmem>>, vector<1x64xf32>
    %48 = vector.broadcast %47 : vector<1x64xf32> to vector<256x64xf32>
    %49 = arith.addf %46, %48 : vector<256x64xf32>
    %50 = vector.extract_strided_slice %2 {offsets = [1, 1, 0], sizes = [16, 16, 64], strides = [1, 1, 1]} : vector<18x18x64xf32> to vector<16x16x64xf32>
    %51 = vector.shape_cast %50 : vector<16x16x64xf32> to vector<256x64xf32>
    %52 = arith.addf %49, %51 : vector<256x64xf32>
    %cst_25 = arith.constant 0.000000e+00 : f32
    %53 = vector.broadcast %cst_25 : f32 to vector<256x64xf32>
    %54 = arith.maximumf %52, %53 : vector<256x64xf32>
    %55 = vector.shape_cast %54 : vector<256x64xf32> to vector<16x16x64xf32>
    %56 = arith.truncf %55 : vector<16x16x64xf32> to vector<16x16x64xbf16>
    %c0_26 = arith.constant 0 : index
    %c0_27 = arith.constant 0 : index
    %c0_28 = arith.constant 0 : index
    %c0_29 = arith.constant 0 : index
    %57 = vector.load %arg8[%c0_26, %c0_27, %c0_28, %c0_29] : memref<1x16x16x64xbf16, #tpu.memory_space<vmem>>, vector<1x16x16x64xbf16>
    %58 = vector.shape_cast %57 : vector<1x16x16x64xbf16> to vector<16x16x64xbf16>
    %59 = vector.shape_cast %56 : vector<16x16x64xbf16> to vector<1x16x16x64xbf16>
    tpu.vector_store %arg8[%c0_26, %c0_27, %c0_28, %c0_29], %59 {strides = array<i32>} : memref<1x16x16x64xbf16, #tpu.memory_space<vmem>>, vector<1x16x16x64xbf16>,
    return
  }
  func.func @transform_0(%arg0: i32) -> (i32, i32, i32, i32) {
    %c0_i32 = arith.constant 0 : i32
    %c0_i32_0 = arith.constant 0 : i32
    %c0_i32_1 = arith.constant 0 : i32
    %c0_i32_2 = arith.constant 0 : i32
    return %arg0, %c0_i32, %c0_i32_0, %c0_i32_1 : i32, i32, i32, i32
  }
  func.func @transform_1(%arg0: i32) -> (i32, i32) {
    %c0_i32 = arith.constant 0 : i32
    %c0_i32_0 = arith.constant 0 : i32
    %c0_i32_1 = arith.constant 0 : i32
    return %c0_i32, %c0_i32_0 : i32, i32
  }
  func.func @transform_2(%arg0: i32) -> (i32, i32) {
    %c0_i32 = arith.constant 0 : i32
    %c0_i32_0 = arith.constant 0 : i32
    %c0_i32_1 = arith.constant 0 : i32
    return %c0_i32, %c0_i32_0 : i32, i32
  }
  func.func @transform_3(%arg0: i32) -> (i32, i32) {
    %c0_i32 = arith.constant 0 : i32
    %c0_i32_0 = arith.constant 0 : i32
    %c0_i32_1 = arith.constant 0 : i32
    return %c0_i32, %c0_i32_0 : i32, i32
  }
  func.func @transform_4(%arg0: i32) -> (i32, i32) {
    %c0_i32 = arith.constant 0 : i32
    %c0_i32_0 = arith.constant 0 : i32
    %c0_i32_1 = arith.constant 0 : i32
    return %c0_i32, %c0_i32_0 : i32, i32
  }
  func.func @transform_5(%arg0: i32) -> (i32, i32) {
    %c0_i32 = arith.constant 0 : i32
    %c0_i32_0 = arith.constant 0 : i32
    %c0_i32_1 = arith.constant 0 : i32
    return %c0_i32, %c0_i32_0 : i32, i32
  }
  func.func @transform_6(%arg0: i32) -> (i32, i32) {
    %c0_i32 = arith.constant 0 : i32
    %c0_i32_0 = arith.constant 0 : i32
    %c0_i32_1 = arith.constant 0 : i32
    return %c0_i32, %c0_i32_0 : i32, i32
  }
  func.func @transform_7(%arg0: i32) -> (i32, i32, i32, i32) {
    %c0_i32 = arith.constant 0 : i32
    %c0_i32_0 = arith.constant 0 : i32
    %c0_i32_1 = arith.constant 0 : i32
    %c0_i32_2 = arith.constant 0 : i32
    return %arg0, %c0_i32, %c0_i32_0, %c0_i32_1 : i32, i32, i32, i32
  }
}

module attributes {stable_mosaic.version = 11 : i64} {
  func.func @_block_proj_kernel(%arg0: i32, %arg1: memref<1x8x8x576xbf16, #tpu.memory_space<vmem>>, %arg2: memref<576x128xbf16, #tpu.memory_space<vmem>>, %arg3: memref<1x128xf32, #tpu.memory_space<vmem>>, %arg4: memref<1x128xf32, #tpu.memory_space<vmem>>, %arg5: memref<1152x128xbf16, #tpu.memory_space<vmem>>, %arg6: memref<1x128xf32, #tpu.memory_space<vmem>>, %arg7: memref<1x128xf32, #tpu.memory_space<vmem>>, %arg8: memref<64x128xbf16, #tpu.memory_space<vmem>>, %arg9: memref<1x128xf32, #tpu.memory_space<vmem>>, %arg10: memref<1x128xf32, #tpu.memory_space<vmem>>, %arg11: memref<1x8x8x128xbf16, #tpu.memory_space<vmem>>, %arg12: memref<10x24x128xf32, #tpu.memory_space<vmem>>) attributes {dimension_semantics = [#tpu.dimension_semantics<parallel>], iteration_bounds = array<i64: 2>, scalar_prefetch = 0 : i64, scratch_operands = 1 : i64, tpu.core_type = #tpu.core_type<tc>, window_params = [{transform_indices = @transform_0, window_bounds = array<i64: 1, 8, 8, 576>}, {pipeline_mode = #tpu.pipeline_mode<synchronous>, transform_indices = @transform_1, window_bounds = array<i64: 576, 128>}, {pipeline_mode = #tpu.pipeline_mode<synchronous>, transform_indices = @transform_2, window_bounds = array<i64: 1, 128>}, {pipeline_mode = #tpu.pipeline_mode<synchronous>, transform_indices = @transform_3, window_bounds = array<i64: 1, 128>}, {pipeline_mode = #tpu.pipeline_mode<synchronous>, transform_indices = @transform_4, window_bounds = array<i64: 1152, 128>}, {pipeline_mode = #tpu.pipeline_mode<synchronous>, transform_indices = @transform_5, window_bounds = array<i64: 1, 128>}, {pipeline_mode = #tpu.pipeline_mode<synchronous>, transform_indices = @transform_6, window_bounds = array<i64: 1, 128>}, {pipeline_mode = #tpu.pipeline_mode<synchronous>, transform_indices = @transform_7, window_bounds = array<i64: 64, 128>}, {pipeline_mode = #tpu.pipeline_mode<synchronous>, transform_indices = @transform_8, window_bounds = array<i64: 1, 128>}, {pipeline_mode = #tpu.pipeline_mode<synchronous>, transform_indices = @transform_9, window_bounds = array<i64: 1, 128>}, {transform_indices = @transform_10, window_bounds = array<i64: 1, 8, 8, 128>}]} {
    %c0 = arith.constant 0 : index
    %c0_0 = arith.constant 0 : index
    %c0_1 = arith.constant 0 : index
    %c0_2 = arith.constant 0 : index
    %0 = vector.load %arg1[%c0, %c0_0, %c0_1, %c0_2] : memref<1x8x8x576xbf16, #tpu.memory_space<vmem>>, vector<1x8x8x576xbf16>
    %1 = vector.shape_cast %0 : vector<1x8x8x576xbf16> to vector<8x8x576xbf16>
    %2 = arith.extf %1 : vector<8x8x576xbf16> to vector<8x8x576xf32>
    %3 = vector.shape_cast %2 : vector<8x8x576xf32> to vector<64x576xf32>
    %4 = arith.truncf %3 : vector<64x576xf32> to vector<64x576xbf16>
    %c0_3 = arith.constant 0 : index
    %c0_4 = arith.constant 0 : index
    %5 = vector.load %arg2[%c0_3, %c0_4] : memref<576x128xbf16, #tpu.memory_space<vmem>>, vector<576x128xbf16>
    %cst = arith.constant dense<0.000000e+00> : vector<64x128xf32>
    %6 = tpu.matmul %4, %5, %cst {dimension_numbers = #tpu.dot_dimension_numbers<[1], [0], [0], [1], [0, 0, 1, 1], [], []>} : vector<64x576xbf16>, vector<576x128xbf16>, vector<64x128xf32> -> vector<64x128xf32>
    %c0_5 = arith.constant 0 : index
    %c0_6 = arith.constant 0 : index
    %7 = vector.load %arg3[%c0_5, %c0_6] : memref<1x128xf32, #tpu.memory_space<vmem>>, vector<1x128xf32>
    %8 = vector.broadcast %7 : vector<1x128xf32> to vector<64x128xf32>
    %9 = arith.mulf %6, %8 : vector<64x128xf32>
    %c0_7 = arith.constant 0 : index
    %c0_8 = arith.constant 0 : index
    %10 = vector.load %arg4[%c0_7, %c0_8] : memref<1x128xf32, #tpu.memory_space<vmem>>, vector<1x128xf32>
    %11 = vector.broadcast %10 : vector<1x128xf32> to vector<64x128xf32>
    %12 = arith.addf %9, %11 : vector<64x128xf32>
    %cst_9 = arith.constant 0.000000e+00 : f32
    %13 = vector.broadcast %cst_9 : f32 to vector<64x128xf32>
    %14 = arith.maximumf %12, %13 : vector<64x128xf32>
    %cst_10 = arith.constant 0.000000e+00 : f32
    %15 = vector.broadcast %cst_10 : f32 to vector<10x24x128xf32>
    %c0_11 = arith.constant 0 : index
    %c0_12 = arith.constant 0 : index
    %c0_13 = arith.constant 0 : index
    %16 = vector.load %arg12[%c0_11, %c0_12, %c0_13] : memref<10x24x128xf32, #tpu.memory_space<vmem>>, vector<10x24x128xf32>
    tpu.vector_store %arg12[%c0_11, %c0_12, %c0_13], %15 {strides = array<i32>} : memref<10x24x128xf32, #tpu.memory_space<vmem>>, vector<10x24x128xf32>,
    %17 = vector.shape_cast %14 : vector<64x128xf32> to vector<8x8x128xf32>
    %c1 = arith.constant 1 : index
    %c8 = arith.constant 8 : index
    %c0_14 = arith.constant 0 : index
    %18 = vector.load %arg12[%c1, %c8, %c0_14] : memref<10x24x128xf32, #tpu.memory_space<vmem>>, vector<8x8x128xf32>
    tpu.vector_store %arg12[%c1, %c8, %c0_14], %17 {strides = array<i32>} : memref<10x24x128xf32, #tpu.memory_space<vmem>>, vector<8x8x128xf32>,
    %c0_15 = arith.constant 0 : index
    %c0_16 = arith.constant 0 : index
    %c0_17 = arith.constant 0 : index
    %19 = vector.load %arg12[%c0_15, %c0_16, %c0_17] : memref<10x24x128xf32, #tpu.memory_space<vmem>>, vector<10x24x128xf32>
    %20 = vector.extract_strided_slice %19 {offsets = [0, 7, 0], sizes = [8, 8, 128], strides = [1, 1, 1]} : vector<10x24x128xf32> to vector<8x8x128xf32>
    %21 = vector.extract_strided_slice %19 {offsets = [0, 8, 0], sizes = [8, 8, 128], strides = [1, 1, 1]} : vector<10x24x128xf32> to vector<8x8x128xf32>
    %22 = vector.extract_strided_slice %19 {offsets = [0, 9, 0], sizes = [8, 8, 128], strides = [1, 1, 1]} : vector<10x24x128xf32> to vector<8x8x128xf32>
    %23 = vector.extract_strided_slice %19 {offsets = [1, 7, 0], sizes = [8, 8, 128], strides = [1, 1, 1]} : vector<10x24x128xf32> to vector<8x8x128xf32>
    %24 = vector.extract_strided_slice %19 {offsets = [1, 8, 0], sizes = [8, 8, 128], strides = [1, 1, 1]} : vector<10x24x128xf32> to vector<8x8x128xf32>
    %25 = vector.extract_strided_slice %19 {offsets = [1, 9, 0], sizes = [8, 8, 128], strides = [1, 1, 1]} : vector<10x24x128xf32> to vector<8x8x128xf32>
    %26 = vector.extract_strided_slice %19 {offsets = [2, 7, 0], sizes = [8, 8, 128], strides = [1, 1, 1]} : vector<10x24x128xf32> to vector<8x8x128xf32>
    %27 = vector.extract_strided_slice %19 {offsets = [2, 8, 0], sizes = [8, 8, 128], strides = [1, 1, 1]} : vector<10x24x128xf32> to vector<8x8x128xf32>
    %28 = vector.extract_strided_slice %19 {offsets = [2, 9, 0], sizes = [8, 8, 128], strides = [1, 1, 1]} : vector<10x24x128xf32> to vector<8x8x128xf32>
    %29 = tpu.concatenate %20, %21, %22, %23, %24, %25, %26, %27, %28 in 2 : vector<8x8x128xf32>, vector<8x8x128xf32>, vector<8x8x128xf32>, vector<8x8x128xf32>, vector<8x8x128xf32>, vector<8x8x128xf32>, vector<8x8x128xf32>, vector<8x8x128xf32>, vector<8x8x128xf32> -> vector<8x8x1152xf32>
    %30 = vector.shape_cast %29 : vector<8x8x1152xf32> to vector<64x1152xf32>
    %31 = arith.truncf %30 : vector<64x1152xf32> to vector<64x1152xbf16>
    %c0_18 = arith.constant 0 : index
    %c0_19 = arith.constant 0 : index
    %32 = vector.load %arg5[%c0_18, %c0_19] : memref<1152x128xbf16, #tpu.memory_space<vmem>>, vector<1152x128xbf16>
    %cst_20 = arith.constant dense<0.000000e+00> : vector<64x128xf32>
    %33 = tpu.matmul %31, %32, %cst_20 {dimension_numbers = #tpu.dot_dimension_numbers<[1], [0], [0], [1], [0, 0, 1, 1], [], []>} : vector<64x1152xbf16>, vector<1152x128xbf16>, vector<64x128xf32> -> vector<64x128xf32>
    %c0_21 = arith.constant 0 : index
    %c0_22 = arith.constant 0 : index
    %34 = vector.load %arg6[%c0_21, %c0_22] : memref<1x128xf32, #tpu.memory_space<vmem>>, vector<1x128xf32>
    %35 = vector.broadcast %34 : vector<1x128xf32> to vector<64x128xf32>
    %36 = arith.mulf %33, %35 : vector<64x128xf32>
    %c0_23 = arith.constant 0 : index
    %c0_24 = arith.constant 0 : index
    %37 = vector.load %arg7[%c0_23, %c0_24] : memref<1x128xf32, #tpu.memory_space<vmem>>, vector<1x128xf32>
    %38 = vector.broadcast %37 : vector<1x128xf32> to vector<64x128xf32>
    %39 = arith.addf %36, %38 : vector<64x128xf32>
    %40 = vector.extract_strided_slice %2 {offsets = [0, 0, 256], sizes = [8, 8, 64], strides = [1, 1, 1]} : vector<8x8x576xf32> to vector<8x8x64xf32>
    %41 = vector.shape_cast %40 : vector<8x8x64xf32> to vector<64x64xf32>
    %42 = arith.truncf %41 : vector<64x64xf32> to vector<64x64xbf16>
    %c0_25 = arith.constant 0 : index
    %c0_26 = arith.constant 0 : index
    %43 = vector.load %arg8[%c0_25, %c0_26] : memref<64x128xbf16, #tpu.memory_space<vmem>>, vector<64x128xbf16>
    %cst_27 = arith.constant dense<0.000000e+00> : vector<64x128xf32>
    %44 = tpu.matmul %42, %43, %cst_27 {dimension_numbers = #tpu.dot_dimension_numbers<[1], [0], [0], [1], [0, 0, 1, 1], [], []>} : vector<64x64xbf16>, vector<64x128xbf16>, vector<64x128xf32> -> vector<64x128xf32>
    %c0_28 = arith.constant 0 : index
    %c0_29 = arith.constant 0 : index
    %45 = vector.load %arg9[%c0_28, %c0_29] : memref<1x128xf32, #tpu.memory_space<vmem>>, vector<1x128xf32>
    %46 = vector.broadcast %45 : vector<1x128xf32> to vector<64x128xf32>
    %47 = arith.mulf %44, %46 : vector<64x128xf32>
    %c0_30 = arith.constant 0 : index
    %c0_31 = arith.constant 0 : index
    %48 = vector.load %arg10[%c0_30, %c0_31] : memref<1x128xf32, #tpu.memory_space<vmem>>, vector<1x128xf32>
    %49 = vector.broadcast %48 : vector<1x128xf32> to vector<64x128xf32>
    %50 = arith.addf %47, %49 : vector<64x128xf32>
    %51 = arith.addf %39, %50 : vector<64x128xf32>
    %cst_32 = arith.constant 0.000000e+00 : f32
    %52 = vector.broadcast %cst_32 : f32 to vector<64x128xf32>
    %53 = arith.maximumf %51, %52 : vector<64x128xf32>
    %54 = vector.shape_cast %53 : vector<64x128xf32> to vector<8x8x128xf32>
    %55 = arith.truncf %54 : vector<8x8x128xf32> to vector<8x8x128xbf16>
    %c0_33 = arith.constant 0 : index
    %c0_34 = arith.constant 0 : index
    %c0_35 = arith.constant 0 : index
    %c0_36 = arith.constant 0 : index
    %56 = vector.load %arg11[%c0_33, %c0_34, %c0_35, %c0_36] : memref<1x8x8x128xbf16, #tpu.memory_space<vmem>>, vector<1x8x8x128xbf16>
    %57 = vector.shape_cast %56 : vector<1x8x8x128xbf16> to vector<8x8x128xbf16>
    %58 = vector.shape_cast %55 : vector<8x8x128xbf16> to vector<1x8x8x128xbf16>
    tpu.vector_store %arg11[%c0_33, %c0_34, %c0_35, %c0_36], %58 {strides = array<i32>} : memref<1x8x8x128xbf16, #tpu.memory_space<vmem>>, vector<1x8x8x128xbf16>,
    return
  }
  func.func @transform_0(%arg0: i32) -> (i32, i32, i32, i32) {
    %c0_i32 = arith.constant 0 : i32
    %c0_i32_0 = arith.constant 0 : i32
    %c0_i32_1 = arith.constant 0 : i32
    %c0_i32_2 = arith.constant 0 : i32
    return %arg0, %c0_i32, %c0_i32_0, %c0_i32_1 : i32, i32, i32, i32
  }
  func.func @transform_1(%arg0: i32) -> (i32, i32) {
    %c0_i32 = arith.constant 0 : i32
    %c0_i32_0 = arith.constant 0 : i32
    %c0_i32_1 = arith.constant 0 : i32
    return %c0_i32, %c0_i32_0 : i32, i32
  }
  func.func @transform_2(%arg0: i32) -> (i32, i32) {
    %c0_i32 = arith.constant 0 : i32
    %c0_i32_0 = arith.constant 0 : i32
    %c0_i32_1 = arith.constant 0 : i32
    return %c0_i32, %c0_i32_0 : i32, i32
  }
  func.func @transform_3(%arg0: i32) -> (i32, i32) {
    %c0_i32 = arith.constant 0 : i32
    %c0_i32_0 = arith.constant 0 : i32
    %c0_i32_1 = arith.constant 0 : i32
    return %c0_i32, %c0_i32_0 : i32, i32
  }
  func.func @transform_4(%arg0: i32) -> (i32, i32) {
    %c0_i32 = arith.constant 0 : i32
    %c0_i32_0 = arith.constant 0 : i32
    %c0_i32_1 = arith.constant 0 : i32
    return %c0_i32, %c0_i32_0 : i32, i32
  }
  func.func @transform_5(%arg0: i32) -> (i32, i32) {
    %c0_i32 = arith.constant 0 : i32
    %c0_i32_0 = arith.constant 0 : i32
    %c0_i32_1 = arith.constant 0 : i32
    return %c0_i32, %c0_i32_0 : i32, i32
  }
  func.func @transform_6(%arg0: i32) -> (i32, i32) {
    %c0_i32 = arith.constant 0 : i32
    %c0_i32_0 = arith.constant 0 : i32
    %c0_i32_1 = arith.constant 0 : i32
    return %c0_i32, %c0_i32_0 : i32, i32
  }
  func.func @transform_7(%arg0: i32) -> (i32, i32) {
    %c0_i32 = arith.constant 0 : i32
    %c0_i32_0 = arith.constant 0 : i32
    %c0_i32_1 = arith.constant 0 : i32
    return %c0_i32, %c0_i32_0 : i32, i32
  }
  func.func @transform_8(%arg0: i32) -> (i32, i32) {
    %c0_i32 = arith.constant 0 : i32
    %c0_i32_0 = arith.constant 0 : i32
    %c0_i32_1 = arith.constant 0 : i32
    return %c0_i32, %c0_i32_0 : i32, i32
  }
  func.func @transform_9(%arg0: i32) -> (i32, i32) {
    %c0_i32 = arith.constant 0 : i32
    %c0_i32_0 = arith.constant 0 : i32
    %c0_i32_1 = arith.constant 0 : i32
    return %c0_i32, %c0_i32_0 : i32, i32
  }
  func.func @transform_10(%arg0: i32) -> (i32, i32, i32, i32) {
    %c0_i32 = arith.constant 0 : i32
    %c0_i32_0 = arith.constant 0 : i32
    %c0_i32_1 = arith.constant 0 : i32
    %c0_i32_2 = arith.constant 0 : i32
    return %arg0, %c0_i32, %c0_i32_0, %c0_i32_1 : i32, i32, i32, i32
  }
}

module attributes {stable_mosaic.version = 11 : i64} {
  func.func @_block_identity_kernel(%arg0: i32, %arg1: memref<1x10x10x128xbf16, #tpu.memory_space<vmem>>, %arg2: memref<1152x128xbf16, #tpu.memory_space<vmem>>, %arg3: memref<1x128xf32, #tpu.memory_space<vmem>>, %arg4: memref<1x128xf32, #tpu.memory_space<vmem>>, %arg5: memref<1152x128xbf16, #tpu.memory_space<vmem>>, %arg6: memref<1x128xf32, #tpu.memory_space<vmem>>, %arg7: memref<1x128xf32, #tpu.memory_space<vmem>>, %arg8: memref<1x8x8x128xbf16, #tpu.memory_space<vmem>>, %arg9: memref<10x24x128xf32, #tpu.memory_space<vmem>>) attributes {dimension_semantics = [#tpu.dimension_semantics<parallel>], iteration_bounds = array<i64: 2>, scalar_prefetch = 0 : i64, scratch_operands = 1 : i64, tpu.core_type = #tpu.core_type<tc>, window_params = [{transform_indices = @transform_0, window_bounds = array<i64: 1, 10, 10, 128>}, {pipeline_mode = #tpu.pipeline_mode<synchronous>, transform_indices = @transform_1, window_bounds = array<i64: 1152, 128>}, {pipeline_mode = #tpu.pipeline_mode<synchronous>, transform_indices = @transform_2, window_bounds = array<i64: 1, 128>}, {pipeline_mode = #tpu.pipeline_mode<synchronous>, transform_indices = @transform_3, window_bounds = array<i64: 1, 128>}, {pipeline_mode = #tpu.pipeline_mode<synchronous>, transform_indices = @transform_4, window_bounds = array<i64: 1152, 128>}, {pipeline_mode = #tpu.pipeline_mode<synchronous>, transform_indices = @transform_5, window_bounds = array<i64: 1, 128>}, {pipeline_mode = #tpu.pipeline_mode<synchronous>, transform_indices = @transform_6, window_bounds = array<i64: 1, 128>}, {transform_indices = @transform_7, window_bounds = array<i64: 1, 8, 8, 128>}]} {
    %c0 = arith.constant 0 : index
    %c0_0 = arith.constant 0 : index
    %c0_1 = arith.constant 0 : index
    %c0_2 = arith.constant 0 : index
    %0 = vector.load %arg1[%c0, %c0_0, %c0_1, %c0_2] : memref<1x10x10x128xbf16, #tpu.memory_space<vmem>>, vector<1x10x10x128xbf16>
    %1 = vector.shape_cast %0 : vector<1x10x10x128xbf16> to vector<10x10x128xbf16>
    %2 = arith.extf %1 : vector<10x10x128xbf16> to vector<10x10x128xf32>
    %3 = vector.extract_strided_slice %2 {offsets = [0, 0, 0], sizes = [8, 8, 128], strides = [1, 1, 1]} : vector<10x10x128xf32> to vector<8x8x128xf32>
    %4 = vector.extract_strided_slice %2 {offsets = [0, 1, 0], sizes = [8, 8, 128], strides = [1, 1, 1]} : vector<10x10x128xf32> to vector<8x8x128xf32>
    %5 = vector.extract_strided_slice %2 {offsets = [0, 2, 0], sizes = [8, 8, 128], strides = [1, 1, 1]} : vector<10x10x128xf32> to vector<8x8x128xf32>
    %6 = vector.extract_strided_slice %2 {offsets = [1, 0, 0], sizes = [8, 8, 128], strides = [1, 1, 1]} : vector<10x10x128xf32> to vector<8x8x128xf32>
    %7 = vector.extract_strided_slice %2 {offsets = [1, 1, 0], sizes = [8, 8, 128], strides = [1, 1, 1]} : vector<10x10x128xf32> to vector<8x8x128xf32>
    %8 = vector.extract_strided_slice %2 {offsets = [1, 2, 0], sizes = [8, 8, 128], strides = [1, 1, 1]} : vector<10x10x128xf32> to vector<8x8x128xf32>
    %9 = vector.extract_strided_slice %2 {offsets = [2, 0, 0], sizes = [8, 8, 128], strides = [1, 1, 1]} : vector<10x10x128xf32> to vector<8x8x128xf32>
    %10 = vector.extract_strided_slice %2 {offsets = [2, 1, 0], sizes = [8, 8, 128], strides = [1, 1, 1]} : vector<10x10x128xf32> to vector<8x8x128xf32>
    %11 = vector.extract_strided_slice %2 {offsets = [2, 2, 0], sizes = [8, 8, 128], strides = [1, 1, 1]} : vector<10x10x128xf32> to vector<8x8x128xf32>
    %12 = tpu.concatenate %3, %4, %5, %6, %7, %8, %9, %10, %11 in 2 : vector<8x8x128xf32>, vector<8x8x128xf32>, vector<8x8x128xf32>, vector<8x8x128xf32>, vector<8x8x128xf32>, vector<8x8x128xf32>, vector<8x8x128xf32>, vector<8x8x128xf32>, vector<8x8x128xf32> -> vector<8x8x1152xf32>
    %13 = vector.shape_cast %12 : vector<8x8x1152xf32> to vector<64x1152xf32>
    %14 = arith.truncf %13 : vector<64x1152xf32> to vector<64x1152xbf16>
    %c0_3 = arith.constant 0 : index
    %c0_4 = arith.constant 0 : index
    %15 = vector.load %arg2[%c0_3, %c0_4] : memref<1152x128xbf16, #tpu.memory_space<vmem>>, vector<1152x128xbf16>
    %cst = arith.constant dense<0.000000e+00> : vector<64x128xf32>
    %16 = tpu.matmul %14, %15, %cst {dimension_numbers = #tpu.dot_dimension_numbers<[1], [0], [0], [1], [0, 0, 1, 1], [], []>} : vector<64x1152xbf16>, vector<1152x128xbf16>, vector<64x128xf32> -> vector<64x128xf32>
    %c0_5 = arith.constant 0 : index
    %c0_6 = arith.constant 0 : index
    %17 = vector.load %arg3[%c0_5, %c0_6] : memref<1x128xf32, #tpu.memory_space<vmem>>, vector<1x128xf32>
    %18 = vector.broadcast %17 : vector<1x128xf32> to vector<64x128xf32>
    %19 = arith.mulf %16, %18 : vector<64x128xf32>
    %c0_7 = arith.constant 0 : index
    %c0_8 = arith.constant 0 : index
    %20 = vector.load %arg4[%c0_7, %c0_8] : memref<1x128xf32, #tpu.memory_space<vmem>>, vector<1x128xf32>
    %21 = vector.broadcast %20 : vector<1x128xf32> to vector<64x128xf32>
    %22 = arith.addf %19, %21 : vector<64x128xf32>
    %cst_9 = arith.constant 0.000000e+00 : f32
    %23 = vector.broadcast %cst_9 : f32 to vector<64x128xf32>
    %24 = arith.maximumf %22, %23 : vector<64x128xf32>
    %cst_10 = arith.constant 0.000000e+00 : f32
    %25 = vector.broadcast %cst_10 : f32 to vector<10x24x128xf32>
    %c0_11 = arith.constant 0 : index
    %c0_12 = arith.constant 0 : index
    %c0_13 = arith.constant 0 : index
    %26 = vector.load %arg9[%c0_11, %c0_12, %c0_13] : memref<10x24x128xf32, #tpu.memory_space<vmem>>, vector<10x24x128xf32>
    tpu.vector_store %arg9[%c0_11, %c0_12, %c0_13], %25 {strides = array<i32>} : memref<10x24x128xf32, #tpu.memory_space<vmem>>, vector<10x24x128xf32>,
    %27 = vector.shape_cast %24 : vector<64x128xf32> to vector<8x8x128xf32>
    %c1 = arith.constant 1 : index
    %c8 = arith.constant 8 : index
    %c0_14 = arith.constant 0 : index
    %28 = vector.load %arg9[%c1, %c8, %c0_14] : memref<10x24x128xf32, #tpu.memory_space<vmem>>, vector<8x8x128xf32>
    tpu.vector_store %arg9[%c1, %c8, %c0_14], %27 {strides = array<i32>} : memref<10x24x128xf32, #tpu.memory_space<vmem>>, vector<8x8x128xf32>,
    %c0_15 = arith.constant 0 : index
    %c0_16 = arith.constant 0 : index
    %c0_17 = arith.constant 0 : index
    %29 = vector.load %arg9[%c0_15, %c0_16, %c0_17] : memref<10x24x128xf32, #tpu.memory_space<vmem>>, vector<10x24x128xf32>
    %30 = vector.extract_strided_slice %29 {offsets = [0, 7, 0], sizes = [8, 8, 128], strides = [1, 1, 1]} : vector<10x24x128xf32> to vector<8x8x128xf32>
    %31 = vector.extract_strided_slice %29 {offsets = [0, 8, 0], sizes = [8, 8, 128], strides = [1, 1, 1]} : vector<10x24x128xf32> to vector<8x8x128xf32>
    %32 = vector.extract_strided_slice %29 {offsets = [0, 9, 0], sizes = [8, 8, 128], strides = [1, 1, 1]} : vector<10x24x128xf32> to vector<8x8x128xf32>
    %33 = vector.extract_strided_slice %29 {offsets = [1, 7, 0], sizes = [8, 8, 128], strides = [1, 1, 1]} : vector<10x24x128xf32> to vector<8x8x128xf32>
    %34 = vector.extract_strided_slice %29 {offsets = [1, 8, 0], sizes = [8, 8, 128], strides = [1, 1, 1]} : vector<10x24x128xf32> to vector<8x8x128xf32>
    %35 = vector.extract_strided_slice %29 {offsets = [1, 9, 0], sizes = [8, 8, 128], strides = [1, 1, 1]} : vector<10x24x128xf32> to vector<8x8x128xf32>
    %36 = vector.extract_strided_slice %29 {offsets = [2, 7, 0], sizes = [8, 8, 128], strides = [1, 1, 1]} : vector<10x24x128xf32> to vector<8x8x128xf32>
    %37 = vector.extract_strided_slice %29 {offsets = [2, 8, 0], sizes = [8, 8, 128], strides = [1, 1, 1]} : vector<10x24x128xf32> to vector<8x8x128xf32>
    %38 = vector.extract_strided_slice %29 {offsets = [2, 9, 0], sizes = [8, 8, 128], strides = [1, 1, 1]} : vector<10x24x128xf32> to vector<8x8x128xf32>
    %39 = tpu.concatenate %30, %31, %32, %33, %34, %35, %36, %37, %38 in 2 : vector<8x8x128xf32>, vector<8x8x128xf32>, vector<8x8x128xf32>, vector<8x8x128xf32>, vector<8x8x128xf32>, vector<8x8x128xf32>, vector<8x8x128xf32>, vector<8x8x128xf32>, vector<8x8x128xf32> -> vector<8x8x1152xf32>
    %40 = vector.shape_cast %39 : vector<8x8x1152xf32> to vector<64x1152xf32>
    %41 = arith.truncf %40 : vector<64x1152xf32> to vector<64x1152xbf16>
    %c0_18 = arith.constant 0 : index
    %c0_19 = arith.constant 0 : index
    %42 = vector.load %arg5[%c0_18, %c0_19] : memref<1152x128xbf16, #tpu.memory_space<vmem>>, vector<1152x128xbf16>
    %cst_20 = arith.constant dense<0.000000e+00> : vector<64x128xf32>
    %43 = tpu.matmul %41, %42, %cst_20 {dimension_numbers = #tpu.dot_dimension_numbers<[1], [0], [0], [1], [0, 0, 1, 1], [], []>} : vector<64x1152xbf16>, vector<1152x128xbf16>, vector<64x128xf32> -> vector<64x128xf32>
    %c0_21 = arith.constant 0 : index
    %c0_22 = arith.constant 0 : index
    %44 = vector.load %arg6[%c0_21, %c0_22] : memref<1x128xf32, #tpu.memory_space<vmem>>, vector<1x128xf32>
    %45 = vector.broadcast %44 : vector<1x128xf32> to vector<64x128xf32>
    %46 = arith.mulf %43, %45 : vector<64x128xf32>
    %c0_23 = arith.constant 0 : index
    %c0_24 = arith.constant 0 : index
    %47 = vector.load %arg7[%c0_23, %c0_24] : memref<1x128xf32, #tpu.memory_space<vmem>>, vector<1x128xf32>
    %48 = vector.broadcast %47 : vector<1x128xf32> to vector<64x128xf32>
    %49 = arith.addf %46, %48 : vector<64x128xf32>
    %50 = vector.extract_strided_slice %2 {offsets = [1, 1, 0], sizes = [8, 8, 128], strides = [1, 1, 1]} : vector<10x10x128xf32> to vector<8x8x128xf32>
    %51 = vector.shape_cast %50 : vector<8x8x128xf32> to vector<64x128xf32>
    %52 = arith.addf %49, %51 : vector<64x128xf32>
    %cst_25 = arith.constant 0.000000e+00 : f32
    %53 = vector.broadcast %cst_25 : f32 to vector<64x128xf32>
    %54 = arith.maximumf %52, %53 : vector<64x128xf32>
    %55 = vector.shape_cast %54 : vector<64x128xf32> to vector<8x8x128xf32>
    %56 = arith.truncf %55 : vector<8x8x128xf32> to vector<8x8x128xbf16>
    %c0_26 = arith.constant 0 : index
    %c0_27 = arith.constant 0 : index
    %c0_28 = arith.constant 0 : index
    %c0_29 = arith.constant 0 : index
    %57 = vector.load %arg8[%c0_26, %c0_27, %c0_28, %c0_29] : memref<1x8x8x128xbf16, #tpu.memory_space<vmem>>, vector<1x8x8x128xbf16>
    %58 = vector.shape_cast %57 : vector<1x8x8x128xbf16> to vector<8x8x128xbf16>
    %59 = vector.shape_cast %56 : vector<8x8x128xbf16> to vector<1x8x8x128xbf16>
    tpu.vector_store %arg8[%c0_26, %c0_27, %c0_28, %c0_29], %59 {strides = array<i32>} : memref<1x8x8x128xbf16, #tpu.memory_space<vmem>>, vector<1x8x8x128xbf16>,
    return
  }
  func.func @transform_0(%arg0: i32) -> (i32, i32, i32, i32) {
    %c0_i32 = arith.constant 0 : i32
    %c0_i32_0 = arith.constant 0 : i32
    %c0_i32_1 = arith.constant 0 : i32
    %c0_i32_2 = arith.constant 0 : i32
    return %arg0, %c0_i32, %c0_i32_0, %c0_i32_1 : i32, i32, i32, i32
  }
  func.func @transform_1(%arg0: i32) -> (i32, i32) {
    %c0_i32 = arith.constant 0 : i32
    %c0_i32_0 = arith.constant 0 : i32
    %c0_i32_1 = arith.constant 0 : i32
    return %c0_i32, %c0_i32_0 : i32, i32
  }
  func.func @transform_2(%arg0: i32) -> (i32, i32) {
    %c0_i32 = arith.constant 0 : i32
    %c0_i32_0 = arith.constant 0 : i32
    %c0_i32_1 = arith.constant 0 : i32
    return %c0_i32, %c0_i32_0 : i32, i32
  }
  func.func @transform_3(%arg0: i32) -> (i32, i32) {
    %c0_i32 = arith.constant 0 : i32
    %c0_i32_0 = arith.constant 0 : i32
    %c0_i32_1 = arith.constant 0 : i32
    return %c0_i32, %c0_i32_0 : i32, i32
  }
  func.func @transform_4(%arg0: i32) -> (i32, i32) {
    %c0_i32 = arith.constant 0 : i32
    %c0_i32_0 = arith.constant 0 : i32
    %c0_i32_1 = arith.constant 0 : i32
    return %c0_i32, %c0_i32_0 : i32, i32
  }
  func.func @transform_5(%arg0: i32) -> (i32, i32) {
    %c0_i32 = arith.constant 0 : i32
    %c0_i32_0 = arith.constant 0 : i32
    %c0_i32_1 = arith.constant 0 : i32
    return %c0_i32, %c0_i32_0 : i32, i32
  }
  func.func @transform_6(%arg0: i32) -> (i32, i32) {
    %c0_i32 = arith.constant 0 : i32
    %c0_i32_0 = arith.constant 0 : i32
    %c0_i32_1 = arith.constant 0 : i32
    return %c0_i32, %c0_i32_0 : i32, i32
  }
  func.func @transform_7(%arg0: i32) -> (i32, i32, i32, i32) {
    %c0_i32 = arith.constant 0 : i32
    %c0_i32_0 = arith.constant 0 : i32
    %c0_i32_1 = arith.constant 0 : i32
    %c0_i32_2 = arith.constant 0 : i32
    return %arg0, %c0_i32, %c0_i32_0, %c0_i32_1 : i32, i32, i32, i32
  }
}

</mosaic_0001>

<bundles_post_ra>
// kernel: encoder_forward.5
= control target key start
LH: loop header
LB: loop body
LE: loop exit
PB: predicated region body
PF: predicated region fallthrough
CT: control target
= control target key end

     0   :  { %s1110_s15 = smov 0   ;;  %s1317_s0 = inlined_call_operand.vmem [shape: bf16[2,16,16,40], index: 0, kind: input, shape index: {}]   ;;  %s1318_s1 = inlined_call_operand.vmem [shape: bf16[40,64], index: 1, kind: input, shape index: {}]   ;;  %s1319_s2 = inlined_call_operand.vmem [shape: f32[1,64], index: 2, kind: input, shape index: {}]   ;;  %s1320_s3 = inlined_call_operand.vmem [shape: f32[1,64], index: 3, kind: input, shape index: {}]   ;;  %s1321_s4 = inlined_call_operand.vmem [shape: bf16[2,16,16,64], index: 4, kind: output, shape index: {}]  }
   0x1 LB: > { %s871_s16 = sadd.s32 4294967295, %s1083_s15   ;;  %p875_p0 = scmp.ge.s32.totalorder %s1083_s15, 1  ;;  %s1083_s15 = sphi %s1110_s15, %s14_s15  }
   0x2   : > { %p162_p1 = scmp.lt.s32.totalorder %s1083_s15, 3 }
   0x4   : > { %p163_p2 = pnand %p875_p0, %p162_p1 }
   0x5   : > { %p188_p3 = scmp.lt.s32.totalorder (!%p163_p2), %s871_s16, 1 }
   0x6   : > { %166 = sbr.rel (%p163_p2) target bundleno = 259 (0x103), region = 36 }
   0xb   : > { %v1058_v0 = vld [vmem:[%s1318_s1 + $0x10] ss:$0 sps:$4 sm:$0xff]   ;;  %vm380_vm0 = vcmask 1043456   ;;  %v1059_v1 = vld [vmem:[%s1318_s1 + $0x8] sm:$0xff]   ;;  %v1060_v3 = vld [vmem:[%s1318_s1] sm:$0xff]   ;;  %s1323_s16 = smov (!%p188_p3, %s871_s16), 1 }
   0xc   : > { %1048 = vmatprep.subr.msk.bf16.mxu0 %vm380_vm0, %v1058_v0  ;;  %1049 = vmatprep.subr.msk.bf16.mxu1 %vm380_vm0, %v1058_v0  ;;  %v382_v2 = vsel %vm380_vm0, %v1058_v0, 0  ;;  %s951_s23 = sshll.u32 %s1323_s16, 7  ;;  %vm331_vm1 = vcmask 326656   ;;  %v1172_v20 = vld [vmem:[%s1319_s2] ss:$0 sm:$0xff]  ;;  %vm783_vm2 = vcmask 519168  }
   0xd   : > { %1005 = vmatpush3.bf16.msra.mxu0 %v382_v2  ;;  %1045 = vmatpush3.bf16.msra.mxu1 %v382_v2  ;;  %s1135_s26 = scalar_lea.vmem %s1317_s0, %s951_s23  ;;  %v1177_v22 = vld [vmem:[%s1320_s3] ss:$0 sm:$0xff]  ;;  %s1192_s7 = scalar_lea.vmem %s1321_s4, %s951_s23 }
   0xe   : > { %1006 = vmatprep.subr.bf16.mxu0 %v1059_v1  ;;  %1043 = vmatprep.subr.bf16.mxu1 %v1059_v1  ;;  %v1061_v4 = vld [vmem:[%s1135_s26] sm:$0xff]   ;;  %v1063_v6 = vld [vmem:[%s1135_s26 + $0x8] sm:$0xff]   ;;  %v1065_v8 = vld [vmem:[%s1135_s26 + $0x10] sm:$0xff]  }
   0xf   : > { %v1062_v5 = vld [vmem:[%s1135_s26 + $0x40] sm:$0xff]   ;;  %1010 = vmatprep.mubr.msk.bf16.mxu0 %vm331_vm1, %v1061_v4  ;;  %v1064_v7 = vld [vmem:[%s1135_s26 + $0x48] sm:$0xff]   ;;  %v1066_v9 = vld [vmem:[%s1135_s26 + $0x50] sm:$0xff]  }
  0x10   : > { %1026 = vmatprep.mubr.msk.bf16.mxu1 %vm331_vm1, %v1062_v5  ;;  %v1067_v10 = vld [vmem:[%s1135_s26 + $0x18] sm:$0xff]   ;;  %v1069_v12 = vld [vmem:[%s1135_s26 + $0x20] sm:$0xff]   ;;  %v1071_v14 = vld [vmem:[%s1135_s26 + $0x28] sm:$0xff]  }
  0x11   : > { %1007 = vmatpush3.bf16.msra.mxu0 %v1059_v1  ;;  %1046 = vmatpush3.bf16.msra.mxu1 %v1059_v1  ;;  %v1068_v11 = vld [vmem:[%s1135_s26 + $0x58] sm:$0xff]   ;;  %v1070_v13 = vld [vmem:[%s1135_s26 + $0x60] sm:$0xff]   ;;  %v1072_v15 = vld [vmem:[%s1135_s26 + $0x68] sm:$0xff]  }
  0x12   : > { %1008 = vmatprep.subr.bf16.mxu0 %v1060_v3  ;;  %1044 = vmatprep.subr.bf16.mxu1 %v1060_v3  ;;  %v1073_v16 = vld [vmem:[%s1135_s26 + $0x30] sm:$0xff]   ;;  %v1075_v18 = vld [vmem:[%s1135_s26 + $0x38] sm:$0xff]  }
  0x13   : > { %v1074_v17 = vld [vmem:[%s1135_s26 + $0x70] sm:$0xff]   ;;  %v1076_v19 = vld [vmem:[%s1135_s26 + $0x78] sm:$0xff]  }
  0x15   : > { %1009 = vmatpush3.bf16.msra.mxu0 %v1060_v3  ;;  %1047 = vmatpush3.bf16.msra.mxu1 %v1060_v3 }
  0x18   : > { %1011 = vmatmul.mubr.msk.bf16.vlgmr.msra.gmra.mxu0 %vm331_vm1, %v1063_v6  ;;  %1027 = vmatmul.mubr.msk.bf16.vlgmr.msra.gmra.mxu1 %vm331_vm1, %v1064_v7 }
  0x19   : > { %1014 = vmatprep.mubr.msk.bf16.mxu0 %vm331_vm1, %v1065_v8  ;;  %1030 = vmatprep.mubr.msk.bf16.mxu1 %vm331_vm1, %v1066_v9 }
  0x20   : > { %1015 = vmatmul.mubr.msk.bf16.gmra.mxu0 %vm331_vm1, %v1067_v10  ;;  %1031 = vmatmul.mubr.msk.bf16.gmra.mxu1 %vm331_vm1, %v1068_v11 }
  0x21   : > { %1018 = vmatprep.mubr.msk.bf16.mxu0 %vm331_vm1, %v1069_v12  ;;  %1034 = vmatprep.mubr.msk.bf16.mxu1 %vm331_vm1, %v1070_v13 }
  0x28   : > { %1019 = vmatmul.mubr.msk.bf16.gmra.mxu0 %vm331_vm1, %v1071_v14  ;;  %1035 = vmatmul.mubr.msk.bf16.gmra.mxu1 %vm331_vm1, %v1072_v15 }
  0x29   : > { %1022 = vmatprep.mubr.msk.bf16.mxu0 %vm331_vm1, %v1073_v16  ;;  %1038 = vmatprep.mubr.msk.bf16.mxu1 %vm331_vm1, %v1074_v17 }
  0x30   : > { %1023 = vmatmul.mubr.msk.bf16.gmra.mxu0 %vm331_vm1, %v1075_v18  ;;  %1039 = vmatmul.mubr.msk.bf16.gmra.mxu1 %vm331_vm1, %v1076_v19 }
  0xd8   : > { %v1012_v21 = vpop.f32.mrf.mxu0  ;;  %v1028_v23 = vpop.f32.mrf.mxu1 }
  0xd9   : > { %v554_v24 = vmul.f32 %v1012_v21, %v1172_v20  ;;  %v570_v25 = vmul.f32 %v1028_v23, %v1172_v20 }
  0xda   : > { %v418_v26 = vpop.f32.mrf.mxu0  ;;  %v482_v27 = vpop.f32.mrf.mxu1 }
  0xdb   : > { %v593_v28 = vadd.f32 %v1177_v22, %v554_v24  ;;  %v609_v29 = vadd.f32 %v1177_v22, %v570_v25  ;;  %v552_v30 = vmul.f32 %v1172_v20, %v418_v26  ;;  %v568_v31 = vmul.f32 %v1172_v20, %v482_v27 }
  0xdc   : > { %v1013_v32 = vpop.f32.mrf.mxu0  ;;  %v1029_v33 = vpop.f32.mrf.mxu1 }
  0xdd   : > { %v625_v34 = vmax.f32 %v593_v28, 0.0  ;;  %v641_v35 = vmax.f32 %v609_v29, 0.0  ;;  %v591_v36 = vadd.f32 %v1177_v22, %v552_v30  ;;  %v607_v37 = vadd.f32 %v1177_v22, %v568_v31 }
  0xde   : > { %v555_v38 = vmul.f32 %v1013_v32, %v1172_v20  ;;  %v571_v39 = vmul.f32 %v1029_v33, %v1172_v20  ;;  %v421_v40 = vpop.f32.mrf.mxu0  ;;  %v485_v41 = vpop.f32.mrf.mxu1 }
  0xdf   : > { %v955_v42 = vpack.c.bf16 %v625_v34, %v625_v34  ;;  %v971_v43 = vpack.c.bf16 %v641_v35, %v641_v35  ;;  %v623_v44 = vmax.f32 %v591_v36, 0.0  ;;  %v639_v45 = vmax.f32 %v607_v37, 0.0 }
  0xe0   : > { %v594_v46 = vadd.f32 %v1177_v22, %v555_v38  ;;  %v610_v47 = vadd.f32 %v1177_v22, %v571_v39  ;;  %v553_v48 = vmul.f32 %v1172_v20, %v421_v40  ;;  %v569_v49 = vmul.f32 %v1172_v20, %v485_v41  ;;  %v1016_v50 = vpop.f32.mrf.mxu0  ;;  %v1032_v51 = vpop.f32.mrf.mxu1 }
  0xe1   : > { %786 = vst.msk [vmem:[%s1192_s7 + $0x8] sm:$0xf] %vm783_vm2, %v955_v42  ;;  %802 = vst.msk [vmem:[%s1192_s7 + $0x48] sm:$0xf] %vm783_vm2, %v971_v43  ;;  %v953_v52 = vpack.c.bf16 %v623_v44, %v623_v44  ;;  %v969_v53 = vpack.c.bf16 %v639_v45, %v639_v45  ;;  %v558_v54 = vmul.f32 %v1016_v50, %v1172_v20 }
  0xe2   : > { %v574_v55 = vmul.f32 %v1032_v51, %v1172_v20  ;;  %v626_v56 = vmax.f32 %v594_v46, 0.0  ;;  %v642_v57 = vmax.f32 %v610_v47, 0.0  ;;  %v592_v58 = vadd.f32 %v1177_v22, %v553_v48  ;;  %v434_v60 = vpop.f32.mrf.mxu0  ;;  %v498_v61 = vpop.f32.mrf.mxu1 }
  0xe3   : > { %v608_v59 = vadd.f32 %v1177_v22, %v569_v49  ;;  %784 = vst.msk [vmem:[%s1192_s7] sm:$0xf] %vm783_vm2, %v953_v52  ;;  %800 = vst.msk [vmem:[%s1192_s7 + $0x40] sm:$0xf] %vm783_vm2, %v969_v53  ;;  %v597_v62 = vadd.f32 %v1177_v22, %v558_v54  ;;  %v556_v0 = vmul.f32 %v1172_v20, %v434_v60 }
  0xe4   : > { %v613_v63 = vadd.f32 %v1177_v22, %v574_v55  ;;  %v572_v1 = vmul.f32 %v1172_v20, %v498_v61  ;;  %v956_v2 = vpack.c.bf16 %v626_v56, %v626_v56  ;;  %v972_v3 = vpack.c.bf16 %v642_v57, %v642_v57  ;;  %v1017_v6 = vpop.f32.mrf.mxu0  ;;  %v1033_v7 = vpop.f32.mrf.mxu1 }
  0xe5   : > { %v624_v4 = vmax.f32 %v592_v58, 0.0  ;;  %v640_v5 = vmax.f32 %v608_v59, 0.0  ;;  %v629_v8 = vmax.f32 %v597_v62, 0.0  ;;  %v595_v10 = vadd.f32 %v1177_v22, %v556_v0 }
  0xe6   : > { %v645_v9 = vmax.f32 %v613_v63, 0.0  ;;  %v611_v11 = vadd.f32 %v1177_v22, %v572_v1  ;;  %787 = vst.msk [vmem:[%s1192_s7 + $0xc] sm:$0xf] %vm783_vm2, %v956_v2  ;;  %803 = vst.msk [vmem:[%s1192_s7 + $0x4c] sm:$0xf] %vm783_vm2, %v972_v3  ;;  %v559_v14 = vmul.f32 %v1017_v6, %v1172_v20  ;;  %v575_v15 = vmul.f32 %v1033_v7, %v1172_v20  ;;  %v437_v16 = vpop.f32.mrf.mxu0  ;;  %v501_v17 = vpop.f32.mrf.mxu1 }
  0xe7   : > { %v954_v12 = vpack.c.bf16 %v624_v4, %v624_v4  ;;  %v970_v13 = vpack.c.bf16 %v640_v5, %v640_v5  ;;  %v959_v18 = vpack.c.bf16 %v629_v8, %v629_v8  ;;  %v627_v21 = vmax.f32 %v595_v10, 0.0 }
  0xe8   : > { %v975_v19 = vpack.c.bf16 %v645_v9, %v645_v9  ;;  %v643_v23 = vmax.f32 %v611_v11, 0.0  ;;  %v598_v24 = vadd.f32 %v1177_v22, %v559_v14  ;;  %v614_v25 = vadd.f32 %v1177_v22, %v575_v15  ;;  %v1020_v28 = vpop.f32.mrf.mxu0  ;;  %v1036_v29 = vpop.f32.mrf.mxu1 }
  0xe9   : > { %785 = vst.msk [vmem:[%s1192_s7 + $0x4] sm:$0xf] %vm783_vm2, %v954_v12  ;;  %801 = vst.msk [vmem:[%s1192_s7 + $0x44] sm:$0xf] %vm783_vm2, %v970_v13  ;;  %v557_v26 = vmul.f32 %v1172_v20, %v437_v16  ;;  %v573_v27 = vmul.f32 %v1172_v20, %v501_v17  ;;  %v957_v30 = vpack.c.bf16 %v627_v21, %v627_v21 }
  0xea   : > { %790 = vst.msk [vmem:[%s1192_s7 + $0x18] sm:$0xf] %vm783_vm2, %v959_v18  ;;  %806 = vst.msk [vmem:[%s1192_s7 + $0x58] sm:$0xf] %vm783_vm2, %v975_v19  ;;  %v973_v31 = vpack.c.bf16 %v643_v23, %v643_v23  ;;  %v562_v32 = vmul.f32 %v1020_v28, %v1172_v20  ;;  %v578_v33 = vmul.f32 %v1036_v29, %v1172_v20  ;;  %v630_v34 = vmax.f32 %v598_v24, 0.0  ;;  %v450_v38 = vpop.f32.mrf.mxu0  ;;  %v514_v39 = vpop.f32.mrf.mxu1 }
  0xeb   : > { %v646_v35 = vmax.f32 %v614_v25, 0.0  ;;  %v596_v36 = vadd.f32 %v1177_v22, %v557_v26  ;;  %v612_v37 = vadd.f32 %v1177_v22, %v573_v27  ;;  %788 = vst.msk [vmem:[%s1192_s7 + $0x10] sm:$0xf] %vm783_vm2, %v957_v30  ;;  %v560_v42 = vmul.f32 %v1172_v20, %v450_v38 }
  0xec   : > { %804 = vst.msk [vmem:[%s1192_s7 + $0x50] sm:$0xf] %vm783_vm2, %v973_v31  ;;  %v601_v40 = vadd.f32 %v1177_v22, %v562_v32  ;;  %v617_v41 = vadd.f32 %v1177_v22, %v578_v33  ;;  %v576_v43 = vmul.f32 %v1172_v20, %v514_v39  ;;  %v960_v44 = vpack.c.bf16 %v630_v34, %v630_v34  ;;  %v1021_v48 = vpop.f32.mrf.mxu0  ;;  %v1037_v49 = vpop.f32.mrf.mxu1 }
  0xed   : > { %v976_v45 = vpack.c.bf16 %v646_v35, %v646_v35  ;;  %v628_v46 = vmax.f32 %v596_v36, 0.0  ;;  %v644_v47 = vmax.f32 %v612_v37, 0.0  ;;  %v599_v52 = vadd.f32 %v1177_v22, %v560_v42 }
  0xee   : > { %v633_v50 = vmax.f32 %v601_v40, 0.0  ;;  %v649_v51 = vmax.f32 %v617_v41, 0.0  ;;  %v615_v53 = vadd.f32 %v1177_v22, %v576_v43  ;;  %791 = vst.msk [vmem:[%s1192_s7 + $0x1c] sm:$0xf] %vm783_vm2, %v960_v44  ;;  %v563_v56 = vmul.f32 %v1021_v48, %v1172_v20  ;;  %v453_v58 = vpop.f32.mrf.mxu0  ;;  %v517_v59 = vpop.f32.mrf.mxu1 }
  0xef   : > { %807 = vst.msk [vmem:[%s1192_s7 + $0x5c] sm:$0xf] %vm783_vm2, %v976_v45  ;;  %v958_v54 = vpack.c.bf16 %v628_v46, %v628_v46  ;;  %v974_v55 = vpack.c.bf16 %v644_v47, %v644_v47  ;;  %v579_v57 = vmul.f32 %v1037_v49, %v1172_v20  ;;  %v631_v62 = vmax.f32 %v599_v52, 0.0 }
  0xf0   : > { %v963_v60 = vpack.c.bf16 %v633_v50, %v633_v50  ;;  %v979_v61 = vpack.c.bf16 %v649_v51, %v649_v51  ;;  %v647_v63 = vmax.f32 %v615_v53, 0.0  ;;  %v602_v0 = vadd.f32 %v1177_v22, %v563_v56  ;;  %v1024_v4 = vpop.f32.mrf.mxu0  ;;  %v1040_v5 = vpop.f32.mrf.mxu1 }
  0xf1   : > { %789 = vst.msk [vmem:[%s1192_s7 + $0x14] sm:$0xf] %vm783_vm2, %v958_v54  ;;  %805 = vst.msk [vmem:[%s1192_s7 + $0x54] sm:$0xf] %vm783_vm2, %v974_v55  ;;  %v618_v1 = vadd.f32 %v1177_v22, %v579_v57  ;;  %v561_v2 = vmul.f32 %v1172_v20, %v453_v58  ;;  %v577_v3 = vmul.f32 %v1172_v20, %v517_v59 }
  0xf2   : > { %794 = vst.msk [vmem:[%s1192_s7 + $0x28] sm:$0xf] %vm783_vm2, %v963_v60  ;;  %810 = vst.msk [vmem:[%s1192_s7 + $0x68] sm:$0xf] %vm783_vm2, %v979_v61  ;;  %v961_v6 = vpack.c.bf16 %v631_v62, %v631_v62  ;;  %v977_v7 = vpack.c.bf16 %v647_v63, %v647_v63  ;;  %v566_v8 = vmul.f32 %v1024_v4, %v1172_v20  ;;  %v634_v10 = vmax.f32 %v602_v0, 0.0  ;;  %v466_v14 = vpop.f32.mrf.mxu0  ;;  %v530_v15 = vpop.f32.mrf.mxu1 }
  0xf3   : > { %v582_v9 = vmul.f32 %v1040_v5, %v1172_v20  ;;  %v650_v11 = vmax.f32 %v618_v1, 0.0  ;;  %v600_v12 = vadd.f32 %v1177_v22, %v561_v2  ;;  %v616_v13 = vadd.f32 %v1177_v22, %v577_v3 }
  0xf4   : > { %792 = vst.msk [vmem:[%s1192_s7 + $0x20] sm:$0xf] %vm783_vm2, %v961_v6  ;;  %808 = vst.msk [vmem:[%s1192_s7 + $0x60] sm:$0xf] %vm783_vm2, %v977_v7  ;;  %v605_v16 = vadd.f32 %v1177_v22, %v566_v8  ;;  %v564_v18 = vmul.f32 %v1172_v20, %v466_v14  ;;  %v580_v19 = vmul.f32 %v1172_v20, %v530_v15  ;;  %v1025_v26 = vpop.f32.mrf.mxu0  ;;  %v1041_v27 = vpop.f32.mrf.mxu1 }
  0xf5   : > { %v621_v17 = vadd.f32 %v1177_v22, %v582_v9  ;;  %v964_v21 = vpack.c.bf16 %v634_v10, %v634_v10  ;;  %v980_v23 = vpack.c.bf16 %v650_v11, %v650_v11  ;;  %v632_v24 = vmax.f32 %v600_v12, 0.0 }
  0xf6   : > { %v648_v25 = vmax.f32 %v616_v13, 0.0  ;;  %v637_v28 = vmax.f32 %v605_v16, 0.0  ;;  %v603_v30 = vadd.f32 %v1177_v22, %v564_v18  ;;  %v619_v31 = vadd.f32 %v1177_v22, %v580_v19  ;;  %v469_v36 = vpop.f32.mrf.mxu0  ;;  %v533_v37 = vpop.f32.mrf.mxu1 }
  0xf7   : > { %v653_v29 = vmax.f32 %v621_v17, 0.0  ;;  %795 = vst.msk [vmem:[%s1192_s7 + $0x2c] sm:$0xf] %vm783_vm2, %v964_v21  ;;  %811 = vst.msk [vmem:[%s1192_s7 + $0x6c] sm:$0xf] %vm783_vm2, %v980_v23  ;;  %v962_v32 = vpack.c.bf16 %v632_v24, %v632_v24  ;;  %v567_v34 = vmul.f32 %v1025_v26, %v1172_v20  ;;  %v583_v35 = vmul.f32 %v1041_v27, %v1172_v20 }
  0xf8   : > { %v978_v33 = vpack.c.bf16 %v648_v25, %v648_v25  ;;  %v967_v38 = vpack.c.bf16 %v637_v28, %v637_v28  ;;  %v635_v40 = vmax.f32 %v603_v30, 0.0  ;;  %v651_v41 = vmax.f32 %v619_v31, 0.0 }
  0xf9   : > { %v983_v39 = vpack.c.bf16 %v653_v29, %v653_v29  ;;  %793 = vst.msk [vmem:[%s1192_s7 + $0x24] sm:$0xf] %vm783_vm2, %v962_v32  ;;  %v606_v42 = vadd.f32 %v1177_v22, %v567_v34  ;;  %v622_v43 = vadd.f32 %v1177_v22, %v583_v35  ;;  %v565_v44 = vmul.f32 %v1172_v20, %v469_v36 }
  0xfa   : > { %809 = vst.msk [vmem:[%s1192_s7 + $0x64] sm:$0xf] %vm783_vm2, %v978_v33  ;;  %v581_v45 = vmul.f32 %v1172_v20, %v533_v37  ;;  %798 = vst.msk [vmem:[%s1192_s7 + $0x38] sm:$0xf] %vm783_vm2, %v967_v38  ;;  %v965_v46 = vpack.c.bf16 %v635_v40, %v635_v40  ;;  %v981_v47 = vpack.c.bf16 %v651_v41, %v651_v41 }
  0xfb   : > { %814 = vst.msk [vmem:[%s1192_s7 + $0x78] sm:$0xf] %vm783_vm2, %v983_v39  ;;  %v638_v48 = vmax.f32 %v606_v42, 0.0  ;;  %v654_v49 = vmax.f32 %v622_v43, 0.0  ;;  %v604_v50 = vadd.f32 %v1177_v22, %v565_v44 }
  0xfc   : > { %v620_v51 = vadd.f32 %v1177_v22, %v581_v45  ;;  %796 = vst.msk [vmem:[%s1192_s7 + $0x30] sm:$0xf] %vm783_vm2, %v965_v46  ;;  %812 = vst.msk [vmem:[%s1192_s7 + $0x70] sm:$0xf] %vm783_vm2, %v981_v47 }
  0xfd   : > { %v968_v20 = vpack.c.bf16 %v638_v48, %v638_v48  ;;  %v984_v52 = vpack.c.bf16 %v654_v49, %v654_v49  ;;  %v636_v53 = vmax.f32 %v604_v50, 0.0 }
  0xfe   : > { %v652_v54 = vmax.f32 %v620_v51, 0.0 }
  0xff   : > { %799 = vst.msk [vmem:[%s1192_s7 + $0x3c] sm:$0xf] %vm783_vm2, %v968_v20  ;;  %815 = vst.msk [vmem:[%s1192_s7 + $0x7c] sm:$0xf] %vm783_vm2, %v984_v52  ;;  %v966_v55 = vpack.c.bf16 %v636_v53, %v636_v53 }
 0x100   : > { %v982_v56 = vpack.c.bf16 %v652_v54, %v652_v54 }
 0x101   : > { %797 = vst.msk [vmem:[%s1192_s7 + $0x34] sm:$0xf] %vm783_vm2, %v966_v55 }
 0x102   : > { %813 = vst.msk [vmem:[%s1192_s7 + $0x74] sm:$0xf] %vm783_vm2, %v982_v56 }
 0x103 PF: > { %s14_s15 = sadd.s32 1, %s1083_s15  }
 0x104   : > { %p11_p4 = scmp.ge.s32.totalorder %s14_s15, 4  }
 0x106   :  { %13 = sbr.rel (!%p11_p4) target bundleno = 1 (0x1), region = 66 }

// kernel: encoder_forward.8
= control target key start
LH: loop header
LB: loop body
LE: loop exit
PB: predicated region body
PF: predicated region fallthrough
CT: control target
= control target key end

     0   :  { %s3138_s13 = smov 0   ;;  %s3813_s0 = inlined_call_operand.vmem [shape: bf16[2,8,8,576], index: 0, kind: input, shape index: {}]   ;;  %s3814_s1 = inlined_call_operand.vmem [shape: bf16[576,128], index: 1, kind: input, shape index: {}]   ;;  %s3815_s2 = inlined_call_operand.vmem [shape: f32[1,128], index: 2, kind: input, shape index: {}]   ;;  %s3816_s3 = inlined_call_operand.vmem [shape: f32[1,128], index: 3, kind: input, shape index: {}]   ;;  %s3817_s4 = inlined_call_operand.vmem [shape: bf16[1152,128], index: 4, kind: input, shape index: {}]   ;;  %s3818_s5 = inlined_call_operand.vmem [shape: f32[1,128], index: 5, kind: input, shape index: {}]   ;;  %s3819_s6 = inlined_call_operand.vmem [shape: f32[1,128], index: 6, kind: input, shape index: {}]   ;;  %s3820_s7 = inlined_call_operand.vmem [shape: bf16[64,128], index: 7, kind: input, shape index: {}]   ;;  %s3821_s8 = inlined_call_operand.vmem [shape: f32[1,128], index: 8, kind: input, shape index: {}]   ;;  %s3822_s9 = inlined_call_operand.vmem [shape: f32[1,128], index: 9, kind: input, shape index: {}]   ;;  %s3823_s10 = inlined_call_operand.vmem [shape: bf16[2,8,8,128], index: 10, kind: output, shape index: {}]  }
   0x1 LB: > { %s2414_s14 = sadd.s32 4294967295, %s3080_s13   ;;  %p2418_p0 = scmp.ge.s32.totalorder %s3080_s13, 1  ;;  %s3080_s13 = sphi %s3138_s13, %s20_s13  }
   0x2   : > { %p312_p1 = scmp.lt.s32.totalorder %s3080_s13, 3 }
   0x4   : > { %p313_p2 = pnand %p2418_p0, %p312_p1 }
   0x6   : > { %316 = sbr.rel (%p313_p2) target bundleno = 586 (0x24a), region = 60 }
   0xb   : > { %v2930_v0 = vld [vmem:[%s3814_s1 + $0x78] sm:$0xff]   ;;  %v2934_v4 = vld [vmem:[%s3814_s1 + $0x70] sm:$0xff]   ;;  %v2938_v8 = vld [vmem:[%s3814_s1 + $0x68] sm:$0xff]   ;;  %p350_p3 = scmp.lt.s32.totalorder %s2414_s14, 1  ;;  %vm733_vm0 = vcmask 523264   ;;  %vm1119_vm1 = vcmask 1040384  }
   0xc   : > { %v2931_v1 = vld [vmem:[%s3814_s1 + $0xf8] sm:$0xff]   ;;  %2596 = vmatprep.subr.bf16.mxu0 %v2930_v0  ;;  %v2935_v5 = vld [vmem:[%s3814_s1 + $0xf0] sm:$0xff]   ;;  %v2939_v9 = vld [vmem:[%s3814_s1 + $0xe8] sm:$0xff]   ;;  %vm1072_vm2 = vcmask 1045504  }
   0xd   : > { %v2932_v2 = vld [vmem:[%s3814_s1 + $0x38] sm:$0xff]   ;;  %2636 = vmatprep.subr.bf16.mxu1 %v2931_v1  ;;  %v2936_v6 = vld [vmem:[%s3814_s1 + $0x30] sm:$0xff]   ;;  %v2940_v10 = vld [vmem:[%s3814_s1 + $0x28] sm:$0xff]   ;;  %s3849_s14 = smov (!%p350_p3, %s2414_s14), 1 }
   0xe   : > { %v2933_v3 = vld [vmem:[%s3814_s1 + $0xb8] sm:$0xff]   ;;  %2597 = vmatpush3.bf16.msra.mxu0 %v2932_v2  ;;  %v2937_v7 = vld [vmem:[%s3814_s1 + $0xb0] sm:$0xff]   ;;  %v2941_v11 = vld [vmem:[%s3814_s1 + $0xa8] sm:$0xff]   ;;  %s2920_s11 = smul.u32 160, %s3849_s14  ;;  %s2572_s30 = sshll.u32 %s3849_s14, 5 }
   0xf   : > { %2637 = vmatpush3.bf16.msra.mxu1 %v2933_v3  ;;  %2598 = vmatprep.subr.bf16.mxu0 %v2934_v4  ;;  %v2942_v12 = vld [vmem:[%s3814_s1 + $0x60] sm:$0xff]   ;;  %v2946_v16 = vld [vmem:[%s3814_s1 + $0x58] sm:$0xff]   ;;  %v2950_v20 = vld [vmem:[%s3814_s1 + $0x50] sm:$0xff]   ;;  %s359_s15 = scalar_lea.vmem %s3823_s10, %s2572_s30 }
  0x10   : > { %2638 = vmatprep.subr.bf16.mxu1 %v2935_v5  ;;  %v2943_v13 = vld [vmem:[%s3814_s1 + $0xe0] sm:$0xff]   ;;  %v2947_v17 = vld [vmem:[%s3814_s1 + $0xd8] sm:$0xff]   ;;  %v2951_v21 = vld [vmem:[%s3814_s1 + $0xd0] sm:$0xff]   ;;  %s3246_s24 = scalar_lea.vmem %s3813_s0, %s2920_s11 }
  0x11   : > { %v2944_v14 = vld [vmem:[%s3814_s1 + $0x20] sm:$0xff]   ;;  %v2948_v18 = vld [vmem:[%s3814_s1 + $0x18] sm:$0xff]   ;;  %v2952_v22 = vld [vmem:[%s3814_s1 + $0x10] sm:$0xff]  }
  0x12   : > { %2599 = vmatpush3.bf16.msra.mxu0 %v2936_v6  ;;  %v2945_v15 = vld [vmem:[%s3814_s1 + $0xa0] sm:$0xff]   ;;  %v2949_v19 = vld [vmem:[%s3814_s1 + $0x98] sm:$0xff]   ;;  %v2953_v23 = vld [vmem:[%s3814_s1 + $0x90] sm:$0xff]  }
  0x13   : > { %2639 = vmatpush3.bf16.msra.mxu1 %v2937_v7  ;;  %2600 = vmatprep.subr.bf16.mxu0 %v2938_v8  ;;  %v2954_v24 = vld [vmem:[%s3814_s1 + $0x48] sm:$0xff]   ;;  %v2958_v28 = vld [vmem:[%s3814_s1 + $0x40] sm:$0xff]   ;;  %v2968_v36 = vld [vmem:[%s3814_s1 + $0x118] sm:$0xff]  }
  0x14   : > { %2640 = vmatprep.subr.bf16.mxu1 %v2939_v9  ;;  %v2955_v25 = vld [vmem:[%s3814_s1 + $0xc8] sm:$0xff]   ;;  %v2959_v29 = vld [vmem:[%s3814_s1 + $0xc0] sm:$0xff]   ;;  %v2975_v39 = vld [vmem:[%s3814_s1 + $0x110] sm:$0xff]  }
  0x15   : > { %v2956_v26 = vld [vmem:[%s3814_s1 + $0x8] sm:$0xff]   ;;  %v2960_v30 = vld [vmem:[%s3814_s1] sm:$0xff]   ;;  %v2978_v43 = vld [vmem:[%s3246_s24 + $0x5c] ss:$20 sps:$4 sm:$0xff]  }
  0x16   : > { %2601 = vmatpush3.bf16.msra.mxu0 %v2940_v10  ;;  %v2957_v27 = vld [vmem:[%s3814_s1 + $0x88] sm:$0xff]   ;;  %v2961_v31 = vld [vmem:[%s3814_s1 + $0x80] sm:$0xff]   ;;  %v2983_v48 = vld [vmem:[%s3246_s24 + $0x7c] ss:$20 sps:$4 sm:$0xff]  }
  0x17   : > { %2641 = vmatpush3.bf16.msra.mxu1 %v2941_v11  ;;  %2602 = vmatprep.subr.bf16.mxu0 %v2942_v12  ;;  %v2962_v32 = vld [vmem:[%s3246_s24] ss:$20 sps:$4 sm:$0xff]   ;;  %v2964_v33 = vld [vmem:[%s3246_s24 + $0x4] ss:$20 sps:$4 sm:$0xff]   ;;  %v2965_v34 = vld [vmem:[%s3246_s24 + $0x8] ss:$20 sps:$4 sm:$0xff]  }
  0x18   : > { %2642 = vmatprep.subr.bf16.mxu1 %v2943_v13  ;;  %v2967_v35 = vld [vmem:[%s3246_s24 + $0xc] ss:$20 sps:$4 sm:$0xff]   ;;  %778 = vmatprep.mubr.bf16.mxu0 %v2964_v33  ;;  %v2971_v38 = vld [vmem:[%s3246_s24 + $0x34] ss:$20 sps:$4 sm:$0xff]   ;;  %v2974_v41 = vld [vmem:[%s3246_s24 + $0x30] ss:$20 sps:$4 sm:$0xff]  }
  0x19   : > { %843 = vmatprep.mubr.bf16.mxu1 %v2967_v35  ;;  %v2969_v37 = vld [vmem:[%s3246_s24 + $0x2c] ss:$20 sps:$4 sm:$0xff]   ;;  %v2973_v40 = vld [vmem:[%s3246_s24 + $0x28] ss:$20 sps:$4 sm:$0xff]   ;;  %v2980_v46 = vld [vmem:[%s3246_s24 + $0x50] ss:$20 sps:$4 sm:$0xff]  }
  0x1a   : > { %2603 = vmatpush3.bf16.msra.mxu0 %v2944_v14  ;;  %v2976_v42 = vld [vmem:[%s3246_s24 + $0x54] ss:$20 sps:$4 sm:$0xff]   ;;  %v2989_v45 = vld [vmem:[%s3814_s1 + $0x100] sm:$0xff]   ;;  %v2981_v47 = vld [vmem:[%s3246_s24 + $0x58] ss:$20 sps:$4 sm:$0xff]  }
  0x1b   : > { %2643 = vmatpush3.bf16.msra.mxu1 %v2945_v15  ;;  %2604 = vmatprep.subr.bf16.mxu0 %v2946_v16  ;;  %v2982_v44 = vld [vmem:[%s3814_s1 + $0x108] sm:$0xff]   ;;  %v2985_v49 = vld [vmem:[%s3246_s24 + $0x84] ss:$20 sps:$4 sm:$0xff]   ;;  %v2988_v51 = vld [vmem:[%s3246_s24 + $0x80] ss:$20 sps:$4 sm:$0xff]  }
  0x1c   : > { %2644 = vmatprep.subr.bf16.mxu1 %v2947_v17  ;;  %v2987_v50 = vld [vmem:[%s3246_s24 + $0x78] ss:$20 sps:$4 sm:$0xff]   ;;  %v2990_v52 = vld [vmem:[%s3246_s24 + $0x10] ss:$20 sps:$4 sm:$0xff]   ;;  %v2992_v54 = vld [vmem:[%s3246_s24 + $0x60] ss:$20 sps:$4 sm:$0xff]  }
  0x1d   : > { %v2991_v53 = vld [vmem:[%s3246_s24 + $0x38] ss:$20 sps:$4 sm:$0xff]   ;;  %v2993_v55 = vld [vmem:[%s3246_s24 + $0x88] ss:$20 sps:$4 sm:$0xff]   ;;  %v2997_v59 = vld [vmem:[%s3817_s4 + $0x70] sm:$0xff]  }
  0x1e   : > { %2605 = vmatpush3.bf16.msra.mxu0 %v2948_v18  ;;  %v2994_v56 = vld [vmem:[%s3817_s4 + $0x78] sm:$0xff]   ;;  %v2999_v61 = vld [vmem:[%s3817_s4 + $0x30] sm:$0xff]   ;;  %v3001_v63 = vld [vmem:[%s3817_s4 + $0x68] sm:$0xff]  }
  0x1f   : > { %2645 = vmatpush3.bf16.msra.mxu1 %v2949_v19  ;;  %2606 = vmatprep.subr.bf16.mxu0 %v2950_v20  ;;  %v2995_v57 = vld [vmem:[%s3817_s4 + $0x38] sm:$0xff]   ;;  %v3000_v62 = vld [vmem:[%s3817_s4 + $0xf0] sm:$0xff]   ;;  %v3003_v1 = vld [vmem:[%s3817_s4 + $0x28] sm:$0xff]  }
  0x20   : > { %2646 = vmatprep.subr.bf16.mxu1 %v2951_v21  ;;  %v2996_v58 = vld [vmem:[%s3817_s4 + $0xf8] sm:$0xff]   ;;  %v3002_v0 = vld [vmem:[%s3817_s4 + $0xb0] sm:$0xff]   ;;  %v3004_v2 = vld [vmem:[%s3817_s4 + $0xe8] sm:$0xff]  }
  0x21   : > { %v2998_v60 = vld [vmem:[%s3817_s4 + $0xb8] sm:$0xff]   ;;  %v3005_v3 = vld [vmem:[%s3817_s4 + $0x60] sm:$0xff]   ;;  %v3006_v4 = vld [vmem:[%s3817_s4 + $0xa8] sm:$0xff]  }
  0x22   : > { %2607 = vmatpush3.bf16.msra.mxu0 %v2952_v22  ;;  %v3007_v5 = vld [vmem:[%s3817_s4 + $0x20] sm:$0xff]   ;;  %v3009_v7 = vld [vmem:[%s3817_s4 + $0x58] sm:$0xff]   ;;  %v3013_v11 = vld [vmem:[%s3817_s4 + $0x50] sm:$0xff]  }
  0x23   : > { %2647 = vmatpush3.bf16.msra.mxu1 %v2953_v23  ;;  %2608 = vmatprep.subr.bf16.mxu0 %v2954_v24  ;;  %v3008_v6 = vld [vmem:[%s3817_s4 + $0xe0] sm:$0xff]   ;;  %v3011_v9 = vld [vmem:[%s3817_s4 + $0x18] sm:$0xff]   ;;  %v3015_v13 = vld [vmem:[%s3817_s4 + $0x10] sm:$0xff]  }
  0x24   : > { %2648 = vmatprep.subr.bf16.mxu1 %v2955_v25  ;;  %v3010_v8 = vld [vmem:[%s3817_s4 + $0xa0] sm:$0xff]   ;;  %v3012_v10 = vld [vmem:[%s3817_s4 + $0xd8] sm:$0xff]   ;;  %v3016_v14 = vld [vmem:[%s3817_s4 + $0xd0] sm:$0xff]  }
  0x25   : > { %v3014_v12 = vld [vmem:[%s3817_s4 + $0x98] sm:$0xff]   ;;  %v3017_v15 = vld [vmem:[%s3817_s4 + $0x48] sm:$0xff]   ;;  %v3018_v16 = vld [vmem:[%s3817_s4 + $0x90] sm:$0xff]  }
  0x26   : > { %2609 = vmatpush3.bf16.msra.mxu0 %v2956_v26  ;;  %v3019_v17 = vld [vmem:[%s3817_s4 + $0x8] sm:$0xff]   ;;  %v3021_v19 = vld [vmem:[%s3817_s4 + $0x40] sm:$0xff]   ;;  %v3026_v24 = vld [vmem:[%s3817_s4 + $0x178] sm:$0xff]  }
  0x27   : > { %2649 = vmatpush3.bf16.msra.mxu1 %v2957_v27  ;;  %2610 = vmatprep.subr.bf16.mxu0 %v2958_v28  ;;  %v3020_v18 = vld [vmem:[%s3817_s4 + $0xc8] sm:$0xff]   ;;  %v3023_v21 = vld [vmem:[%s3817_s4] sm:$0xff]   ;;  %v3028_v25 = vld [vmem:[%s3817_s4 + $0x1f8] sm:$0xff]  }
  0x28   : > { %2650 = vmatprep.subr.bf16.mxu1 %v2959_v29  ;;  %v3022_v20 = vld [vmem:[%s3817_s4 + $0x88] sm:$0xff]   ;;  %v3024_v22 = vld [vmem:[%s3817_s4 + $0xc0] sm:$0xff]  }
  0x29   : > { %v3025_v23 = vld [vmem:[%s3817_s4 + $0x80] sm:$0xff]  }
  0x2a   : > { %2611 = vmatpush3.bf16.msra.mxu0 %v2960_v30 }
  0x2b   : > { %2651 = vmatpush3.bf16.msra.mxu1 %v2961_v31  ;;  %2864 = vmatprep.subr.bf16.mxu0 %v2968_v36 }
  0x2c   : > { %2684 = vmatprep.subr.bf16.mxu1 %v2994_v56 }
  0x2d   : > { %779 = vmatmul.mubr.bf16.vlgmr.msra.gmra.mxu0 %v2962_v32 }
  0x2e   : > { %844 = vmatmul.mubr.bf16.vlgmr.msra.gmra.mxu1 %v2965_v34  ;;  %2865 = vmatpush3.bf16.msra.mxu0 %v2968_v36 }
  0x2f   : > { %786 = vmatprep.mubr.bf16.mxu0 %v2969_v37  ;;  %851 = vmatprep.mubr.bf16.mxu1 %v2971_v38 }
  0x30   : > { %2866 = vmatprep.subr.bf16.mxu0 %v2975_v39  ;;  %2685 = vmatpush3.bf16.msra.mxu1 %v2995_v57 }
  0x31   : > { %2686 = vmatprep.subr.bf16.mxu1 %v2997_v59 }
  0x32   : > { %2867 = vmatpush3.bf16.msra.mxu0 %v2975_v39 }
  0x33   : > { %2868 = vmatprep.subr.bf16.mxu0 %v2982_v44 }
  0x34   : > { %2687 = vmatpush3.bf16.msra.mxu1 %v2999_v61 }
  0x35   : > { %787 = vmatmul.mubr.bf16.gmra.mxu0 %v2973_v40  ;;  %2688 = vmatprep.subr.bf16.mxu1 %v3001_v63 }
  0x36   : > { %852 = vmatmul.mubr.bf16.gmra.mxu1 %v2974_v41  ;;  %794 = vmatprep.mubr.bf16.mxu0 %v2976_v42 }
  0x37   : > { %859 = vmatprep.mubr.bf16.mxu1 %v2978_v43  ;;  %2869 = vmatpush3.bf16.msra.mxu0 %v2982_v44 }
  0x38   : > { %2870 = vmatprep.subr.bf16.mxu0 %v2989_v45  ;;  %2689 = vmatpush3.bf16.msra.mxu1 %v3003_v1  ;;  %v3395_v1 = vld [vmem:[%s3815_s2] ss:$0 sm:$0xff] }
  0x39   : > { %2690 = vmatprep.subr.bf16.mxu1 %v3005_v3 }
  0x3b   : > { %2871 = vmatpush3.bf16.msra.mxu0 %v2989_v45 }
  0x3c   : > { %2724 = vmatprep.subr.bf16.mxu0 %v2996_v58  ;;  %2691 = vmatpush3.bf16.msra.mxu1 %v3007_v5 }
  0x3d   : > { %795 = vmatmul.mubr.bf16.gmra.mxu0 %v2980_v46  ;;  %2692 = vmatprep.subr.bf16.mxu1 %v3009_v7 }
  0x3e   : > { %860 = vmatmul.mubr.bf16.gmra.mxu1 %v2981_v47  ;;  %802 = vmatprep.mubr.bf16.mxu0 %v2983_v48 }
  0x3f   : > { %867 = vmatprep.mubr.bf16.mxu1 %v2985_v49 }
  0x40   : > { %2693 = vmatpush3.bf16.msra.mxu1 %v3011_v9 }
  0x41   : > { %2694 = vmatprep.subr.bf16.mxu1 %v3013_v11 }
  0x44   : > { %2695 = vmatpush3.bf16.msra.mxu1 %v3015_v13 }
  0x45   : > { %803 = vmatmul.mubr.bf16.gmra.mxu0 %v2987_v50  ;;  %2696 = vmatprep.subr.bf16.mxu1 %v3017_v15 }
  0x46   : > { %868 = vmatmul.mubr.bf16.gmra.mxu1 %v2988_v51  ;;  %2872 = vmatprep.mubr.msk.bf16.mxu0 %vm733_vm0, %v2990_v52 }
  0x48   : > { %2697 = vmatpush3.bf16.msra.mxu1 %v3019_v17 }
  0x49   : > { %2698 = vmatprep.subr.bf16.mxu1 %v3021_v19 }
  0x4c   : > { %2699 = vmatpush3.bf16.msra.mxu1 %v3023_v21 }
  0x4d   : > { %2873 = vmatmul.mubr.msk.bf16.vlgmr.msra.gmra.mxu0 %vm733_vm0, %v2991_v53  ;;  %2764 = vmatprep.subr.bf16.mxu1 %v3026_v24 }
  0x4e   : > { %2876 = vmatprep.mubr.msk.bf16.mxu0 %vm733_vm0, %v2992_v54  ;;  %2725 = vmatpush3.bf16.msra.mxu0 %v2998_v60 }
  0x4f   : > { %2726 = vmatprep.subr.bf16.mxu0 %v3000_v62 }
  0x52   : > { %2727 = vmatpush3.bf16.msra.mxu0 %v3002_v0 }
  0x53   : > { %2728 = vmatprep.subr.bf16.mxu0 %v3004_v2 }
  0x55   : > { %2877 = vmatmul.mubr.msk.bf16.gmra.mxu0 %vm733_vm0, %v2993_v55 }
  0x56   : > { %2729 = vmatpush3.bf16.msra.mxu0 %v3006_v4 }
  0x57   : > { %2730 = vmatprep.subr.bf16.mxu0 %v3008_v6  ;;  %v3400_v6 = vld [vmem:[%s3816_s3] ss:$0 sm:$0xff] }
  0x5a   : > { %2731 = vmatpush3.bf16.msra.mxu0 %v3010_v8 }
  0x5b   : > { %2732 = vmatprep.subr.bf16.mxu0 %v3012_v10 }
  0x5e   : > { %2733 = vmatpush3.bf16.msra.mxu0 %v3014_v12 }
  0x5f   : > { %2734 = vmatprep.subr.bf16.mxu0 %v3016_v14 }
  0x62   : > { %2735 = vmatpush3.bf16.msra.mxu0 %v3018_v16 }
  0x63   : > { %2736 = vmatprep.subr.bf16.mxu0 %v3020_v18 }
  0x66   : > { %2737 = vmatpush3.bf16.msra.mxu0 %v3022_v20 }
  0x67   : > { %2738 = vmatprep.subr.bf16.mxu0 %v3024_v22 }
  0x6a   : > { %2739 = vmatpush3.bf16.msra.mxu0 %v3025_v23 }
  0x6b   : > { %2804 = vmatprep.subr.bf16.mxu0 %v3028_v25 }
  0xed   : > { %v2612_v26 = vpop.f32.mrf.mxu0 }
  0xee   : > { %v2652_v27 = vpop.f32.mrf.mxu1 }
  0xef   : > { %v2613_v28 = vpop.f32.mrf.mxu0 }
  0xf0   : > { %v2653_v29 = vpop.f32.mrf.mxu1  ;;  %v2614_v57 = vadd.f32 %v2613_v28, %v2612_v26 }
  0xf1   : > { %v2615_v30 = vpop.f32.mrf.mxu0  ;;  %v2654_v58 = vadd.f32 %v2653_v29, %v2652_v27  ;;  %v3082_v27 = vmov 0.0  }
  0xf2   : > { %v2655_v31 = vpop.f32.mrf.mxu1  ;;  %v3408_v28 = vrot.slane %v3082_v27, 2 }
  0xf3   : > { %v2616_v32 = vpop.f32.mrf.mxu0  ;;  %v846_v5 = vadd.f32 %v2654_v58, %v2614_v57 }
  0xf4   : > { %v2656_v33 = vpop.f32.mrf.mxu1  ;;  %v2617_v2 = vadd.f32 %v2616_v32, %v2615_v30  ;;  %v3411_v32 = vrot.slane %v3082_v27, 7 }
  0xf5   : > { %v2618_v34 = vpop.f32.mrf.mxu0  ;;  %v2657_v3 = vadd.f32 %v2656_v33, %v2655_v31 }
  0xf6   : > { %v2658_v35 = vpop.f32.mrf.mxu1 }
  0xf7   : > { %v2619_v36 = vpop.f32.mrf.mxu0  ;;  %v849_v18 = vadd.f32 %v2657_v3, %v2617_v2  ;;  %v3027_v3 = vld [vmem:[%s3817_s4 + $0x138] sm:$0xff]  }
  0xf8   : > { %v2659_v37 = vpop.f32.mrf.mxu1  ;;  %v2620_v53 = vadd.f32 %v2619_v36, %v2618_v34 }
  0xf9   : > { %v2621_v38 = vpop.f32.mrf.mxu0  ;;  %v2660_v54 = vadd.f32 %v2659_v37, %v2658_v35 }
  0xfa   : > { %v2661_v39 = vpop.f32.mrf.mxu1 }
  0xfb   : > { %v2622_v40 = vpop.f32.mrf.mxu0  ;;  %v854_v63 = vadd.f32 %v2660_v54, %v2620_v53 }
  0xfc   : > { %v2662_v41 = vpop.f32.mrf.mxu1  ;;  %v2623_v60 = vadd.f32 %v2622_v40, %v2621_v38 }
  0xfd   : > { %v2624_v42 = vpop.f32.mrf.mxu0  ;;  %v2663_v61 = vadd.f32 %v2662_v41, %v2661_v39 }
  0xfe   : > { %v2664_v43 = vpop.f32.mrf.mxu1 }
  0xff   : > { %v2625_v44 = vpop.f32.mrf.mxu0  ;;  %v857_v11 = vadd.f32 %v2663_v61, %v2623_v60 }
 0x100   : > { %v2665_v45 = vpop.f32.mrf.mxu1  ;;  %v2626_v19 = vadd.f32 %v2625_v44, %v2624_v42 }
 0x101   : > { %v2627_v46 = vpop.f32.mrf.mxu0  ;;  %v2666_v20 = vadd.f32 %v2665_v45, %v2664_v43 }
 0x102   : > { %v2667_v47 = vpop.f32.mrf.mxu1 }
 0x103   : > { %v2628_v48 = vpop.f32.mrf.mxu0  ;;  %v862_v38 = vadd.f32 %v2666_v20, %v2626_v19 }
 0x104   : > { %v2668_v49 = vpop.f32.mrf.mxu1  ;;  %v2629_v29 = vadd.f32 %v2628_v48, %v2627_v46 }
 0x105   : > { %v2630_v50 = vpop.f32.mrf.mxu0  ;;  %v2669_v33 = vadd.f32 %v2668_v49, %v2667_v47  ;;  %v1125_v49 = vrot.slane %v3408_v28, 7 }
 0x106   : > { %v2670_v51 = vpop.f32.mrf.mxu1 }
 0x107   : > { %v2631_v52 = vpop.f32.mrf.mxu0 }
 0x108   : > { %v2671_v55 = vpop.f32.mrf.mxu1  ;;  %v2632_v12 = vadd.f32 %v2631_v52, %v2630_v50  ;;  %v865_v52 = vadd.f32 %v2669_v33, %v2629_v29  ;;  %v3033_v33 = vld [vmem:[%s3817_s4 + $0x168] sm:$0xff]  }
 0x109   : > { %v2633_v56 = vpop.f32.mrf.mxu0  ;;  %v2672_v13 = vadd.f32 %v2671_v55, %v2670_v51 }
 0x10a   : > { %v2673_v62 = vpop.f32.mrf.mxu1 }
 0x10b   : > { %v2634_v59 = vpop.f32.mrf.mxu0  ;;  %v870_v30 = vadd.f32 %v2672_v13, %v2632_v12 }
 0x10c   : > { %v2674_v8 = vpop.f32.mrf.mxu1  ;;  %v2635_v21 = vadd.f32 %v2634_v59, %v2633_v56 }
 0x10d   : > { %v2874_v0 = vpop.f32.mrf.mxu0  ;;  %v2675_v22 = vadd.f32 %v2674_v8, %v2673_v62 }
 0x10e   : > { %v919_v4 = vadd.f32 %v2874_v0, %v854_v63 }
 0x10f   : > { %v910_v7 = vpop.f32.mrf.mxu0  ;;  %v873_v40 = vadd.f32 %v2675_v22, %v2635_v21  ;;  %v3031_v21 = vld [vmem:[%s3817_s4 + $0x130] sm:$0xff]  }
 0x110   : > { %v950_v9 = vmul.f32 %v3395_v1, %v919_v4  ;;  %v911_v10 = vadd.f32 %v910_v7, %v846_v5 }
 0x111   : > { %v2875_v14 = vpop.f32.mrf.mxu0 }
 0x112   : > { %v965_v15 = vadd.f32 %v3400_v6, %v950_v9  ;;  %v948_v16 = vmul.f32 %v3395_v1, %v911_v10  ;;  %v922_v17 = vadd.f32 %v2875_v14, %v857_v11  ;;  %v3029_v10 = vld [vmem:[%s3817_s4 + $0x170] sm:$0xff]  }
 0x113   : > { %v913_v23 = vpop.f32.mrf.mxu0 }
 0x114   : > { %v963_v24 = vadd.f32 %v3400_v6, %v948_v16  ;;  %v951_v25 = vmul.f32 %v3395_v1, %v922_v17  ;;  %v914_v26 = vadd.f32 %v913_v23, %v849_v18  ;;  %v3413_v34 = vmax.f32 %v965_v15, 0.0 }
 0x115   : > { %v2878_v31 = vpop.f32.mrf.mxu0 }
 0x116   : > { %v971_v35 = vmax.f32 %v963_v24, 0.0  ;;  %v949_v36 = vmul.f32 %v3395_v1, %v914_v26  ;;  %v935_v37 = vadd.f32 %v2878_v31, %v870_v30  ;;  %v966_v43 = vadd.f32 %v3400_v6, %v951_v25  ;;  %v3030_v26 = vld [vmem:[%s3817_s4 + $0x1b8] sm:$0xff]   ;;  %v3032_v31 = vld [vmem:[%s3817_s4 + $0x1f0] sm:$0xff]  }
 0x117   : > { %v926_v39 = vpop.f32.mrf.mxu0  ;;  %v1059_v53 = vrot.slane %v3413_v34, 1  ;;  %v1145_v58 = vrot.slane %v3413_v34, 7  ;;  %v1082_v18 = vrot.slane %v3413_v34, 2 }
 0x118   : > { %v1076_v41 = vrot.slane %v971_v35, 2  ;;  %v1129_v42 = vrot.slane %v971_v35, 7  ;;  %v964_v44 = vadd.f32 %v3400_v6, %v949_v36  ;;  %v954_v45 = vmul.f32 %v3395_v1, %v935_v37 }
 0x119   : > { %v927_v46 = vadd.f32 %v926_v39, %v862_v38  ;;  %v2879_v47 = vpop.f32.mrf.mxu0  ;;  %v1057_v48 = vrot.slane %v971_v35, 1  ;;  %v3427_v60 = vmax.f32 %v966_v43, 0.0  ;;  %v3446_v13 = vrot.slane %v1059_v53, 7 }
 0x11a   : > { %v972_v50 = vmax.f32 %v964_v44, 0.0  ;;  %v938_v51 = vadd.f32 %v2879_v47, %v873_v40  ;;  %v1130_v57 = vsel %vm1119_vm1, %v3411_v32, %v1129_v42  ;;  %v1133_v59 = vrot.slane %v1076_v41, 7  ;;  %v3035_v40 = vld [vmem:[%s3817_s4 + $0x128] sm:$0xff]   ;;  %v3034_v44 = vld [vmem:[%s3817_s4 + $0x1b0] sm:$0xff]  }
 0x11b   : > { %v952_v54 = vmul.f32 %v3395_v1, %v927_v46  ;;  %v929_v55 = vpop.f32.mrf.mxu0  ;;  %v3422_v56 = vrot.slane %v1057_v48, 7  ;;  %v969_v61 = vadd.f32 %v3400_v6, %v954_v45  ;;  %v1230_v7 = vpack.c.bf16 %v1130_v57, %v3411_v32 }
 0x11c   : > { %v930_v62 = vadd.f32 %v929_v55, %v865_v52  ;;  %v955_v0 = vmul.f32 %v3395_v1, %v938_v51  ;;  %v1137_v4 = vrot.slane %v972_v50, 7  ;;  %v1058_v8 = vrot.slane %v972_v50, 1  ;;  %v3036_v51 = vld [vmem:[%s3817_s4 + $0x1e8] sm:$0xff]  }
 0x11d   : > { %v967_v63 = vadd.f32 %v3400_v6, %v952_v54  ;;  %v1231_v2 = vpack.c.bf16 %v3422_v56, %v3082_v27  ;;  %v1078_v9 = vsel %vm1072_vm2, %v1076_v41, %v3408_v28  ;;  %v1079_v11 = vrot.slane %v972_v50, 2  ;;  %v3037_v54 = vld [vmem:[%s3817_s4 + $0x160] sm:$0xff]  }
 0x11e   : > { %v953_v5 = vmul.f32 %v3395_v1, %v930_v62  ;;  %v1138_v12 = vsel %vm1119_vm1, %v3411_v32, %v1137_v4  ;;  %v1134_v14 = vrot.slane %v1078_v9, 7  ;;  %v3451_v17 = vrot.slane %v1058_v8, 7 }
 0x11f   : > { %1865 = vmatprep.mubr.bf16.mxu1 %v1231_v2  ;;  %v3448_v15 = vmax.f32 %v967_v63, 0.0  ;;  %v1233_v16 = vpack.c.bf16 %v1138_v12, %v1130_v57  ;;  %v1153_v20 = vrot.slane %v3427_v60, 7  ;;  %v3461_v22 = vmax.f32 %v969_v61, 0.0  ;;  %v3039_v61 = vld [vmem:[%s3817_s4 + $0x120] sm:$0xff]  }
 0x120   : > { %v968_v1 = vadd.f32 %v3400_v6, %v953_v5  ;;  %1866 = vmatmul.mubr.bf16.vlgmr.msra.gmra.mxu1 %v1230_v7  ;;  %v3455_v19 = vsel %vm1119_vm1, %v1133_v59, %v1134_v14  ;;  %v970_v23 = vadd.f32 %v3400_v6, %v955_v0  ;;  %v3466_v24 = vpack.c.bf16 %v3446_v13, %v3451_v17  ;;  %v3038_v0 = vld [vmem:[%s3817_s4 + $0x1a8] sm:$0xff]   ;;  %v3040_v5 = vld [vmem:[%s3817_s4 + $0x1e0] sm:$0xff]   ;;  %v3041_v7 = vld [vmem:[%s3817_s4 + $0x158] sm:$0xff]  }
 0x121   : > { %2765 = vmatpush3.bf16.msra.mxu1 %v3027_v3  ;;  %1930 = vmatprep.mubr.bf16.mxu0 %v1233_v16  ;;  %v1146_v25 = vsel %vm1119_vm1, %v3411_v32, %v1145_v58  ;;  %v1232_v30 = vpack.c.bf16 %v3455_v19, %v1125_v49  ;;  %v3480_v6 = vsel %vm1119_vm1, %v3411_v32, %v1153_v20  ;;  %v1060_v34 = vrot.slane %v3427_v60, 1  ;;  %v3042_v20 = vld [vmem:[%s3817_s4 + $0x1a0] sm:$0xff]  }
 0x122   : > { %2766 = vmatprep.subr.bf16.mxu1 %v3029_v10  ;;  %v3473_v29 = vmax.f32 %v968_v1, 0.0  ;;  %v1088_v35 = vrot.slane %v3448_v15, 2  ;;  %1873 = vmatprep.mubr.bf16.mxu1 %v3466_v24  ;;  %v1239_v36 = vpack.c.bf16 %v3480_v6, %v1146_v25  ;;  %v1061_v37 = vrot.slane %v3448_v15, 1  ;;  %v3043_v1 = vld [vmem:[%s3817_s4 + $0x118] sm:$0xff]  }
 0x123   : > { %v1081_v38 = vsel %vm1072_vm2, %v1079_v11, %v3408_v28  ;;  %1931 = vmatmul.mubr.bf16.vlgmr.msra.gmra.mxu0 %v1232_v30  ;;  %v3495_v39 = vpack.c.bf16 %v1146_v25, %v1138_v12  ;;  %v1084_v41 = vsel %vm1072_vm2, %v1082_v18, %v3408_v28  ;;  %v1141_v42 = vrot.slane %v1079_v11, 7  ;;  %v3045_v25 = vld [vmem:[%s3817_s4 + $0x150] sm:$0xff]   ;;  %v3044_v30 = vld [vmem:[%s3817_s4 + $0x1d8] sm:$0xff]  }
 0x124   : > { %v1142_v43 = vrot.slane %v1081_v38, 7  ;;  %1938 = vmatprep.mubr.bf16.mxu0 %v1239_v36  ;;  %2805 = vmatpush3.bf16.msra.mxu0 %v3030_v26  ;;  %v3505_v45 = vrot.slane %v1060_v34, 7  ;;  %v3507_v46 = vrot.slane %v1061_v37, 7  ;;  %v1149_v47 = vrot.slane %v1082_v18, 7  ;;  %v3047_v34 = vld [vmem:[%s3817_s4 + $0x110] sm:$0xff]   ;;  %v3046_v36 = vld [vmem:[%s3817_s4 + $0x198] sm:$0xff]  }
 0x125   : > { %2767 = vmatpush3.bf16.msra.mxu1 %v3031_v21  ;;  %v1150_v48 = vrot.slane %v1084_v41, 7  ;;  %v1085_v50 = vrot.slane %v3427_v60, 2  ;;  %2806 = vmatprep.subr.bf16.mxu0 %v3032_v31  ;;  %v1161_v52 = vrot.slane %v3448_v15, 7  ;;  %v1169_v53 = vrot.slane %v3473_v29, 7  ;;  %v3049_v41 = vld [vmem:[%s3817_s4 + $0x148] sm:$0xff]  }
 0x126   : > { %2768 = vmatprep.subr.bf16.mxu1 %v3033_v33  ;;  %v1062_v55 = vrot.slane %v3473_v29, 1  ;;  %v3522_v57 = vpack.c.bf16 %v3507_v46, %v3505_v45  ;;  %v3525_v58 = vsel %vm1119_vm1, %v1141_v42, %v1142_v43  ;;  %v3527_v59 = vmax.f32 %v970_v23, 0.0 }
 0x127   : > { %v3531_v60 = vsel %vm1119_vm1, %v3411_v32, %v1169_v53  ;;  %v1063_v62 = vrot.slane %v3461_v22, 1  ;;  %v3539_v63 = vsel %vm1119_vm1, %v1149_v47, %v1150_v48  ;;  %v1090_v2 = vsel %vm1072_vm2, %v1088_v35, %v3408_v28  ;;  %v3051_v48 = vld [vmem:[%s3817_s4 + $0x108] sm:$0xff]  }
 0x128   : > { %1874 = vmatmul.mubr.bf16.gmra.mxu1 %v3495_v39  ;;  %2807 = vmatpush3.bf16.msra.mxu0 %v3034_v44  ;;  %v3548_v3 = vpack.c.bf16 %v3539_v63, %v3525_v58  ;;  %v1162_v4 = vsel %vm1119_vm1, %v3411_v32, %v1161_v52  ;;  %v3558_v8 = vrot.slane %v1062_v55, 7  ;;  %v1087_v9 = vsel %vm1072_vm2, %v1085_v50, %v3408_v28 }
 0x129   : > { %2769 = vmatpush3.bf16.msra.mxu1 %v3035_v40  ;;  %1881 = vmatprep.mubr.bf16.mxu1 %v3522_v57  ;;  %v1245_v10 = vpack.c.bf16 %v3531_v60, %v1162_v4  ;;  %v1165_v11 = vrot.slane %v1088_v35, 7  ;;  %v1166_v12 = vrot.slane %v1090_v2, 7  ;;  %v1091_v14 = vrot.slane %v3473_v29, 2  ;;  %v3048_v40 = vld [vmem:[%s3817_s4 + $0x1d0] sm:$0xff]   ;;  %v3056_v2 = vld [vmem:[%s3817_s4 + $0x1c0] sm:$0xff]  }
 0x12a   : > { %2808 = vmatprep.subr.bf16.mxu0 %v3036_v51  ;;  %2770 = vmatprep.subr.bf16.mxu1 %v3037_v54  ;;  %v3565_v15 = vrot.slane %v1063_v62, 7  ;;  %v1185_v16 = vrot.slane %v3527_v59, 7  ;;  %v3572_v18 = vpack.c.bf16 %v1162_v4, %v3480_v6  ;;  %v1157_v21 = vrot.slane %v1085_v50, 7  ;;  %v3050_v51 = vld [vmem:[%s3817_s4 + $0x190] sm:$0xff]   ;;  %v3053_v54 = vld [vmem:[%s3817_s4 + $0x140] sm:$0xff]   ;;  %v3058_v4 = vld [vmem:[%s3817_s4 + $0x238] sm:$0xff]  }
 0x12b   : > { %1939 = vmatmul.mubr.bf16.gmra.mxu0 %v3548_v3  ;;  %v1158_v23 = vrot.slane %v1087_v9, 7  ;;  %v1094_v26 = vrot.slane %v3461_v22, 2  ;;  %v1177_v6 = vrot.slane %v3461_v22, 7  ;;  %v3591_v31 = vsel %vm1119_vm1, %v1165_v11, %v1166_v12  ;;  %v3055_v62 = vld [vmem:[%s3817_s4 + $0x100] sm:$0xff]   ;;  %v3059_v9 = vld [vmem:[%s3817_s4 + $0x230] sm:$0xff]  }
 0x12c   : > { %1946 = vmatprep.mubr.bf16.mxu0 %v1245_v10  ;;  %2809 = vmatpush3.bf16.msra.mxu0 %v3038_v0  ;;  %v3583_v29 = vpack.c.bf16 %v3565_v15, %v3558_v8  ;;  %v3596_v33 = vsel %vm1119_vm1, %v3411_v32, %v1185_v16  ;;  %v1093_v35 = vsel %vm1072_vm2, %v1091_v14, %v3408_v28  ;;  %v1173_v44 = vrot.slane %v1091_v14, 7  ;;  %v3063_v16 = vld [vmem:[%s3817_s4 + $0x210] sm:$0xff]  }
 0x12d   : > { %2771 = vmatpush3.bf16.msra.mxu1 %v3039_v61  ;;  %2810 = vmatprep.subr.bf16.mxu0 %v3040_v5  ;;  %v1159_v22 = vsel %vm1119_vm1, %v1157_v21, %v1158_v23  ;;  %v1178_v38 = vsel %vm1119_vm1, %v3411_v32, %v1177_v6  ;;  %v1096_v42 = vsel %vm1072_vm2, %v1094_v26, %v3408_v28  ;;  %v1174_v47 = vrot.slane %v1093_v35, 7 }
 0x12e   : > { %2772 = vmatprep.subr.bf16.mxu1 %v3041_v7  ;;  %v3608_v37 = vpack.c.bf16 %v3591_v31, %v1159_v22  ;;  %v1251_v43 = vpack.c.bf16 %v3596_v33, %v1178_v38  ;;  %v3626_v50 = vpack.c.bf16 %v1178_v38, %v3531_v60  ;;  %v1181_v52 = vrot.slane %v1094_v26, 7  ;;  %v3052_v60 = vld [vmem:[%s3817_s4 + $0x1c8] sm:$0xff]   ;;  %v3057_v7 = vld [vmem:[%s3817_s4 + $0x180] sm:$0xff]  }
 0x12f   : > { %v1182_v53 = vrot.slane %v1096_v42, 7  ;;  %v1235_v55 = vpack.c.bf16 %v3525_v58, %v3455_v19  ;;  %v1175_v61 = vsel %vm1119_vm1, %v1173_v44, %v1174_v47  ;;  %v3054_v19 = vld [vmem:[%s3817_s4 + $0x188] sm:$0xff]   ;;  %v1234_v5 = vpack.c.bf16 %v3451_v17, %v3422_v56 }
 0x130   : > { %1882 = vmatmul.mubr.bf16.gmra.mxu1 %v3572_v18  ;;  %2811 = vmatpush3.bf16.msra.mxu0 %v3042_v20  ;;  %v1241_v10 = vpack.c.bf16 %v1159_v22, %v3539_v63  ;;  %v1100_v11 = vrot.slane %v3527_v59, 2  ;;  %v3060_v56 = vld [vmem:[%s3817_s4 + $0x228] sm:$0xff]   ;;  %v3061_v63 = vld [vmem:[%s3817_s4 + $0x220] sm:$0xff]   ;;  %v1247_v12 = vpack.c.bf16 %v1175_v61, %v3591_v31  ;;  %v1254_v23 = vpack.c.bf16 %v3411_v32, %v3596_v33 }
 0x131   : > { %1889 = vmatprep.mubr.bf16.mxu1 %v3583_v29  ;;  %2773 = vmatpush3.bf16.msra.mxu1 %v3043_v1  ;;  %v1183_v0 = vsel %vm1119_vm1, %v1181_v52, %v1182_v53  ;;  %v3068_v32 = vld [vmem:[%s3820_s7 + $0x8] sm:$0xff]  }
 0x132   : > { %2774 = vmatprep.subr.bf16.mxu1 %v3045_v25  ;;  %2812 = vmatprep.subr.bf16.mxu0 %v3044_v30  ;;  %v3648_v58 = vpack.c.bf16 %v1183_v0, %v1175_v61  ;;  %v1102_v17 = vsel %vm1072_vm2, %v1100_v11, %v3408_v28  ;;  %v1189_v14 = vrot.slane %v1100_v11, 7  ;;  %v3069_v25 = vld [vmem:[%s3820_s7] sm:$0xff]   ;;  %v3070_v26 = vld [vmem:[%s3246_s24 + $0x8] ss:$20 sps:$4 sm:$0xff]   ;;  %v3072_v30 = vld [vmem:[%s3246_s24 + $0x58] ss:$20 sps:$4 sm:$0xff]  }
 0x133   : > { %1947 = vmatmul.mubr.bf16.gmra.mxu0 %v3608_v37  ;;  %v1190_v1 = vrot.slane %v1102_v17, 7  ;;  %v3073_v28 = vld [vmem:[%s3246_s24 + $0x80] ss:$20 sps:$4 sm:$0xff]  }
 0x134   : > { %1954 = vmatprep.mubr.bf16.mxu0 %v1251_v43  ;;  %2813 = vmatpush3.bf16.msra.mxu0 %v3046_v36 }
 0x135   : > { %2775 = vmatpush3.bf16.msra.mxu1 %v3047_v34  ;;  %2814 = vmatprep.subr.bf16.mxu0 %v3048_v40 }
 0x136   : > { %2776 = vmatprep.subr.bf16.mxu1 %v3049_v41 }
 0x138   : > { %1890 = vmatmul.mubr.bf16.gmra.mxu1 %v3626_v50  ;;  %2815 = vmatpush3.bf16.msra.mxu0 %v3050_v51 }
 0x139   : > { %2777 = vmatpush3.bf16.msra.mxu1 %v3051_v48  ;;  %1995 = vmatprep.mubr.bf16.mxu1 %v1235_v55 }
 0x13a   : > { %2778 = vmatprep.subr.bf16.mxu1 %v3053_v54  ;;  %2816 = vmatprep.subr.bf16.mxu0 %v3052_v60 }
 0x13b   : > { %1955 = vmatmul.mubr.bf16.gmra.mxu0 %v3648_v58 }
 0x13c   : > { %2817 = vmatpush3.bf16.msra.mxu0 %v3054_v19  ;;  %2060 = vmatprep.mubr.bf16.mxu0 %v3466_v24  ;;  %v1240_v24 = vpack.c.bf16 %v3505_v45, %v3446_v13  ;;  %v1098_v13 = vrot.slane %v3527_v59, 1  ;;  %v1246_v45 = vpack.c.bf16 %v3558_v8, %v3507_v46  ;;  %v3064_v59 = vld [vmem:[%s3817_s4 + $0x208] sm:$0xff]   ;;  %v3065_v8 = vld [vmem:[%s3817_s4 + $0x200] sm:$0xff]  }
 0x13d   : > { %2779 = vmatpush3.bf16.msra.mxu1 %v3055_v62  ;;  %2818 = vmatprep.subr.bf16.mxu0 %v3056_v2 }
 0x13e   : > { %2880 = vmatprep.subr.bf16.mxu1 %v3058_v4  ;;  %v1187_v21 = vrot.slane %v1098_v13, 7 }
 0x140   : > { %1996 = vmatmul.mubr.bf16.vlgmr.msra.gmra.mxu1 %v1234_v5  ;;  %2819 = vmatpush3.bf16.msra.mxu0 %v3057_v7  ;;  %v1252_v46 = vpack.c.bf16 %v1187_v21, %v3565_v15  ;;  %v3067_v15 = vld [vmem:[%s3820_s7 + $0x10] sm:$0xff]  }
 0x141   : > { %2003 = vmatprep.mubr.bf16.mxu1 %v1241_v10  ;;  %2881 = vmatpush3.bf16.msra.mxu1 %v3058_v4 }
 0x142   : > { %2882 = vmatprep.subr.bf16.mxu1 %v3059_v9 }
 0x143   : > { %2061 = vmatmul.mubr.bf16.vlgmr.msra.gmra.mxu0 %v3495_v39  ;;  %v3062_v39 = vld [vmem:[%s3817_s4 + $0x218] sm:$0xff]  }
 0x144   : > { %2068 = vmatprep.mubr.bf16.mxu0 %v3522_v57  ;;  %v1191_v57 = vsel %vm1119_vm1, %v1189_v14, %v1190_v1 }
 0x145   : > { %2883 = vmatpush3.bf16.msra.mxu1 %v3059_v9  ;;  %v1253_v20 = vpack.c.bf16 %v1191_v57, %v1183_v0 }
 0x146   : > { %2884 = vmatprep.subr.bf16.mxu1 %v3060_v56 }
 0x148   : > { %2004 = vmatmul.mubr.bf16.gmra.mxu1 %v1240_v24 }
 0x149   : > { %2011 = vmatprep.mubr.bf16.mxu1 %v1247_v12  ;;  %2885 = vmatpush3.bf16.msra.mxu1 %v3060_v56 }
 0x14a   : > { %2886 = vmatprep.subr.bf16.mxu1 %v3061_v63 }
 0x14b   : > { %2069 = vmatmul.mubr.bf16.gmra.mxu0 %v3572_v18  ;;  %v1255_v18 = vpack.c.bf16 %v3082_v27, %v1187_v21  ;;  %v3066_v27 = vld [vmem:[%s3820_s7 + $0x18] sm:$0xff]  }
 0x14c   : > { %2076 = vmatprep.mubr.bf16.mxu0 %v3583_v29  ;;  %v3071_v29 = vld [vmem:[%s3246_s24 + $0x30] ss:$20 sps:$4 sm:$0xff]  }
 0x14d   : > { %2887 = vmatpush3.bf16.msra.mxu1 %v3061_v63 }
 0x14e   : > { %2888 = vmatprep.subr.bf16.mxu1 %v3062_v39 }
 0x150   : > { %2012 = vmatmul.mubr.bf16.gmra.mxu1 %v1246_v45 }
 0x151   : > { %2019 = vmatprep.mubr.bf16.mxu1 %v1253_v20  ;;  %2889 = vmatpush3.bf16.msra.mxu1 %v3062_v39 }
 0x152   : > { %2890 = vmatprep.subr.bf16.mxu1 %v3063_v16 }
 0x153   : > { %2077 = vmatmul.mubr.bf16.gmra.mxu0 %v3626_v50 }
 0x154   : > { %2084 = vmatprep.mubr.bf16.mxu0 %v1255_v18 }
 0x155   : > { %2891 = vmatpush3.bf16.msra.mxu1 %v3063_v16 }
 0x156   : > { %2892 = vmatprep.subr.bf16.mxu1 %v3064_v59 }
 0x158   : > { %2020 = vmatmul.mubr.bf16.gmra.mxu1 %v1252_v46 }
 0x159   : > { %2893 = vmatpush3.bf16.msra.mxu1 %v3064_v59  ;;  %2896 = vmatprep.mubr.bf16.mxu1 %v3548_v3  ;;  %v1256_v3 = vpack.c.bf16 %v1125_v49, %v1191_v57 }
 0x15a   : > { %2894 = vmatprep.subr.bf16.mxu1 %v3065_v8 }
 0x15b   : > { %2085 = vmatmul.mubr.bf16.gmra.mxu0 %v1254_v23 }
 0x15d   : > { %2895 = vmatpush3.bf16.msra.mxu1 %v3065_v8 }
 0x15e   : > { %2904 = vmatprep.subr.bf16.mxu1 %v3066_v27 }
 0x160   : > { %2897 = vmatmul.mubr.bf16.vlgmr.msra.gmra.mxu1 %v3608_v37 }
 0x161   : > { %2900 = vmatprep.mubr.bf16.mxu1 %v3648_v58  ;;  %2905 = vmatpush3.bf16.msra.mxu1 %v3066_v27 }
 0x162   : > { %2906 = vmatprep.subr.bf16.mxu1 %v3067_v15 }
 0x165   : > { %2907 = vmatpush3.bf16.msra.mxu1 %v3067_v15 }
 0x166   : > { %2908 = vmatprep.subr.bf16.mxu1 %v3068_v32 }
 0x168   : > { %2901 = vmatmul.mubr.bf16.gmra.mxu1 %v1256_v3 }
 0x169   : > { %2909 = vmatpush3.bf16.msra.mxu1 %v3068_v32  ;;  %2912 = vmatprep.mubr.msk.bf16.mxu1 %vm733_vm0, %v3070_v26 }
 0x16a   : > { %2910 = vmatprep.subr.bf16.mxu1 %v3069_v25 }
 0x16d   : > { %2911 = vmatpush3.bf16.msra.mxu1 %v3069_v25 }
 0x170   : > { %2913 = vmatmul.mubr.msk.bf16.vlgmr.msra.gmra.mxu1 %vm733_vm0, %v3071_v29 }
 0x171   : > { %2916 = vmatprep.mubr.msk.bf16.mxu1 %vm733_vm0, %v3072_v30 }
 0x178   : > { %2917 = vmatmul.mubr.msk.bf16.gmra.mxu1 %vm733_vm0, %v3073_v28 }
 0x1e0   : > { %v2700_v49 = vpop.f32.mrf.mxu1 }
 0x1e2   : > { %v2701_v6 = vpop.f32.mrf.mxu1 }
 0x1e3   : > { %v3729_v31 = vadd.f32 %v2701_v6, %v2700_v49  ;;  %v2740_v34 = vpop.f32.mrf.mxu0 }
 0x1e4   : > { %v2703_v33 = vpop.f32.mrf.mxu1 }
 0x1e5   : > { %v2741_v22 = vpop.f32.mrf.mxu0 }
 0x1e6   : > { %v2704_v35 = vpop.f32.mrf.mxu1 }
 0x1e7   : > { %v3731_v36 = vadd.f32 %v2704_v35, %v2703_v33  ;;  %v2743_v38 = vpop.f32.mrf.mxu0  ;;  %v2742_v33 = vadd.f32 %v2741_v22, %v2740_v34 }
 0x1e8   : > { %v2706_v37 = vpop.f32.mrf.mxu1 }
 0x1e9   : > { %v2744_v41 = vpop.f32.mrf.mxu0 }
 0x1ea   : > { %v2707_v40 = vpop.f32.mrf.mxu1 }
 0x1eb   : > { %v2708_v42 = vadd.f32 %v2707_v40, %v2706_v37  ;;  %v2746_v44 = vpop.f32.mrf.mxu0 }
 0x1ec   : > { %v2709_v43 = vpop.f32.mrf.mxu1 }
 0x1ed   : > { %v2747_v48 = vpop.f32.mrf.mxu0 }
 0x1ee   : > { %v2710_v47 = vpop.f32.mrf.mxu1  ;;  %v2748_v6 = vadd.f32 %v2747_v48, %v2746_v44 }
 0x1ef   : > { %v2749_v51 = vpop.f32.mrf.mxu0 }
 0x1f0   : > { %v2712_v50 = vpop.f32.mrf.mxu1 }
 0x1f1   : > { %v2750_v53 = vpop.f32.mrf.mxu0 }
 0x1f2   : > { %v2713_v52 = vpop.f32.mrf.mxu1  ;;  %v2751_v37 = vadd.f32 %v2750_v53, %v2749_v51 }
 0x1f3   : > { %v3733_v54 = vadd.f32 %v2713_v52, %v2712_v50  ;;  %v2752_v60 = vpop.f32.mrf.mxu0  ;;  %v2745_v52 = vadd.f32 %v2744_v41, %v2743_v38 }
 0x1f4   : > { %v3735_v55 = vpop.f32.mrf.mxu1 }
 0x1f5   : > { %3824 = vst [vmem:[#allocation3_spill] sm:$0xff] %v3733_v54  ;;  %v2753_v62 = vpop.f32.mrf.mxu0  ;;  %v1936_v34 = vadd.f32 %v2745_v52, %v3731_v36 }
 0x1f6   : > { %v3737_v61 = vpop.f32.mrf.mxu1  ;;  %v2754_v22 = vadd.f32 %v2753_v62, %v2752_v60 }
 0x1f7   : > { %3825 = vst [vmem:[#allocation4_spill] sm:$0xff] %v3737_v61  ;;  %v3741_v19 = vpop.f32.mrf.mxu0 }
 0x1f8   : > { %v3739_v0 = vpop.f32.mrf.mxu1  ;;  %3827 = vst [vmem:[#allocation6_spill] sm:$0xff] %v3741_v19 }
 0x1f9   : > { %3826 = vst [vmem:[#allocation5_spill] sm:$0xff] %v3739_v0  ;;  %v3745_v2 = vpop.f32.mrf.mxu0  ;;  %v1933_v0 = vadd.f32 %v2742_v33, %v3729_v31 }
 0x1fa   : > { %v3743_v58 = vpop.f32.mrf.mxu1  ;;  %3829 = vst [vmem:[#allocation8_spill] sm:$0xff] %v3745_v2 }
 0x1fb   : > { %3828 = vst [vmem:[#allocation7_spill] sm:$0xff] %v3743_v58  ;;  %v2758_v5 = vpop.f32.mrf.mxu0 }
 0x1fc   : > { %v3747_v4 = vpop.f32.mrf.mxu1  ;;  %v3839_v60 = vld [vmem:[#allocation3_spill] sm:$0xff] }
 0x1fd   : > { %3830 = vst [vmem:[#allocation9_spill] sm:$0xff] %v3747_v4  ;;  %v2759_v9 = vpop.f32.mrf.mxu0  ;;  %v1941_v4 = vadd.f32 %v2748_v6, %v2708_v42  ;;  %v1949_v62 = vadd.f32 %v2754_v22, %v3839_v60 }
 0x1fe   : > { %v3749_v7 = vpop.f32.mrf.mxu1  ;;  %v3836_v42 = vld [vmem:[#allocation4_spill] sm:$0xff] }
 0x1ff   : > { %3831 = vst [vmem:[#allocation10_spill] sm:$0xff] %v3749_v7  ;;  %v2761_v11 = vpop.f32.mrf.mxu0 }
 0x200   : > { %v2780_v10 = vpop.f32.mrf.mxu1 }
 0x201   : > { %v2762_v17 = vpop.f32.mrf.mxu0 }
 0x202   : > { %v2781_v56 = vpop.f32.mrf.mxu1 }
 0x203   : > { %v2820_v63 = vpop.f32.mrf.mxu0 }
 0x204   : > { %v2783_v24 = vpop.f32.mrf.mxu1 }
 0x205   : > { %v2821_v14 = vpop.f32.mrf.mxu0 }
 0x206   : > { %v2784_v12 = vpop.f32.mrf.mxu1  ;;  %v2822_v48 = vadd.f32 %v2821_v14, %v2820_v63  ;;  %v3841_v63 = vld [vmem:[#allocation7_spill] sm:$0xff] }
 0x207   : > { %v2823_v39 = vpop.f32.mrf.mxu0 }
 0x208   : > { %v2786_v1 = vpop.f32.mrf.mxu1 }
 0x209   : > { %v2824_v13 = vpop.f32.mrf.mxu0 }
 0x20a   : > { %v2787_v57 = vpop.f32.mrf.mxu1  ;;  %v2825_v31 = vadd.f32 %v2824_v13, %v2823_v39 }
 0x20b   : > { %v2826_v16 = vpop.f32.mrf.mxu0  ;;  %v2788_v40 = vadd.f32 %v2787_v57, %v2786_v1 }
 0x20c   : > { %v2789_v45 = vpop.f32.mrf.mxu1 }
 0x20d   : > { %v2827_v21 = vpop.f32.mrf.mxu0  ;;  %v2006_v19 = vadd.f32 %v2788_v40, %v1941_v4 }
 0x20e   : > { %v2790_v20 = vpop.f32.mrf.mxu1 }
 0x20f   : > { %v2829_v18 = vpop.f32.mrf.mxu0  ;;  %v2791_v58 = vadd.f32 %v2790_v20, %v2789_v45 }
 0x210   : > { %v2792_v59 = vpop.f32.mrf.mxu1 }
 0x211   : > { %v2830_v8 = vpop.f32.mrf.mxu0 }
 0x212   : > { %v2793_v46 = vpop.f32.mrf.mxu1  ;;  %v2831_v41 = vadd.f32 %v2830_v8, %v2829_v18  ;;  %v3776_v18 = vld [vmem:[%s3821_s8] ss:$0 sm:$0xff] }
 0x213   : > { %v3751_v23 = vpop.f32.mrf.mxu0  ;;  %v2794_v1 = vadd.f32 %v2793_v46, %v2792_v59 }
 0x214   : > { %v2795_v27 = vpop.f32.mrf.mxu1  ;;  %3832 = vst [vmem:[#allocation11_spill] sm:$0xff] %v3751_v23  ;;  %v2782_v23 = vadd.f32 %v2781_v56, %v2780_v10  ;;  %v3837_v56 = vld [vmem:[#allocation6_spill] sm:$0xff] }
 0x215   : > { %v3753_v32 = vpop.f32.mrf.mxu0 }
 0x216   : > { %v2796_v15 = vpop.f32.mrf.mxu1  ;;  %3833 = vst [vmem:[#allocation12_spill] sm:$0xff] %v3753_v32  ;;  %v2711_v32 = vadd.f32 %v2710_v47, %v2709_v43  ;;  %v1998_v44 = vadd.f32 %v2782_v23, %v1933_v0  ;;  %v2717_v43 = vadd.f32 %v3836_v42, %v3735_v55  ;;  %v2760_v47 = vadd.f32 %v2759_v9, %v2758_v5  ;;  %v3840_v0 = vld [vmem:[#allocation5_spill] sm:$0xff]  ;;  %v3843_v5 = vld [vmem:[#allocation10_spill] sm:$0xff] }
 0x217   : > { %v3755_v26 = vpop.f32.mrf.mxu0  ;;  %v3842_v55 = vld [vmem:[#allocation9_spill] sm:$0xff]  ;;  %v2797_v39 = vadd.f32 %v2796_v15, %v2795_v27  ;;  %v2014_v23 = vadd.f32 %v2794_v1, %v1949_v62 }
 0x218   : > { %v2798_v3 = vpop.f32.mrf.mxu1  ;;  %3834 = vst [vmem:[#allocation13_spill] sm:$0xff] %v3755_v26  ;;  %v2785_v26 = vadd.f32 %v2784_v12, %v2783_v24  ;;  %v1944_v2 = vadd.f32 %v2751_v37, %v2711_v32  ;;  %v3838_v24 = vld [vmem:[#allocation8_spill] sm:$0xff]  ;;  %v2763_v12 = vadd.f32 %v2762_v17, %v2761_v11  ;;  %v2063_v14 = vadd.f32 %v2822_v48, %v1998_v44 }
 0x219   : > { %v3757_v28 = vpop.f32.mrf.mxu0  ;;  %v2757_v4 = vadd.f32 %v3838_v24, %v3837_v56  ;;  %v2723_v9 = vadd.f32 %v3843_v5, %v3842_v55 }
 0x21a   : > { %v2799_v25 = vpop.f32.mrf.mxu1  ;;  %3835 = vst [vmem:[#allocation14_spill] sm:$0xff] %v3757_v28  ;;  %v2828_v28 = vadd.f32 %v2827_v21, %v2826_v16  ;;  %v2009_v38 = vadd.f32 %v2791_v58, %v1944_v2  ;;  %v2001_v53 = vadd.f32 %v2785_v26, %v1936_v34  ;;  %v2720_v58 = vadd.f32 %v3841_v63, %v3840_v0  ;;  %v2559_v34 = vld [vmem:[%s3819_s6] ss:$0 sm:$0xff] }
 0x21b   : > { %v2838_v50 = vpop.f32.mrf.mxu0  ;;  %v2800_v2 = vadd.f32 %v2799_v25, %v2798_v3  ;;  %v1952_v46 = vadd.f32 %v2757_v4, %v2717_v43  ;;  %v1960_v8 = vadd.f32 %v2763_v12, %v2723_v9  ;;  %v3844_v32 = vld [vmem:[#allocation11_spill] sm:$0xff] }
 0x21c   : > { %v2801_v29 = vpop.f32.mrf.mxu1  ;;  %v2071_v36 = vadd.f32 %v2828_v28, %v2006_v19  ;;  %v2074_v16 = vadd.f32 %v2831_v41, %v2009_v38  ;;  %v1957_v20 = vadd.f32 %v2760_v47, %v2720_v58  ;;  %v2558_v19 = vld [vmem:[%s3818_s5] ss:$0 sm:$0xff]  ;;  %v2066_v17 = vadd.f32 %v2825_v31, %v2001_v53 }
 0x21d   : > { %v2839_v61 = vpop.f32.mrf.mxu0  ;;  %v3845_v3 = vld [vmem:[#allocation12_spill] sm:$0xff]  ;;  %v2017_v6 = vadd.f32 %v2797_v39, %v1952_v46 }
 0x21e   : > { %v2802_v30 = vpop.f32.mrf.mxu1  ;;  %v2834_v25 = vadd.f32 %v3845_v3, %v3844_v32  ;;  %v2022_v26 = vadd.f32 %v2800_v2, %v1957_v20 }
 0x21f   : > { %v2841_v57 = vpop.f32.mrf.mxu0  ;;  %v2803_v21 = vadd.f32 %v2802_v30, %v2801_v29  ;;  %v2840_v29 = vadd.f32 %v2839_v61, %v2838_v50  ;;  %v3846_v33 = vld [vmem:[#allocation13_spill] sm:$0xff] }
 0x220   : > { %v2898_v49 = vpop.f32.mrf.mxu1  ;;  %v2079_v42 = vadd.f32 %v2834_v25, %v2014_v23 }
 0x221   : > { %v2136_v13 = vadd.f32 %v2898_v49, %v2071_v36  ;;  %v2842_v27 = vpop.f32.mrf.mxu0  ;;  %v3783_v49 = vld [vmem:[%s3822_s9] ss:$0 sm:$0xff]  ;;  %v2087_v41 = vadd.f32 %v2840_v29, %v2022_v26 }
 0x222   : > { %v2127_v35 = vpop.f32.mrf.mxu1  ;;  %v2843_v61 = vadd.f32 %v2842_v27, %v2841_v57 }
 0x223   : > { %v2128_v11 = vadd.f32 %v2127_v35, %v2063_v14  ;;  %v3847_v35 = vld [vmem:[#allocation14_spill] sm:$0xff]  ;;  %v2167_v40 = vmul.f32 %v2558_v19, %v2136_v13 }
 0x224   : > { %v2899_v7 = vpop.f32.mrf.mxu1  ;;  %v2837_v37 = vadd.f32 %v3847_v35, %v3846_v33 }
 0x225   : > { %v2139_v15 = vadd.f32 %v2899_v7, %v2074_v16  ;;  %v2025_v7 = vadd.f32 %v2803_v21, %v1960_v8  ;;  %v2182_v47 = vadd.f32 %v2559_v34, %v2167_v40 }
 0x226   : > { %v2130_v54 = vpop.f32.mrf.mxu1  ;;  %v2082_v53 = vadd.f32 %v2837_v37, %v2017_v6 }
 0x227   : > { %v2131_v30 = vadd.f32 %v2130_v54, %v2066_v17  ;;  %v2165_v54 = vmul.f32 %v2558_v19, %v2128_v11  ;;  %v2168_v22 = vmul.f32 %v2558_v19, %v2139_v15  ;;  %v2090_v1 = vadd.f32 %v2843_v61, %v2025_v7 }
 0x228   : > { %v2902_v51 = vpop.f32.mrf.mxu1 }
 0x229   : > { %v2166_v38 = vmul.f32 %v2558_v19, %v2131_v30  ;;  %v2180_v24 = vadd.f32 %v2559_v34, %v2165_v54  ;;  %v2152_v4 = vadd.f32 %v2902_v51, %v2087_v41  ;;  %v2183_v36 = vadd.f32 %v2559_v34, %v2168_v22 }
 0x22a   : > { %v2143_v10 = vpop.f32.mrf.mxu1 }
 0x22b   : > { %v2144_v12 = vadd.f32 %v2143_v10, %v2079_v42  ;;  %v2181_v63 = vadd.f32 %v2559_v34, %v2166_v38  ;;  %v2171_v10 = vmul.f32 %v2558_v19, %v2152_v4 }
 0x22c   : > { %v2903_v45 = vpop.f32.mrf.mxu1 }
 0x22d   : > { %v2155_v58 = vadd.f32 %v2903_v45, %v2090_v1  ;;  %v2169_v39 = vmul.f32 %v2558_v19, %v2144_v12  ;;  %v2186_v32 = vadd.f32 %v2559_v34, %v2171_v10 }
 0x22e   : > { %v2146_v59 = vpop.f32.mrf.mxu1 }
 0x22f   : > { %v2147_v2 = vadd.f32 %v2146_v59, %v2082_v53  ;;  %v2172_v17 = vmul.f32 %v2558_v19, %v2155_v58  ;;  %v2184_v26 = vadd.f32 %v2559_v34, %v2169_v39 }
 0x230   : > { %v2914_v28 = vpop.f32.mrf.mxu1 }
 0x231   : > { %v2306_v52 = vmul.f32 %v2914_v28, %v3776_v18  ;;  %v2170_v46 = vmul.f32 %v2558_v19, %v2147_v2  ;;  %v2187_v30 = vadd.f32 %v2559_v34, %v2172_v17 }
 0x232   : > { %v2266_v50 = vpop.f32.mrf.mxu1 }
 0x233   : > { %v2321_v44 = vadd.f32 %v3783_v49, %v2306_v52  ;;  %v2304_v48 = vmul.f32 %v3776_v18, %v2266_v50  ;;  %v2185_v33 = vadd.f32 %v2559_v34, %v2170_v46 }
 0x234   : > { %v2915_v43 = vpop.f32.mrf.mxu1 }
 0x235   : > { %v2319_v31 = vadd.f32 %v3783_v49, %v2304_v48  ;;  %v2307_v56 = vmul.f32 %v2915_v43, %v3776_v18  ;;  %v2329_v60 = vadd.f32 %v2321_v44, %v2182_v47 }
 0x236   : > { %v2269_v57 = vpop.f32.mrf.mxu1 }
 0x237   : > { %v2322_v62 = vadd.f32 %v3783_v49, %v2307_v56  ;;  %v2305_v0 = vmul.f32 %v3776_v18, %v2269_v57  ;;  %v2327_v55 = vadd.f32 %v2319_v31, %v2180_v24  ;;  %v2337_v16 = vmax.f32 %v2329_v60, 0.0 }
 0x238   : > { %v2918_v14 = vpop.f32.mrf.mxu1 }
 0x239   : > { %v2330_v5 = vadd.f32 %v2322_v62, %v2183_v36  ;;  %v2320_v9 = vadd.f32 %v3783_v49, %v2305_v0  ;;  %v2310_v51 = vmul.f32 %v2918_v14, %v3776_v18  ;;  %v2335_v8 = vmax.f32 %v2327_v55, 0.0 }
 0x23a   : > { %v2282_v13 = vpop.f32.mrf.mxu1 }
 0x23b   : > { %v2338_v20 = vmax.f32 %v2330_v5, 0.0  ;;  %v2328_v21 = vadd.f32 %v2320_v9, %v2181_v63  ;;  %v2308_v11 = vmul.f32 %v3776_v18, %v2282_v13  ;;  %v2325_v45 = vadd.f32 %v3783_v49, %v2310_v51 }
 0x23c   : > { %v2919_v59 = vpop.f32.mrf.mxu1 }
 0x23d   : > { %v2581_v23 = vpack.c.bf16 %v2338_v20, %v2337_v16  ;;  %v2336_v27 = vmax.f32 %v2328_v21, 0.0  ;;  %v2323_v15 = vadd.f32 %v3783_v49, %v2308_v11  ;;  %v2311_v3 = vmul.f32 %v2919_v59, %v3776_v18 }
 0x23e   : > { %v2285_v25 = vpop.f32.mrf.mxu1  ;;  %v2333_v28 = vadd.f32 %v2325_v45, %v2186_v32 }
 0x23f   : > { %2593 = vst [vmem:[%s359_s15 + $0x8] sm:$0xff] %v2581_v23   ;;  %v2576_v29 = vpack.c.bf16 %v2336_v27, %v2335_v8  ;;  %v2309_v19 = vmul.f32 %v3776_v18, %v2285_v25  ;;  %v2326_v6 = vadd.f32 %v3783_v49, %v2311_v3  ;;  %v2331_v35 = vadd.f32 %v2323_v15, %v2184_v26 }
 0x240   : > { %v2341_v7 = vmax.f32 %v2333_v28, 0.0 }
 0x241   : > { %2577 = vst [vmem:[%s359_s15] sm:$0xff] %v2576_v29   ;;  %v2324_v37 = vadd.f32 %v3783_v49, %v2309_v19  ;;  %v2334_v40 = vadd.f32 %v2326_v6, %v2187_v30  ;;  %v2339_v54 = vmax.f32 %v2331_v35, 0.0 }
 0x243   : > { %v2332_v52 = vadd.f32 %v2324_v37, %v2185_v33  ;;  %v2342_v61 = vmax.f32 %v2334_v40, 0.0 }
 0x245   : > { %v2340_v50 = vmax.f32 %v2332_v52, 0.0  ;;  %v2591_v22 = vpack.c.bf16 %v2342_v61, %v2341_v7 }
 0x247   : > { %v2586_v44 = vpack.c.bf16 %v2340_v50, %v2339_v54  ;;  %2595 = vst [vmem:[%s359_s15 + $0x18] sm:$0xff] %v2591_v22  }
 0x249   : > { %2594 = vst [vmem:[%s359_s15 + $0x10] sm:$0xff] %v2586_v44  }
 0x24a PF: > { %s20_s13 = sadd.s32 1, %s3080_s13  }
 0x24b   : > { %p17_p4 = scmp.ge.s32.totalorder %s20_s13, 4  }
 0x24d   :  { %19 = sbr.rel (!%p17_p4) target bundleno = 1 (0x1), region = 91 }

// kernel: encoder_forward.6
= control target key start
LH: loop header
LB: loop body
LE: loop exit
PB: predicated region body
PF: predicated region fallthrough
CT: control target
= control target key end

     0   :  { %s6632_s24 = smov 0   ;;  %s10218_s0 = inlined_call_operand.vmem [shape: bf16[2,18,18,64], index: 0, kind: input, shape index: {}]   ;;  %s10219_s1 = inlined_call_operand.vmem [shape: bf16[576,64], index: 1, kind: input, shape index: {}]   ;;  %s10220_s2 = inlined_call_operand.vmem [shape: f32[1,64], index: 2, kind: input, shape index: {}]   ;;  %s10221_s3 = inlined_call_operand.vmem [shape: f32[1,64], index: 3, kind: input, shape index: {}]   ;;  %s10222_s4 = inlined_call_operand.vmem [shape: bf16[576,64], index: 4, kind: input, shape index: {}]   ;;  %s10223_s5 = inlined_call_operand.vmem [shape: f32[1,64], index: 5, kind: input, shape index: {}]   ;;  %s10224_s6 = inlined_call_operand.vmem [shape: f32[1,64], index: 6, kind: input, shape index: {}]   ;;  %s10225_s7 = inlined_call_operand.vmem [shape: bf16[2,16,16,64], index: 7, kind: output, shape index: {}]  }
   0x1 LB: > { %s5031_s25 = sadd.s32 4294967295, %s6588_s24   ;;  %p5035_p0 = scmp.ge.s32.totalorder %s6588_s24, 1  ;;  %s6588_s24 = sphi %s6632_s24, %s17_s24  }
   0x2   : > { %p237_p1 = scmp.lt.s32.totalorder %s6588_s24, 3 }
   0x4   : > { %p238_p2 = pnand %p5035_p0, %p237_p1 }
   0x6   : > { %241 = sbr.rel (%p238_p2) target bundleno = 1018 (0x3fa), region = 48 }
   0xb   : > { %p269_p3 = scmp.lt.s32.totalorder %s5031_s25, 1  ;;  %v6457_v0 = vld [vmem:[%s10219_s1 + $0x78] sm:$0xff]   ;;  %v6459_v2 = vld [vmem:[%s10219_s1 + $0x70] sm:$0xff]   ;;  %v6461_v4 = vld [vmem:[%s10219_s1 + $0x68] sm:$0xff]   ;;  %vm436_vm0 = vcmask 1046528   ;;  %s6590_s19 = smov 64  }
   0xc   : > { %v6458_v1 = vld [vmem:[%s10219_s1 + $0x38] sm:$0xff]   ;;  %5258 = vmatprep.subr.bf16.mxu0 %v6457_v0  ;;  %v6460_v3 = vld [vmem:[%s10219_s1 + $0x30] sm:$0xff]   ;;  %v6462_v5 = vld [vmem:[%s10219_s1 + $0x28] sm:$0xff]   ;;  %vm613_vm1 = vcmask 1045504   ;;  %vm992_vm2 = vcmask 523264   ;;  %vm3325_vm3 = vcmask 1040384  }
   0xd   : > { %s10873_s25 = smov (!%p269_p3, %s5031_s25), 1  ;;  %5259 = vmatpush3.bf16.msra.mxu0 %v6458_v1  ;;  %v6463_v53 = vld [vmem:[%s10219_s1 + $0x60] sm:$0xff]   ;;  %vm4943_vm4 = vcmask 519168  }
   0xe   : > { %s5826_s9 = smul.u32 216, %s10873_s25  ;;  %5260 = vmatprep.subr.bf16.mxu0 %v6459_v2  ;;  %v6464_v58 = vld [vmem:[%s10219_s1 + $0x20] sm:$0xff]   ;;  %s5181_s23 = sshll.u32 %s10873_s25, 7 }
   0xf   : > { %s9957_s27 = scalar_lea.vmem %s10225_s7, %s5181_s23 }
  0x10   : > { %s6661_s16 = scalar_lea.vmem %s10218_s0, %s5826_s9 }
  0x11   : > { %v283_v6 = vld [vmem:[%s6661_s16 + $0xc] sm:$0xff]   ;;  %v5215_v7 = vld [vmem:[%s6661_s16] sm:$0xff]   ;;  %v6669_v8 = vld [vmem:[%s6661_s16 + $0x8] sm:$0x1]  ;;  %5261 = vmatpush3.bf16.msra.mxu0 %v6460_v3 }
  0x12   : > { %10423 = vst [vmem:[#allocation3_spill] sm:$0xff] %v6669_v8  ;;  %v6671_v9 = vunpack.c.l.bf16 %v283_v6  ;;  %v6673_v10 = vunpack.c.h.bf16 %v283_v6  ;;  %v6675_v11 = vunpack.c.l.bf16 %v5215_v7  ;;  %v6677_v12 = vunpack.c.h.bf16 %v5215_v7  ;;  %v5250_v13 = vld [vmem:[%s6661_s16 + $0x18] sm:$0xff]   ;;  %v289_v14 = vld [vmem:[%s6661_s16 + $0x24] sm:$0xff]   ;;  %v6682_v15 = vld [vmem:[%s6661_s16 + $0x14] sm:$0x1]  ;;  %5262 = vmatprep.subr.bf16.mxu0 %v6461_v4 }
  0x13   : > { %v10226_v16 = vunpack.c.l.bf16 %v6669_v8  ;;  %v6685_v17 = vunpack.c.l.bf16 %v5250_v13  ;;  %v6687_v18 = vunpack.c.h.bf16 %v5250_v13  ;;  %v6689_v19 = vunpack.c.l.bf16 %v289_v14  ;;  %v6698_v24 = vld [vmem:[%s6661_s16 + $0x20] sm:$0x1]  ;;  %v5251_v31 = vld [vmem:[%s6661_s16 + $0x30] sm:$0xff]   ;;  %v6716_v35 = vld [vmem:[%s6661_s16 + $0x2c] sm:$0x1] }
  0x14   : > { %10424 = vst [vmem:[#allocation4_spill] sm:$0xff] %v6671_v9  ;;  %10425 = vst [vmem:[#allocation5_spill] sm:$0xff] %v6673_v10  ;;  %v5837_v20 = vpack.i.bf16 %v6673_v10, %v6671_v9  ;;  %v437_v21 = vrot.slane %v6675_v11, 1  ;;  %v438_v22 = vrot.slane %v6677_v12, 1  ;;  %v6695_v23 = vunpack.c.h.bf16 %v289_v14  ;;  %v6742_v48 = vld [vmem:[%s6661_s16 + $0x38] sm:$0x1] }
  0x15   : > { %10426 = vst [vmem:[#allocation6_spill] sm:$0xff] %v6675_v11  ;;  %10427 = vst [vmem:[#allocation7_spill] sm:$0xff] %v6677_v12  ;;  %v440_v25 = vrot.slane %v10226_v16, 1  ;;  %v5847_v26 = vpack.i.bf16 %v6687_v18, %v6685_v17  ;;  %v10235_v27 = vunpack.c.l.bf16 %v6682_v15  ;;  %v442_v28 = vrot.slane %v6671_v9, 1  ;;  %5263 = vmatpush3.bf16.msra.mxu0 %v6462_v5  ;;  %v295_v50 = vld [vmem:[%s6661_s16 + $0x3c] sm:$0xff]   ;;  %v5252_v60 = vld [vmem:[%s6661_s16 + $0x48] sm:$0xff]  }
  0x16   : > { %10428 = vst [vmem:[#allocation8_spill] sm:$0xff] %v6685_v17  ;;  %10429 = vst [vmem:[#allocation9_spill] sm:$0xff] %v6687_v18  ;;  %5838 = vrot.lane.b32.xlu0 %v5837_v20, %s6590_s19  ;;  %v439_v29 = vsel %vm436_vm0, %v437_v21, %v438_v22  ;;  %v443_v30 = vrot.slane %v6673_v10, 1  ;;  %v10233_v34 = vunpack.c.l.bf16 %v6698_v24  ;;  %v447_v38 = vrot.slane %v6685_v17, 1  ;;  %v6759_v56 = vld [vmem:[%s6661_s16 + $0x44] sm:$0x1]  ;;  %5264 = vmatprep.subr.bf16.mxu0 %v6463_v53 }
  0x17   : > { %10430 = vst [vmem:[#allocation10_spill] sm:$0xff] %v6689_v19  ;;  %v441_v32 = vsel %vm436_vm0, %v438_v22, %v440_v25  ;;  %5848 = vrot.lane.b32.xlu1 %v5847_v26, %s6590_s19  ;;  %v445_v33 = vrot.slane %v10235_v27, 1  ;;  %v448_v39 = vrot.slane %v6687_v18, 1  ;;  %v5857_v40 = vpack.i.bf16 %v6695_v23, %v6689_v19  ;;  %v6762_v57 = vld [vmem:[%s6661_s16 + $0x50] sm:$0x1]  ;;  %v301_v5 = vld [vmem:[%s6661_s16 + $0x54] sm:$0xff]  }
  0x18   : > { %v5842_v36 = vpack.i.bf16 %v441_v32, %v439_v29  ;;  %v6719_v37 = vsel %vm436_vm0, %v442_v28, %v443_v30  ;;  %v6728_v42 = vunpack.c.l.bf16 %v5251_v31  ;;  %v450_v43 = vrot.slane %v10233_v34, 1  ;;  %v6465_v7 = vld [vmem:[%s10219_s1 + $0x58] sm:$0xff]   ;;  %v6467_v25 = vld [vmem:[%s10219_s1 + $0x50] sm:$0xff]   ;;  %v6488_v12 = vld [vmem:[%s10219_s1 + $0x88] sm:$0xff]  }
  0x19   : > { %10431 = vst [vmem:[#allocation11_spill] sm:$0xff] %v6719_v37  ;;  %v6726_v41 = vsel %vm436_vm0, %v443_v30, %v445_v33  ;;  %v6735_v45 = vunpack.c.h.bf16 %v5251_v31  ;;  %v6738_v46 = vsel %vm436_vm0, %v447_v38, %v448_v39  ;;  %v10232_v47 = vunpack.c.l.bf16 %v6716_v35  ;;  %5265 = vmatpush3.bf16.msra.mxu0 %v6464_v58  ;;  %v6799_v21 = vld [vmem:[%s6661_s16 + $0x5c] sm:$0x1]  ;;  %v6469_v38 = vld [vmem:[%s10219_s1 + $0x48] sm:$0xff]  }
  0x1a   : > { %10432 = vst [vmem:[#allocation12_spill] sm:$0xff] %v6726_v41  ;;  %5843 = vrot.lane.b32.xlu0 %v5842_v36, %s6590_s19  ;;  %v5852_v44 = vpack.i.bf16 %v6726_v41, %v6719_v37  ;;  %10434 = vst [vmem:[#allocation14_spill] sm:$0xff] %v6738_v46  ;;  %v6745_v49 = vsel %vm436_vm0, %v448_v39, %v450_v43  ;;  %v452_v51 = vrot.slane %v6689_v19, 1  ;;  %v453_v52 = vrot.slane %v6695_v23, 1  ;;  %v6466_v22 = vld [vmem:[%s10219_s1 + $0x18] sm:$0xff]   ;;  %v6468_v36 = vld [vmem:[%s10219_s1 + $0x10] sm:$0xff]  }
  0x1b   : > { %10433 = vst [vmem:[#allocation13_spill] sm:$0xff] %v6735_v45  ;;  %10435 = vst [vmem:[#allocation15_spill] sm:$0xff] %v6745_v49  ;;  %v5862_v54 = vpack.i.bf16 %v6745_v49, %v6738_v46  ;;  %v455_v55 = vrot.slane %v10232_v47, 1  ;;  %v10231_v61 = vunpack.c.l.bf16 %v6742_v48  ;;  %v457_v62 = vrot.slane %v6728_v42, 1  ;;  %5266 = vmatprep.subr.bf16.mxu0 %v6465_v7  ;;  %v6866_v7 = vld [vmem:[%s6661_s16 + $0x74] sm:$0x1] }
  0x1c   : > { %5853 = vrot.lane.b32.xlu1 %v5852_v44, %s6590_s19  ;;  %v6768_v59 = vsel %vm436_vm0, %v452_v51, %v453_v52  ;;  %v458_v63 = vrot.slane %v6735_v45, 1  ;;  %v5867_v0 = vpack.i.bf16 %v6735_v45, %v6728_v42  ;;  %v6777_v1 = vunpack.c.l.bf16 %v295_v50  ;;  %v6478_v47 = vld [vmem:[%s10219_s1 + $0xb0] sm:$0xff]   ;;  %v5257_v49 = vld [vmem:[%s6661_s16 + $0xc0] sm:$0xff]  }
  0x1d   : > { %10436 = vst [vmem:[#allocation16_spill] sm:$0xff] %v6768_v59  ;;  %v6779_v2 = vunpack.c.h.bf16 %v295_v50  ;;  %v6782_v3 = vsel %vm436_vm0, %v453_v52, %v455_v55  ;;  %v460_v4 = vrot.slane %v10231_v61, 1  ;;  %v10229_v6 = vunpack.c.l.bf16 %v6759_v56  ;;  %5267 = vmatpush3.bf16.msra.mxu0 %v6466_v22  ;;  %v5253_v52 = vld [vmem:[%s6661_s16 + $0x60] sm:$0xff]   ;;  %v6845_v55 = vld [vmem:[%s6661_s16 + $0x68] sm:$0x1] }
  0x1e   : > { %5858 = vrot.lane.b32.xlu0 %v5857_v40, %s6590_s19  ;;  %10438 = vst [vmem:[#allocation18_spill] sm:$0xff] %v6782_v3  ;;  %v5872_v13 = vpack.i.bf16 %v6782_v3, %v6768_v59  ;;  %v6795_v14 = vsel %vm436_vm0, %v457_v62, %v458_v63  ;;  %v462_v20 = vrot.slane %v6777_v1, 1  ;;  %v10228_v30 = vunpack.c.l.bf16 %v6762_v57  ;;  %5268 = vmatprep.subr.bf16.mxu0 %v6467_v25  ;;  %v6470_v62 = vld [vmem:[%s10219_s1 + $0x8] sm:$0xff]   ;;  %v325_v59 = vld [vmem:[%s6661_s16 + $0xb4] sm:$0xff]  }
  0x1f   : > { %10437 = vst [vmem:[#allocation17_spill] sm:$0xff] %v6779_v2  ;;  %10439 = vst [vmem:[#allocation19_spill] sm:$0xff] %v6795_v14  ;;  %v6808_v26 = vsel %vm436_vm0, %v458_v63, %v460_v4  ;;  %v463_v28 = vrot.slane %v6779_v2, 1  ;;  %v465_v29 = vrot.slane %v10229_v6, 1  ;;  %v5877_v31 = vpack.i.bf16 %v6779_v2, %v6777_v1  ;;  %v6931_v61 = vld [vmem:[%s6661_s16 + $0x8c] sm:$0x1] }
  0x20   : > { %5863 = vrot.lane.b32.xlu1 %v5862_v54, %s6590_s19  ;;  %10440 = vst [vmem:[#allocation20_spill] sm:$0xff] %v6808_v26  ;;  %v6817_v32 = vunpack.c.l.bf16 %v5252_v60  ;;  %v6819_v33 = vunpack.c.h.bf16 %v5252_v60  ;;  %v5882_v39 = vpack.i.bf16 %v6808_v26, %v6795_v14  ;;  %v6830_v40 = vunpack.c.l.bf16 %v301_v5  ;;  %v7035_v14 = vld [vmem:[%s6661_s16 + $0xb0] sm:$0x1] }
  0x21   : > { %v6835_v50 = vsel %vm436_vm0, %v462_v20, %v463_v28  ;;  %v6838_v51 = vsel %vm436_vm0, %v463_v28, %v465_v29  ;;  %v470_v53 = vrot.slane %v10228_v30, 1  ;;  %v10227_v54 = vunpack.c.l.bf16 %v6799_v21  ;;  %5269 = vmatpush3.bf16.msra.mxu0 %v6468_v36  ;;  %v307_v20 = vld [vmem:[%s6661_s16 + $0x6c] sm:$0xff]  }
  0x22   : > { %5868 = vrot.lane.b32.xlu0 %v5867_v0, %s6590_s19  ;;  %10441 = vst [vmem:[#allocation21_spill] sm:$0xff] %v6819_v33  ;;  %v467_v43 = vrot.slane %v6817_v32, 1  ;;  %v468_v44 = vrot.slane %v6819_v33, 1  ;;  %10442 = vst [vmem:[#allocation22_spill] sm:$0xff] %v6835_v50  ;;  %v5887_v58 = vpack.i.bf16 %v6819_v33, %v6817_v32  ;;  %v6850_v60 = vunpack.c.h.bf16 %v301_v5  ;;  %5270 = vmatprep.subr.bf16.mxu0 %v6469_v38  ;;  %v6471_v0 = vld [vmem:[%s10219_s1 + $0x40] sm:$0xff]  }
  0x23   : > { %10443 = vst [vmem:[#allocation23_spill] sm:$0xff] %v6838_v51  ;;  %v472_v63 = vrot.slane %v6830_v40, 1  ;;  %v5892_v4 = vpack.i.bf16 %v6838_v51, %v6835_v50  ;;  %v475_v25 = vrot.slane %v10227_v54, 1  ;;  %v10230_v28 = vunpack.c.l.bf16 %v6845_v55  ;;  %v6472_v38 = vld [vmem:[%s10219_s1] sm:$0xff]   ;;  %v6475_v54 = vld [vmem:[%s10219_s1 + $0xb8] sm:$0xff]   ;;  %v5256_v51 = vld [vmem:[%s6661_s16 + $0xa8] sm:$0xff]  }
  0x24   : > { %5873 = vrot.lane.b32.xlu1 %v5872_v13, %s6590_s19  ;;  %v6863_v5 = vsel %vm436_vm0, %v467_v43, %v468_v44  ;;  %v6869_v13 = vsel %vm436_vm0, %v468_v44, %v470_v53  ;;  %v473_v22 = vrot.slane %v6850_v60, 1  ;;  %v5897_v29 = vpack.i.bf16 %v6850_v60, %v6830_v40  ;;  %v6892_v43 = vld [vmem:[%s10219_s1 + $0x118] sm:$0xff]  }
  0x25   : > { %10444 = vst [vmem:[#allocation24_spill] sm:$0xff] %v6863_v5  ;;  %10445 = vst [vmem:[#allocation25_spill] sm:$0xff] %v6869_v13  ;;  %v6881_v36 = vunpack.c.h.bf16 %v5253_v52  ;;  %5271 = vmatpush3.bf16.msra.mxu0 %v6470_v62  ;;  %v5902_v44 = vpack.i.bf16 %v6869_v13, %v6863_v5  ;;  %v10234_v16 = vunpack.c.l.bf16 %v6866_v7  ;;  %v6919_v6 = vunpack.c.h.bf16 %v307_v20  ;;  %v7013_v5 = vld [vmem:[%s6661_s16 + $0xa4] sm:$0x1] }
  0x26   : > { %5878 = vrot.lane.b32.xlu0 %v5877_v31, %s6590_s19  ;;  %v6879_v31 = vunpack.c.l.bf16 %v5253_v52  ;;  %5272 = vmatprep.subr.bf16.mxu0 %v6471_v0  ;;  %10447 = vst [vmem:[#allocation27_spill] sm:$0xff] %v6892_v43  ;;  %v6903_v62 = vsel %vm436_vm0, %v472_v63, %v473_v22  ;;  %v6906_v0 = vsel %vm436_vm0, %v473_v22, %v475_v25  ;;  %v6917_v63 = vunpack.c.l.bf16 %v307_v20  ;;  %v5254_v22 = vld [vmem:[%s6661_s16 + $0x78] sm:$0xff]   ;;  %v6477_v20 = vld [vmem:[%s10219_s1 + $0xf0] sm:$0xff]  }
  0x27   : > { %10446 = vst [vmem:[#allocation26_spill] sm:$0xff] %v6881_v36  ;;  %v478_v53 = vrot.slane %v6881_v36, 1  ;;  %10448 = vst [vmem:[#allocation28_spill] sm:$0xff] %v6903_v62  ;;  %v5912_v25 = vpack.i.bf16 %v6906_v0, %v6903_v62  ;;  %v6949_v34 = vunpack.c.l.bf16 %v5254_v22  ;;  %v10459_v13 = vunpack.c.l.bf16 %v6931_v61 }
  0x28   : > { %5883 = vrot.lane.b32.xlu1 %v5882_v39, %s6590_s19  ;;  %v6887_v39 = vld [vmem:[%s6661_s16 + $0x80] sm:$0x1]  ;;  %v477_v52 = vrot.slane %v6879_v31, 1  ;;  %10449 = vst [vmem:[#allocation29_spill] sm:$0xff] %v6906_v0  ;;  %v5907_v30 = vpack.i.bf16 %v6881_v36, %v6879_v31  ;;  %10450 = vst [vmem:[#allocation30_spill] sm:$0xff] %v6919_v6  ;;  %v7081_v46 = vunpack.c.l.bf16 %v325_v59 }
  0x29   : > { %5273 = vmatpush3.bf16.msra.mxu0 %v6472_v38  ;;  %10453 = vst [vmem:[#allocation33_spill] sm:$0xff] %v6949_v34  ;;  %v487_v27 = vrot.slane %v6949_v34, 1 }
  0x2a   : > { %5888 = vrot.lane.b32.xlu0 %v5887_v58, %s6590_s19  ;;  %v6474_v58 = vld [vmem:[%s10219_s1 + $0xf8] sm:$0xff]   ;;  %5746 = vmatprep.subr.bf16.mxu0 %v6892_v43  ;;  %v10471_v43 = vunpack.c.l.bf16 %v7035_v14 }
  0x2b   : > { %5370 = vmatprep.subr.bf16.mxu1 %v6474_v58  ;;  %v483_v58 = vrot.slane %v6919_v6, 1 }
  0x2c   : > { %5893 = vrot.lane.b32.xlu1 %v5892_v4, %s6590_s19  ;;  %v480_v4 = vrot.slane %v10230_v28, 1  ;;  %v10242_v28 = vunpack.c.l.bf16 %v6887_v39  ;;  %5371 = vmatpush3.bf16.msra.mxu1 %v6475_v54  ;;  %v5917_v54 = vpack.i.bf16 %v6919_v6, %v6917_v63  ;;  %v510_v8 = vrot.slane %v10471_v43, 1 }
  0x2d   : > { %5372 = vmatprep.subr.bf16.mxu1 %v6477_v20  ;;  %v620_v43 = vrot.slane %v6673_v10, 2  ;;  %v6489_v10 = vld [vmem:[%s10219_s1 + $0xc0] sm:$0xff]  }
  0x2e   : > { %5898 = vrot.lane.b32.xlu0 %v5897_v29, %s6590_s19  ;;  %v6927_v29 = vsel %vm436_vm0, %v477_v52, %v478_v53  ;;  %v6937_v38 = vsel %vm436_vm0, %v478_v53, %v480_v4  ;;  %v485_v52 = vrot.slane %v10234_v16, 1  ;;  %v6951_v53 = vunpack.c.h.bf16 %v5254_v22  ;;  %v313_v4 = vld [vmem:[%s6661_s16 + $0x84] sm:$0xff]  }
  0x2f   : > { %10451 = vst [vmem:[#allocation31_spill] sm:$0xff] %v6927_v29  ;;  %10452 = vst [vmem:[#allocation32_spill] sm:$0xff] %v6937_v38  ;;  %v5922_v16 = vpack.i.bf16 %v6937_v38, %v6927_v29  ;;  %v490_v0 = vrot.slane %v10242_v28, 1  ;;  %v6479_v22 = vld [vmem:[%s10219_s1 + $0xe8] sm:$0xff]   ;;  %v6977_v28 = vunpack.c.l.bf16 %v313_v4  ;;  %v6979_v62 = vunpack.c.h.bf16 %v313_v4  ;;  %v6481_v4 = vld [vmem:[%s10219_s1 + $0xe0] sm:$0xff]  }
  0x30   : > { %5903 = vrot.lane.b32.xlu1 %v5902_v44, %s6590_s19  ;;  %v482_v44 = vrot.slane %v6917_v63, 1  ;;  %10454 = vst [vmem:[#allocation34_spill] sm:$0xff] %v6951_v53  ;;  %5373 = vmatpush3.bf16.msra.mxu1 %v6478_v47  ;;  %v6480_v29 = vld [vmem:[%s10219_s1 + $0xa8] sm:$0xff]   ;;  %v5927_v47 = vpack.i.bf16 %v6951_v53, %v6949_v34 }
  0x31   : > { %5374 = vmatprep.subr.bf16.mxu1 %v6479_v22  ;;  %v492_v22 = vrot.slane %v6977_v28, 1 }
  0x32   : > { %5908 = vrot.lane.b32.xlu0 %v5907_v30, %s6590_s19  ;;  %v488_v30 = vrot.slane %v6951_v53, 1  ;;  %v6965_v20 = vsel %vm436_vm0, %v482_v44, %v483_v58  ;;  %v6982_v44 = vld [vmem:[%s6661_s16 + $0x98] sm:$0x1] }
  0x33   : > { %10455 = vst [vmem:[#allocation35_spill] sm:$0xff] %v6965_v20 }
  0x34   : > { %5913 = vrot.lane.b32.xlu1 %v5912_v25, %s6590_s19  ;;  %v6968_v25 = vsel %vm436_vm0, %v483_v58, %v485_v52  ;;  %v5255_v58 = vld [vmem:[%s6661_s16 + $0x90] sm:$0xff]   ;;  %v6992_v38 = vsel %vm436_vm0, %v488_v30, %v490_v0  ;;  %5375 = vmatpush3.bf16.msra.mxu1 %v6480_v29  ;;  %v5937_v0 = vpack.i.bf16 %v6979_v62, %v6977_v28 }
  0x35   : > { %10456 = vst [vmem:[#allocation36_spill] sm:$0xff] %v6968_v25  ;;  %v5932_v52 = vpack.i.bf16 %v6968_v25, %v6965_v20  ;;  %10458 = vst [vmem:[#allocation38_spill] sm:$0xff] %v6992_v38  ;;  %v495_v25 = vrot.slane %v10459_v13, 1  ;;  %v7008_v29 = vunpack.c.l.bf16 %v5255_v58  ;;  %5376 = vmatprep.subr.bf16.mxu1 %v6481_v4  ;;  %v319_v13 = vld [vmem:[%s6661_s16 + $0x9c] sm:$0xff]  }
  0x36   : > { %5918 = vrot.lane.b32.xlu0 %v5917_v54, %s6590_s19  ;;  %v6989_v54 = vsel %vm436_vm0, %v487_v27, %v488_v30  ;;  %v6482_v27 = vld [vmem:[%s10219_s1 + $0xa0] sm:$0xff]   ;;  %v7010_v30 = vunpack.c.h.bf16 %v5255_v58  ;;  %v6483_v58 = vld [vmem:[%s10219_s1 + $0xd8] sm:$0xff]   ;;  %v7043_v3 = vunpack.c.l.bf16 %v319_v13 }
  0x37   : > { %10457 = vst [vmem:[#allocation37_spill] sm:$0xff] %v6989_v54  ;;  %v5942_v20 = vpack.i.bf16 %v6992_v38, %v6989_v54 }
  0x38   : > { %5923 = vrot.lane.b32.xlu1 %v5922_v16, %s6590_s19  ;;  %v493_v16 = vrot.slane %v6979_v62, 1  ;;  %v498_v50 = vrot.slane %v7010_v30, 1  ;;  %5377 = vmatpush3.bf16.msra.mxu1 %v6482_v27  ;;  %v6484_v27 = vld [vmem:[%s10219_s1 + $0x98] sm:$0xff]  }
  0x39   : > { %5378 = vmatprep.subr.bf16.mxu1 %v6483_v58 }
  0x3a   : > { %5928 = vrot.lane.b32.xlu0 %v5927_v47, %s6590_s19  ;;  %v497_v47 = vrot.slane %v7008_v29, 1  ;;  %v7026_v26 = vsel %vm436_vm0, %v492_v22, %v493_v16  ;;  %v7029_v4 = vsel %vm436_vm0, %v493_v16, %v495_v25  ;;  %v5947_v22 = vpack.i.bf16 %v7010_v30, %v7008_v29 }
  0x3b   : > { %10460 = vst [vmem:[#allocation39_spill] sm:$0xff] %v7026_v26  ;;  %10461 = vst [vmem:[#allocation40_spill] sm:$0xff] %v7029_v4  ;;  %v7045_v25 = vunpack.c.h.bf16 %v319_v13  ;;  %v7047_v16 = vunpack.c.l.bf16 %v5256_v51  ;;  %v5952_v54 = vpack.i.bf16 %v7029_v4, %v7026_v26  ;;  %v10468_v4 = vunpack.c.l.bf16 %v7013_v5 }
  0x3c   : > { %5933 = vrot.lane.b32.xlu1 %v5932_v52, %s6590_s19  ;;  %v10462_v52 = vunpack.c.l.bf16 %v6982_v44  ;;  %5379 = vmatpush3.bf16.msra.mxu1 %v6484_v27 }
  0x3d   : > { %10463 = vst [vmem:[#allocation41_spill] sm:$0xff] %v7045_v25  ;;  %10464 = vst [vmem:[#allocation42_spill] sm:$0xff] %v7047_v16  ;;  %v503_v58 = vrot.slane %v7045_v25, 1  ;;  %v505_v26 = vrot.slane %v10468_v4, 1  ;;  %v5957_v27 = vpack.i.bf16 %v7045_v25, %v7043_v3  ;;  %v7083_v4 = vunpack.c.h.bf16 %v325_v59 }
  0x3e   : > { %v500_v38 = vrot.slane %v10462_v52, 1  ;;  %5938 = vrot.lane.b32.xlu0 %v5937_v0, %s6590_s19  ;;  %v7049_v52 = vunpack.c.h.bf16 %v5256_v51  ;;  %v7055_v0 = vsel %vm436_vm0, %v497_v47, %v498_v50  ;;  %v6485_v51 = vld [vmem:[%s10219_s1 + $0xd0] sm:$0xff]  }
  0x3f   : > { %10466 = vst [vmem:[#allocation44_spill] sm:$0xff] %v7055_v0  ;;  %v6486_v47 = vld [vmem:[%s10219_s1 + $0x90] sm:$0xff]   ;;  %5380 = vmatprep.subr.bf16.mxu1 %v6485_v51  ;;  %10470 = vst [vmem:[#allocation47_spill] sm:$0xff] %v7083_v4  ;;  %v6487_v51 = vld [vmem:[%s10219_s1 + $0xc8] sm:$0xff]  }
  0x40   : > { %10465 = vst [vmem:[#allocation43_spill] sm:$0xff] %v7049_v52  ;;  %5943 = vrot.lane.b32.xlu1 %v5942_v20, %s6590_s19  ;;  %v7063_v13 = vsel %vm436_vm0, %v498_v50, %v500_v38  ;;  %v502_v20 = vrot.slane %v7043_v3, 1  ;;  %v7077_v50 = vld [vmem:[%s6661_s16 + $0xbc] sm:$0x1]  ;;  %v5967_v38 = vpack.i.bf16 %v7049_v52, %v7047_v16  ;;  %v508_v37 = vrot.slane %v7049_v52, 1  ;;  %5381 = vmatpush3.bf16.msra.mxu1 %v6486_v47 }
  0x41   : > { %10467 = vst [vmem:[#allocation45_spill] sm:$0xff] %v7063_v13  ;;  %10469 = vst [vmem:[#allocation46_spill] sm:$0xff] %v7077_v50  ;;  %v5962_v41 = vpack.i.bf16 %v7063_v13, %v7055_v0  ;;  %v619_v13 = vrot.slane %v6671_v9, 2  ;;  %v10474_v47 = vunpack.c.l.bf16 %v6682_v15  ;;  %5382 = vmatprep.subr.bf16.mxu1 %v6487_v51  ;;  %v7114_v0 = vunpack.c.l.bf16 %v5257_v49 }
  0x42   : > { %5948 = vrot.lane.b32.xlu0 %v5947_v22, %s6590_s19  ;;  %v507_v22 = vrot.slane %v7047_v16, 1  ;;  %v7096_v59 = vsel %vm436_vm0, %v502_v20, %v503_v58  ;;  %v512_v20 = vrot.slane %v7081_v46, 1  ;;  %v7116_v9 = vunpack.c.h.bf16 %v5257_v49 }
  0x43   : > { %10472 = vst [vmem:[#allocation48_spill] sm:$0xff] %v7096_v59  ;;  %v622_v11 = vrot.slane %v10474_v47, 2  ;;  %10475 = vst [vmem:[#allocation50_spill] sm:$0xff] %v7114_v0  ;;  %v7125_v47 = vsel %vm436_vm0, %v508_v37, %v510_v8  ;;  %v624_v51 = vrot.slane %v6685_v17, 2  ;;  %v10479_v49 = vunpack.c.l.bf16 %v7077_v50  ;;  %v6490_v8 = vld [vmem:[%s10219_s1 + $0x80] sm:$0xff]  }
  0x44   : > { %5953 = vrot.lane.b32.xlu1 %v5952_v54, %s6590_s19  ;;  %v7099_v54 = vsel %vm436_vm0, %v503_v58, %v505_v26  ;;  %v513_v26 = vrot.slane %v7083_v4, 1  ;;  %v5977_v58 = vpack.i.bf16 %v7083_v4, %v7081_v46  ;;  %10476 = vst [vmem:[#allocation51_spill] sm:$0xff] %v7116_v9  ;;  %v7122_v15 = vsel %vm436_vm0, %v507_v22, %v508_v37 }
  0x45   : > { %10473 = vst [vmem:[#allocation49_spill] sm:$0xff] %v7099_v54  ;;  %10477 = vst [vmem:[#allocation52_spill] sm:$0xff] %v7122_v15  ;;  %5383 = vmatpush3.bf16.msra.mxu1 %v6488_v12  ;;  %v515_v4 = vrot.slane %v10479_v49, 1  ;;  %v629_v22 = vrot.slane %v6689_v19, 2  ;;  %v630_v12 = vrot.slane %v6695_v23, 2  ;;  %v10481_v37 = vunpack.c.l.bf16 %v6716_v35 }
  0x46   : > { %5958 = vrot.lane.b32.xlu0 %v5957_v27, %s6590_s19  ;;  %v5972_v27 = vpack.i.bf16 %v7099_v54, %v7096_v59  ;;  %10478 = vst [vmem:[#allocation53_spill] sm:$0xff] %v7125_v47  ;;  %v10480_v54 = vunpack.c.l.bf16 %v6698_v24  ;;  %v634_v49 = vrot.slane %v6728_v42, 2  ;;  %5384 = vmatprep.subr.bf16.mxu1 %v6489_v10  ;;  %v5987_v24 = vpack.i.bf16 %v7116_v9, %v7114_v0 }
  0x47   : > { %v632_v17 = vrot.slane %v10481_v37, 2  ;;  %v639_v50 = vrot.slane %v6777_v1, 2  ;;  %v7155_v35 = vsel %vm613_vm1, %v619_v13, %v620_v43  ;;  %v640_v37 = vrot.slane %v6779_v2, 2 }
  0x48   : > { %5963 = vrot.lane.b32.xlu1 %v5962_v41, %s6590_s19  ;;  %v625_v41 = vrot.slane %v6687_v18, 2  ;;  %v627_v59 = vrot.slane %v10480_v54, 2  ;;  %v635_v18 = vrot.slane %v6735_v45, 2  ;;  %v10482_v54 = vunpack.c.l.bf16 %v6742_v48 }
  0x49   : > { %v10483_v10 = vunpack.c.l.bf16 %v6759_v56  ;;  %5385 = vmatpush3.bf16.msra.mxu1 %v6490_v8  ;;  %v7161_v48 = vsel %vm436_vm0, %v512_v20, %v513_v26  ;;  %v10486_v13 = vunpack.c.l.bf16 %v6762_v57  ;;  %v649_v56 = vrot.slane %v6830_v40, 2 }
  0x4a   : > { %5968 = vrot.lane.b32.xlu0 %v5967_v38, %s6590_s19  ;;  %v637_v19 = vrot.slane %v10482_v54, 2  ;;  %v5982_v38 = vpack.i.bf16 %v7125_v47, %v7122_v15  ;;  %10484 = vst [vmem:[#allocation54_spill] sm:$0xff] %v7161_v48  ;;  %v7164_v54 = vsel %vm436_vm0, %v513_v26, %v515_v4  ;;  %v645_v47 = vrot.slane %v6819_v33, 2  ;;  %v7184_v33 = vld [vmem:[%s6661_s16 + $0xc8] sm:$0x1] }
  0x4b   : > { %v642_v45 = vrot.slane %v10483_v10, 2  ;;  %10485 = vst [vmem:[#allocation55_spill] sm:$0xff] %v7164_v54  ;;  %v647_v15 = vrot.slane %v10486_v13, 2  ;;  %v650_v10 = vrot.slane %v6850_v60, 2  ;;  %v10487_v8 = vunpack.c.l.bf16 %v6799_v21 }
  0x4c   : > { %5973 = vrot.lane.b32.xlu1 %v5972_v27, %s6590_s19  ;;  %v644_v27 = vrot.slane %v6817_v32, 2  ;;  %v7176_v2 = vsel %vm613_vm1, %v620_v43, %v622_v11  ;;  %v7179_v4 = vsel %vm613_vm1, %v624_v51, %v625_v41  ;;  %v654_v26 = vrot.slane %v6879_v31, 2 }
  0x4d   : > { %v652_v20 = vrot.slane %v10487_v8, 2  ;;  %v5992_v57 = vpack.i.bf16 %v7164_v54, %v7161_v48  ;;  %v7190_v21 = vsel %vm613_vm1, %v625_v41, %v627_v59  ;;  %v10488_v11 = vunpack.c.l.bf16 %v6845_v55 }
  0x4e   : > { %5978 = vrot.lane.b32.xlu0 %v5977_v58, %s6590_s19  ;;  %v655_v58 = vrot.slane %v6881_v36, 2  ;;  %v659_v51 = vrot.slane %v6917_v63, 2  ;;  %v660_v13 = vrot.slane %v6919_v6, 2  ;;  %v10489_v8 = vunpack.c.l.bf16 %v6866_v7 }
  0x4f   : > { %v657_v43 = vrot.slane %v10488_v11, 2  ;;  %v664_v54 = vrot.slane %v6949_v34, 2  ;;  %v665_v59 = vrot.slane %v6951_v53, 2  ;;  %v6002_v55 = vpack.i.bf16 %v7190_v21, %v7179_v4 }
  0x50   : > { %5983 = vrot.lane.b32.xlu1 %v5982_v38, %s6590_s19  ;;  %v662_v36 = vrot.slane %v10489_v8, 2  ;;  %v5997_v38 = vpack.i.bf16 %v7176_v2, %v7155_v35  ;;  %v7206_v41 = vsel %vm613_vm1, %v629_v22, %v630_v12  ;;  %v7209_v11 = vsel %vm613_vm1, %v630_v12, %v632_v17 }
  0x51   : > { %10490 = vst [vmem:[#allocation56_spill] sm:$0xff] %v7209_v11  ;;  %v7212_v7 = vsel %vm613_vm1, %v634_v49, %v635_v18  ;;  %v10492_v8 = vunpack.c.l.bf16 %v6887_v39  ;;  %v384_v53 = vunpack.c.l.bf16 %v7184_v33  ;;  %v862_v34 = vrot.slane %v7114_v0, 2 }
  0x52   : > { %5988 = vrot.lane.b32.xlu0 %v5987_v24, %s6590_s19  ;;  %v7216_v24 = vsel %vm613_vm1, %v635_v18, %v637_v19  ;;  %v669_v22 = vrot.slane %v6977_v28, 2  ;;  %v670_v17 = vrot.slane %v6979_v62, 2  ;;  %v10493_v12 = vunpack.c.l.bf16 %v6931_v61 }
  0x53   : > { %10491 = vst [vmem:[#allocation57_spill] sm:$0xff] %v7216_v24  ;;  %v667_v48 = vrot.slane %v10492_v8, 2  ;;  %v674_v6 = vrot.slane %v7008_v29, 2  ;;  %v6007_v18 = vpack.i.bf16 %v7209_v11, %v7206_v41  ;;  %v863_v19 = vrot.slane %v7116_v9, 2 }
  0x54   : > { %5993 = vrot.lane.b32.xlu1 %v5992_v57, %s6590_s19  ;;  %v672_v49 = vrot.slane %v10493_v12, 2  ;;  %v865_v39 = vrot.slane %v384_v53, 2  ;;  %v7232_v33 = vsel %vm613_vm1, %v639_v50, %v640_v37  ;;  %v7235_v57 = vsel %vm613_vm1, %v640_v37, %v642_v45 }
  0x55   : > { %10494 = vst [vmem:[#allocation58_spill] sm:$0xff] %v7232_v33  ;;  %10495 = vst [vmem:[#allocation59_spill] sm:$0xff] %v7235_v57  ;;  %v6012_v61 = vpack.i.bf16 %v7216_v24, %v7212_v7  ;;  %v7241_v8 = vsel %vm613_vm1, %v862_v34, %v863_v19  ;;  %v7247_v12 = vsel %vm613_vm1, %v644_v27, %v645_v47 }
  0x56   : > { %5998 = vrot.lane.b32.xlu0 %v5997_v38, %s6590_s19  ;;  %10496 = vst [vmem:[#allocation60_spill] sm:$0xff] %v7241_v8  ;;  %v7244_v38 = vsel %vm613_vm1, %v863_v19, %v865_v39  ;;  %10498 = vst [vmem:[#allocation62_spill] sm:$0xff] %v7247_v12  ;;  %v7250_v50 = vsel %vm613_vm1, %v645_v47, %v647_v15  ;;  %v6017_v37 = vpack.i.bf16 %v7235_v57, %v7232_v33 }
  0x57   : > { %10497 = vst [vmem:[#allocation61_spill] sm:$0xff] %v7244_v38  ;;  %10499 = vst [vmem:[#allocation63_spill] sm:$0xff] %v7250_v50  ;;  %v7258_v34 = vsel %vm613_vm1, %v649_v56, %v650_v10  ;;  %v6022_v15 = vpack.i.bf16 %v7250_v50, %v7247_v12  ;;  %v7267_v47 = vsel %vm613_vm1, %v654_v26, %v655_v58 }
  0x58   : > { %6003 = vrot.lane.b32.xlu1 %v6002_v55, %s6590_s19  ;;  %10500 = vst [vmem:[#allocation64_spill] sm:$0xff] %v7258_v34  ;;  %v7261_v55 = vsel %vm613_vm1, %v650_v10, %v652_v20  ;;  %10502 = vst [vmem:[#allocation66_spill] sm:$0xff] %v7267_v47  ;;  %v7270_v27 = vsel %vm613_vm1, %v655_v58, %v657_v43  ;;  %v7276_v56 = vsel %vm613_vm1, %v660_v13, %v662_v36 }
  0x59   : > { %10501 = vst [vmem:[#allocation65_spill] sm:$0xff] %v7261_v55  ;;  %10503 = vst [vmem:[#allocation67_spill] sm:$0xff] %v7270_v27  ;;  %v6027_v10 = vpack.i.bf16 %v7261_v55, %v7258_v34  ;;  %v6032_v20 = vpack.i.bf16 %v7270_v27, %v7267_v47  ;;  %v7287_v58 = vsel %vm613_vm1, %v664_v54, %v665_v59  ;;  %v680_v54 = vrot.slane %v7045_v25, 2 }
  0x5a   : > { %6008 = vrot.lane.b32.xlu0 %v6007_v18, %s6590_s19  ;;  %v7273_v18 = vsel %vm613_vm1, %v659_v51, %v660_v13  ;;  %v7290_v36 = vsel %vm613_vm1, %v665_v59, %v667_v48  ;;  %v7293_v43 = vsel %vm613_vm1, %v669_v22, %v670_v17  ;;  %v675_v51 = vrot.slane %v7010_v30, 2 }
  0x5b   : > { %v6037_v26 = vpack.i.bf16 %v7276_v56, %v7273_v18  ;;  %v10504_v13 = vunpack.c.l.bf16 %v6982_v44  ;;  %v7300_v39 = vsel %vm613_vm1, %v670_v17, %v672_v49  ;;  %v10505_v48 = vunpack.c.l.bf16 %v7013_v5 }
  0x5c   : > { %6013 = vrot.lane.b32.xlu1 %v6012_v61, %s6590_s19  ;;  %v679_v61 = vrot.slane %v7043_v3, 2  ;;  %v6042_v22 = vpack.i.bf16 %v7290_v36, %v7287_v58  ;;  %v684_v44 = vrot.slane %v7047_v16, 2  ;;  %v6047_v17 = vpack.i.bf16 %v7300_v39, %v7293_v43 }
  0x5d   : > { %v677_v19 = vrot.slane %v10504_v13, 2  ;;  %v682_v59 = vrot.slane %v10505_v48, 2  ;;  %v7318_v49 = vsel %vm613_vm1, %v674_v6, %v675_v51  ;;  %v826_v16 = vrot.slane %v7116_v9, 1 }
  0x5e   : > { %6018 = vrot.lane.b32.xlu0 %v6017_v37, %s6590_s19  ;;  %v685_v37 = vrot.slane %v7049_v52, 2  ;;  %v7327_v48 = vsel %vm613_vm1, %v679_v61, %v680_v54  ;;  %v825_v52 = vrot.slane %v7114_v0, 1  ;;  %v828_v6 = vrot.slane %v384_v53, 1  ;;  %v10510_v53 = vld [vmem:[#allocation47_spill] sm:$0xff] }
  0x5f   : > { %v7321_v5 = vsel %vm613_vm1, %v675_v51, %v677_v19  ;;  %v7330_v45 = vsel %vm613_vm1, %v680_v54, %v682_v59  ;;  %v689_v54 = vrot.slane %v7081_v46, 2  ;;  %v690_v59 = vrot.slane %v10510_v53, 2 }
  0x60   : > { %6023 = vrot.lane.b32.xlu1 %v6022_v15, %s6590_s19  ;;  %v331_v15 = vld [vmem:[%s6661_s16 + $0xcc] sm:$0xff]   ;;  %v7343_v19 = vsel %vm613_vm1, %v684_v44, %v685_v37  ;;  %v7359_v44 = vsel %vm436_vm0, %v826_v16, %v828_v6 }
  0x61   : > { %v7334_v25 = vunpack.c.l.bf16 %v331_v15  ;;  %v7336_v51 = vunpack.c.h.bf16 %v331_v15  ;;  %10514 = vst [vmem:[#allocation71_spill] sm:$0xff] %v7359_v44 }
  0x62   : > { %6028 = vrot.lane.b32.xlu0 %v6027_v10, %s6590_s19  ;;  %v7313_v10 = vld [vmem:[%s6661_s16 + $0xd4] sm:$0x1] }
  0x63   : > { %10506 = vst [vmem:[#allocation68_spill] sm:$0xff] %v7313_v10  ;;  %10508 = vst [vmem:[#allocation69_spill] sm:$0xff] %v7334_v25  ;;  %v10515_v0 = vunpack.c.l.bf16 %v7313_v10 }
  0x64   : > { %6033 = vrot.lane.b32.xlu1 %v6032_v20, %s6590_s19  ;;  %v10507_v20 = vunpack.c.l.bf16 %v7035_v14  ;;  %10509 = vst [vmem:[#allocation70_spill] sm:$0xff] %v7336_v51  ;;  %v7356_v14 = vsel %vm436_vm0, %v825_v52, %v826_v16 }
  0x65   : > { %v969_v53 = vrot.slane %v10515_v0, 1  ;;  %v6067_v16 = vpack.i.bf16 %v7359_v44, %v7356_v14 }
  0x66   : > { %v687_v13 = vrot.slane %v10507_v20, 2  ;;  %6038 = vrot.lane.b32.xlu0 %v6037_v26, %s6590_s19  ;;  %v6052_v26 = vpack.i.bf16 %v7321_v5, %v7318_v49  ;;  %v10511_v20 = vld [vmem:[#allocation46_spill] sm:$0xff] }
  0x67   : > { %v10512_v15 = vunpack.c.l.bf16 %v10511_v20  ;;  %10513 = vst [vmem:[#allocation46_spill] sm:$0xff] %v7356_v14  ;;  %v7369_v20 = vsel %vm613_vm1, %v689_v54, %v690_v59 }
  0x68   : > { %6043 = vrot.lane.b32.xlu1 %v6042_v22, %s6590_s19  ;;  %v7346_v61 = vsel %vm613_vm1, %v685_v37, %v687_v13  ;;  %v6057_v22 = vpack.i.bf16 %v7330_v45, %v7327_v48  ;;  %v966_v37 = vrot.slane %v7334_v25, 1  ;;  %v967_v13 = vrot.slane %v7336_v51, 1 }
  0x69   : > { %v692_v9 = vrot.slane %v10512_v15, 2 }
  0x6a   : > { %6048 = vrot.lane.b32.xlu0 %v6047_v17, %s6590_s19  ;;  %v6062_v17 = vpack.i.bf16 %v7346_v61, %v7343_v19  ;;  %v968_v6 = vsel %vm436_vm0, %v966_v37, %v967_v13  ;;  %v970_v0 = vsel %vm436_vm0, %v967_v13, %v969_v53  ;;  %v10517_v53 = vld [vmem:[#allocation7_spill] sm:$0xff] }
  0x6b   : > { %v7372_v52 = vsel %vm613_vm1, %v690_v59, %v692_v9  ;;  %v6077_v54 = vpack.i.bf16 %v970_v0, %v968_v6  ;;  %v6082_v9 = vpack.i.bf16 %v7244_v38, %v7241_v8  ;;  %v10516_v59 = vld [vmem:[#allocation6_spill] sm:$0xff]  ;;  %v10518_v37 = vld [vmem:[#allocation3_spill] sm:$0xff] }
  0x6c   : > { %6053 = vrot.lane.b32.xlu1 %v6052_v26, %s6590_s19  ;;  %v6072_v26 = vpack.i.bf16 %v7372_v52, %v7369_v20  ;;  %v614_v15 = vrot.slane %v10516_v59, 2  ;;  %v10519_v13 = vunpack.c.l.bf16 %v10518_v37 }
  0x6e   : > { %6058 = vrot.lane.b32.xlu0 %v6057_v22, %s6590_s19  ;;  %v615_v22 = vrot.slane %v10517_v53, 2 }
  0x70   : > { %6063 = vrot.lane.b32.xlu1 %v6062_v17, %s6590_s19  ;;  %v617_v17 = vrot.slane %v10519_v13, 2 }
  0x72   : > { %6068 = vrot.lane.b32.xlu0 %v6067_v16, %s6590_s19  ;;  %v616_v16 = vsel %vm613_vm1, %v614_v15, %v615_v22  ;;  %v618_v6 = vsel %vm613_vm1, %v615_v22, %v617_v17 }
  0x74   : > { %6073 = vrot.lane.b32.xlu1 %v6072_v26, %s6590_s19 }
  0x76   : > { %6078 = vrot.lane.b32.xlu0 %v6077_v54, %s6590_s19 }
  0x78   : > { %6083 = vrot.lane.b32.xlu1 %v6082_v9, %s6590_s19 }
  0x88   : > { %v5839_v10 = vpop.permute.xlu0 %5838 }
  0x89   : > { %v5841_v0 = vunpack.i.h.bf16 %v5839_v10  ;;  %v5840_v26 = vunpack.i.l.bf16 %v5839_v10  ;;  %v5849_v8 = vpop.permute.xlu1 %5848 }
  0x8a   : > { %v5851_v38 = vunpack.i.h.bf16 %v5849_v8  ;;  %v5850_v54 = vunpack.i.l.bf16 %v5849_v8 }
  0x8b   : > { %v1025_v9 = vsel %vm992_vm2, %v616_v16, %v5840_v26  ;;  %v1026_v44 = vsel %vm992_vm2, %v618_v6, %v5841_v0 }
  0x8c   : > { %v5844_v14 = vpop.permute.xlu0 %5843  ;;  %v1094_v51 = vpack.c.bf16 %v1026_v44, %v1025_v9  ;;  %v1027_v37 = vsel %vm992_vm2, %v7155_v35, %v5850_v54  ;;  %v1028_v15 = vsel %vm992_vm2, %v7176_v2, %v5851_v38  ;;  %v6476_v35 = vld [vmem:[%s10219_s1 + $0x110] sm:$0xff]   ;;  %v10521_v9 = vld [vmem:[#allocation4_spill] sm:$0xff] }
  0x8d   : > { %v5846_v13 = vunpack.i.h.bf16 %v5844_v14  ;;  %v5845_v22 = vunpack.i.l.bf16 %v5844_v14  ;;  %v1099_v10 = vpack.c.bf16 %v1028_v15, %v1027_v37  ;;  %v10520_v14 = vld [vmem:[#allocation27_spill] sm:$0xff]  ;;  %v10522_v37 = vld [vmem:[#allocation5_spill] sm:$0xff] }
  0x8e   : > { %1527 = vmatprep.mubr.bf16.mxu0 %v1094_v51  ;;  %v5854_v17 = vpop.permute.xlu1 %5853 }
  0x8f   : > { %v993_v8 = vsel %vm992_vm2, %v10516_v59, %v5845_v22  ;;  %v994_v16 = vsel %vm992_vm2, %v10517_v53, %v5846_v13  ;;  %v5856_v6 = vunpack.i.h.bf16 %v5854_v17  ;;  %v5855_v0 = vunpack.i.l.bf16 %v5854_v17 }
  0x90   : > { %v5859_v44 = vpop.permute.xlu0 %5858  ;;  %v1093_v26 = vpack.c.bf16 %v994_v16, %v993_v8  ;;  %v10523_v8 = vld [vmem:[#allocation8_spill] sm:$0xff] }
  0x91   : > { %v5861_v2 = vunpack.i.h.bf16 %v5859_v44  ;;  %v5860_v38 = vunpack.i.l.bf16 %v5859_v44  ;;  %v995_v53 = vsel %vm992_vm2, %v10521_v9, %v5855_v0  ;;  %v996_v15 = vsel %vm992_vm2, %v10522_v37, %v5856_v6  ;;  %v10524_v44 = vld [vmem:[#allocation9_spill] sm:$0xff] }
  0x92   : > { %1528 = vmatmul.mubr.bf16.vlgmr.msra.gmra.mxu0 %v1093_v26  ;;  %v5864_v51 = vpop.permute.xlu1 %5863  ;;  %v1098_v26 = vpack.c.bf16 %v996_v15, %v995_v53 }
  0x93   : > { %5747 = vmatpush3.bf16.msra.mxu0 %v10520_v14  ;;  %1535 = vmatprep.mubr.bf16.mxu0 %v1099_v10  ;;  %v5866_v54 = vunpack.i.h.bf16 %v5864_v51  ;;  %v5865_v59 = vunpack.i.l.bf16 %v5864_v51  ;;  %v1029_v22 = vsel %vm992_vm2, %v7179_v4, %v5860_v38  ;;  %v1030_v17 = vsel %vm992_vm2, %v7190_v21, %v5861_v2  ;;  %v6491_v10 = vld [vmem:[%s10219_s1 + $0x108] sm:$0xff]   ;;  %v6492_v2 = vld [vmem:[%s10219_s1 + $0x100] sm:$0xff]  }
  0x94   : > { %v5869_v13 = vpop.permute.xlu0 %5868  ;;  %5748 = vmatprep.subr.bf16.mxu0 %v6476_v35  ;;  %v1103_v14 = vpack.c.bf16 %v1030_v17, %v1029_v22 }
  0x95   : > { %v997_v16 = vsel %vm992_vm2, %v10523_v8, %v5865_v59  ;;  %v998_v0 = vsel %vm992_vm2, %v10524_v44, %v5866_v54  ;;  %v5871_v38 = vunpack.i.h.bf16 %v5869_v13  ;;  %v5870_v9 = vunpack.i.l.bf16 %v5869_v13 }
  0x96   : > { %v5874_v6 = vpop.permute.xlu1 %5873  ;;  %v1096_v51 = vpack.c.bf16 %v998_v0, %v997_v16 }
  0x97   : > { %5749 = vmatpush3.bf16.msra.mxu0 %v6476_v35  ;;  %v1031_v54 = vsel %vm992_vm2, %v7206_v41, %v5870_v9  ;;  %v1032_v35 = vsel %vm992_vm2, %v7209_v11, %v5871_v38  ;;  %v5876_v15 = vunpack.i.h.bf16 %v5874_v6  ;;  %v5875_v13 = vunpack.i.l.bf16 %v5874_v6 }
  0x98   : > { %v5879_v37 = vpop.permute.xlu0 %5878  ;;  %1688 = vmatprep.mubr.bf16.mxu1 %v1096_v51  ;;  %5750 = vmatprep.subr.bf16.mxu0 %v6491_v10  ;;  %v1107_v22 = vpack.c.bf16 %v1032_v35, %v1031_v54 }
  0x99   : > { %v5881_v17 = vunpack.i.h.bf16 %v5879_v37  ;;  %v5880_v8 = vunpack.i.l.bf16 %v5879_v37 }
  0x9a   : > { %1536 = vmatmul.mubr.bf16.gmra.mxu0 %v1098_v26  ;;  %v5884_v25 = vpop.permute.xlu1 %5883  ;;  %v1000_v26 = vsel %vm992_vm2, %v6695_v23, %v5876_v15  ;;  %v10526_v15 = vld [vmem:[#allocation13_spill] sm:$0xff] }
  0x9b   : > { %1543 = vmatprep.mubr.bf16.mxu0 %v1103_v14  ;;  %5751 = vmatpush3.bf16.msra.mxu0 %v6491_v10  ;;  %v10525_v10 = vld [vmem:[#allocation10_spill] sm:$0xff]  ;;  %v1033_v38 = vsel %vm992_vm2, %v7212_v7, %v5880_v8  ;;  %v1034_v6 = vsel %vm992_vm2, %v7216_v24, %v5881_v17 }
  0x9c   : > { %v5889_v59 = vpop.permute.xlu0 %5888  ;;  %5752 = vmatprep.subr.bf16.mxu0 %v6492_v2  ;;  %v999_v0 = vsel %vm992_vm2, %v10525_v10, %v5875_v13  ;;  %v1111_v54 = vpack.c.bf16 %v1034_v6, %v1033_v38 }
  0x9d   : > { %v7438_v9 = vpack.c.bf16 %v1000_v26, %v999_v0  ;;  %v5891_v35 = vunpack.i.h.bf16 %v5889_v59 }
  0x9e   : > { %v5894_v53 = vpop.permute.xlu1 %5893 }
  0x9f   : > { %5753 = vmatpush3.bf16.msra.mxu0 %v6492_v2  ;;  %v5886_v2 = vunpack.i.h.bf16 %v5884_v25  ;;  %v5896_v26 = vunpack.i.h.bf16 %v5894_v53  ;;  %v5895_v38 = vunpack.i.l.bf16 %v5894_v53 }
  0xa0   : > { %v5899_v16 = vpop.permute.xlu0 %5898 }
  0xa1   : > { %v1002_v17 = vsel %vm992_vm2, %v10526_v15, %v5886_v2 }
  0xa2   : > { %1544 = vmatmul.mubr.bf16.gmra.mxu0 %v1096_v51  ;;  %v5904_v44 = vpop.permute.xlu1 %5903  ;;  %v5885_v51 = vunpack.i.l.bf16 %v5884_v25 }
  0xa3   : > { %1551 = vmatprep.mubr.bf16.mxu0 %v1107_v22  ;;  %v5890_v22 = vunpack.i.l.bf16 %v5889_v59  ;;  %v1036_v59 = vsel %vm992_vm2, %v7235_v57, %v5891_v35  ;;  %v10527_v35 = vld [vmem:[#allocation17_spill] sm:$0xff] }
  0xa4   : > { %v5909_v14 = vpop.permute.xlu0 %5908  ;;  %v1001_v23 = vsel %vm992_vm2, %v6728_v42, %v5885_v51  ;;  %v5900_v42 = vunpack.i.l.bf16 %v5899_v16 }
  0xa5   : > { %v1035_v25 = vsel %vm992_vm2, %v7232_v33, %v5890_v22  ;;  %v7453_v10 = vpack.c.bf16 %v1002_v17, %v1001_v23  ;;  %v1003_v22 = vsel %vm992_vm2, %v6777_v1, %v5895_v38  ;;  %v1004_v23 = vsel %vm992_vm2, %v10527_v35, %v5896_v26 }
  0xa6   : > { %v5914_v37 = vpop.permute.xlu1 %5913  ;;  %v1115_v6 = vpack.c.bf16 %v1036_v59, %v1035_v25  ;;  %v1037_v53 = vsel %vm992_vm2, %v7247_v12, %v5900_v42  ;;  %v7472_v17 = vpack.c.bf16 %v1004_v23, %v1003_v22  ;;  %v5906_v59 = vunpack.i.h.bf16 %v5904_v44 }
  0xa7   : > { %v5911_v33 = vunpack.i.h.bf16 %v5909_v14  ;;  %v5910_v1 = vunpack.i.l.bf16 %v5909_v14 }
  0xa8   : > { %v5919_v11 = vpop.permute.xlu0 %5918 }
  0xa9   : > { %v1040_v14 = vsel %vm992_vm2, %v7261_v55, %v5911_v33  ;;  %v5921_v12 = vunpack.i.h.bf16 %v5919_v11 }
  0xaa   : > { %1552 = vmatmul.mubr.bf16.gmra.mxu0 %v7438_v9  ;;  %v7441_v13 = vpop.permute.xlu1 %5923 }
  0xab   : > { %1559 = vmatprep.mubr.bf16.mxu0 %v1111_v54  ;;  %v5901_v54 = vunpack.i.h.bf16 %v5899_v16 }
  0xac   : > { %v7447_v8 = vpop.permute.xlu0 %5928 }
  0xad   : > { %v1038_v16 = vsel %vm992_vm2, %v7250_v50, %v5901_v54  ;;  %v10528_v54 = vld [vmem:[#allocation21_spill] sm:$0xff] }
  0xae   : > { %v7455_v0 = vpop.permute.xlu1 %5933  ;;  %v1119_v57 = vpack.c.bf16 %v1038_v16, %v1037_v53  ;;  %v1006_v22 = vsel %vm992_vm2, %v10528_v54, %v5906_v59  ;;  %v5916_v16 = vunpack.i.h.bf16 %v5914_v37  ;;  %v5926_v54 = vunpack.i.h.bf16 %v7441_v13 }
  0xb0   : > { %v7457_v51 = vpop.permute.xlu0 %5938  ;;  %v1008_v33 = vsel %vm992_vm2, %v6850_v60, %v5916_v16  ;;  %v5930_v60 = vunpack.i.l.bf16 %v7447_v8 }
  0xb2   : > { %1560 = vmatmul.mubr.bf16.gmra.mxu0 %v7453_v10  ;;  %v7460_v2 = vpop.permute.xlu1 %5943 }
  0xb3   : > { %1567 = vmatprep.mubr.bf16.mxu0 %v1115_v6  ;;  %v5905_v6 = vunpack.i.l.bf16 %v5904_v44  ;;  %v1039_v44 = vsel %vm992_vm2, %v7258_v34, %v5910_v1 }
  0xb4   : > { %v7466_v15 = vpop.permute.xlu0 %5948  ;;  %v1123_v50 = vpack.c.bf16 %v1040_v14, %v1039_v44  ;;  %v5931_v14 = vunpack.i.h.bf16 %v7447_v8 }
  0xb5   : > { %v1005_v42 = vsel %vm992_vm2, %v6817_v32, %v5905_v6  ;;  %v5920_v32 = vunpack.i.l.bf16 %v5919_v11  ;;  %v1042_v11 = vsel %vm992_vm2, %v7270_v27, %v5921_v12  ;;  %v10529_v27 = vld [vmem:[#allocation26_spill] sm:$0xff] }
  0xb6   : > { %v7474_v25 = vpop.permute.xlu1 %5953  ;;  %v7491_v23 = vpack.c.bf16 %v1006_v22, %v1005_v42  ;;  %v5925_v22 = vunpack.i.l.bf16 %v7441_v13  ;;  %v1010_v13 = vsel %vm992_vm2, %v10529_v27, %v5926_v54  ;;  %v1044_v24 = vsel %vm992_vm2, %v7276_v56, %v5931_v14  ;;  %v10532_v54 = vld [vmem:[#allocation14_spill] sm:$0xff] }
  0xb7   : > { %v5940_v14 = vunpack.i.l.bf16 %v7457_v51 }
  0xb8   : > { %v7476_v38 = vpop.permute.xlu0 %5958  ;;  %v1009_v12 = vsel %vm992_vm2, %v6879_v31, %v5925_v22  ;;  %v5936_v31 = vunpack.i.h.bf16 %v7455_v0 }
  0xb9   : > { %v7532_v27 = vpack.c.bf16 %v1010_v13, %v1009_v12 }
  0xba   : > { %1568 = vmatmul.mubr.bf16.gmra.mxu0 %v7472_v17  ;;  %v7479_v26 = vpop.permute.xlu1 %5963 }
  0xbb   : > { %1575 = vmatprep.mubr.bf16.mxu0 %v1119_v57  ;;  %v5915_v57 = vunpack.i.l.bf16 %v5914_v37  ;;  %v1041_v37 = vsel %vm992_vm2, %v7267_v47, %v5920_v32 }
  0xbc   : > { %v7485_v35 = vpop.permute.xlu0 %5968 }
  0xbd   : > { %v1007_v1 = vsel %vm992_vm2, %v6830_v40, %v5915_v57  ;;  %v1127_v40 = vpack.c.bf16 %v1042_v11, %v1041_v37  ;;  %v10531_v37 = vld [vmem:[#allocation12_spill] sm:$0xff] }
  0xbe   : > { %v7493_v53 = vpop.permute.xlu1 %5973  ;;  %v7512_v44 = vpack.c.bf16 %v1008_v33, %v1007_v1  ;;  %v10530_v1 = vld [vmem:[#allocation11_spill] sm:$0xff] }
  0xc0   : > { %v7495_v6 = vpop.permute.xlu0 %5978 }
  0xc2   : > { %1576 = vmatmul.mubr.bf16.gmra.mxu0 %v7491_v23  ;;  %v7498_v59 = vpop.permute.xlu1 %5983 }
  0xc3   : > { %1583 = vmatprep.mubr.bf16.mxu0 %v1123_v50 }
  0xc4   : > { %v7504_v42 = vpop.permute.xlu0 %5988 }
  0xc6   : > { %v7514_v50 = vpop.permute.xlu1 %5993 }
  0xc8   : > { %v5999_v16 = vpop.permute.xlu0 %5998 }
  0xc9   : > { %v6001_v57 = vunpack.i.h.bf16 %v5999_v16  ;;  %v6000_v55 = vunpack.i.l.bf16 %v5999_v16  ;;  %v1043_v16 = vsel %vm992_vm2, %v7273_v18, %v5930_v60  ;;  %v5941_v60 = vunpack.i.h.bf16 %v7457_v51 }
  0xca   : > { %1584 = vmatmul.mubr.bf16.gmra.mxu0 %v7512_v44  ;;  %v6004_v32 = vpop.permute.xlu1 %6003  ;;  %v5946_v51 = vunpack.i.h.bf16 %v7460_v2 }
  0xcb   : > { %v1057_v33 = vsel %vm992_vm2, %v10530_v1, %v6000_v55  ;;  %v1058_v11 = vsel %vm992_vm2, %v10531_v37, %v6001_v57  ;;  %v6006_v47 = vunpack.i.h.bf16 %v6004_v32  ;;  %v6005_v8 = vunpack.i.l.bf16 %v6004_v32  ;;  %1591 = vmatprep.mubr.bf16.mxu0 %v1127_v40  ;;  %v10533_v40 = vld [vmem:[#allocation15_spill] sm:$0xff] }
  0xcc   : > { %v1095_v34 = vpack.c.bf16 %v1058_v11, %v1057_v33  ;;  %v5935_v55 = vunpack.i.l.bf16 %v7455_v0  ;;  %v1131_v32 = vpack.c.bf16 %v1044_v24, %v1043_v16  ;;  %v6009_v33 = vpop.permute.xlu0 %6008  ;;  %v10534_v0 = vld [vmem:[#allocation30_spill] sm:$0xff]  ;;  %v1045_v24 = vsel %vm992_vm2, %v7287_v58, %v5940_v14 }
  0xcd   : > { %v1059_v22 = vsel %vm992_vm2, %v10532_v54, %v6005_v8  ;;  %v1060_v57 = vsel %vm992_vm2, %v10533_v40, %v6006_v47  ;;  %v6011_v12 = vunpack.i.h.bf16 %v6009_v33  ;;  %v6010_v13 = vunpack.i.l.bf16 %v6009_v33 }
  0xce   : > { %1689 = vmatmul.mubr.bf16.vlgmr.msra.gmra.mxu1 %v1095_v34  ;;  %v1100_v34 = vpack.c.bf16 %v1060_v57, %v1059_v22  ;;  %v1012_v11 = vsel %vm992_vm2, %v10534_v0, %v5936_v31  ;;  %v1046_v47 = vsel %vm992_vm2, %v7290_v36, %v5941_v60  ;;  %v5945_v16 = vunpack.i.l.bf16 %v7460_v2  ;;  %v10535_v22 = vld [vmem:[#allocation16_spill] sm:$0xff]  ;;  %v6014_v14 = vpop.permute.xlu1 %6013  ;;  %v10537_v2 = vld [vmem:[#allocation33_spill] sm:$0xff]  ;;  %v10538_v0 = vld [vmem:[#allocation34_spill] sm:$0xff] }
  0xcf   : > { %1696 = vmatprep.mubr.bf16.mxu1 %v7438_v9  ;;  %v1011_v9 = vsel %vm992_vm2, %v6917_v63, %v5935_v55  ;;  %v1061_v63 = vsel %vm992_vm2, %v10535_v22, %v6010_v13  ;;  %v10536_v55 = vld [vmem:[#allocation18_spill] sm:$0xff]  ;;  %v1135_v57 = vpack.c.bf16 %v1046_v47, %v1045_v24  ;;  %v5950_v60 = vunpack.i.l.bf16 %v7466_v15 }
  0xd0   : > { %v7552_v8 = vpack.c.bf16 %v1012_v11, %v1011_v9  ;;  %v1062_v31 = vsel %vm992_vm2, %v10536_v55, %v6011_v12  ;;  %v6015_v9 = vunpack.i.l.bf16 %v6014_v14  ;;  %v1014_v13 = vsel %vm992_vm2, %v10538_v0, %v5946_v51 }
  0xd1   : > { %v1104_v33 = vpack.c.bf16 %v1062_v31, %v1061_v63  ;;  %v1047_v12 = vsel %vm992_vm2, %v7293_v43, %v5950_v60  ;;  %v5955_v47 = vunpack.i.l.bf16 %v7474_v25  ;;  %v10539_v63 = vld [vmem:[#allocation19_spill] sm:$0xff]  ;;  %v10540_v31 = vld [vmem:[#allocation20_spill] sm:$0xff]  ;;  %v5961_v60 = vunpack.i.h.bf16 %v7476_v38 }
  0xd2   : > { %1592 = vmatmul.mubr.bf16.gmra.mxu0 %v7532_v27 }
  0xd3   : > { %1599 = vmatprep.mubr.bf16.mxu0 %v1131_v32  ;;  %v5951_v32 = vunpack.i.h.bf16 %v7466_v15  ;;  %v5956_v15 = vunpack.i.h.bf16 %v7474_v25 }
  0xd5   : > { %v1048_v11 = vsel %vm992_vm2, %v7300_v39, %v5951_v32  ;;  %v5960_v32 = vunpack.i.l.bf16 %v7476_v38  ;;  %v1016_v25 = vsel %vm992_vm2, %v6979_v62, %v5956_v15  ;;  %v5966_v38 = vunpack.i.h.bf16 %v7479_v26 }
  0xd6   : > { %1697 = vmatmul.mubr.bf16.gmra.mxu1 %v1100_v34  ;;  %v6016_v34 = vunpack.i.h.bf16 %v6014_v14  ;;  %v6019_v14 = vpop.permute.xlu0 %6018 }
  0xd7   : > { %1704 = vmatprep.mubr.bf16.mxu1 %v7453_v10  ;;  %v1013_v10 = vsel %vm992_vm2, %v10537_v2, %v5945_v16  ;;  %v1063_v16 = vsel %vm992_vm2, %v10539_v63, %v6015_v9  ;;  %v6021_v2 = vunpack.i.h.bf16 %v6019_v14  ;;  %v1050_v9 = vsel %vm992_vm2, %v7321_v5, %v5961_v60 }
  0xd8   : > { %v7572_v24 = vpack.c.bf16 %v1014_v13, %v1013_v10  ;;  %v1064_v51 = vsel %vm992_vm2, %v10540_v31, %v6016_v34  ;;  %v6020_v10 = vunpack.i.l.bf16 %v6019_v14  ;;  %v1049_v34 = vsel %vm992_vm2, %v7318_v49, %v5960_v32 }
  0xd9   : > { %v5965_v13 = vunpack.i.l.bf16 %v7479_v26  ;;  %v1143_v15 = vpack.c.bf16 %v1050_v9, %v1049_v34  ;;  %v1018_v32 = vsel %vm992_vm2, %v7010_v30, %v5966_v38  ;;  %v10544_v30 = vld [vmem:[#allocation25_spill] sm:$0xff]  ;;  %v5981_v38 = vunpack.i.h.bf16 %v7495_v6 }
  0xda   : > { %1600 = vmatmul.mubr.bf16.gmra.mxu0 %v7552_v8  ;;  %v6029_v9 = vpop.permute.xlu0 %6028 }
  0xdb   : > { %1607 = vmatprep.mubr.bf16.mxu0 %v1135_v57  ;;  %v1139_v57 = vpack.c.bf16 %v1048_v11, %v1047_v12  ;;  %v10541_v12 = vld [vmem:[#allocation22_spill] sm:$0xff]  ;;  %v10542_v11 = vld [vmem:[#allocation23_spill] sm:$0xff] }
  0xdc   : > { %v1066_v62 = vsel %vm992_vm2, %v10542_v11, %v6021_v2 }
  0xde   : > { %1705 = vmatmul.mubr.bf16.gmra.mxu1 %v1104_v33  ;;  %v1108_v33 = vpack.c.bf16 %v1064_v51, %v1063_v16  ;;  %v5970_v16 = vunpack.i.l.bf16 %v7485_v35  ;;  %v6024_v51 = vpop.permute.xlu1 %6023 }
  0xdf   : > { %1712 = vmatprep.mubr.bf16.mxu1 %v7472_v17  ;;  %v1015_v17 = vsel %vm992_vm2, %v6977_v28, %v5955_v47  ;;  %v1065_v28 = vsel %vm992_vm2, %v10541_v12, %v6020_v10  ;;  %v5971_v47 = vunpack.i.h.bf16 %v7485_v35  ;;  %v6026_v60 = vunpack.i.h.bf16 %v6024_v51 }
  0xe0   : > { %v7592_v0 = vpack.c.bf16 %v1016_v25, %v1015_v17  ;;  %v6025_v26 = vunpack.i.l.bf16 %v6024_v51  ;;  %v1051_v14 = vsel %vm992_vm2, %v7327_v48, %v5970_v16  ;;  %v5976_v35 = vunpack.i.h.bf16 %v7493_v53 }
  0xe1   : > { %v5975_v10 = vunpack.i.l.bf16 %v7493_v53  ;;  %v1068_v34 = vsel %vm992_vm2, %v10544_v30, %v6026_v60  ;;  %v6030_v53 = vunpack.i.l.bf16 %v6029_v9 }
  0xe2   : > { %1608 = vmatmul.mubr.bf16.gmra.mxu0 %v7572_v24 }
  0xe3   : > { %1615 = vmatprep.mubr.bf16.mxu0 %v1139_v57  ;;  %v1112_v57 = vpack.c.bf16 %v1066_v62, %v1065_v28  ;;  %v6031_v62 = vunpack.i.h.bf16 %v6029_v9 }
  0xe6   : > { %1713 = vmatmul.mubr.bf16.gmra.mxu1 %v1108_v33  ;;  %v1052_v33 = vsel %vm992_vm2, %v7330_v45, %v5971_v47 }
  0xe7   : > { %1720 = vmatprep.mubr.bf16.mxu1 %v7491_v23  ;;  %v1017_v23 = vsel %vm992_vm2, %v7008_v29, %v5965_v13  ;;  %v1147_v17 = vpack.c.bf16 %v1052_v33, %v1051_v14  ;;  %v10543_v29 = vld [vmem:[#allocation24_spill] sm:$0xff]  ;;  %v5980_v13 = vunpack.i.l.bf16 %v7495_v6  ;;  %v1054_v6 = vsel %vm992_vm2, %v7346_v61, %v5981_v38  ;;  %v10549_v38 = vld [vmem:[#allocation43_spill] sm:$0xff] }
  0xe8   : > { %v7612_v2 = vpack.c.bf16 %v1018_v32, %v1017_v23  ;;  %v1067_v25 = vsel %vm992_vm2, %v10543_v29, %v6025_v26  ;;  %v10547_v26 = vld [vmem:[#allocation29_spill] sm:$0xff]  ;;  %v6034_v23 = vpop.permute.xlu1 %6033  ;;  %v5986_v32 = vunpack.i.h.bf16 %v7498_v59  ;;  %v5985_v14 = vunpack.i.l.bf16 %v7498_v59 }
  0xe9   : > { %v1116_v28 = vpack.c.bf16 %v1068_v34, %v1067_v25  ;;  %v1053_v51 = vsel %vm992_vm2, %v7343_v19, %v5980_v13  ;;  %v6035_v25 = vunpack.i.l.bf16 %v6034_v23  ;;  %v10548_v34 = vld [vmem:[#allocation42_spill] sm:$0xff]  ;;  %v6503_v29 = vld [vmem:[%s10222_s4 + $0x50] sm:$0xff]  }
  0xea   : > { %1616 = vmatmul.mubr.bf16.gmra.mxu0 %v7592_v0  ;;  %v1151_v33 = vpack.c.bf16 %v1054_v6, %v1053_v51  ;;  %v1021_v9 = vsel %vm992_vm2, %v10548_v34, %v5985_v14  ;;  %v1022_v13 = vsel %vm992_vm2, %v10549_v38, %v5986_v32  ;;  %v5996_v51 = vunpack.i.h.bf16 %v7514_v50  ;;  %v10552_v14 = vld [vmem:[#allocation47_spill] sm:$0xff] }
  0xeb   : > { %1623 = vmatprep.mubr.bf16.mxu0 %v1143_v15  ;;  %v10545_v15 = vld [vmem:[#allocation41_spill] sm:$0xff]  ;;  %v5995_v6 = vunpack.i.l.bf16 %v7514_v50 }
  0xec   : > { %v1020_v47 = vsel %vm992_vm2, %v10545_v15, %v5976_v35  ;;  %v5991_v35 = vunpack.i.h.bf16 %v7504_v42  ;;  %v1145_v15 = vpack.c.bf16 %v1022_v13, %v1021_v9  ;;  %v6044_v34 = vpop.permute.xlu1 %6043  ;;  %v10555_v13 = vld [vmem:[#allocation56_spill] sm:$0xff] }
  0xed   : > { %v6045_v38 = vunpack.i.l.bf16 %v6044_v34 }
  0xee   : > { %1721 = vmatmul.mubr.bf16.gmra.mxu1 %v1112_v57  ;;  %v10546_v57 = vld [vmem:[#allocation28_spill] sm:$0xff] }
  0xef   : > { %1728 = vmatprep.mubr.bf16.mxu1 %v7512_v44  ;;  %v1019_v44 = vsel %vm992_vm2, %v7043_v3, %v5975_v10  ;;  %v1069_v60 = vsel %vm992_vm2, %v10546_v57, %v6030_v53  ;;  %v1070_v3 = vsel %vm992_vm2, %v10547_v26, %v6031_v62  ;;  %v5990_v10 = vunpack.i.l.bf16 %v7504_v42  ;;  %v10550_v42 = vld [vmem:[#allocation31_spill] sm:$0xff]  ;;  %v10551_v53 = vld [vmem:[#allocation32_spill] sm:$0xff] }
  0xf0   : > { %v7627_v16 = vpack.c.bf16 %v1020_v47, %v1019_v44  ;;  %v1071_v62 = vsel %vm992_vm2, %v10550_v42, %v6035_v25  ;;  %v6039_v47 = vpop.permute.xlu0 %6038 }
  0xf1   : > { %v1055_v59 = vsel %vm992_vm2, %v7369_v20, %v5990_v10  ;;  %v6040_v32 = vunpack.i.l.bf16 %v6039_v47 }
  0xf2   : > { %1624 = vmatmul.mubr.bf16.gmra.mxu0 %v7612_v2 }
  0xf3   : > { %1631 = vmatprep.mubr.bf16.mxu0 %v1147_v17  ;;  %v1120_v17 = vpack.c.bf16 %v1070_v3, %v1069_v60 }
  0xf6   : > { %1729 = vmatmul.mubr.bf16.gmra.mxu1 %v1116_v28  ;;  %v1056_v28 = vsel %vm992_vm2, %v7372_v52, %v5991_v35  ;;  %v10553_v35 = vld [vmem:[#allocation35_spill] sm:$0xff] }
  0xf7   : > { %1736 = vmatprep.mubr.bf16.mxu1 %v7532_v27  ;;  %v6036_v27 = vunpack.i.h.bf16 %v6034_v23  ;;  %v1155_v60 = vpack.c.bf16 %v1056_v28, %v1055_v59  ;;  %v6041_v23 = vunpack.i.h.bf16 %v6039_v47  ;;  %v1073_v10 = vsel %vm992_vm2, %v10553_v35, %v6040_v32  ;;  %v10556_v59 = vld [vmem:[#allocation37_spill] sm:$0xff]  ;;  %v6049_v47 = vpop.permute.xlu0 %6048 }
  0xf8   : > { %v1075_v28 = vsel %vm992_vm2, %v10556_v59, %v6045_v38 }
  0xf9   : > { %v1072_v44 = vsel %vm992_vm2, %v10551_v53, %v6036_v27  ;;  %v1097_v27 = vpack.c.bf16 %v7190_v21, %v7179_v4  ;;  %v10558_v21 = vld [vmem:[#allocation57_spill] sm:$0xff] }
  0xfa   : > { %1632 = vmatmul.mubr.bf16.gmra.mxu0 %v7627_v16  ;;  %v1124_v3 = vpack.c.bf16 %v1072_v44, %v1071_v62  ;;  %v10557_v62 = vld [vmem:[#allocation38_spill] sm:$0xff]  ;;  %v1106_v44 = vpack.c.bf16 %v10558_v21, %v7212_v7 }
  0xfb   : > { %1639 = vmatprep.mubr.bf16.mxu0 %v1151_v33  ;;  %v1024_v33 = vsel %vm992_vm2, %v10552_v14, %v5996_v51  ;;  %v10563_v14 = vld [vmem:[#allocation62_spill] sm:$0xff] }
  0xfc   : > { %v10569_v21 = vld [vmem:[#allocation66_spill] sm:$0xff] }
  0xfe   : > { %1737 = vmatmul.mubr.bf16.gmra.mxu1 %v1120_v17  ;;  %v10554_v17 = vld [vmem:[#allocation36_spill] sm:$0xff] }
  0xff   : > { %1744 = vmatprep.mubr.bf16.mxu1 %v7552_v8  ;;  %v1023_v8 = vsel %vm992_vm2, %v7081_v46, %v5995_v6  ;;  %v1074_v50 = vsel %vm992_vm2, %v10554_v17, %v6041_v23  ;;  %v6046_v46 = vunpack.i.h.bf16 %v6044_v34  ;;  %v6051_v6 = vunpack.i.h.bf16 %v6049_v47  ;;  %v10561_v23 = vld [vmem:[#allocation39_spill] sm:$0xff] }
 0x100   : > { %v1149_v25 = vpack.c.bf16 %v1024_v33, %v1023_v8  ;;  %v1128_v9 = vpack.c.bf16 %v1074_v50, %v1073_v10  ;;  %v10562_v8 = vld [vmem:[#allocation40_spill] sm:$0xff]  ;;  %v10564_v33 = vld [vmem:[#allocation63_spill] sm:$0xff]  ;;  %v6054_v50 = vpop.permute.xlu1 %6053 }
 0x101   : > { %v1076_v4 = vsel %vm992_vm2, %v10557_v62, %v6046_v46  ;;  %v1078_v7 = vsel %vm992_vm2, %v10562_v8, %v6051_v6  ;;  %v1114_v10 = vpack.c.bf16 %v10564_v33, %v10563_v14  ;;  %v6056_v34 = vunpack.i.h.bf16 %v6054_v50  ;;  %v10565_v46 = vld [vmem:[#allocation64_spill] sm:$0xff] }
 0x102   : > { %1640 = vmatmul.mubr.bf16.gmra.mxu0 %v1145_v15  ;;  %v1132_v51 = vpack.c.bf16 %v1076_v4, %v1075_v28  ;;  %v10568_v28 = vld [vmem:[#allocation45_spill] sm:$0xff]  ;;  %v1130_v14 = vpack.c.bf16 %v7290_v36, %v7287_v58 }
 0x103   : > { %1647 = vmatprep.mubr.bf16.mxu0 %v1155_v60  ;;  %v6050_v60 = vunpack.i.l.bf16 %v6049_v47  ;;  %v1080_v4 = vsel %vm992_vm2, %v10568_v28, %v6056_v34  ;;  %v10574_v58 = vld [vmem:[#allocation53_spill] sm:$0xff] }
 0x104   : > { %v6064_v33 = vpop.permute.xlu1 %6063 }
 0x105   : > { %v1077_v32 = vsel %vm992_vm2, %v10561_v23, %v6050_v60  ;;  %v6065_v34 = vunpack.i.l.bf16 %v6064_v33 }
 0x106   : > { %1745 = vmatmul.mubr.bf16.gmra.mxu1 %v1124_v3 }
 0x107   : > { %1752 = vmatprep.mubr.bf16.mxu1 %v7572_v24  ;;  %v1102_v24 = vpack.c.bf16 %v10555_v13, %v7206_v41  ;;  %v10559_v41 = vld [vmem:[#allocation58_spill] sm:$0xff]  ;;  %v10567_v13 = vld [vmem:[#allocation44_spill] sm:$0xff] }
 0x10a   : > { %1648 = vmatmul.mubr.bf16.gmra.mxu0 %v1149_v25 }
 0x10b   : > { %5754 = vmatprep.mubr.msk.bf16.mxu0 %vm992_vm2, %v1097_v27  ;;  %v1136_v27 = vpack.c.bf16 %v1078_v7, %v1077_v32  ;;  %v10572_v32 = vld [vmem:[#allocation49_spill] sm:$0xff] }
 0x10e   : > { %1753 = vmatmul.mubr.bf16.gmra.mxu1 %v1128_v9  ;;  %v6055_v9 = vunpack.i.l.bf16 %v6054_v50 }
 0x10f   : > { %1760 = vmatprep.mubr.bf16.mxu1 %v7592_v0  ;;  %v10560_v0 = vld [vmem:[#allocation59_spill] sm:$0xff] }
 0x110   : > { %v1110_v3 = vpack.c.bf16 %v10560_v0, %v10559_v41  ;;  %v10571_v0 = vld [vmem:[#allocation48_spill] sm:$0xff] }
 0x112   : > { %5755 = vmatmul.mubr.msk.bf16.vlgmr.msra.gmra.mxu0 %vm992_vm2, %v1102_v24  ;;  %v1079_v24 = vsel %vm992_vm2, %v10567_v13, %v6055_v9  ;;  %v10573_v9 = vld [vmem:[#allocation52_spill] sm:$0xff] }
 0x113   : > { %5758 = vmatprep.mubr.msk.bf16.mxu0 %vm992_vm2, %v1106_v44  ;;  %v10570_v44 = vld [vmem:[#allocation67_spill] sm:$0xff]  ;;  %v1140_v6 = vpack.c.bf16 %v1080_v4, %v1079_v24  ;;  %v10575_v24 = vld [vmem:[#allocation50_spill] sm:$0xff] }
 0x114   : > { %v1122_v47 = vpack.c.bf16 %v10570_v44, %v10569_v21  ;;  %v10576_v21 = vld [vmem:[#allocation51_spill] sm:$0xff] }
 0x116   : > { %1761 = vmatmul.mubr.bf16.gmra.mxu1 %v1132_v51  ;;  %v6059_v51 = vpop.permute.xlu0 %6058 }
 0x117   : > { %1768 = vmatprep.mubr.bf16.mxu1 %v7612_v2  ;;  %v10566_v2 = vld [vmem:[#allocation65_spill] sm:$0xff]  ;;  %v6061_v60 = vunpack.i.h.bf16 %v6059_v51  ;;  %v6060_v41 = vunpack.i.l.bf16 %v6059_v51 }
 0x118   : > { %v1118_v38 = vpack.c.bf16 %v10566_v2, %v10565_v46  ;;  %v1083_v46 = vsel %vm992_vm2, %v10573_v9, %v6065_v34  ;;  %v1138_v2 = vpack.c.bf16 %v7321_v5, %v7318_v49  ;;  %v1142_v49 = vpack.c.bf16 %v7330_v45, %v7327_v48  ;;  %v10577_v5 = vld [vmem:[#allocation54_spill] sm:$0xff] }
 0x119   : > { %v1082_v7 = vsel %vm992_vm2, %v10572_v32, %v6061_v60 }
 0x11a   : > { %5759 = vmatmul.mubr.msk.bf16.gmra.mxu0 %vm992_vm2, %v1110_v3  ;;  %v1081_v3 = vsel %vm992_vm2, %v10571_v0, %v6060_v41 }
 0x11b   : > { %5762 = vmatprep.mubr.msk.bf16.mxu0 %vm992_vm2, %v1114_v10  ;;  %v6069_v10 = vpop.permute.xlu0 %6068  ;;  %v1144_v50 = vpack.c.bf16 %v1082_v7, %v1081_v3  ;;  %v1146_v7 = vpack.c.bf16 %v7346_v61, %v7343_v19  ;;  %v10581_v61 = vld [vmem:[#allocation46_spill] sm:$0xff] }
 0x11e   : > { %1769 = vmatmul.mubr.bf16.gmra.mxu1 %v1136_v27  ;;  %v6066_v27 = vunpack.i.h.bf16 %v6064_v33  ;;  %v10579_v33 = vld [vmem:[#allocation69_spill] sm:$0xff] }
 0x11f   : > { %1776 = vmatprep.mubr.bf16.mxu1 %v7627_v16  ;;  %v1126_v16 = vpack.c.bf16 %v7276_v56, %v7273_v18  ;;  %v6071_v18 = vunpack.i.h.bf16 %v6069_v10  ;;  %v6070_v56 = vunpack.i.l.bf16 %v6069_v10  ;;  %v983_v19 = vrot.slane %v10579_v33, 2 }
 0x120   : > { %v1084_v36 = vsel %vm992_vm2, %v10574_v58, %v6066_v27 }
 0x121   : > { %v1089_v4 = vsel %vm992_vm2, %v10575_v24, %v6070_v56  ;;  %v1090_v44 = vsel %vm992_vm2, %v10576_v21, %v6071_v18  ;;  %v1150_v56 = vpack.c.bf16 %v7372_v52, %v7369_v20 }
 0x122   : > { %5763 = vmatmul.mubr.msk.bf16.gmra.mxu0 %vm992_vm2, %v1118_v38  ;;  %v6074_v38 = vpop.permute.xlu1 %6073  ;;  %v1153_v51 = vpack.c.bf16 %v1090_v44, %v1089_v4  ;;  %v10585_v44 = vld [vmem:[#allocation61_spill] sm:$0xff] }
 0x123   : > { %5766 = vmatprep.mubr.msk.bf16.mxu0 %vm992_vm2, %v1122_v47  ;;  %v6079_v47 = vpop.permute.xlu0 %6078 }
 0x124   : > { %v6080_v60 = vunpack.i.l.bf16 %v6079_v47 }
 0x126   : > { %1777 = vmatmul.mubr.bf16.gmra.mxu1 %v1140_v6  ;;  %v6081_v6 = vunpack.i.h.bf16 %v6079_v47  ;;  %v1091_v10 = vsel %vm992_vm2, %v10579_v33, %v6080_v60  ;;  %v10586_v47 = vld [vmem:[#allocation60_spill] sm:$0xff] }
 0x127   : > { %1784 = vmatprep.mubr.bf16.mxu1 %v1145_v15  ;;  %v1134_v15 = vpack.c.bf16 %v7300_v39, %v7293_v43  ;;  %v1148_v43 = vpack.c.bf16 %v1084_v36, %v1083_v46  ;;  %v6076_v39 = vunpack.i.h.bf16 %v6074_v38  ;;  %v10582_v46 = vld [vmem:[#allocation71_spill] sm:$0xff]  ;;  %v10587_v20 = vpack.c.bf16 %v10585_v44, %v10586_v47 }
 0x12a   : > { %5767 = vmatmul.mubr.msk.bf16.gmra.mxu0 %vm992_vm2, %v1126_v16  ;;  %v10578_v16 = vld [vmem:[#allocation55_spill] sm:$0xff] }
 0x12b   : > { %5770 = vmatprep.mubr.msk.bf16.mxu0 %vm992_vm2, %v1130_v14  ;;  %v1086_v3 = vsel %vm992_vm2, %v10578_v16, %v6076_v39  ;;  %v6084_v14 = vpop.permute.xlu1 %6083 }
 0x12c   : > { %v6086_v48 = vunpack.i.h.bf16 %v6084_v14  ;;  %v6085_v34 = vunpack.i.l.bf16 %v6084_v14 }
 0x12e   : > { %1785 = vmatmul.mubr.bf16.gmra.mxu1 %v1144_v50  ;;  %v10580_v50 = vld [vmem:[#allocation70_spill] sm:$0xff]  ;;  %v1088_v36 = vsel %vm992_vm2, %v10582_v46, %v6086_v48 }
 0x12f   : > { %1792 = vmatprep.mubr.bf16.mxu1 %v1149_v25  ;;  %v6075_v25 = vunpack.i.l.bf16 %v6074_v38  ;;  %v1092_v27 = vsel %vm992_vm2, %v10580_v50, %v6081_v6  ;;  %v10583_v38 = vld [vmem:[#allocation68_spill] sm:$0xff] }
 0x130   : > { %v1157_v18 = vpack.c.bf16 %v1092_v27, %v1091_v10  ;;  %v10584_v24 = vunpack.c.l.bf16 %v10583_v38 }
 0x131   : > { %v1085_v41 = vsel %vm992_vm2, %v10577_v5, %v6075_v25 }
 0x132   : > { %5771 = vmatmul.mubr.msk.bf16.gmra.mxu0 %vm992_vm2, %v1134_v15  ;;  %v1152_v45 = vpack.c.bf16 %v1086_v3, %v1085_v41  ;;  %v1087_v15 = vsel %vm992_vm2, %v10581_v61, %v6085_v34  ;;  %v986_v4 = vrot.slane %v10584_v24, 2  ;;  %v6591_v3 = vmov 0.0  }
 0x133   : > { %5774 = vmatprep.mubr.msk.bf16.mxu0 %vm992_vm2, %v1138_v2  ;;  %v984_v2 = vrot.slane %v10580_v50, 2  ;;  %v1156_v21 = vpack.c.bf16 %v1088_v36, %v1087_v15  ;;  %2097 = vst.msk [vmem:[#allocation2 + $0x48] sm:$0xff] %vm992_vm2, %v6591_v3  ;;  %2088 = vst.msk [vmem:[#allocation2] sm:$0xff] %vm992_vm2, %v6591_v3  ;;  %v6493_v36 = vld [vmem:[%s10222_s4 + $0x78] sm:$0xff]  }
 0x134   : > { %2089 = vst.msk [vmem:[#allocation2 + $0x8] sm:$0xff] %vm992_vm2, %v6591_v3  ;;  %2090 = vst.msk [vmem:[#allocation2 + $0x10] sm:$0xff] %vm992_vm2, %v6591_v3  ;;  %5502 = vmatprep.subr.bf16.mxu1 %v6493_v36 }
 0x135   : > { %v985_v52 = vsel %vm613_vm1, %v983_v19, %v984_v2  ;;  %2091 = vst.msk [vmem:[#allocation2 + $0x18] sm:$0xff] %vm992_vm2, %v6591_v3  ;;  %2092 = vst.msk [vmem:[#allocation2 + $0x20] sm:$0xff] %vm992_vm2, %v6591_v3 }
 0x136   : > { %1793 = vmatmul.mubr.bf16.gmra.mxu1 %v1148_v43  ;;  %v987_v43 = vsel %vm613_vm1, %v984_v2, %v986_v4  ;;  %2093 = vst.msk [vmem:[#allocation2 + $0x28] sm:$0xff] %vm992_vm2, %v6591_v3  ;;  %2094 = vst.msk [vmem:[#allocation2 + $0x30] sm:$0xff] %vm992_vm2, %v6591_v3  ;;  %v6494_v2 = vld [vmem:[%s10222_s4 + $0x38] sm:$0xff]  }
 0x137   : > { %1800 = vmatprep.mubr.bf16.mxu1 %v1153_v51  ;;  %v1158_v39 = vpack.c.bf16 %v987_v43, %v985_v52  ;;  %2095 = vst.msk [vmem:[#allocation2 + $0x38] sm:$0xff] %vm992_vm2, %v6591_v3  ;;  %2096 = vst.msk [vmem:[#allocation2 + $0x40] sm:$0xff] %vm992_vm2, %v6591_v3  ;;  %5503 = vmatpush3.bf16.msra.mxu1 %v6494_v2 }
 0x138   : > { %2098 = vst.msk [vmem:[#allocation2 + $0x50] sm:$0xff] %vm992_vm2, %v6591_v3  ;;  %2099 = vst.msk [vmem:[#allocation2 + $0x58] sm:$0xff] %vm992_vm2, %v6591_v3 }
 0x139   : > { %2100 = vst.msk [vmem:[#allocation2 + $0x60] sm:$0xff] %vm992_vm2, %v6591_v3  ;;  %2101 = vst.msk [vmem:[#allocation2 + $0x68] sm:$0xff] %vm992_vm2, %v6591_v3 }
 0x13a   : > { %5775 = vmatmul.mubr.msk.bf16.gmra.mxu0 %vm992_vm2, %v1142_v49  ;;  %2102 = vst.msk [vmem:[#allocation2 + $0x70] sm:$0xff] %vm992_vm2, %v6591_v3  ;;  %2103 = vst.msk [vmem:[#allocation2 + $0x78] sm:$0xff] %vm992_vm2, %v6591_v3 }
 0x13b   : > { %5778 = vmatprep.mubr.msk.bf16.mxu0 %vm992_vm2, %v1146_v7  ;;  %2104 = vst.msk [vmem:[#allocation2 + $0x80] sm:$0xff] %vm992_vm2, %v6591_v3  ;;  %2105 = vst.msk [vmem:[#allocation2 + $0x88] sm:$0xff] %vm992_vm2, %v6591_v3 }
 0x13c   : > { %2106 = vst.msk [vmem:[#allocation2 + $0x90] sm:$0xff] %vm992_vm2, %v6591_v3  ;;  %2107 = vst.msk [vmem:[#allocation2 + $0x98] sm:$0xff] %vm992_vm2, %v6591_v3 }
 0x13d   : > { %2108 = vst.msk [vmem:[#allocation2 + $0xa0] sm:$0xff] %vm992_vm2, %v6591_v3  ;;  %2109 = vst.msk [vmem:[#allocation2 + $0xa8] sm:$0xff] %vm992_vm2, %v6591_v3 }
 0x13e   : > { %1801 = vmatmul.mubr.bf16.gmra.mxu1 %v1152_v45  ;;  %2110 = vst.msk [vmem:[#allocation2 + $0xb0] sm:$0xff] %vm992_vm2, %v6591_v3  ;;  %2111 = vst.msk [vmem:[#allocation2 + $0xb8] sm:$0xff] %vm992_vm2, %v6591_v3 }
 0x13f   : > { %1808 = vmatprep.mubr.bf16.mxu1 %v1157_v18  ;;  %2112 = vst.msk [vmem:[#allocation2 + $0xc0] sm:$0xff] %vm992_vm2, %v6591_v3  ;;  %2113 = vst.msk [vmem:[#allocation2 + $0xc8] sm:$0xff] %vm992_vm2, %v6591_v3 }
 0x140   : > { %2114 = vst.msk [vmem:[#allocation2 + $0xd0] sm:$0xff] %vm992_vm2, %v6591_v3  ;;  %2115 = vst.msk [vmem:[#allocation2 + $0xd8] sm:$0xff] %vm992_vm2, %v6591_v3 }
 0x141   : > { %2116 = vst.msk [vmem:[#allocation2 + $0xe0] sm:$0xff] %vm992_vm2, %v6591_v3  ;;  %2117 = vst.msk [vmem:[#allocation2 + $0xe8] sm:$0xff] %vm992_vm2, %v6591_v3 }
 0x142   : > { %5779 = vmatmul.mubr.msk.bf16.gmra.mxu0 %vm992_vm2, %v1150_v56  ;;  %2118 = vst.msk [vmem:[#allocation2 + $0xf0] sm:$0xff] %vm992_vm2, %v6591_v3  ;;  %2119 = vst.msk [vmem:[#allocation2 + $0xf8] sm:$0xff] %vm992_vm2, %v6591_v3 }
 0x143   : > { %5782 = vmatprep.mubr.msk.bf16.mxu0 %vm992_vm2, %v10587_v20  ;;  %2120 = vst.msk [vmem:[#allocation2 + $0x100] sm:$0xff] %vm992_vm2, %v6591_v3  ;;  %2121 = vst.msk [vmem:[#allocation2 + $0x108] sm:$0xff] %vm992_vm2, %v6591_v3 }
 0x144   : > { %2122 = vst.msk [vmem:[#allocation2 + $0x110] sm:$0xff] %vm992_vm2, %v6591_v3  ;;  %2123 = vst.msk [vmem:[#allocation2 + $0x118] sm:$0xff] %vm992_vm2, %v6591_v3 }
 0x145   : > { %2124 = vst.msk [vmem:[#allocation2 + $0x120] sm:$0xff] %vm992_vm2, %v6591_v3  ;;  %2125 = vst.msk [vmem:[#allocation2 + $0x128] sm:$0xff] %vm992_vm2, %v6591_v3 }
 0x146   : > { %1809 = vmatmul.mubr.bf16.gmra.mxu1 %v1156_v21  ;;  %2126 = vst.msk [vmem:[#allocation2 + $0x130] sm:$0xff] %vm992_vm2, %v6591_v3  ;;  %2127 = vst.msk [vmem:[#allocation2 + $0x138] sm:$0xff] %vm992_vm2, %v6591_v3 }
 0x147   : > { %2128 = vst.msk [vmem:[#allocation2 + $0x140] sm:$0xff] %vm992_vm2, %v6591_v3  ;;  %2129 = vst.msk [vmem:[#allocation2 + $0x148] sm:$0xff] %vm992_vm2, %v6591_v3 }
 0x148   : > { %2130 = vst.msk [vmem:[#allocation2 + $0x150] sm:$0xff] %vm992_vm2, %v6591_v3  ;;  %2131 = vst.msk [vmem:[#allocation2 + $0x158] sm:$0xff] %vm992_vm2, %v6591_v3 }
 0x149   : > { %2132 = vst.msk [vmem:[#allocation2 + $0x160] sm:$0xff] %vm992_vm2, %v6591_v3  ;;  %2133 = vst.msk [vmem:[#allocation2 + $0x168] sm:$0xff] %vm992_vm2, %v6591_v3 }
 0x14a   : > { %5783 = vmatmul.mubr.msk.bf16.gmra.mxu0 %vm992_vm2, %v1158_v39  ;;  %2134 = vst.msk [vmem:[#allocation2 + $0x170] sm:$0xff] %vm992_vm2, %v6591_v3  ;;  %2135 = vst.msk [vmem:[#allocation2 + $0x178] sm:$0xff] %vm992_vm2, %v6591_v3 }
 0x14b   : > { %2136 = vst.msk [vmem:[#allocation2 + $0x180] sm:$0xff] %vm992_vm2, %v6591_v3  ;;  %2137 = vst.msk [vmem:[#allocation2 + $0x188] sm:$0xff] %vm992_vm2, %v6591_v3 }
 0x14c   : > { %2138 = vst.msk [vmem:[#allocation2 + $0x190] sm:$0xff] %vm992_vm2, %v6591_v3  ;;  %2139 = vst.msk [vmem:[#allocation2 + $0x198] sm:$0xff] %vm992_vm2, %v6591_v3 }
 0x14d   : > { %2140 = vst.msk [vmem:[#allocation2 + $0x1a0] sm:$0xff] %vm992_vm2, %v6591_v3  ;;  %2141 = vst.msk [vmem:[#allocation2 + $0x1a8] sm:$0xff] %vm992_vm2, %v6591_v3 }
 0x14e   : > { %2142 = vst.msk [vmem:[#allocation2 + $0x1b0] sm:$0xff] %vm992_vm2, %v6591_v3  ;;  %2143 = vst.msk [vmem:[#allocation2 + $0x1b8] sm:$0xff] %vm992_vm2, %v6591_v3 }
 0x14f   : > { %2144 = vst.msk [vmem:[#allocation2 + $0x1c0] sm:$0xff] %vm992_vm2, %v6591_v3  ;;  %2145 = vst.msk [vmem:[#allocation2 + $0x1c8] sm:$0xff] %vm992_vm2, %v6591_v3 }
 0x150   : > { %2146 = vst.msk [vmem:[#allocation2 + $0x1d0] sm:$0xff] %vm992_vm2, %v6591_v3  ;;  %2147 = vst.msk [vmem:[#allocation2 + $0x1d8] sm:$0xff] %vm992_vm2, %v6591_v3 }
 0x151   : > { %2148 = vst.msk [vmem:[#allocation2 + $0x1e0] sm:$0xff] %vm992_vm2, %v6591_v3  ;;  %2149 = vst.msk [vmem:[#allocation2 + $0x1e8] sm:$0xff] %vm992_vm2, %v6591_v3 }
 0x152   : > { %v5274_v25 = vpop.f32.mrf.mxu0  ;;  %2150 = vst.msk [vmem:[#allocation2 + $0x1f0] sm:$0xff] %vm992_vm2, %v6591_v3  ;;  %2151 = vst.msk [vmem:[#allocation2 + $0x1f8] sm:$0xff] %vm992_vm2, %v6591_v3 }
 0x153   : > { %2152 = vst.msk [vmem:[#allocation2 + $0x200] sm:$0xff] %vm992_vm2, %v6591_v3  ;;  %2153 = vst.msk [vmem:[#allocation2 + $0x208] sm:$0xff] %vm992_vm2, %v6591_v3 }
 0x154   : > { %v5275_v51 = vpop.f32.mrf.mxu0  ;;  %2154 = vst.msk [vmem:[#allocation2 + $0x210] sm:$0xff] %vm992_vm2, %v6591_v3  ;;  %2155 = vst.msk [vmem:[#allocation2 + $0x218] sm:$0xff] %vm992_vm2, %v6591_v3 }
 0x155   : > { %v7759_v6 = vadd.f32 %v5275_v51, %v5274_v25  ;;  %2156 = vst.msk [vmem:[#allocation2 + $0x220] sm:$0xff] %vm992_vm2, %v6591_v3  ;;  %2157 = vst.msk [vmem:[#allocation2 + $0x228] sm:$0xff] %vm992_vm2, %v6591_v3  ;;  %v6495_v25 = vld [vmem:[%s10222_s4 + $0x70] sm:$0xff]  }
 0x156   : > { %v7761_v60 = vpop.f32.mrf.mxu0  ;;  %2158 = vst.msk [vmem:[#allocation2 + $0x230] sm:$0xff] %vm992_vm2, %v6591_v3  ;;  %2159 = vst.msk [vmem:[#allocation2 + $0x238] sm:$0xff] %vm992_vm2, %v6591_v3  ;;  %v6496_v51 = vld [vmem:[%s10222_s4 + $0x30] sm:$0xff]   ;;  %5504 = vmatprep.subr.bf16.mxu1 %v6495_v25 }
 0x157   : > { %5505 = vmatpush3.bf16.msra.mxu1 %v6496_v51 }
 0x158   : > { %v7763_v49 = vpop.f32.mrf.mxu0 }
 0x159   : > { %v5279_v5 = vadd.f32 %v7763_v49, %v7761_v60  ;;  %v6500_v60 = vld [vmem:[%s10222_s4 + $0x20] sm:$0xff]  }
 0x15a   : > { %v7765_v41 = vpop.f32.mrf.mxu0 }
 0x15c   : > { %v5281_v7 = vpop.f32.mrf.mxu0 }
 0x15d   : > { %v7912_v14 = vadd.f32 %v5281_v7, %v7765_v41 }
 0x15e   : > { %v7914_v33 = vpop.f32.mrf.mxu0 }
 0x160   : > { %v7916_v10 = vpop.f32.mrf.mxu0 }
 0x162   : > { %v5286_v50 = vpop.f32.mrf.mxu0 }
 0x164   : > { %v5287_v27 = vpop.f32.mrf.mxu0 }
 0x165   : > { %v7918_v45 = vadd.f32 %v5287_v27, %v5286_v50 }
 0x166   : > { %v7920_v48 = vpop.f32.mrf.mxu0 }
 0x168   : > { %v7922_v34 = vpop.f32.mrf.mxu0 }
 0x16a   : > { %v5292_v18 = vpop.f32.mrf.mxu0 }
 0x16c   : > { %v5293_v56 = vpop.f32.mrf.mxu0 }
 0x16d   : > { %v7924_v19 = vadd.f32 %v5293_v56, %v5292_v18 }
 0x16e   : > { %v7926_v15 = vpop.f32.mrf.mxu0 }
 0x170   : > { %v7934_v38 = vpop.f32.mrf.mxu0 }
 0x172   : > { %v5298_v24 = vpop.f32.mrf.mxu0 }
 0x174   : > { %v5299_v4 = vpop.f32.mrf.mxu0 }
 0x175   : > { %v7936_v21 = vadd.f32 %v5299_v4, %v5298_v24 }
 0x176   : > { %v7938_v44 = vpop.f32.mrf.mxu0 }
 0x178   : > { %v7940_v47 = vpop.f32.mrf.mxu0 }
 0x17a   : > { %v5304_v20 = vpop.f32.mrf.mxu0 }
 0x17c   : > { %v5305_v52 = vpop.f32.mrf.mxu0 }
 0x17d   : > { %v7942_v43 = vadd.f32 %v5305_v52, %v5304_v20  ;;  %v6497_v20 = vld [vmem:[%s10222_s4 + $0x68] sm:$0xff]  }
 0x17e   : > { %v7944_v39 = vpop.f32.mrf.mxu0  ;;  %v6498_v52 = vld [vmem:[%s10222_s4 + $0x28] sm:$0xff]   ;;  %5506 = vmatprep.subr.bf16.mxu1 %v6497_v20 }
 0x17f   : > { %5507 = vmatpush3.bf16.msra.mxu1 %v6498_v52 }
 0x180   : > { %v7952_v41 = vpop.f32.mrf.mxu0 }
 0x182   : > { %v5310_v3 = vpop.f32.mrf.mxu0 }
 0x184   : > { %v5311_v7 = vpop.f32.mrf.mxu0 }
 0x185   : > { %v7954_v50 = vadd.f32 %v5311_v7, %v5310_v3 }
 0x186   : > { %v7956_v27 = vpop.f32.mrf.mxu0 }
 0x187   : > { %10588 = vst [vmem:[#allocation6_spill] sm:$0xff] %v7954_v50 }
 0x188   : > { %v7958_v18 = vpop.f32.mrf.mxu0 }
 0x18a   : > { %v5316_v56 = vpop.f32.mrf.mxu0 }
 0x18c   : > { %v5317_v36 = vpop.f32.mrf.mxu0 }
 0x18d   : > { %v7960_v2 = vadd.f32 %v5317_v36, %v5316_v56 }
 0x18e   : > { %v7962_v24 = vpop.f32.mrf.mxu0  ;;  %v5386_v4 = vpop.f32.mrf.mxu1 }
 0x18f   : > { %10589 = vst [vmem:[#allocation7_spill] sm:$0xff] %v7960_v2 }
 0x190   : > { %v7970_v25 = vpop.f32.mrf.mxu0  ;;  %v5387_v51 = vpop.f32.mrf.mxu1 }
 0x191   : > { %v5388_v3 = vadd.f32 %v5387_v51, %v5386_v4 }
 0x192   : > { %v5322_v7 = vpop.f32.mrf.mxu0  ;;  %v5389_v16 = vpop.f32.mrf.mxu1 }
 0x193   : > { %v7973_v56 = vadd.f32 %v5388_v3, %v7759_v6  ;;  %v6499_v6 = vld [vmem:[%s10222_s4 + $0x60] sm:$0xff]  }
 0x194   : > { %v5323_v36 = vpop.f32.mrf.mxu0  ;;  %v5390_v46 = vpop.f32.mrf.mxu1  ;;  %5508 = vmatprep.subr.bf16.mxu1 %v6499_v6  ;;  %v6501_v6 = vld [vmem:[%s10222_s4 + $0x58] sm:$0xff]  }
 0x195   : > { %v7977_v61 = vadd.f32 %v5323_v36, %v5322_v7  ;;  %v5391_v32 = vadd.f32 %v5390_v46, %v5389_v16  ;;  %5509 = vmatpush3.bf16.msra.mxu1 %v6500_v60  ;;  %v6502_v60 = vld [vmem:[%s10222_s4 + $0x18] sm:$0xff]  }
 0x196   : > { %v7979_v58 = vpop.f32.mrf.mxu0  ;;  %v7981_v0 = vpop.f32.mrf.mxu1  ;;  %5510 = vmatprep.subr.bf16.mxu1 %v6501_v6 }
 0x197   : > { %10590 = vst [vmem:[#allocation3_spill] sm:$0xff] %v7977_v61  ;;  %v7983_v4 = vadd.f32 %v5391_v32, %v5279_v5 }
 0x198   : > { %v7985_v20 = vpop.f32.mrf.mxu0  ;;  %v7987_v52 = vpop.f32.mrf.mxu1 }
 0x199   : > { %5511 = vmatpush3.bf16.msra.mxu1 %v6502_v60 }
 0x19a   : > { %v5328_v49 = vpop.f32.mrf.mxu0  ;;  %v7995_v16 = vpop.f32.mrf.mxu1  ;;  %5512 = vmatprep.subr.bf16.mxu1 %v6503_v29 }
 0x19c   : > { %v5329_v46 = vpop.f32.mrf.mxu0  ;;  %v7997_v51 = vpop.f32.mrf.mxu1 }
 0x19d   : > { %v7999_v32 = vadd.f32 %v5329_v46, %v5328_v49 }
 0x19e   : > { %v8001_v5 = vpop.f32.mrf.mxu0  ;;  %v8003_v3 = vpop.f32.mrf.mxu1 }
 0x19f   : > { %10591 = vst [vmem:[#allocation27_spill] sm:$0xff] %v7999_v32 }
 0x1a0   : > { %v8005_v7 = vpop.f32.mrf.mxu0  ;;  %v8007_v36 = vpop.f32.mrf.mxu1 }
 0x1a2   : > { %v5334_v9 = vpop.f32.mrf.mxu0  ;;  %v8009_v8 = vpop.f32.mrf.mxu1 }
 0x1a4   : > { %v5335_v28 = vpop.f32.mrf.mxu0  ;;  %v8011_v23 = vpop.f32.mrf.mxu1 }
 0x1a5   : > { %v8019_v49 = vadd.f32 %v5335_v28, %v5334_v9 }
 0x1a6   : > { %v8021_v46 = vpop.f32.mrf.mxu0  ;;  %v8023_v13 = vpop.f32.mrf.mxu1 }
 0x1a7   : > { %10592 = vst [vmem:[#allocation4_spill] sm:$0xff] %v8019_v49 }
 0x1a8   : > { %v8025_v17 = vpop.f32.mrf.mxu0  ;;  %v8027_v62 = vpop.f32.mrf.mxu1 }
 0x1aa   : > { %v5340_v35 = vpop.f32.mrf.mxu0  ;;  %v8029_v59 = vpop.f32.mrf.mxu1 }
 0x1ac   : > { %v5341_v26 = vpop.f32.mrf.mxu0  ;;  %v8031_v53 = vpop.f32.mrf.mxu1 }
 0x1ad   : > { %v8033_v57 = vadd.f32 %v5341_v26, %v5340_v35  ;;  %v6504_v26 = vld [vmem:[%s10222_s4 + $0x10] sm:$0xff]  }
 0x1ae   : > { %v8035_v28 = vpop.f32.mrf.mxu0  ;;  %v8037_v9 = vpop.f32.mrf.mxu1  ;;  %5513 = vmatpush3.bf16.msra.mxu1 %v6504_v26 }
 0x1af   : > { %10593 = vst [vmem:[#allocation5_spill] sm:$0xff] %v8033_v57  ;;  %10594 = vst [vmem:[#allocation8_spill] sm:$0xff] %v8035_v28 }
 0x1b0   : > { %v8039_v42 = vpop.f32.mrf.mxu0  ;;  %v8041_v6 = vpop.f32.mrf.mxu1 }
 0x1b1   : > { %10595 = vst [vmem:[#allocation9_spill] sm:$0xff] %v8039_v42 }
 0x1b2   : > { %v5346_v60 = vpop.f32.mrf.mxu0  ;;  %v8043_v11 = vpop.f32.mrf.mxu1 }
 0x1b4   : > { %v5347_v30 = vpop.f32.mrf.mxu0  ;;  %v8045_v12 = vpop.f32.mrf.mxu1 }
 0x1b5   : > { %v8053_v35 = vadd.f32 %v5347_v30, %v5346_v60 }
 0x1b6   : > { %v5349_v55 = vpop.f32.mrf.mxu0  ;;  %v8055_v31 = vpop.f32.mrf.mxu1 }
 0x1b7   : > { %10596 = vst [vmem:[#allocation10_spill] sm:$0xff] %v8053_v35 }
 0x1b8   : > { %v5350_v22 = vpop.f32.mrf.mxu0  ;;  %v8057_v63 = vpop.f32.mrf.mxu1 }
 0x1b9   : > { %v8059_v37 = vadd.f32 %v5350_v22, %v5349_v55 }
 0x1ba   : > { %v5352_v40 = vpop.f32.mrf.mxu0  ;;  %v8061_v1 = vpop.f32.mrf.mxu1 }
 0x1bb   : > { %10597 = vst [vmem:[#allocation13_spill] sm:$0xff] %v8059_v37  ;;  %v6505_v37 = vld [vmem:[%s10222_s4 + $0x48] sm:$0xff]  }
 0x1bc   : > { %v5353_v54 = vpop.f32.mrf.mxu0  ;;  %v8063_v57 = vpop.f32.mrf.mxu1  ;;  %5514 = vmatprep.subr.bf16.mxu1 %v6505_v37  ;;  %v2195_v37 = vld [vmem:[#allocation2 + $0x10] sm:$0xff] }
 0x1bd   : > { %v8065_v49 = vadd.f32 %v5353_v54, %v5352_v40  ;;  %v6506_v54 = vld [vmem:[%s10222_s4 + $0x8] sm:$0xff]  }
 0x1be   : > { %v5355_v30 = vpop.f32.mrf.mxu0  ;;  %v8067_v60 = vpop.f32.mrf.mxu1  ;;  %5515 = vmatpush3.bf16.msra.mxu1 %v6506_v54 }
 0x1bf   : > { %10598 = vst [vmem:[#allocation17_spill] sm:$0xff] %v8065_v49 }
 0x1c0   : > { %v5356_v35 = vpop.f32.mrf.mxu0  ;;  %v8069_v32 = vpop.f32.mrf.mxu1 }
 0x1c1   : > { %v8071_v29 = vadd.f32 %v5356_v35, %v5355_v30 }
 0x1c2   : > { %v5358_v26 = vpop.f32.mrf.mxu0  ;;  %v8073_v61 = vpop.f32.mrf.mxu1 }
 0x1c3   : > { %10599 = vst [vmem:[#allocation21_spill] sm:$0xff] %v8071_v29 }
 0x1c4   : > { %v5359_v22 = vpop.f32.mrf.mxu0  ;;  %v8075_v55 = vpop.f32.mrf.mxu1 }
 0x1c5   : > { %10600 = vst [vmem:[#allocation26_spill] sm:$0xff] %v8075_v55  ;;  %v8083_v40 = vadd.f32 %v5359_v22, %v5358_v26  ;;  %v5394_v26 = vadd.f32 %v7987_v52, %v7981_v0  ;;  %v8101_v22 = vld [vmem:[#allocation2 + $0x8] sm:$0xff] }
 0x1c6   : > { %v5361_v49 = vpop.f32.mrf.mxu0  ;;  %v8085_v2 = vpop.f32.mrf.mxu1  ;;  %10608 = vst [vmem:[#allocation56_spill] sm:$0xff] %v8101_v22 }
 0x1c7   : > { %10601 = vst [vmem:[#allocation30_spill] sm:$0xff] %v8083_v40 }
 0x1c8   : > { %v5362_v35 = vpop.f32.mrf.mxu0  ;;  %v8087_v30 = vpop.f32.mrf.mxu1 }
 0x1c9   : > { %10602 = vst [vmem:[#allocation33_spill] sm:$0xff] %v8087_v30  ;;  %v8089_v29 = vadd.f32 %v5362_v35, %v5361_v49 }
 0x1ca   : > { %v8091_v50 = vpop.f32.mrf.mxu0  ;;  %v8093_v42 = vpop.f32.mrf.mxu1 }
 0x1cb   : > { %10603 = vst [vmem:[#allocation34_spill] sm:$0xff] %v8089_v29  ;;  %10604 = vst [vmem:[#allocation41_spill] sm:$0xff] %v8091_v50  ;;  %v10345_v29 = vrot.slane %v8101_v22, 1  ;;  %v2298_v50 = vrot.slane %v2195_v37, 1  ;;  %v8127_v37 = vld [vmem:[%s10221_s3] ss:$0 sm:$0xff] }
 0x1cc   : > { %10605 = vst [vmem:[#allocation42_spill] sm:$0xff] %v8093_v42  ;;  %v8095_v28 = vpop.f32.mrf.mxu0  ;;  %v8097_v55 = vpop.f32.mrf.mxu1 }
 0x1cd   : > { %10606 = vst [vmem:[#allocation43_spill] sm:$0xff] %v8095_v28  ;;  %10607 = vst [vmem:[#allocation47_spill] sm:$0xff] %v8097_v55  ;;  %v5397_v28 = vadd.f32 %v7997_v51, %v7995_v16  ;;  %v1699_v55 = vadd.f32 %v5394_v26, %v7912_v14  ;;  %v2299_v51 = vsel %vm436_vm0, %v10345_v29, %v2298_v50  ;;  %v6507_v26 = vld [vmem:[%s10222_s4 + $0x40] sm:$0xff]  }
 0x1ce   : > { %v8103_v54 = vpop.f32.mrf.mxu0  ;;  %v8105_v40 = vpop.f32.mrf.mxu1  ;;  %5516 = vmatprep.subr.bf16.mxu1 %v6507_v26  ;;  %v5400_v29 = vadd.f32 %v8007_v36, %v8003_v3 }
 0x1cf   : > { %10609 = vst [vmem:[#allocation57_spill] sm:$0xff] %v8103_v54  ;;  %10610 = vst [vmem:[#allocation58_spill] sm:$0xff] %v8105_v40  ;;  %v8120_v54 = vld [vmem:[%s10220_s2] ss:$0 sm:$0xff] }
 0x1d0   : > { %v8107_v49 = vpop.f32.mrf.mxu0  ;;  %v8109_v35 = vpop.f32.mrf.mxu1 }
 0x1d1   : > { %10611 = vst [vmem:[#allocation59_spill] sm:$0xff] %v8107_v49  ;;  %10612 = vst [vmem:[#allocation62_spill] sm:$0xff] %v8109_v35  ;;  %v5285_v49 = vadd.f32 %v7916_v10, %v7914_v33  ;;  %v6508_v33 = vld [vmem:[%s10222_s4] sm:$0xff]   ;;  %v5406_v10 = vadd.f32 %v8027_v62, %v8023_v13  ;;  %v5291_v62 = vadd.f32 %v7922_v34, %v7920_v48 }
 0x1d2   : > { %v8115_v0 = vpop.f32.mrf.mxu1  ;;  %v5756_v52 = vpop.f32.mrf.mxu0  ;;  %5517 = vmatpush3.bf16.msra.mxu1 %v6508_v33  ;;  %v5409_v13 = vadd.f32 %v8031_v53, %v8029_v59  ;;  %v8165_v48 = vadd.f32 %v7940_v47, %v7938_v44  ;;  %v5309_v53 = vadd.f32 %v7952_v41, %v7944_v39  ;;  %v5403_v44 = vadd.f32 %v8011_v23, %v8009_v8 }
 0x1d3   : > { %10613 = vst [vmem:[#allocation63_spill] sm:$0xff] %v8115_v0  ;;  %v1860_v35 = vadd.f32 %v5756_v52, %v1699_v55  ;;  %v5412_v23 = vadd.f32 %v8041_v6, %v8037_v9  ;;  %v5421_v8 = vadd.f32 %v8063_v57, %v8061_v1  ;;  %v8208_v9 = vadd.f32 %v8005_v7, %v8001_v5 }
 0x1d4   : > { %v8129_v16 = vpop.f32.mrf.mxu1  ;;  %v1851_v14 = vpop.f32.mrf.mxu0  ;;  %v8212_v1 = vadd.f32 %v8025_v17, %v8021_v46  ;;  %v5415_v5 = vadd.f32 %v8045_v12, %v8043_v11  ;;  %v10615_v12 = vld [vmem:[#allocation26_spill] sm:$0xff] }
 0x1d5   : > { %10614 = vst [vmem:[#allocation64_spill] sm:$0xff] %v8129_v16  ;;  %v1987_v55 = vmul.f32 %v8120_v54, %v1860_v35  ;;  %v1852_v52 = vadd.f32 %v1851_v14, %v7973_v56  ;;  %v1702_v16 = vadd.f32 %v5397_v28, %v5285_v49  ;;  %v8156_v49 = vpack.i.bf16 %v2298_v50, %v2299_v51 }
 0x1d6   : > { %v8144_v0 = vpop.f32.mrf.mxu1  ;;  %v5757_v22 = vpop.f32.mrf.mxu0  ;;  %v1715_v14 = vadd.f32 %v5406_v10, %v7924_v19  ;;  %v5427_v11 = vadd.f32 %v10615_v12, %v8073_v61  ;;  %v10628_v12 = vld [vmem:[#allocation56_spill] sm:$0xff] }
 0x1d7   : > { %v2026_v40 = vadd.f32 %v8127_v37, %v1987_v55  ;;  %v1985_v42 = vmul.f32 %v8120_v54, %v1852_v52  ;;  %v1863_v30 = vadd.f32 %v5757_v22, %v1702_v16  ;;  %v5297_v22 = vadd.f32 %v7934_v38, %v7926_v15 }
 0x1d8   : > { %v8154_v56 = vpop.f32.mrf.mxu1  ;;  %v1854_v28 = vpop.f32.mrf.mxu0  ;;  %v1707_v15 = vadd.f32 %v5400_v29, %v7918_v45  ;;  %v8177_v38 = vadd.f32 %v7958_v18, %v7956_v27  ;;  %v8190_v27 = vadd.f32 %v7970_v25, %v7962_v24 }
 0x1d9   : > { %v2058_v35 = vmax.f32 %v2026_v40, 0.0  ;;  %v2024_v3 = vadd.f32 %v8127_v37, %v1985_v42  ;;  %v1988_v36 = vmul.f32 %v8120_v54, %v1863_v30  ;;  %v1855_v59 = vadd.f32 %v1854_v28, %v7983_v4 }
 0x1da   : > { %v8170_v34 = vpop.f32.mrf.mxu1  ;;  %v5760_v50 = vpop.f32.mrf.mxu0  ;;  %v1718_v4 = vadd.f32 %v5409_v13, %v5297_v22  ;;  %v5418_v30 = vadd.f32 %v8057_v63, %v8055_v31  ;;  %v8201_v31 = vadd.f32 %v7985_v20, %v7979_v58  ;;  %v1710_v58 = vadd.f32 %v5403_v44, %v5291_v62 }
 0x1db   : > { %2163 = vst.msk [vmem:[#allocation2 + $0x48] sm:$0xff] %vm992_vm2, %v2058_v35  ;;  %v2056_v42 = vmax.f32 %v2024_v3, 0.0  ;;  %v2027_v19 = vadd.f32 %v8127_v37, %v1988_v36  ;;  %v1876_v40 = vadd.f32 %v5760_v50, %v1715_v14  ;;  %v1986_v47 = vmul.f32 %v8120_v54, %v1855_v59  ;;  %v2197_v36 = vld [vmem:[#allocation2 + $0x20] sm:$0xff]  ;;  %v10616_v14 = vld [vmem:[#allocation33_spill] sm:$0xff]  ;;  %v10617_v59 = vld [vmem:[#allocation42_spill] sm:$0xff] }
 0x1dc   : > { %v8182_v39 = vpop.f32.mrf.mxu1  ;;  %v1867_v41 = vpop.f32.mrf.mxu0  ;;  %v1731_v52 = vadd.f32 %v5418_v30, %v7942_v43  ;;  %v1723_v13 = vadd.f32 %v5412_v23, %v7936_v21  ;;  %v1734_v62 = vadd.f32 %v5421_v8, %v5309_v53  ;;  %v5424_v28 = vadd.f32 %v8069_v32, %v8067_v60  ;;  %v10618_v50 = vld [vmem:[#allocation47_spill] sm:$0xff]  ;;  %v6509_v8 = vld [vmem:[%s10222_s4 + $0xf8] sm:$0xff]  }
 0x1dd   : > { %2161 = vst.msk [vmem:[#allocation2 + $0x28] sm:$0xff] %vm992_vm2, %v2056_v42  ;;  %v2059_v16 = vmax.f32 %v2027_v19, 0.0  ;;  %v1991_v45 = vmul.f32 %v8120_v54, %v1876_v40  ;;  %v1868_v29 = vadd.f32 %v1867_v41, %v1707_v15  ;;  %v2025_v18 = vadd.f32 %v8127_v37, %v1986_v47  ;;  %v10619_v19 = vld [vmem:[#allocation58_spill] sm:$0xff]  ;;  %v10622_v41 = vld [vmem:[#allocation9_spill] sm:$0xff]  ;;  %5614 = vmatprep.subr.bf16.mxu0 %v6509_v8 }
 0x1de   : > { %v8197_v51 = vpop.f32.mrf.mxu1  ;;  %v5761_v63 = vpop.f32.mrf.mxu0  ;;  %v5430_v22 = vadd.f32 %v10616_v14, %v8085_v2  ;;  %v5433_v21 = vadd.f32 %v10618_v50, %v10617_v59  ;;  %v10620_v40 = vld [vmem:[#allocation62_spill] sm:$0xff]  ;;  %v10621_v2 = vld [vmem:[#allocation8_spill] sm:$0xff]  ;;  %v1726_v23 = vadd.f32 %v5415_v5, %v8165_v48 }
 0x1df   : > { %2164 = vst.msk [vmem:[#allocation2 + $0x50] sm:$0xff] %vm992_vm2, %v2059_v16  ;;  %v2030_v24 = vadd.f32 %v8127_v37, %v1991_v45  ;;  %v1989_v25 = vmul.f32 %v8120_v54, %v1868_v29  ;;  %v1879_v26 = vadd.f32 %v5761_v63, %v1718_v4  ;;  %v2057_v57 = vmax.f32 %v2025_v18, 0.0  ;;  %v6510_v18 = vld [vmem:[%s10222_s4 + $0xb8] sm:$0xff]  }
 0x1e0   : > { %v8214_v6 = vpop.f32.mrf.mxu1  ;;  %v1870_v20 = vpop.f32.mrf.mxu0  ;;  %v5436_v15 = vadd.f32 %v10620_v40, %v10619_v19  ;;  %v8246_v4 = vadd.f32 %v10622_v41, %v10621_v2  ;;  %5615 = vmatpush3.bf16.msra.mxu0 %v6510_v18  ;;  %v6511_v59 = vld [vmem:[%s10222_s4 + $0x118] sm:$0xff]  }
 0x1e1   : > { %v2062_v33 = vmax.f32 %v2030_v24, 0.0  ;;  %v2028_v10 = vadd.f32 %v8127_v37, %v1989_v25  ;;  %v1992_v55 = vmul.f32 %v8120_v54, %v1879_v26  ;;  %2162 = vst.msk [vmem:[#allocation2 + $0x30] sm:$0xff] %vm992_vm2, %v2057_v57  ;;  %v1871_v7 = vadd.f32 %v1870_v20, %v1710_v58  ;;  %v10623_v26 = vld [vmem:[#allocation6_spill] sm:$0xff]  ;;  %5786 = vmatprep.subr.bf16.mxu1 %v6511_v59 }
 0x1e2   : > { %v8222_v17 = vpop.f32.mrf.mxu1  ;;  %v5764_v46 = vpop.f32.mrf.mxu0  ;;  %v1739_v57 = vadd.f32 %v5424_v28, %v10623_v26  ;;  %v8294_v19 = vld [vmem:[#allocation2 + $0x48] sm:$0xff] }
 0x1e3   : > { %2167 = vst.msk [vmem:[#allocation2 + $0x88] sm:$0xff] %vm992_vm2, %v2062_v33  ;;  %v2060_v35 = vmax.f32 %v2028_v10, 0.0  ;;  %v2031_v43 = vadd.f32 %v8127_v37, %v1992_v55  ;;  %v1892_v3 = vadd.f32 %v5764_v46, %v1731_v52  ;;  %v1990_v53 = vmul.f32 %v8120_v54, %v1871_v7  ;;  %v10624_v33 = vld [vmem:[#allocation7_spill] sm:$0xff] }
 0x1e4   : > { %v8236_v42 = vpop.f32.mrf.mxu1  ;;  %v1883_v32 = vpop.f32.mrf.mxu0  ;;  %v8238_v60 = vld [vmem:[#allocation2 + $0x28] sm:$0xff]  ;;  %v1747_v10 = vadd.f32 %v5430_v22, %v10624_v33  ;;  %v1750_v55 = vadd.f32 %v5433_v21, %v8190_v27  ;;  %v8269_v52 = vadd.f32 %v5427_v11, %v8177_v38  ;;  %v10629_v11 = vrot.slane %v10628_v12, 1 }
 0x1e5   : > { %2165 = vst.msk [vmem:[#allocation2 + $0x68] sm:$0xff] %vm992_vm2, %v2060_v35  ;;  %v2063_v44 = vmax.f32 %v2031_v43, 0.0  ;;  %v1995_v61 = vmul.f32 %v8120_v54, %v1892_v3  ;;  %v1884_v47 = vadd.f32 %v1883_v32, %v1723_v13  ;;  %v2029_v30 = vadd.f32 %v8127_v37, %v1990_v53  ;;  %v10626_v35 = vld [vmem:[#allocation63_spill] sm:$0xff]  ;;  %v10627_v43 = vld [vmem:[#allocation64_spill] sm:$0xff] }
 0x1e6   : > { %v8249_v16 = vpop.f32.mrf.mxu1  ;;  %v5765_v45 = vpop.f32.mrf.mxu0  ;;  %v6087_v29 = vpack.i.bf16 %v8238_v60, %v2197_v36  ;;  %v5439_v3 = vadd.f32 %v10627_v43, %v10626_v35  ;;  %v8287_v22 = vrot.slane %v8238_v60, 1  ;;  %v2201_v32 = vld [vmem:[#allocation2 + $0x40] sm:$0xff]  ;;  %v8296_v40 = vld [vmem:[#allocation2 + $0x50] sm:$0xff] }
 0x1e7   : > { %2168 = vst.msk [vmem:[#allocation2 + $0x90] sm:$0xff] %vm992_vm2, %v2063_v44  ;;  %v2034_v63 = vadd.f32 %v8127_v37, %v1995_v61  ;;  %v1993_v24 = vmul.f32 %v8120_v54, %v1884_v47  ;;  %v1895_v25 = vadd.f32 %v5765_v45, %v1734_v62  ;;  %v2061_v58 = vmax.f32 %v2029_v30, 0.0  ;;  %v10625_v62 = vld [vmem:[#allocation3_spill] sm:$0xff]  ;;  %v6512_v35 = vld [vmem:[%s10222_s4 + $0xf0] sm:$0xff]  }
 0x1e8   : > { %6088 = vrot.lane.b32.xlu0 %v6087_v29, %s6590_s19  ;;  %v8264_v48 = vpop.f32.mrf.mxu1  ;;  %v1886_v20 = vpop.f32.mrf.mxu0  ;;  %v8273_v13 = vld [vmem:[#allocation2 + $0x30] sm:$0xff]  ;;  %v8276_v28 = vadd.f32 %v5436_v15, %v10625_v62  ;;  %10630 = vst [vmem:[#allocation65_spill] sm:$0xff] %v8287_v22  ;;  %v5442_v44 = vadd.f32 %v8154_v56, %v8144_v0  ;;  %v5445_v61 = vadd.f32 %v8182_v39, %v8170_v34  ;;  %v8322_v8 = vrot.slane %v8296_v40, 1 }
 0x1e9   : > { %v2066_v5 = vmax.f32 %v2034_v63, 0.0  ;;  %v2032_v7 = vadd.f32 %v8127_v37, %v1993_v24  ;;  %v1996_v46 = vmul.f32 %v8120_v54, %v1895_v25  ;;  %2166 = vst.msk [vmem:[#allocation2 + $0x70] sm:$0xff] %vm992_vm2, %v2061_v58  ;;  %v1887_v27 = vadd.f32 %v1886_v20, %v1726_v23  ;;  %v2205_v63 = vld [vmem:[#allocation2 + $0x60] sm:$0xff]  ;;  %v6513_v43 = vld [vmem:[%s10222_s4 + $0xb0] sm:$0xff]   ;;  %5616 = vmatprep.subr.bf16.mxu0 %v6512_v35 }
 0x1ea   : > { %v8281_v38 = vpop.f32.mrf.mxu1  ;;  %v5768_v36 = vpop.f32.mrf.mxu0  ;;  %v6092_v14 = vpack.i.bf16 %v10629_v11, %v8273_v13  ;;  %v8299_v15 = vrot.slane %v8273_v13, 1  ;;  %v5448_v30 = vadd.f32 %v8214_v6, %v8197_v51  ;;  %v6107_v23 = vpack.i.bf16 %v8287_v22, %v8296_v40  ;;  %10632 = vst [vmem:[#allocation67_spill] sm:$0xff] %v8322_v8  ;;  %v10634_v20 = vld [vmem:[#allocation27_spill] sm:$0xff]  ;;  %5617 = vmatpush3.bf16.msra.mxu0 %v6513_v43 }
 0x1eb   : > { %2171 = vst.msk [vmem:[#allocation2 + $0xc8] sm:$0xff] %vm992_vm2, %v2066_v5  ;;  %v2064_v50 = vmax.f32 %v2032_v7, 0.0  ;;  %v2035_v21 = vadd.f32 %v8127_v37, %v1996_v46  ;;  %v1908_v53 = vadd.f32 %v5768_v36, %v1747_v10  ;;  %v1994_v47 = vmul.f32 %v8120_v54, %v1887_v27 }
 0x1ec   : > { %10631 = vst [vmem:[#allocation66_spill] sm:$0xff] %v8299_v15  ;;  %6093 = vrot.lane.b32.xlu1 %v6092_v14, %s6590_s19  ;;  %6098 = vrot.lane.b32.xlu0 %v8156_v49, %s6590_s19  ;;  %v8309_v2 = vpop.f32.mrf.mxu1  ;;  %v1899_v41 = vpop.f32.mrf.mxu0  ;;  %v6102_v49 = vpack.i.bf16 %v8294_v19, %v2201_v32  ;;  %v8327_v24 = vld [vmem:[#allocation2 + $0x68] sm:$0xff]  ;;  %v8332_v25 = vsel %vm436_vm0, %v8287_v22, %v8299_v15  ;;  %v8340_v10 = vrot.slane %v8294_v19, 1 }
 0x1ed   : > { %2169 = vst.msk [vmem:[#allocation2 + $0xa8] sm:$0xff] %vm992_vm2, %v2064_v50  ;;  %v2067_v45 = vmax.f32 %v2035_v21, 0.0  ;;  %v1999_v0 = vmul.f32 %v8120_v54, %v1908_v53  ;;  %v1900_v56 = vadd.f32 %v1899_v41, %v1739_v57  ;;  %v2033_v34 = vadd.f32 %v8127_v37, %v1994_v47  ;;  %10633 = vst [vmem:[#allocation50_spill] sm:$0xff] %v8332_v25  ;;  %v10637_v21 = vld [vmem:[#allocation4_spill] sm:$0xff] }
 0x1ee   : > { %v8316_v39 = vpop.f32.mrf.mxu1  ;;  %v5769_v29 = vpop.f32.mrf.mxu0  ;;  %v1763_v33 = vadd.f32 %v5442_v44, %v10634_v20  ;;  %10635 = vst [vmem:[#allocation51_spill] sm:$0xff] %v8340_v10  ;;  %v1766_v62 = vadd.f32 %v5445_v61, %v8208_v9  ;;  %v6117_v36 = vpack.i.bf16 %v8327_v24, %v2205_v63  ;;  %v6112_v9 = vpack.i.bf16 %v8299_v15, %v8332_v25  ;;  %v8370_v50 = vld [vmem:[#allocation2 + $0x90] sm:$0xff]  ;;  %v6514_v63 = vld [vmem:[%s10222_s4 + $0xe8] sm:$0xff]  }
 0x1ef   : > { %2172 = vst.msk [vmem:[#allocation2 + $0xd0] sm:$0xff] %vm992_vm2, %v2067_v45  ;;  %v2038_v51 = vadd.f32 %v8127_v37, %v1999_v0  ;;  %v1997_v6 = vmul.f32 %v8120_v54, %v1900_v56  ;;  %v1911_v18 = vadd.f32 %v5769_v29, %v1750_v55  ;;  %v2065_v26 = vmax.f32 %v2033_v34, 0.0  ;;  %5618 = vmatprep.subr.bf16.mxu0 %v6514_v63 }
 0x1f0   : > { %6103 = vrot.lane.b32.xlu1 %v6102_v49, %s6590_s19  ;;  %6108 = vrot.lane.b32.xlu0 %v6107_v23, %s6590_s19  ;;  %v8336_v57 = vpop.f32.mrf.mxu1  ;;  %v1902_v58 = vpop.f32.mrf.mxu0  ;;  %v8343_v55 = vadd.f32 %v5439_v3, %v8201_v31  ;;  %v8364_v12 = vsel %vm436_vm0, %v8340_v10, %v8322_v8  ;;  %v8373_v53 = vadd.f32 %v5448_v30, %v10637_v21  ;;  %v8397_v29 = vrot.slane %v8327_v24, 1  ;;  %v2209_v49 = vld [vmem:[#allocation2 + $0x80] sm:$0xff]  ;;  %v10645_v21 = vld [vmem:[#allocation41_spill] sm:$0xff] }
 0x1f1   : > { %v2070_v5 = vmax.f32 %v2038_v51, 0.0  ;;  %v2036_v7 = vadd.f32 %v8127_v37, %v1997_v6  ;;  %v2000_v46 = vmul.f32 %v8120_v54, %v1911_v18  ;;  %2170 = vst.msk [vmem:[#allocation2 + $0xb0] sm:$0xff] %vm992_vm2, %v2065_v26  ;;  %v1903_v31 = vadd.f32 %v1902_v58, %v8269_v52  ;;  %10636 = vst [vmem:[#allocation69_spill] sm:$0xff] %v8364_v12  ;;  %v8368_v52 = vld [vmem:[#allocation2 + $0x70] sm:$0xff]  ;;  %v6515_v26 = vld [vmem:[%s10222_s4 + $0xa8] sm:$0xff]  }
 0x1f2   : > { %v8356_v3 = vpop.f32.mrf.mxu1  ;;  %v5772_v27 = vpop.f32.mrf.mxu0  ;;  %v8377_v32 = vadd.f32 %v8236_v42, %v8222_v17  ;;  %v5454_v44 = vadd.f32 %v8264_v48, %v8249_v16  ;;  %v6127_v42 = vpack.i.bf16 %v8322_v8, %v8364_v12  ;;  %v8391_v16 = vld [vmem:[#allocation2 + $0x88] sm:$0xff]  ;;  %v6122_v34 = vpack.i.bf16 %v8340_v10, %v8368_v52  ;;  %10638 = vst [vmem:[#allocation70_spill] sm:$0xff] %v8397_v29  ;;  %v8915_v8 = vld [vmem:[#allocation2 + $0x1d8] sm:$0xff]  ;;  %v8917_v10 = vld [vmem:[#allocation2 + $0x230] sm:$0xff] }
 0x1f3   : > { %2175 = vst.msk [vmem:[#allocation2 + $0x108] sm:$0xff] %vm992_vm2, %v2070_v5  ;;  %v2068_v11 = vmax.f32 %v2036_v7, 0.0  ;;  %v2039_v14 = vadd.f32 %v8127_v37, %v2000_v46  ;;  %v1924_v59 = vadd.f32 %v5772_v27, %v1763_v33  ;;  %v1998_v61 = vmul.f32 %v8120_v54, %v1903_v31  ;;  %v10641_v7 = vld [vmem:[#allocation5_spill] sm:$0xff]  ;;  %5619 = vmatpush3.bf16.msra.mxu0 %v6515_v26 }
 0x1f4   : > { %6118 = vrot.lane.b32.xlu0 %v6117_v36, %s6590_s19  ;;  %6113 = vrot.lane.b32.xlu1 %v6112_v9, %s6590_s19  ;;  %v8384_v47 = vpop.f32.mrf.mxu1  ;;  %v1915_v41 = vpop.f32.mrf.mxu0  ;;  %v8400_v23 = vrot.slane %v8370_v50, 1  ;;  %v8406_v18 = vrot.slane %v8368_v52, 1  ;;  %v5457_v58 = vadd.f32 %v8309_v2, %v8281_v38  ;;  %v1779_v46 = vadd.f32 %v5454_v44, %v10641_v7  ;;  %v10646_v44 = vld [vmem:[#allocation43_spill] sm:$0xff] }
 0x1f5   : > { %2173 = vst.msk [vmem:[#allocation2 + $0xe8] sm:$0xff] %vm992_vm2, %v2068_v11  ;;  %v2071_v30 = vmax.f32 %v2039_v14, 0.0  ;;  %v2003_v45 = vmul.f32 %v8120_v54, %v1924_v59  ;;  %v1916_v17 = vadd.f32 %v1915_v41, %v8276_v28  ;;  %v2037_v48 = vadd.f32 %v8127_v37, %v1998_v61 }
 0x1f6   : > { %v5464_v0 = vpop.f32.mrf.mxu1  ;;  %v5773_v56 = vpop.f32.mrf.mxu0  ;;  %10639 = vst [vmem:[#allocation68_spill] sm:$0xff] %v8400_v23  ;;  %10640 = vst [vmem:[#allocation61_spill] sm:$0xff] %v8406_v18  ;;  %v6132_v27 = vpack.i.bf16 %v8391_v16, %v2209_v49  ;;  %v5460_v38 = vadd.f32 %v8336_v57, %v8316_v39  ;;  %v6137_v11 = vpack.i.bf16 %v8397_v29, %v8370_v50  ;;  %v8457_v49 = vld [vmem:[#allocation2 + $0xa8] sm:$0xff] }
 0x1f7   : > { %2176 = vst.msk [vmem:[#allocation2 + $0x110] sm:$0xff] %vm992_vm2, %v2071_v30  ;;  %v2042_v28 = vadd.f32 %v8127_v37, %v2003_v45  ;;  %v2001_v51 = vmul.f32 %v8120_v54, %v1916_v17  ;;  %v1927_v6 = vadd.f32 %v5773_v56, %v1766_v62  ;;  %v2069_v20 = vmax.f32 %v2037_v48, 0.0 }
 0x1f8   : > { %6128 = vrot.lane.b32.xlu0 %v6127_v42, %s6590_s19  ;;  %6123 = vrot.lane.b32.xlu1 %v6122_v34, %s6590_s19  ;;  %v5465_v33 = vpop.f32.mrf.mxu1  ;;  %v1918_v5 = vpop.f32.mrf.mxu0  ;;  %v8420_v62 = vrot.slane %v8391_v16, 1  ;;  %v8445_v61 = vadd.f32 %v10646_v44, %v10645_v21  ;;  %v8451_v42 = vrot.slane %v8238_v60, 2  ;;  %v1774_v26 = vadd.f32 %v8377_v32, %v8212_v1  ;;  %v6517_v1 = vld [vmem:[%s10222_s4 + $0xa0] sm:$0xff]   ;;  %v8489_v44 = vld [vmem:[#allocation2 + $0xd0] sm:$0xff] }
 0x1f9   : > { %v2074_v35 = vmax.f32 %v2042_v28, 0.0  ;;  %v2040_v43 = vadd.f32 %v8127_v37, %v2001_v51  ;;  %v2004_v31 = vmul.f32 %v8120_v54, %v1927_v6  ;;  %2174 = vst.msk [vmem:[#allocation2 + $0xf0] sm:$0xff] %vm992_vm2, %v2069_v20  ;;  %v1919_v2 = vadd.f32 %v1918_v5, %v8343_v55  ;;  %v2213_v20 = vld [vmem:[#allocation2 + $0xa0] sm:$0xff]  ;;  %v10647_v5 = vld [vmem:[#allocation10_spill] sm:$0xff] }
 0x1fa   : > { %10642 = vst [vmem:[#allocation60_spill] sm:$0xff] %v8420_v62  ;;  %v5467_v36 = vpop.f32.mrf.mxu1  ;;  %v5776_v9 = vpop.f32.mrf.mxu0  ;;  %v8434_v14 = vsel %vm436_vm0, %v8420_v62, %v8400_v23  ;;  %v8441_v55 = vsel %vm436_vm0, %v8397_v29, %v8406_v18  ;;  %v5466_v41 = vadd.f32 %v5465_v33, %v5464_v0  ;;  %v1782_v0 = vadd.f32 %v5457_v58, %v8246_v4  ;;  %v8469_v33 = vld [vmem:[#allocation2 + $0xb0] sm:$0xff] }
 0x1fb   : > { %10643 = vst [vmem:[#allocation26_spill] sm:$0xff] %v8434_v14  ;;  %2179 = vst.msk [vmem:[#allocation2 + $0x148] sm:$0xff] %vm992_vm2, %v2074_v35  ;;  %v2072_v59 = vmax.f32 %v2040_v43, 0.0  ;;  %v2043_v39 = vadd.f32 %v8127_v37, %v2004_v31  ;;  %v1940_v57 = vadd.f32 %v5776_v9, %v1779_v46  ;;  %v2002_v30 = vmul.f32 %v8120_v54, %v1919_v2  ;;  %v6516_v46 = vld [vmem:[%s10222_s4 + $0xe0] sm:$0xff]   ;;  %v10648_v31 = vld [vmem:[#allocation17_spill] sm:$0xff] }
 0x1fc   : > { %10644 = vst [vmem:[#allocation33_spill] sm:$0xff] %v8441_v55  ;;  %6138 = vrot.lane.b32.xlu0 %v6137_v11, %s6590_s19  ;;  %6133 = vrot.lane.b32.xlu1 %v6132_v27, %s6590_s19  ;;  %v5468_v45 = vpop.f32.mrf.mxu1  ;;  %v1931_v17 = vpop.f32.mrf.mxu0  ;;  %v6142_v63 = vpack.i.bf16 %v8400_v23, %v8434_v14  ;;  %v6147_v60 = vpack.i.bf16 %v8406_v18, %v8441_v55  ;;  %v8482_v2 = vrot.slane %v8457_v49, 1  ;;  %v8484_v9 = vld [vmem:[#allocation2 + $0xc8] sm:$0xff]  ;;  %v2511_v11 = vrot.slane %v8273_v13, 2  ;;  %v2228_v14 = vld [vmem:[#allocation2 + $0x118] sm:$0xff] }
 0x1fd   : > { %2177 = vst.msk [vmem:[#allocation2 + $0x128] sm:$0xff] %vm992_vm2, %v2072_v59  ;;  %v2075_v48 = vmax.f32 %v2043_v39, 0.0  ;;  %v2007_v56 = vmul.f32 %v8120_v54, %v1940_v57  ;;  %v1932_v34 = vadd.f32 %v1931_v17, %v8373_v53  ;;  %v2041_v28 = vadd.f32 %v8127_v37, %v2002_v30  ;;  %5620 = vmatprep.subr.bf16.mxu0 %v6516_v46  ;;  %v8514_v46 = vld [vmem:[#allocation2 + $0x108] sm:$0xff]  ;;  %v8896_v23 = vld [vmem:[#allocation2 + $0x198] sm:$0xff] }
 0x1fe   : > { %v5470_v51 = vpop.f32.mrf.mxu1  ;;  %v5777_v6 = vpop.f32.mrf.mxu0  ;;  %v1787_v7 = vadd.f32 %v5460_v38, %v10647_v5  ;;  %v1795_v27 = vadd.f32 %v5466_v41, %v10648_v31  ;;  %10649 = vst [vmem:[#allocation42_spill] sm:$0xff] %v8482_v2  ;;  %v2217_v38 = vld [vmem:[#allocation2 + $0xc0] sm:$0xff]  ;;  %v5469_v39 = vadd.f32 %v5468_v45, %v5467_v36  ;;  %v5463_v41 = vadd.f32 %v8384_v47, %v8356_v3 }
 0x1ff   : > { %2180 = vst.msk [vmem:[#allocation2 + $0x150] sm:$0xff] %vm992_vm2, %v2075_v48  ;;  %v2046_v4 = vadd.f32 %v8127_v37, %v2007_v56  ;;  %v2005_v53 = vmul.f32 %v8120_v54, %v1932_v34  ;;  %v1943_v58 = vadd.f32 %v5777_v6, %v1782_v0  ;;  %v2073_v32 = vmax.f32 %v2041_v28, 0.0  ;;  %5621 = vmatpush3.bf16.msra.mxu0 %v6517_v1  ;;  %v2225_v5 = vld [vmem:[#allocation2 + $0x100] sm:$0xff] }
 0x200   : > { %6143 = vrot.lane.b32.xlu0 %v6142_v63, %s6590_s19  ;;  %6148 = vrot.lane.b32.xlu1 %v6147_v60, %s6590_s19  ;;  %v5471_v35 = vpop.f32.mrf.mxu1  ;;  %v1934_v43 = vpop.f32.mrf.mxu0  ;;  %v6152_v56 = vpack.i.bf16 %v8457_v49, %v2213_v20  ;;  %v6157_v36 = vpack.i.bf16 %v8420_v62, %v8469_v33  ;;  %v6162_v28 = vpack.i.bf16 %v8484_v9, %v2217_v38  ;;  %v8521_v38 = vrot.slane %v8469_v33, 1 }
 0x201   : > { %v2078_v59 = vmax.f32 %v2046_v4, 0.0  ;;  %v2044_v57 = vadd.f32 %v8127_v37, %v2005_v53  ;;  %v2008_v21 = vmul.f32 %v8120_v54, %v1943_v58  ;;  %2178 = vst.msk [vmem:[#allocation2 + $0x130] sm:$0xff] %vm992_vm2, %v2073_v32  ;;  %v1935_v30 = vadd.f32 %v1934_v43, %v1774_v26  ;;  %v10650_v53 = vld [vmem:[#allocation21_spill] sm:$0xff] }
 0x202   : > { %v5473_v17 = vpop.f32.mrf.mxu1  ;;  %v5780_v48 = vpop.f32.mrf.mxu0  ;;  %v6167_v63 = vpack.i.bf16 %v8482_v2, %v8489_v44  ;;  %v8509_v60 = vsel %vm613_vm1, %v8451_v42, %v2511_v11  ;;  %v1798_v58 = vadd.f32 %v5469_v39, %v10650_v53  ;;  %v5472_v1 = vadd.f32 %v5471_v35, %v5470_v51  ;;  %10652 = vst [vmem:[#allocation58_spill] sm:$0xff] %v8521_v38  ;;  %v6518_v51 = vld [vmem:[%s10222_s4 + $0xd8] sm:$0xff]  }
 0x203   : > { %2183 = vst.msk [vmem:[#allocation2 + $0x188] sm:$0xff] %vm992_vm2, %v2078_v59  ;;  %v2076_v45 = vmax.f32 %v2044_v57, 0.0  ;;  %v2047_v34 = vadd.f32 %v8127_v37, %v2008_v21  ;;  %v1956_v0 = vadd.f32 %v5780_v48, %v1795_v27  ;;  %v2006_v3 = vmul.f32 %v8120_v54, %v1935_v30  ;;  %v10653_v57 = vld [vmem:[#allocation13_spill] sm:$0xff]  ;;  %v6519_v35 = vld [vmem:[%s10222_s4 + $0x98] sm:$0xff]   ;;  %5622 = vmatprep.subr.bf16.mxu0 %v6518_v51 }
 0x204   : > { %6153 = vrot.lane.b32.xlu0 %v6152_v56, %s6590_s19  ;;  %6158 = vrot.lane.b32.xlu1 %v6157_v36, %s6590_s19  ;;  %v5474_v47 = vpop.f32.mrf.mxu1  ;;  %v1947_v6 = vpop.f32.mrf.mxu0  ;;  %v8518_v27 = vrot.slane %v8489_v44, 1  ;;  %v1790_v21 = vadd.f32 %v5463_v41, %v10653_v57  ;;  %v6172_v36 = vpack.i.bf16 %v8509_v60, %v8451_v42  ;;  %v6182_v41 = vpack.i.bf16 %v8514_v46, %v2225_v5  ;;  %v10659_v57 = vld [vmem:[#allocation59_spill] sm:$0xff] }
 0x205   : > { %2181 = vst.msk [vmem:[#allocation2 + $0x168] sm:$0xff] %vm992_vm2, %v2076_v45  ;;  %v2079_v26 = vmax.f32 %v2047_v34, 0.0  ;;  %v2011_v20 = vmul.f32 %v8120_v54, %v1956_v0  ;;  %v1948_v4 = vadd.f32 %v1947_v6, %v1787_v7  ;;  %v2045_v32 = vadd.f32 %v8127_v37, %v2006_v3  ;;  %5623 = vmatpush3.bf16.msra.mxu0 %v6519_v35 }
 0x206   : > { %v5476_v43 = vpop.f32.mrf.mxu1  ;;  %v5781_v31 = vpop.f32.mrf.mxu0  ;;  %10651 = vst [vmem:[#allocation47_spill] sm:$0xff] %v8518_v27  ;;  %v8539_v45 = vrot.slane %v8484_v9, 1  ;;  %v5475_v5 = vadd.f32 %v5474_v47, %v5473_v17 }
 0x207   : > { %2184 = vst.msk [vmem:[#allocation2 + $0x190] sm:$0xff] %vm992_vm2, %v2079_v26  ;;  %v2050_v7 = vadd.f32 %v8127_v37, %v2011_v20  ;;  %v2009_v59 = vmul.f32 %v8120_v54, %v1948_v4  ;;  %v1959_v39 = vadd.f32 %v5781_v31, %v1798_v58  ;;  %v2077_v30 = vmax.f32 %v2045_v32, 0.0  ;;  %v10655_v20 = vld [vmem:[#allocation30_spill] sm:$0xff] }
 0x208   : > { %6168 = vrot.lane.b32.xlu0 %v6167_v63, %s6590_s19  ;;  %6163 = vrot.lane.b32.xlu1 %v6162_v28, %s6590_s19  ;;  %v5477_v48 = vpop.f32.mrf.mxu1  ;;  %v1950_v56 = vpop.f32.mrf.mxu0  ;;  %10654 = vst [vmem:[#allocation62_spill] sm:$0xff] %v8539_v45  ;;  %v1803_v4 = vadd.f32 %v5472_v1, %v10655_v20  ;;  %v8548_v53 = vsel %vm436_vm0, %v8539_v45, %v8518_v27  ;;  %v2200_v1 = vld [vmem:[#allocation2 + $0x38] sm:$0xff] }
 0x209   : > { %v2082_v34 = vmax.f32 %v2050_v7, 0.0  ;;  %v2048_v0 = vadd.f32 %v8127_v37, %v2009_v59  ;;  %v2012_v3 = vmul.f32 %v8120_v54, %v1959_v39  ;;  %v5478_v6 = vadd.f32 %v5477_v48, %v5476_v43  ;;  %2182 = vst.msk [vmem:[#allocation2 + $0x170] sm:$0xff] %vm992_vm2, %v2077_v30  ;;  %10656 = vst [vmem:[#allocation8_spill] sm:$0xff] %v8548_v53  ;;  %v6520_v7 = vld [vmem:[%s10222_s4 + $0xd0] sm:$0xff]   ;;  %v10660_v20 = vld [vmem:[#allocation34_spill] sm:$0xff] }
 0x20a   : > { %v1951_v28 = vadd.f32 %v1950_v56, %v1790_v21  ;;  %v5479_v63 = vpop.f32.mrf.mxu1  ;;  %v5784_v26 = vpop.f32.mrf.mxu0  ;;  %v8553_v58 = vsel %vm436_vm0, %v8482_v2, %v8521_v38  ;;  %v6522_v59 = vld [vmem:[%s10222_s4 + $0x90] sm:$0xff]   ;;  %v2221_v56 = vld [vmem:[#allocation2 + $0xe0] sm:$0xff]  ;;  %5624 = vmatprep.subr.bf16.mxu0 %v6520_v7 }
 0x20b   : > { %10657 = vst [vmem:[#allocation9_spill] sm:$0xff] %v8553_v58  ;;  %2187 = vst.msk [vmem:[#allocation2 + $0x1c8] sm:$0xff] %vm992_vm2, %v2082_v34  ;;  %v2080_v32 = vmax.f32 %v2048_v0, 0.0  ;;  %v2051_v43 = vadd.f32 %v8127_v37, %v2012_v3  ;;  %v1811_v31 = vadd.f32 %v5478_v6, %v8445_v61  ;;  %v10658_v39 = vld [vmem:[#allocation57_spill] sm:$0xff]  ;;  %v8570_v34 = vld [vmem:[#allocation2 + $0xe8] sm:$0xff]  ;;  %v2513_v6 = vrot.slane %v2200_v1, 2  ;;  %5625 = vmatpush3.bf16.msra.mxu0 %v6522_v59 }
 0x20c   : > { %v5369_v21 = vadd.f32 %v10659_v57, %v10658_v39  ;;  %v2010_v51 = vmul.f32 %v8120_v54, %v1951_v28  ;;  %6173 = vrot.lane.b32.xlu0 %v6172_v36, %s6590_s19  ;;  %6183 = vrot.lane.b32.xlu1 %v6182_v41, %s6590_s19  ;;  %v5480_v17 = vpop.f32.mrf.mxu1  ;;  %v1963_v61 = vpop.f32.mrf.mxu0  ;;  %v6177_v36 = vpack.i.bf16 %v8518_v27, %v8548_v53  ;;  %v2249_v27 = vld [vmem:[#allocation2 + $0x1c0] sm:$0xff] }
 0x20d   : > { %2185 = vst.msk [vmem:[#allocation2 + $0x1a8] sm:$0xff] %vm992_vm2, %v2080_v32  ;;  %v2083_v47 = vmax.f32 %v2051_v43, 0.0  ;;  %v1972_v35 = vadd.f32 %v5784_v26, %v1811_v31  ;;  %v5481_v30 = vadd.f32 %v5480_v17, %v5479_v63  ;;  %v1964_v48 = vadd.f32 %v1963_v61, %v1803_v4  ;;  %v8581_v32 = vld [vmem:[#allocation2 + $0xf0] sm:$0xff] }
 0x20e   : > { %v2049_v0 = vadd.f32 %v8127_v37, %v2010_v51  ;;  %v5785_v3 = vpop.f32.mrf.mxu0  ;;  %v6187_v41 = vpack.i.bf16 %v8521_v38, %v8553_v58  ;;  %v1806_v4 = vadd.f32 %v5475_v5, %v10660_v20  ;;  %v8583_v43 = vld [vmem:[#allocation2 + $0x110] sm:$0xff]  ;;  %v6192_v7 = vpack.i.bf16 %v8570_v34, %v2221_v56  ;;  %v6523_v5 = vld [vmem:[%s10222_s4 + $0xc8] sm:$0xff]  }
 0x20f   : > { %2188 = vst.msk [vmem:[#allocation2 + $0x1d0] sm:$0xff] %vm992_vm2, %v2083_v47  ;;  %v2015_v28 = vmul.f32 %v8120_v54, %v1972_v35  ;;  %v2013_v63 = vmul.f32 %v8120_v54, %v1964_v48  ;;  %v1814_v26 = vadd.f32 %v5481_v30, %v5369_v21  ;;  %v6524_v51 = vld [vmem:[%s10222_s4 + $0x88] sm:$0xff]   ;;  %v6202_v17 = vpack.i.bf16 %v8539_v45, %v8581_v32 }
 0x210   : > { %v2081_v31 = vmax.f32 %v2049_v0, 0.0  ;;  %6178 = vrot.lane.b32.xlu0 %v6177_v36, %s6590_s19  ;;  %6188 = vrot.lane.b32.xlu1 %v6187_v41, %s6590_s19  ;;  %v1966_v1 = vpop.f32.mrf.mxu0  ;;  %v8600_v61 = vrot.slane %v8570_v34, 1  ;;  %v8605_v47 = vsel %vm613_vm1, %v2511_v11, %v2513_v6  ;;  %v8608_v35 = vrot.slane %v8583_v43, 1  ;;  %v6525_v36 = vld [vmem:[%s10222_s4 + $0xc0] sm:$0xff]  }
 0x211   : > { %v2054_v59 = vadd.f32 %v8127_v37, %v2015_v28  ;;  %v2052_v39 = vadd.f32 %v8127_v37, %v2013_v63  ;;  %v1975_v57 = vadd.f32 %v5785_v3, %v1814_v26  ;;  %v1967_v21 = vadd.f32 %v1966_v1, %v1806_v4  ;;  %v2229_v3 = vld [vmem:[#allocation2 + $0x120] sm:$0xff]  ;;  %5626 = vmatprep.subr.bf16.mxu0 %v6523_v5  ;;  %v2208_v5 = vld [vmem:[#allocation2 + $0x78] sm:$0xff] }
 0x212   : > { %2186 = vst.msk [vmem:[#allocation2 + $0x1b0] sm:$0xff] %vm992_vm2, %v2081_v31  ;;  %10661 = vst [vmem:[#allocation6_spill] sm:$0xff] %v8600_v61  ;;  %5627 = vmatpush3.bf16.msra.mxu0 %v6524_v51  ;;  %v6526_v41 = vld [vmem:[%s10222_s4 + $0x80] sm:$0xff]   ;;  %v6197_v6 = vpack.i.bf16 %v8600_v61, %v8583_v43  ;;  %v6207_v28 = vpack.i.bf16 %v2229_v3, %v8605_v47  ;;  %v8636_v20 = vrot.slane %v8581_v32, 1  ;;  %v8641_v4 = vrot.slane %v8294_v19, 2  ;;  %v2204_v31 = vld [vmem:[#allocation2 + $0x58] sm:$0xff] }
 0x213   : > { %10662 = vst [vmem:[#allocation7_spill] sm:$0xff] %v8608_v35  ;;  %v2086_v30 = vmax.f32 %v2054_v59, 0.0  ;;  %v2084_v48 = vmax.f32 %v2052_v39, 0.0  ;;  %v2016_v56 = vmul.f32 %v8120_v54, %v1975_v57  ;;  %v2014_v0 = vmul.f32 %v8120_v54, %v1967_v21  ;;  %5628 = vmatprep.subr.bf16.mxu0 %v6525_v36  ;;  %v2233_v59 = vld [vmem:[#allocation2 + $0x140] sm:$0xff]  ;;  %v8649_v39 = vld [vmem:[#allocation2 + $0x148] sm:$0xff] }
 0x214   : > { %6193 = vrot.lane.b32.xlu0 %v6192_v7, %s6590_s19  ;;  %6203 = vrot.lane.b32.xlu1 %v6202_v17, %s6590_s19  ;;  %v8622_v54 = vrot.slane %v8514_v46, 1  ;;  %10665 = vst [vmem:[#allocation64_spill] sm:$0xff] %v8636_v20  ;;  %v6212_v1 = vpack.i.bf16 %v8641_v4, %v8608_v35  ;;  %v8654_v19 = vsel %vm436_vm0, %v8600_v61, %v8636_v20  ;;  %v2516_v57 = vrot.slane %v8296_v40, 2  ;;  %v8674_v3 = vld [vmem:[#allocation2 + $0x128] sm:$0xff] }
 0x215   : > { %2191 = vst.msk [vmem:[#allocation2 + $0x208] sm:$0xff] %vm992_vm2, %v2086_v30  ;;  %2189 = vst.msk [vmem:[#allocation2 + $0x1e8] sm:$0xff] %vm992_vm2, %v2084_v48  ;;  %v2055_v13 = vadd.f32 %v8127_v37, %v2016_v56  ;;  %v2053_v11 = vadd.f32 %v8127_v37, %v2014_v0  ;;  %v2518_v21 = vrot.slane %v2204_v31, 2  ;;  %v6232_v51 = vpack.i.bf16 %v8649_v39, %v2233_v59  ;;  %v8662_v30 = vld [vmem:[#allocation2 + $0x130] sm:$0xff]  ;;  %v2212_v59 = vld [vmem:[#allocation2 + $0x98] sm:$0xff] }
 0x216   : > { %10663 = vst [vmem:[#allocation3_spill] sm:$0xff] %v8622_v54  ;;  %v8633_v37 = vsel %vm436_vm0, %v8622_v54, %v8608_v35  ;;  %5629 = vmatpush3.bf16.msra.mxu0 %v6526_v41  ;;  %10666 = vst [vmem:[#allocation56_spill] sm:$0xff] %v8654_v19  ;;  %v6222_v17 = vpack.i.bf16 %v8636_v20, %v8654_v19  ;;  %v8666_v48 = vsel %vm613_vm1, %v8641_v4, %v2516_v57  ;;  %v2237_v41 = vld [vmem:[#allocation2 + $0x160] sm:$0xff]  ;;  %v8836_v45 = vld [vmem:[#allocation2 + $0x1c8] sm:$0xff] }
 0x217   : > { %v2087_v63 = vmax.f32 %v2055_v13, 0.0  ;;  %v2085_v26 = vmax.f32 %v2053_v11, 0.0  ;;  %10664 = vst [vmem:[#allocation63_spill] sm:$0xff] %v8633_v37  ;;  %v6217_v7 = vpack.i.bf16 %v8633_v37, %v8622_v54  ;;  %v8669_v56 = vsel %vm613_vm1, %v2516_v57, %v2518_v21 }
 0x218   : > { %6198 = vrot.lane.b32.xlu0 %v6197_v6, %s6590_s19  ;;  %6208 = vrot.lane.b32.xlu1 %v6207_v28, %s6590_s19  ;;  %v2521_v40 = vrot.slane %v8368_v52, 2  ;;  %v2523_v0 = vrot.slane %v2208_v5, 2  ;;  %v8677_v36 = vrot.slane %v8327_v24, 2  ;;  %v6247_v13 = vpack.i.bf16 %v8662_v30, %v8674_v3  ;;  %v8695_v24 = vld [vmem:[#allocation2 + $0x150] sm:$0xff] }
 0x219   : > { %2192 = vst.msk [vmem:[#allocation2 + $0x210] sm:$0xff] %vm992_vm2, %v2087_v63  ;;  %2190 = vst.msk [vmem:[#allocation2 + $0x1f0] sm:$0xff] %vm992_vm2, %v2085_v26  ;;  %v6227_v11 = vpack.i.bf16 %v8669_v56, %v8666_v48  ;;  %v8691_v28 = vrot.slane %v8662_v30, 1  ;;  %v8698_v63 = vrot.slane %v8674_v3, 1  ;;  %v8714_v57 = vrot.slane %v8649_v39, 1  ;;  %v8811_v20 = vld [vmem:[#allocation2 + $0x1b0] sm:$0xff] }
 0x21a   : > { %v8684_v6 = vsel %vm613_vm1, %v2521_v40, %v2523_v0  ;;  %v8688_v52 = vsel %vm613_vm1, %v8677_v36, %v2521_v40  ;;  %v2528_v40 = vrot.slane %v2212_v59, 2  ;;  %v8729_v0 = vrot.slane %v8391_v16, 2  ;;  %v2216_v16 = vld [vmem:[#allocation2 + $0xb8] sm:$0xff] }
 0x21b   : > { %10667 = vst [vmem:[#allocation27_spill] sm:$0xff] %v8691_v28  ;;  %10668 = vst [vmem:[#allocation4_spill] sm:$0xff] %v8698_v63  ;;  %v6252_v26 = vpack.i.bf16 %v2237_v41, %v8684_v6  ;;  %v6237_v31 = vpack.i.bf16 %v8688_v52, %v8677_v36  ;;  %v6242_v5 = vpack.i.bf16 %v8698_v63, %v8695_v24  ;;  %v2541_v2 = vrot.slane %v8581_v32, 2  ;;  %v8876_v32 = vld [vmem:[#allocation2 + $0x158] sm:$0xff] }
 0x21c   : > { %6213 = vrot.lane.b32.xlu0 %v6212_v1, %s6590_s19  ;;  %6218 = vrot.lane.b32.xlu1 %v6217_v7, %s6590_s19  ;;  %v8706_v1 = vsel %vm436_vm0, %v8698_v63, %v8691_v28  ;;  %v8709_v7 = vrot.slane %v8695_v24, 1  ;;  %10671 = vst [vmem:[#allocation43_spill] sm:$0xff] %v8714_v57  ;;  %v8910_v55 = vrot.slane %v8836_v45, 1  ;;  %v2551_v15 = vrot.slane %v8662_v30, 2 }
 0x21d   : > { %10669 = vst [vmem:[#allocation5_spill] sm:$0xff] %v8706_v1  ;;  %v6257_v21 = vpack.i.bf16 %v8691_v28, %v8706_v1  ;;  %v2245_v1 = vld [vmem:[#allocation2 + $0x1a0] sm:$0xff] }
 0x21e   : > { %10670 = vst [vmem:[#allocation41_spill] sm:$0xff] %v8709_v7  ;;  %10691 = vst [vmem:[#allocation83_spill] sm:$0xff] %v8910_v55 }
 0x220   : > { %6233 = vrot.lane.b32.xlu0 %v6232_v51, %s6590_s19  ;;  %6223 = vrot.lane.b32.xlu1 %v6222_v17, %s6590_s19  ;;  %v8723_v51 = vsel %vm436_vm0, %v8714_v57, %v8709_v7  ;;  %v2526_v17 = vrot.slane %v8370_v50, 2 }
 0x221   : > { %10672 = vst [vmem:[#allocation10_spill] sm:$0xff] %v8723_v51 }
 0x222   : > { %v8737_v41 = vsel %vm613_vm1, %v8729_v0, %v2526_v17  ;;  %v8740_v50 = vsel %vm613_vm1, %v2526_v17, %v2528_v40  ;;  %v8755_v17 = vld [vmem:[#allocation2 + $0x190] sm:$0xff]  ;;  %v2241_v40 = vld [vmem:[#allocation2 + $0x180] sm:$0xff] }
 0x223   : > { %v6272_v59 = vpack.i.bf16 %v8740_v50, %v8737_v41  ;;  %v8786_v54 = vrot.slane %v8755_v17, 1 }
 0x224   : > { %6248 = vrot.lane.b32.xlu0 %v6247_v13, %s6590_s19  ;;  %6228 = vrot.lane.b32.xlu1 %v6227_v11, %s6590_s19  ;;  %v6262_v13 = vpack.i.bf16 %v8723_v51, %v8714_v57  ;;  %v6267_v11 = vpack.i.bf16 %v8729_v0, %v8709_v7  ;;  %v8757_v57 = vld [vmem:[#allocation2 + $0x188] sm:$0xff]  ;;  %v2531_v51 = vrot.slane %v8469_v33, 2 }
 0x225   : > { %v6282_v28 = vpack.i.bf16 %v8757_v57, %v2241_v40  ;;  %10675 = vst [vmem:[#allocation13_spill] sm:$0xff] %v8786_v54  ;;  %v8802_v35 = vrot.slane %v8757_v57, 1 }
 0x227   : > { %10678 = vst [vmem:[#allocation59_spill] sm:$0xff] %v8802_v35 }
 0x228   : > { %6253 = vrot.lane.b32.xlu0 %v6252_v26, %s6590_s19  ;;  %6238 = vrot.lane.b32.xlu1 %v6237_v31, %s6590_s19  ;;  %v8742_v26 = vld [vmem:[#allocation2 + $0x168] sm:$0xff]  ;;  %v8744_v31 = vld [vmem:[#allocation2 + $0x170] sm:$0xff] }
 0x229   : > { %v2561_v30 = vrot.slane %v8744_v31, 2 }
 0x22c   : > { %6258 = vrot.lane.b32.xlu0 %v6257_v21, %s6590_s19  ;;  %6243 = vrot.lane.b32.xlu1 %v6242_v5, %s6590_s19  ;;  %v6277_v21 = vpack.i.bf16 %v8744_v31, %v8742_v26  ;;  %v8753_v5 = vrot.slane %v8742_v26, 1 }
 0x22e   : > { %10673 = vst [vmem:[#allocation17_spill] sm:$0xff] %v8753_v5  ;;  %v6287_v7 = vpack.i.bf16 %v8753_v5, %v8755_v17 }
 0x230   : > { %6263 = vrot.lane.b32.xlu0 %v6262_v13, %s6590_s19  ;;  %6268 = vrot.lane.b32.xlu1 %v6267_v11, %s6590_s19  ;;  %v2533_v13 = vrot.slane %v2216_v16, 2  ;;  %v8763_v11 = vrot.slane %v8457_v49, 2  ;;  %v8776_v16 = vrot.slane %v8744_v31, 1  ;;  %v8780_v49 = vld [vmem:[#allocation2 + $0x210] sm:$0xff] }
 0x232   : > { %v8770_v63 = vsel %vm613_vm1, %v8763_v11, %v2531_v51  ;;  %v8773_v33 = vsel %vm613_vm1, %v2531_v51, %v2533_v13  ;;  %10674 = vst [vmem:[#allocation21_spill] sm:$0xff] %v8776_v16  ;;  %v8788_v51 = vld [vmem:[#allocation2 + $0x208] sm:$0xff]  ;;  %v8793_v13 = vsel %vm436_vm0, %v8753_v5, %v8776_v16 }
 0x233   : > { %v6297_v40 = vpack.i.bf16 %v2245_v1, %v8773_v33  ;;  %10676 = vst [vmem:[#allocation30_spill] sm:$0xff] %v8793_v13  ;;  %v8799_v1 = vrot.slane %v8484_v9, 2  ;;  %v8805_v61 = vrot.slane %v8788_v51, 2  ;;  %v6302_v19 = vpack.i.bf16 %v8776_v16, %v8793_v13 }
 0x234   : > { %6273 = vrot.lane.b32.xlu0 %v6272_v59, %s6590_s19  ;;  %6278 = vrot.lane.b32.xlu1 %v6277_v21, %s6590_s19  ;;  %v2260_v59 = vld [vmem:[#allocation2 + $0x218] sm:$0xff]  ;;  %v6292_v21 = vpack.i.bf16 %v8770_v63, %v8763_v11  ;;  %v8816_v9 = vsel %vm436_vm0, %v8802_v35, %v8786_v54 }
 0x235   : > { %v2850_v37 = vrot.slane %v2260_v59, 2  ;;  %10677 = vst [vmem:[#allocation57_spill] sm:$0xff] %v8799_v1  ;;  %v6312_v5 = vpack.i.bf16 %v8799_v1, %v8786_v54  ;;  %10679 = vst [vmem:[#allocation34_spill] sm:$0xff] %v8816_v9  ;;  %v6307_v54 = vpack.i.bf16 %v8816_v9, %v8802_v35  ;;  %v6327_v9 = vpack.i.bf16 %v8836_v45, %v2249_v27 }
 0x238   : > { %6288 = vrot.lane.b32.xlu0 %v6287_v7, %s6590_s19  ;;  %6283 = vrot.lane.b32.xlu1 %v6282_v28, %s6590_s19  ;;  %v2220_v7 = vld [vmem:[#allocation2 + $0xd8] sm:$0xff]  ;;  %v2848_v28 = vrot.slane %v8780_v49, 2 }
 0x239   : > { %v2538_v59 = vrot.slane %v2220_v7, 2  ;;  %v8828_v7 = vld [vmem:[#allocation2 + $0x1a8] sm:$0xff] }
 0x23a   : > { %v8824_v53 = vsel %vm613_vm1, %v2848_v28, %v2850_v37  ;;  %v6322_v13 = vpack.i.bf16 %v8811_v20, %v8828_v7  ;;  %v8851_v35 = vrot.slane %v8828_v7, 1 }
 0x23c   : > { %6293 = vrot.lane.b32.xlu0 %v6292_v21, %s6590_s19  ;;  %6298 = vrot.lane.b32.xlu1 %v6297_v40, %s6590_s19  ;;  %v2536_v21 = vrot.slane %v8489_v44, 2  ;;  %v8821_v40 = vsel %vm613_vm1, %v8805_v61, %v2848_v28  ;;  %v3634_v44 = vrot.slane %v8824_v53, 7  ;;  %v2224_v28 = vld [vmem:[#allocation2 + $0xf8] sm:$0xff]  ;;  %10683 = vst [vmem:[#allocation75_spill] sm:$0xff] %v8851_v35 }
 0x23d   : > { %v3626_v16 = vrot.slane %v8821_v40, 7  ;;  %v2543_v58 = vrot.slane %v2224_v28, 2  ;;  %v2196_v28 = vld [vmem:[#allocation2 + $0x18] sm:$0xff] }
 0x23e   : > { %v8840_v37 = vsel %vm613_vm1, %v8799_v1, %v2536_v21  ;;  %v2508_v18 = vrot.slane %v2196_v28, 2  ;;  %v2556_v28 = vrot.slane %v8695_v24, 2  ;;  %v8946_v1 = vrot.slane %v8674_v3, 2  ;;  %v2257_v24 = vld [vmem:[#allocation2 + $0x200] sm:$0xff] }
 0x23f   : > { %10680 = vst [vmem:[#allocation72_spill] sm:$0xff] %v8840_v37 }
 0x240   : > { %6313 = vrot.lane.b32.xlu0 %v6312_v5, %s6590_s19  ;;  %6303 = vrot.lane.b32.xlu1 %v6302_v19, %s6590_s19  ;;  %v8843_v19 = vsel %vm613_vm1, %v2536_v21, %v2538_v59  ;;  %v8846_v5 = vrot.slane %v8811_v20, 1  ;;  %v3625_v59 = vrot.slane %v8805_v61, 7  ;;  %v8858_v21 = vsel %vm3325_vm3, %v3626_v16, %v3634_v44  ;;  %10695 = vst [vmem:[#allocation87_spill] sm:$0xff] %v8946_v1 }
 0x241   : > { %10681 = vst [vmem:[#allocation73_spill] sm:$0xff] %v8843_v19  ;;  %v6317_v38 = vpack.i.bf16 %v8843_v19, %v8840_v37  ;;  %10684 = vst [vmem:[#allocation76_spill] sm:$0xff] %v8858_v21  ;;  %v8874_v44 = vrot.slane %v8570_v34, 2  ;;  %v8913_v21 = vld [vmem:[#allocation2 + $0x1b8] sm:$0xff]  ;;  %v8931_v19 = vld [vmem:[#allocation2 + $0x1f0] sm:$0xff] }
 0x242   : > { %10682 = vst [vmem:[#allocation74_spill] sm:$0xff] %v8846_v5  ;;  %v8871_v27 = vsel %vm3325_vm3, %v3625_v59, %v3626_v16  ;;  %v2253_v16 = vld [vmem:[#allocation2 + $0x1e0] sm:$0xff]  ;;  %v8887_v59 = vsel %vm613_vm1, %v2541_v2, %v2543_v58  ;;  %v2548_v58 = vrot.slane %v2228_v14, 2 }
 0x243   : > { %10686 = vst [vmem:[#allocation78_spill] sm:$0xff] %v8871_v27  ;;  %10687 = vst [vmem:[#allocation79_spill] sm:$0xff] %v8874_v44  ;;  %v8891_v34 = vsel %vm613_vm1, %v8874_v44, %v2541_v2  ;;  %v8898_v27 = vld [vmem:[#allocation2 + $0x8] sm:$0xff]  ;;  %v2558_v2 = vrot.slane %v8876_v32, 2  ;;  %v6347_v14 = vpack.i.bf16 %v2253_v16, %v8887_v59  ;;  %v8935_v16 = vrot.slane %v8514_v46, 2 }
 0x244   : > { %6323 = vrot.lane.b32.xlu0 %v6322_v13, %s6590_s19  ;;  %6308 = vrot.lane.b32.xlu1 %v6307_v54, %s6590_s19  ;;  %v8864_v54 = vsel %vm436_vm0, %v8851_v35, %v8846_v5  ;;  %v8866_v13 = vld [vmem:[#allocation2 + $0x1d0] sm:$0xff]  ;;  %10688 = vst [vmem:[#allocation80_spill] sm:$0xff] %v8887_v59  ;;  %10689 = vst [vmem:[#allocation81_spill] sm:$0xff] %v8891_v34  ;;  %v6337_v32 = vpack.i.bf16 %v8891_v34, %v8874_v44  ;;  %v8943_v59 = vrot.slane %v8649_v39, 2 }
 0x245   : > { %10685 = vst [vmem:[#allocation77_spill] sm:$0xff] %v8864_v54  ;;  %v6342_v62 = vpack.i.bf16 %v8846_v5, %v8864_v54  ;;  %v8894_v29 = vrot.slane %v8866_v13, 1  ;;  %v8907_v5 = vld [vmem:[#allocation2 + $0x178] sm:$0xff]  ;;  %10693 = vst [vmem:[#allocation85_spill] sm:$0xff] %v8935_v16  ;;  %v10696_v46 = vrot.slane %v8898_v27, 2  ;;  %v8989_v44 = vrot.slane %v8828_v7, 2 }
 0x246   : > { %10694 = vst [vmem:[#allocation86_spill] sm:$0xff] %v8943_v59  ;;  %v6372_v34 = vpack.i.bf16 %v8788_v51, %v2257_v24 }
 0x247   : > { %10690 = vst [vmem:[#allocation82_spill] sm:$0xff] %v8894_v29 }
 0x248   : > { %6328 = vrot.lane.b32.xlu0 %v6327_v9, %s6590_s19  ;;  %6318 = vrot.lane.b32.xlu1 %v6317_v38, %s6590_s19  ;;  %v6332_v9 = vpack.i.bf16 %v8851_v35, %v8866_v13  ;;  %v8884_v38 = vld [vmem:[#allocation2 + $0x138] sm:$0xff]  ;;  %v8901_v35 = vld [vmem:[#allocation2 + $0x10] sm:$0xff] }
 0x249   : > { %v2506_v54 = vrot.slane %v8901_v35, 2  ;;  %v2553_v12 = vrot.slane %v8884_v38, 2  ;;  %v8929_v38 = vsel %vm436_vm0, %v8910_v55, %v8894_v29 }
 0x24a   : > { %10692 = vst [vmem:[#allocation84_spill] sm:$0xff] %v8929_v38 }
 0x24b   : > { %v2507_v37 = vsel %vm613_vm1, %v10696_v46, %v2506_v54  ;;  %v8967_v46 = vsel %vm613_vm1, %v8946_v1, %v2551_v15  ;;  %v9008_v24 = vsel %vm613_vm1, %v2551_v15, %v2553_v12 }
 0x24c   : > { %6343 = vrot.lane.b32.xlu0 %v6342_v62, %s6590_s19  ;;  %6333 = vrot.lane.b32.xlu1 %v6332_v9, %s6590_s19  ;;  %v2546_v62 = vrot.slane %v8583_v43, 2  ;;  %v2568_v9 = vrot.slane %v8896_v23, 2  ;;  %v2563_v43 = vrot.slane %v8907_v5, 2  ;;  %v2573_v23 = vrot.slane %v8913_v21, 2  ;;  %v2254_v5 = vld [vmem:[#allocation2 + $0x1e8] sm:$0xff]  ;;  %10699 = vst [vmem:[#allocation90_spill] sm:$0xff] %v8967_v46 }
 0x24d   : > { %v6352_v21 = vpack.i.bf16 %v8929_v38, %v8910_v55  ;;  %v8977_v55 = vrot.slane %v8742_v26, 2  ;;  %v8985_v31 = vrot.slane %v2254_v5, 1  ;;  %v2571_v38 = vrot.slane %v8811_v20, 2 }
 0x24e   : > { %v8959_v39 = vsel %vm613_vm1, %v8935_v16, %v2546_v62  ;;  %v8962_v3 = vsel %vm613_vm1, %v2546_v62, %v2548_v58  ;;  %v2566_v58 = vrot.slane %v8755_v17, 2  ;;  %v8981_v62 = vrot.slane %v8757_v57, 2  ;;  %v2256_v17 = vld [vmem:[#allocation2 + $0x1f8] sm:$0xff] }
 0x24f   : > { %10697 = vst [vmem:[#allocation88_spill] sm:$0xff] %v8959_v39  ;;  %10698 = vst [vmem:[#allocation89_spill] sm:$0xff] %v8962_v3  ;;  %v6367_v26 = vpack.i.bf16 %v8962_v3, %v8959_v39  ;;  %v6362_v57 = vpack.i.bf16 %v8935_v16, %v8894_v29  ;;  %v9012_v29 = vsel %vm613_vm1, %v8977_v55, %v2561_v30  ;;  %v9015_v39 = vrot.slane %v8780_v49, 1 }
 0x250   : > { %6348 = vrot.lane.b32.xlu0 %v6347_v14, %s6590_s19  ;;  %6338 = vrot.lane.b32.xlu1 %v6337_v32, %s6590_s19  ;;  %v8952_v14 = vsel %vm613_vm1, %v2506_v54, %v2508_v18  ;;  %v6357_v32 = vpack.i.bf16 %v8931_v19, %v2254_v5  ;;  %v8970_v18 = vrot.slane %v8931_v19, 1  ;;  %v8974_v54 = vsel %vm613_vm1, %v8943_v59, %v2556_v28 }
 0x251   : > { %10701 = vst [vmem:[#allocation92_spill] sm:$0xff] %v8974_v54  ;;  %10702 = vst [vmem:[#allocation93_spill] sm:$0xff] %v8977_v55  ;;  %v9020_v20 = vsel %vm613_vm1, %v2556_v28, %v2558_v2  ;;  %v9027_v15 = vsel %vm613_vm1, %v2566_v58, %v2568_v9  ;;  %v2583_v12 = vrot.slane %v2256_v17, 2  ;;  %v9030_v3 = vsel %vm613_vm1, %v2561_v30, %v2563_v43  ;;  %v2193_v9 = vld [vmem:[#allocation2] sm:$0xff] }
 0x252   : > { %10700 = vst [vmem:[#allocation91_spill] sm:$0xff] %v8970_v18  ;;  %10703 = vst [vmem:[#allocation94_spill] sm:$0xff] %v8985_v31  ;;  %v9005_v7 = vsel %vm436_vm0, %v8985_v31, %v8970_v18  ;;  %v2576_v2 = vrot.slane %v8866_v13, 2  ;;  %v2581_v43 = vrot.slane %v8931_v19, 2  ;;  %v9056_v13 = vrot.slane %v2254_v5, 2 }
 0x253   : > { %10704 = vst [vmem:[#allocation95_spill] sm:$0xff] %v9005_v7  ;;  %10705 = vst [vmem:[#allocation96_spill] sm:$0xff] %v9015_v39 }
 0x254   : > { %6353 = vrot.lane.b32.xlu0 %v6352_v21, %s6590_s19  ;;  %6358 = vrot.lane.b32.xlu1 %v6357_v32, %s6590_s19  ;;  %v6377_v21 = vpack.i.bf16 %v8985_v31, %v8780_v49  ;;  %v6382_v32 = vpack.i.bf16 %v8967_v46, %v8946_v1  ;;  %v9024_v31 = vsel %vm613_vm1, %v8981_v62, %v2566_v58  ;;  %v9049_v1 = vrot.slane %v8836_v45, 2 }
 0x255   : > { %v9034_v49 = vsel %vm613_vm1, %v8989_v44, %v2571_v38  ;;  %v9045_v58 = vsel %vm613_vm1, %v2571_v38, %v2573_v23  ;;  %v9094_v45 = vsel %vm613_vm1, %v2581_v43, %v2583_v12 }
 0x258   : > { %6368 = vrot.lane.b32.xlu0 %v6367_v26, %s6590_s19  ;;  %6363 = vrot.lane.b32.xlu1 %v6362_v57, %s6590_s19  ;;  %v9037_v26 = vrot.slane %v8788_v51, 1  ;;  %v6387_v57 = vpack.i.bf16 %v8970_v18, %v9005_v7 }
 0x25a   : > { %10706 = vst [vmem:[#allocation97_spill] sm:$0xff] %v9037_v26  ;;  %v6089_v28 = vpop.permute.xlu0 %6088  ;;  %v9054_v51 = vsel %vm436_vm0, %v9037_v26, %v9015_v39 }
 0x25b   : > { %v6091_v30 = vunpack.i.h.bf16 %v6089_v28  ;;  %v6090_v17 = vunpack.i.l.bf16 %v6089_v28  ;;  %10707 = vst [vmem:[#allocation98_spill] sm:$0xff] %v9054_v51  ;;  %v10708_v28 = vrot.slane %v8898_v27, 2 }
 0x25c   : > { %6378 = vrot.lane.b32.xlu0 %v6377_v21, %s6590_s19  ;;  %6373 = vrot.lane.b32.xlu1 %v6372_v34, %s6590_s19  ;;  %v9072_v21 = vsel %vm613_vm1, %v9049_v1, %v2576_v2  ;;  %v10709_v34 = vrot.slane %v8915_v8, 2 }
 0x25d   : > { %v3074_v23 = vsel %vm992_vm2, %v2507_v37, %v6091_v30  ;;  %v3073_v5 = vsel %vm992_vm2, %v10708_v28, %v6090_v17  ;;  %v9085_v30 = vsel %vm613_vm1, %v9056_v13, %v2581_v43 }
 0x25e   : > { %v9077_v38 = vsel %vm613_vm1, %v2576_v2, %v10709_v34  ;;  %v6094_v19 = vpop.permute.xlu1 %6093  ;;  %v6099_v7 = vpop.permute.xlu0 %6098  ;;  %v3330_v18 = vrot.slane %v3074_v23, 7  ;;  %v3329_v46 = vrot.slane %v3073_v5, 7 }
 0x25f   : > { %v6096_v8 = vunpack.i.h.bf16 %v6094_v19  ;;  %v6095_v28 = vunpack.i.l.bf16 %v6094_v19  ;;  %v6101_v2 = vunpack.i.h.bf16 %v6099_v7  ;;  %v6100_v34 = vunpack.i.l.bf16 %v6099_v7 }
 0x260   : > { %6383 = vrot.lane.b32.xlu0 %v6382_v32, %s6590_s19  ;;  %6388 = vrot.lane.b32.xlu1 %v6387_v57, %s6590_s19  ;;  %v9103_v32 = vld [vmem:[#allocation2 + $0x228] sm:$0xff] }
 0x261   : > { %v3025_v16 = vsel %vm992_vm2, %v2193_v9, %v6096_v8  ;;  %v3075_v17 = vsel %vm992_vm2, %v8952_v14, %v6095_v28  ;;  %v3027_v7 = vsel %vm992_vm2, %v8901_v35, %v6101_v2  ;;  %v3026_v19 = vsel %vm992_vm2, %v8898_v27, %v6100_v34  ;;  %v6531_v2 = vld [vmem:[#allocation2 + $0x20] sm:$0xff] }
 0x262   : > { %v3326_v57 = vrot.slane %v3025_v16, 7  ;;  %v3343_v23 = vrot.slane %v3075_v17, 7  ;;  %v3341_v5 = vrot.slane %v3027_v7, 7  ;;  %v3327_v37 = vrot.slane %v3026_v19, 7  ;;  %v6104_v25 = vpop.permute.xlu1 %6103  ;;  %v6109_v12 = vpop.permute.xlu0 %6108 }
 0x263   : > { %v6106_v43 = vunpack.i.h.bf16 %v6104_v25  ;;  %v6105_v22 = vunpack.i.l.bf16 %v6104_v25  ;;  %v6111_v9 = vunpack.i.h.bf16 %v6109_v12  ;;  %v6110_v8 = vunpack.i.l.bf16 %v6109_v12 }
 0x264   : > { %v3328_v14 = vsel %vm3325_vm3, %v3326_v57, %v3327_v37  ;;  %v3342_v28 = vsel %vm3325_vm3, %v3327_v37, %v3341_v5  ;;  %v10710_v35 = vpack.i.bf16 %v8974_v54, %v8943_v59  ;;  %2904 = vrot.lane.b32.xlu1 %v9008_v24, %s6590_s19  ;;  %v3344_v27 = vsel %vm3325_vm3, %v3330_v18, %v3343_v23 }
 0x265   : > { %v3076_v25 = vsel %vm992_vm2, %v8451_v42, %v6105_v22  ;;  %v3077_v17 = vsel %vm992_vm2, %v8509_v60, %v6106_v43  ;;  %v3028_v37 = vsel %vm992_vm2, %v6531_v2, %v6111_v9  ;;  %v3078_v34 = vsel %vm992_vm2, %v8605_v47, %v6110_v8  ;;  %v6532_v8 = vld [vmem:[#allocation2 + $0x30] sm:$0xff] }
 0x266   : > { %6393 = vrot.lane.b32.xlu0 %v10710_v35, %s6590_s19  ;;  %v3354_v7 = vrot.slane %v3076_v25, 7  ;;  %v3355_v19 = vrot.slane %v3077_v17, 7  ;;  %v6119_v57 = vpop.permute.xlu0 %6118  ;;  %v6114_v5 = vpop.permute.xlu1 %6113  ;;  %v3331_v23 = vsel %vm3325_vm3, %v3329_v46, %v3330_v18  ;;  %v3351_v60 = vrot.slane %v3028_v37, 7  ;;  %v6533_v17 = vld [vmem:[#allocation2 + $0x28] sm:$0xff] }
 0x267   : > { %v6121_v35 = vunpack.i.h.bf16 %v6119_v57  ;;  %v6120_v22 = vunpack.i.l.bf16 %v6119_v57  ;;  %v6116_v42 = vunpack.i.h.bf16 %v6114_v5  ;;  %v6115_v16 = vunpack.i.l.bf16 %v6114_v5  ;;  %v6521_v5 = vld [vmem:[%s10222_s4 + $0x110] sm:$0xff]  }
 0x268   : > { %v3368_v43 = vrot.slane %v3078_v34, 7  ;;  %v3789_v54 = vpack.c.bf16 %v3344_v27, %v3331_v23  ;;  %v3788_v9 = vpack.c.bf16 %v3342_v28, %v3328_v14  ;;  %v10711_v47 = vpack.i.bf16 %v9012_v29, %v8977_v55  ;;  %2910 = vrot.lane.b32.xlu1 %v9020_v20, %s6590_s19 }
 0x269   : > { %v3080_v46 = vsel %vm992_vm2, %v8666_v48, %v6121_v35  ;;  %v3079_v18 = vsel %vm992_vm2, %v8641_v4, %v6120_v22  ;;  %v3030_v25 = vsel %vm992_vm2, %v6532_v8, %v6116_v42  ;;  %v3029_v14 = vsel %vm992_vm2, %v6533_v17, %v6115_v16  ;;  %v6534_v16 = vld [vmem:[%s10222_s4 + $0x118] sm:$0xff]   ;;  %v6535_v8 = vld [vmem:[#allocation2 + $0x50] sm:$0xff] }
 0x26a   : > { %6398 = vrot.lane.b32.xlu0 %v10711_v47, %s6590_s19  ;;  %v3377_v28 = vrot.slane %v3080_v46, 7  ;;  %v3366_v27 = vrot.slane %v3030_v25, 7  ;;  %v3352_v2 = vrot.slane %v3029_v14, 7  ;;  %4222 = vmatprep.mubr.bf16.mxu1 %v3789_v54  ;;  %v6129_v37 = vpop.permute.xlu0 %6128  ;;  %v6124_v34 = vpop.permute.xlu1 %6123  ;;  %v3356_v57 = vsel %vm3325_vm3, %v3354_v7, %v3355_v19  ;;  %v6537_v14 = vld [vmem:[#allocation2 + $0x40] sm:$0xff] }
 0x26b   : > { %4223 = vmatmul.mubr.bf16.vlgmr.msra.gmra.mxu1 %v3788_v9  ;;  %v6131_v23 = vunpack.i.h.bf16 %v6129_v37  ;;  %v6130_v35 = vunpack.i.l.bf16 %v6129_v37  ;;  %v6126_v22 = vunpack.i.h.bf16 %v6124_v34  ;;  %v6125_v42 = vunpack.i.l.bf16 %v6124_v34 }
 0x26c   : > { %v3376_v47 = vrot.slane %v3079_v18, 7  ;;  %5787 = vmatpush3.bf16.msra.mxu1 %v6534_v16  ;;  %v3369_v54 = vsel %vm3325_vm3, %v3355_v19, %v3368_v43  ;;  %v10712_v7 = vpack.i.bf16 %v9027_v15, %v9024_v31  ;;  %v3353_v46 = vsel %vm3325_vm3, %v3351_v60, %v3352_v2  ;;  %v6536_v18 = vld [vmem:[#allocation2 + $0x48] sm:$0xff] }
 0x26d   : > { %v3367_v9 = vsel %vm3325_vm3, %v3352_v2, %v3366_v27  ;;  %v3033_v25 = vsel %vm992_vm2, %v6535_v8, %v6131_v23  ;;  %v3032_v17 = vsel %vm992_vm2, %v6536_v18, %v6130_v35  ;;  %v3031_v37 = vsel %vm992_vm2, %v6537_v14, %v6126_v22  ;;  %5788 = vmatprep.subr.bf16.mxu1 %v6521_v5  ;;  %v6527_v22 = vld [vmem:[%s10222_s4 + $0x108] sm:$0xff]  }
 0x26e   : > { %6408 = vrot.lane.b32.xlu0 %v10712_v7, %s6590_s19  ;;  %v3081_v19 = vsel %vm992_vm2, %v8669_v56, %v6125_v42  ;;  %v10713_v43 = vpack.i.bf16 %v8981_v62, %v9030_v3  ;;  %v3347_v60 = vrot.slane %v3033_v25, 7  ;;  %v3336_v34 = vrot.slane %v3032_v17, 7  ;;  %v6139_v2 = vpop.permute.xlu0 %6138  ;;  %v6134_v16 = vpop.permute.xlu1 %6133 }
 0x26f   : > { %v3388_v27 = vrot.slane %v3081_v19, 7  ;;  %v10714_v23 = vrot.slane %v8917_v10, 1  ;;  %v10715_v35 = vrot.slane %v9103_v32, 1  ;;  %v3794_v42 = vpack.c.bf16 %v3369_v54, %v3356_v57 }
 0x270   : > { %6403 = vrot.lane.b32.xlu1 %v10713_v43, %s6590_s19  ;;  %v6141_v8 = vunpack.i.h.bf16 %v6139_v2  ;;  %v6140_v18 = vunpack.i.l.bf16 %v6139_v2  ;;  %v6136_v14 = vunpack.i.h.bf16 %v6134_v16  ;;  %v3335_v25 = vrot.slane %v3031_v37, 7  ;;  %5789 = vmatpush3.bf16.msra.mxu1 %v6521_v5  ;;  %v6538_v2 = vld [vmem:[#allocation2 + $0x60] sm:$0xff] }
 0x271   : > { %v3000_v7 = vsel %vm436_vm0, %v10715_v35, %v10714_v23  ;;  %v6135_v17 = vunpack.i.l.bf16 %v6134_v16  ;;  %v10716_v19 = vpack.i.bf16 %v9049_v1, %v9045_v58  ;;  %v3793_v43 = vpack.c.bf16 %v3367_v9, %v3353_v46  ;;  %4230 = vmatprep.mubr.bf16.mxu1 %v3794_v42  ;;  %5790 = vmatprep.subr.bf16.mxu1 %v6527_v22  ;;  %v6528_v42 = vld [vmem:[%s10222_s4 + $0x100] sm:$0xff]  }
 0x272   : > { %v3378_v12 = vsel %vm3325_vm3, %v3376_v47, %v3377_v28  ;;  %v3084_v23 = vsel %vm992_vm2, %v8684_v6, %v6140_v18  ;;  %v3083_v57 = vsel %vm992_vm2, %v8688_v52, %v6136_v14  ;;  %v10717_v54 = vpack.i.bf16 %v9034_v49, %v8989_v44  ;;  %v6144_v16 = vpop.permute.xlu0 %6143  ;;  %v6149_v35 = vpop.permute.xlu1 %6148 }
 0x273   : > { %6418 = vrot.lane.b32.xlu0 %v10716_v19, %s6590_s19  ;;  %v3389_v37 = vsel %vm3325_vm3, %v3377_v28, %v3388_v27  ;;  %v9183_v46 = vsel %vm992_vm2, %v6538_v2, %v6141_v8  ;;  %v3408_v47 = vrot.slane %v3084_v23, 7  ;;  %v3397_v5 = vrot.slane %v3083_v57, 7  ;;  %4231 = vmatmul.mubr.bf16.gmra.mxu1 %v3793_v43 }
 0x274   : > { %6413 = vrot.lane.b32.xlu1 %v10717_v54, %s6590_s19  ;;  %v3082_v9 = vsel %vm992_vm2, %v8677_v36, %v6135_v17  ;;  %v6146_v14 = vunpack.i.h.bf16 %v6144_v16  ;;  %v6145_v28 = vunpack.i.l.bf16 %v6144_v16  ;;  %v6151_v27 = vunpack.i.h.bf16 %v6149_v35  ;;  %5791 = vmatpush3.bf16.msra.mxu1 %v6527_v22  ;;  %v6539_v54 = vld [vmem:[#allocation2 + $0x70] sm:$0xff] }
 0x275   : > { %v3396_v18 = vrot.slane %v3082_v9, 7  ;;  %v6150_v19 = vunpack.i.l.bf16 %v6149_v35  ;;  %v3798_v8 = vpack.c.bf16 %v3389_v37, %v3378_v12  ;;  %v3337_v23 = vsel %vm3325_vm3, %v3335_v25, %v3336_v34  ;;  %v6540_v16 = vld [vmem:[#allocation2 + $0x90] sm:$0xff]  ;;  %v6541_v35 = vld [vmem:[#allocation2 + $0x88] sm:$0xff]  ;;  %5792 = vmatprep.subr.bf16.mxu1 %v6528_v42 }
 0x276   : > { %v3348_v57 = vsel %vm3325_vm3, %v3336_v34, %v3347_v60  ;;  %v10718_v17 = vpack.i.bf16 %v9054_v51, %v9037_v26  ;;  %v3036_v2 = vsel %vm992_vm2, %v6539_v54, %v6151_v27  ;;  %v10719_v43 = vpack.i.bf16 %v9077_v38, %v9072_v21 }
 0x277   : > { %v3791_v9 = vpack.c.bf16 %v3348_v57, %v3337_v23  ;;  %v10720_v12 = vrot.slane %v8917_v10, 1  ;;  %v10721_v60 = vrot.slane %v9103_v32, 1  ;;  %v3360_v37 = vrot.slane %v9183_v46, 7  ;;  %v6542_v23 = vld [vmem:[#allocation2 + $0x68] sm:$0xff]  ;;  %4238 = vmatprep.mubr.bf16.mxu1 %v3798_v8  ;;  %v6159_v10 = vpop.permute.xlu1 %6158 }
 0x278   : > { %6428 = vrot.lane.b32.xlu0 %v10718_v17, %s6590_s19  ;;  %6423 = vrot.lane.b32.xlu1 %v10719_v43, %s6590_s19  ;;  %v3039_v22 = vsel %vm992_vm2, %v6540_v16, %v6146_v14  ;;  %v9209_v27 = vsel %vm992_vm2, %v6541_v35, %v6145_v28  ;;  %v3035_v57 = vsel %vm992_vm2, %v6542_v23, %v6150_v19  ;;  %v6154_v17 = vpop.permute.xlu0 %6153  ;;  %v6161_v54 = vunpack.i.h.bf16 %v6159_v10 }
 0x279   : > { %v6447_v25 = vpack.i.bf16 %v8805_v61, %v10720_v12  ;;  %v6442_v34 = vpack.i.bf16 %v3000_v7, %v10721_v60  ;;  %v3372_v61 = vrot.slane %v3036_v2, 7  ;;  %4383 = vmatprep.mubr.bf16.mxu0 %v3791_v9  ;;  %v6156_v32 = vunpack.i.h.bf16 %v6154_v17  ;;  %5793 = vmatpush3.bf16.msra.mxu1 %v6528_v42 }
 0x27a   : > { %v6155_v7 = vunpack.i.l.bf16 %v6154_v17  ;;  %v3361_v46 = vrot.slane %v3035_v57, 7  ;;  %v6160_v43 = vunpack.i.l.bf16 %v6159_v10  ;;  %v10722_v14 = vpack.i.bf16 %v9094_v45, %v9085_v30 }
 0x27b   : > { %v3398_v28 = vsel %vm3325_vm3, %v3396_v18, %v3397_v5  ;;  %v3409_v19 = vsel %vm3325_vm3, %v3397_v5, %v3408_v47  ;;  %v3392_v8 = vrot.slane %v3039_v22, 7  ;;  %v3383_v12 = vrot.slane %v9209_v27, 7  ;;  %v6164_v18 = vpop.permute.xlu1 %6163  ;;  %v6543_v22 = vld [vmem:[#allocation2 + $0x80] sm:$0xff]  ;;  %4239 = vmatmul.mubr.bf16.gmra.mxu1 %v3791_v9 }
 0x27c   : > { %6438 = vrot.lane.b32.xlu0 %v10722_v14, %s6590_s19  ;;  %v3086_v2 = vsel %vm992_vm2, %v8737_v41, %v6156_v32  ;;  %v3085_v60 = vsel %vm992_vm2, %v8729_v0, %v6155_v7  ;;  %v10723_v16 = vpack.i.bf16 %v9056_v13, %v9015_v39  ;;  %v3087_v47 = vsel %vm992_vm2, %v8740_v50, %v6160_v43  ;;  %v6169_v42 = vpop.permute.xlu0 %6168  ;;  %v10729_v39 = vld [vmem:[#allocation57_spill] sm:$0xff] }
 0x27d   : > { %v3417_v35 = vrot.slane %v3086_v2, 7  ;;  %v3416_v23 = vrot.slane %v3085_v60, 7  ;;  %v3802_v5 = vpack.c.bf16 %v3409_v19, %v3398_v28  ;;  %v3037_v27 = vsel %vm992_vm2, %v6543_v22, %v6161_v54  ;;  %v6544_v60 = vld [vmem:[#allocation2 + $0xa0] sm:$0xff] }
 0x27e   : > { %6433 = vrot.lane.b32.xlu1 %v10723_v16, %s6590_s19  ;;  %v6171_v57 = vunpack.i.h.bf16 %v6169_v42  ;;  %v6170_v17 = vunpack.i.l.bf16 %v6169_v42  ;;  %v6166_v10 = vunpack.i.h.bf16 %v6164_v18  ;;  %v3428_v32 = vrot.slane %v3087_v47, 7 }
 0x27f   : > { %4246 = vmatprep.mubr.bf16.mxu1 %v3802_v5  ;;  %v6165_v7 = vunpack.i.l.bf16 %v6164_v18  ;;  %v3362_v14 = vsel %vm3325_vm3, %v3360_v37, %v3361_v46  ;;  %v3373_v2 = vsel %vm3325_vm3, %v3361_v46, %v3372_v61  ;;  %v6452_v9 = vpack.i.bf16 %v8824_v53, %v8821_v40  ;;  %v6184_v46 = vpop.permute.xlu1 %6183 }
 0x280   : > { %6448 = vrot.lane.b32.xlu0 %v6447_v25, %s6590_s19  ;;  %v3090_v43 = vsel %vm992_vm2, %v8773_v33, %v6170_v17  ;;  %v3089_v28 = vsel %vm992_vm2, %v8770_v63, %v6166_v10  ;;  %v3393_v54 = vsel %vm3325_vm3, %v3383_v12, %v3392_v8  ;;  %v3382_v19 = vrot.slane %v3037_v27, 7  ;;  %v6174_v61 = vpop.permute.xlu0 %6173  ;;  %v10724_v27 = vld [vmem:[#allocation65_spill] sm:$0xff]  ;;  %v10725_v17 = vld [vmem:[#allocation50_spill] sm:$0xff] }
 0x281   : > { %v9242_v25 = vsel %vm992_vm2, %v6544_v60, %v6171_v57  ;;  %v3088_v37 = vsel %vm992_vm2, %v8763_v11, %v6165_v7  ;;  %v3418_v16 = vsel %vm3325_vm3, %v3416_v23, %v3417_v35  ;;  %v6176_v47 = vunpack.i.h.bf16 %v6174_v61  ;;  %v10726_v7 = vld [vmem:[#allocation81_spill] sm:$0xff] }
 0x282   : > { %6443 = vrot.lane.b32.xlu1 %v6442_v34, %s6590_s19  ;;  %v6175_v5 = vunpack.i.l.bf16 %v6174_v61  ;;  %v6186_v34 = vunpack.i.h.bf16 %v6184_v46  ;;  %v9247_v42 = vpack.c.bf16 %v3373_v2, %v3362_v14  ;;  %v3448_v53 = vrot.slane %v3090_v43, 7  ;;  %v10727_v43 = vld [vmem:[#allocation79_spill] sm:$0xff] }
 0x283   : > { %v3437_v40 = vrot.slane %v3089_v28, 7  ;;  %v6185_v8 = vunpack.i.l.bf16 %v6184_v46  ;;  %v3429_v18 = vsel %vm3325_vm3, %v3417_v35, %v3428_v32  ;;  %v3436_v22 = vrot.slane %v3088_v37, 7  ;;  %v6189_v60 = vpop.permute.xlu1 %6188 }
 0x284   : > { %v3121_v57 = vsel %vm992_vm2, %v10724_v27, %v6175_v5  ;;  %v9254_v10 = vsel %vm992_vm2, %v10725_v17, %v6176_v47  ;;  %v9258_v23 = vsel %vm992_vm2, %v10726_v7, %v6186_v34  ;;  %v3806_v32 = vpack.c.bf16 %v3429_v18, %v3418_v16  ;;  %v6179_v28 = vpop.permute.xlu0 %6178  ;;  %4247 = vmatmul.mubr.bf16.gmra.mxu1 %v9247_v42  ;;  %v6546_v18 = vld [vmem:[#allocation2 + $0xc8] sm:$0xff] }
 0x285   : > { %v3332_v14 = vrot.slane %v3121_v57, 7  ;;  %v10419_v2 = vrot.slane %v9254_v10, 7  ;;  %v3094_v35 = vsel %vm992_vm2, %v10727_v43, %v6185_v8  ;;  %v3402_v37 = vrot.slane %v9242_v25, 7  ;;  %v6545_v8 = vld [vmem:[#allocation2 + $0xd0] sm:$0xff] }
 0x286   : > { %6453 = vrot.lane.b32.xlu1 %v6452_v9, %s6590_s19  ;;  %v6181_v61 = vunpack.i.h.bf16 %v6179_v28  ;;  %v6180_v46 = vunpack.i.l.bf16 %v6179_v28  ;;  %v6191_v47 = vunpack.i.h.bf16 %v6189_v60  ;;  %4254 = vmatprep.mubr.bf16.mxu1 %v3806_v32  ;;  %v6190_v9 = vunpack.i.l.bf16 %v6189_v60  ;;  %v6547_v60 = vld [vmem:[#allocation2 + $0xb0] sm:$0xff] }
 0x287   : > { %v3384_v34 = vsel %vm3325_vm3, %v3382_v19, %v3383_v12  ;;  %v3449_v27 = vsel %vm3325_vm3, %v3437_v40, %v3448_v53  ;;  %v3476_v57 = vrot.slane %v3094_v35, 7  ;;  %v3438_v17 = vsel %vm3325_vm3, %v3436_v22, %v3437_v40  ;;  %v6548_v19 = vld [vmem:[#allocation2 + $0xa8] sm:$0xff]  ;;  %v6204_v5 = vpop.permute.xlu1 %6203 }
 0x288   : > { %v3045_v16 = vsel %vm992_vm2, %v6545_v8, %v6181_v61  ;;  %v3044_v25 = vsel %vm992_vm2, %v6546_v18, %v6180_v46  ;;  %v9275_v28 = vsel %vm3325_vm3, %v3332_v14, %v10419_v2  ;;  %v3042_v12 = vsel %vm992_vm2, %v6547_v60, %v6191_v47  ;;  %v6194_v35 = vpop.permute.xlu0 %6193  ;;  %v10728_v2 = vld [vmem:[#allocation72_spill] sm:$0xff]  ;;  %v6549_v60 = vld [vmem:[#allocation2 + $0xc0] sm:$0xff] }
 0x289   : > { %v3432_v32 = vrot.slane %v3045_v16, 7  ;;  %v3041_v53 = vsel %vm992_vm2, %v6548_v19, %v6190_v9  ;;  %v3423_v61 = vrot.slane %v3044_v25, 7  ;;  %v6196_v8 = vunpack.i.h.bf16 %v6194_v35 }
 0x28a   : > { %v6195_v26 = vunpack.i.l.bf16 %v6194_v35  ;;  %v6206_v46 = vunpack.i.h.bf16 %v6204_v5  ;;  %v3403_v18 = vrot.slane %v3041_v53, 7  ;;  %v6205_v40 = vunpack.i.l.bf16 %v6204_v5  ;;  %v10730_v35 = vld [vmem:[#allocation73_spill] sm:$0xff] }
 0x28b   : > { %v9279_v22 = vpack.c.bf16 %v3393_v54, %v3384_v34  ;;  %v3810_v51 = vpack.c.bf16 %v3449_v27, %v3438_v17  ;;  %v3412_v14 = vrot.slane %v3042_v12, 7  ;;  %v3092_v16 = vsel %vm992_vm2, %v10728_v2, %v6196_v8  ;;  %v6209_v54 = vpop.permute.xlu1 %6208 }
 0x28c   : > { %v3091_v47 = vsel %vm992_vm2, %v10729_v39, %v6195_v26  ;;  %v3043_v9 = vsel %vm992_vm2, %v6549_v60, %v6206_v46  ;;  %v3457_v19 = vrot.slane %v3092_v16, 7  ;;  %v3093_v53 = vsel %vm992_vm2, %v10730_v35, %v6205_v40  ;;  %v6199_v5 = vpop.permute.xlu0 %6198  ;;  %v6550_v40 = vld [vmem:[#allocation2 + $0xe0] sm:$0xff] }
 0x28d   : > { %v3456_v25 = vrot.slane %v3091_v47, 7  ;;  %v3422_v43 = vrot.slane %v3043_v9, 7  ;;  %4255 = vmatmul.mubr.bf16.gmra.mxu1 %v9279_v22  ;;  %v6201_v34 = vunpack.i.h.bf16 %v6199_v5  ;;  %v6200_v27 = vunpack.i.l.bf16 %v6199_v5  ;;  %v10732_v9 = vld [vmem:[#allocation80_spill] sm:$0xff] }
 0x28e   : > { %v6211_v17 = vunpack.i.h.bf16 %v6209_v54  ;;  %v3433_v12 = vsel %vm3325_vm3, %v3423_v61, %v3432_v32  ;;  %v3468_v8 = vrot.slane %v3093_v53, 7  ;;  %4262 = vmatprep.mubr.bf16.mxu1 %v3810_v51  ;;  %v6210_v26 = vunpack.i.l.bf16 %v6209_v54  ;;  %v10733_v53 = vld [vmem:[#allocation85_spill] sm:$0xff]  ;;  %v10734_v54 = vld [vmem:[#allocation66_spill] sm:$0xff] }
 0x28f   : > { %v3404_v46 = vsel %vm3325_vm3, %v3402_v37, %v3403_v18  ;;  %v10731_v16 = vrot.slane %v9258_v23, 7  ;;  %v9297_v60 = vsel %vm992_vm2, %v6550_v40, %v6201_v34  ;;  %v3096_v5 = vsel %vm992_vm2, %v10732_v9, %v6200_v27  ;;  %v6219_v39 = vpop.permute.xlu1 %6218 }
 0x290   : > { %v3413_v7 = vsel %vm3325_vm3, %v3403_v18, %v3412_v14  ;;  %v3458_v32 = vsel %vm3325_vm3, %v3456_v25, %v3457_v19  ;;  %v3488_v51 = vrot.slane %v3096_v5, 7  ;;  %v9305_v37 = vsel %vm992_vm2, %v10733_v53, %v6211_v17 }
 0x291   : > { %v9294_v47 = vsel %vm3325_vm3, %v3476_v57, %v10731_v16  ;;  %v3123_v57 = vsel %vm992_vm2, %v10734_v54, %v6210_v26  ;;  %v6214_v16 = vpop.permute.xlu0 %6213  ;;  %v3424_v34 = vsel %vm3325_vm3, %v3422_v43, %v3423_v61  ;;  %v6221_v27 = vunpack.i.h.bf16 %v6219_v39  ;;  %v6551_v54 = vld [vmem:[#allocation2 + $0x110] sm:$0xff]  ;;  %v6552_v61 = vld [vmem:[#allocation2 + $0x108] sm:$0xff] }
 0x292   : > { %v3345_v40 = vrot.slane %v3123_v57, 7  ;;  %v6216_v2 = vunpack.i.h.bf16 %v6214_v16  ;;  %v6215_v35 = vunpack.i.l.bf16 %v6214_v16  ;;  %v3442_v18 = vrot.slane %v9297_v60, 7  ;;  %v10736_v16 = vld [vmem:[#allocation51_spill] sm:$0xff] }
 0x293   : > { %v6220_v14 = vunpack.i.l.bf16 %v6219_v39  ;;  %v9311_v25 = vpack.c.bf16 %v3413_v7, %v3404_v46  ;;  %v3469_v5 = vsel %vm3325_vm3, %v3457_v19, %v3468_v8  ;;  %v10735_v53 = vrot.slane %v9254_v10, 7  ;;  %v6553_v7 = vld [vmem:[#allocation2 + $0x100] sm:$0xff]  ;;  %v6224_v8 = vpop.permute.xlu1 %6223 }
 0x294   : > { %v3051_v43 = vsel %vm992_vm2, %v6551_v54, %v6215_v35  ;;  %v3050_v57 = vsel %vm992_vm2, %v6552_v61, %v6221_v27  ;;  %v3124_v60 = vsel %vm992_vm2, %v10736_v16, %v6216_v2  ;;  %v10737_v17 = vrot.slane %v9258_v23, 7 }
 0x295   : > { %v3346_v26 = vsel %vm3325_vm3, %v10735_v53, %v3345_v40  ;;  %v3463_v39 = vrot.slane %v3050_v57, 7  ;;  %v3049_v46 = vsel %vm992_vm2, %v6553_v7, %v6220_v14  ;;  %v6234_v19 = vpop.permute.xlu0 %6233  ;;  %4263 = vmatmul.mubr.bf16.gmra.mxu1 %v9311_v25  ;;  %v3814_v35 = vpack.c.bf16 %v3469_v5, %v3458_v32  ;;  %v10738_v14 = vld [vmem:[#allocation90_spill] sm:$0xff]  ;;  %v6554_v5 = vld [vmem:[#allocation2 + $0xf0] sm:$0xff]  ;;  %v6555_v7 = vld [vmem:[#allocation2 + $0xe8] sm:$0xff] }
 0x296   : > { %v3489_v10 = vsel %vm3325_vm3, %v10737_v17, %v3488_v51  ;;  %v3462_v53 = vrot.slane %v3049_v46, 7  ;;  %v6236_v40 = vunpack.i.h.bf16 %v6234_v19  ;;  %v6235_v54 = vunpack.i.l.bf16 %v6234_v19  ;;  %v10739_v17 = vld [vmem:[#allocation87_spill] sm:$0xff] }
 0x297   : > { %v3472_v27 = vrot.slane %v3051_v43, 7  ;;  %v6226_v61 = vunpack.i.h.bf16 %v6224_v8  ;;  %v6225_v9 = vunpack.i.l.bf16 %v6224_v8  ;;  %v3790_v2 = vpack.c.bf16 %v3346_v26, %v9275_v28  ;;  %4270 = vmatprep.mubr.bf16.mxu1 %v3814_v35 }
 0x298   : > { %v3357_v57 = vrot.slane %v3124_v60, 7  ;;  %v9330_v16 = vsel %vm992_vm2, %v10738_v14, %v6236_v40  ;;  %v9332_v23 = vpack.c.bf16 %v3433_v12, %v3424_v34  ;;  %v3818_v51 = vpack.c.bf16 %v3489_v10, %v9294_v47  ;;  %v6229_v60 = vpop.permute.xlu1 %6228 }
 0x299   : > { %v9337_v32 = vsel %vm992_vm2, %v10739_v17, %v6235_v54  ;;  %v3048_v43 = vsel %vm992_vm2, %v6554_v5, %v6226_v61  ;;  %v3047_v28 = vsel %vm992_vm2, %v6555_v7, %v6225_v9  ;;  %4384 = vmatmul.mubr.bf16.vlgmr.msra.gmra.mxu0 %v3790_v2  ;;  %v6249_v26 = vpop.permute.xlu0 %6248  ;;  %v3464_v46 = vsel %vm3325_vm3, %v3462_v53, %v3463_v39  ;;  %v10740_v9 = vld [vmem:[#allocation89_spill] sm:$0xff]  ;;  %v10741_v2 = vld [vmem:[#allocation88_spill] sm:$0xff] }
 0x29a   : > { %v3452_v19 = vrot.slane %v3048_v43, 7  ;;  %v3443_v12 = vrot.slane %v3047_v28, 7  ;;  %4391 = vmatprep.mubr.bf16.mxu0 %v9247_v42  ;;  %v6251_v47 = vunpack.i.h.bf16 %v6249_v26  ;;  %v6250_v34 = vunpack.i.l.bf16 %v6249_v26  ;;  %v10742_v42 = vld [vmem:[#allocation67_spill] sm:$0xff]  ;;  %v10743_v28 = vld [vmem:[#allocation69_spill] sm:$0xff] }
 0x29b   : > { %v6231_v10 = vunpack.i.h.bf16 %v6229_v60  ;;  %v6230_v35 = vunpack.i.l.bf16 %v6229_v60  ;;  %v3473_v40 = vsel %vm3325_vm3, %v3463_v39, %v3472_v27 }
 0x29c   : > { %v3099_v61 = vsel %vm992_vm2, %v10740_v9, %v6251_v47  ;;  %v3098_v53 = vsel %vm992_vm2, %v10741_v2, %v6250_v34  ;;  %v3444_v5 = vsel %vm3325_vm3, %v3442_v18, %v3443_v12  ;;  %v6239_v8 = vpop.permute.xlu1 %6238  ;;  %v3453_v39 = vsel %vm3325_vm3, %v3443_v12, %v3452_v19 }
 0x29d   : > { %v3497_v43 = vrot.slane %v3098_v53, 7  ;;  %v3126_v7 = vsel %vm992_vm2, %v10742_v42, %v6231_v10  ;;  %v3125_v26 = vsel %vm992_vm2, %v10743_v28, %v6230_v35  ;;  %v6254_v60 = vpop.permute.xlu0 %6253  ;;  %4271 = vmatmul.mubr.bf16.gmra.mxu1 %v9332_v23  ;;  %v9357_v9 = vpack.c.bf16 %v3473_v40, %v3464_v46  ;;  %v10744_v10 = vld [vmem:[#allocation61_spill] sm:$0xff]  ;;  %v10746_v46 = vld [vmem:[#allocation70_spill] sm:$0xff] }
 0x29e   : > { %v3370_v27 = vrot.slane %v3126_v7, 7  ;;  %v3358_v54 = vrot.slane %v3125_v26, 7  ;;  %v6255_v47 = vunpack.i.l.bf16 %v6254_v60  ;;  %v3508_v34 = vrot.slane %v3099_v61, 7  ;;  %4278 = vmatprep.mubr.bf16.mxu1 %v3818_v51  ;;  %v10745_v7 = vld [vmem:[#allocation33_spill] sm:$0xff] }
 0x29f   : > { %v6256_v18 = vunpack.i.h.bf16 %v6254_v60  ;;  %v6241_v53 = vunpack.i.h.bf16 %v6239_v8  ;;  %v6240_v2 = vunpack.i.l.bf16 %v6239_v8  ;;  %v9363_v19 = vpack.c.bf16 %v3453_v39, %v3444_v5 }
 0x2a0   : > { %v3129_v42 = vsel %vm992_vm2, %v10744_v10, %v6255_v47  ;;  %v3359_v35 = vsel %vm3325_vm3, %v3357_v57, %v3358_v54  ;;  %v3371_v28 = vsel %vm3325_vm3, %v3358_v54, %v3370_v27  ;;  %v6244_v61 = vpop.permute.xlu1 %6243  ;;  %v10747_v8 = vrot.slane %v9305_v37, 7 }
 0x2a1   : > { %v3390_v12 = vrot.slane %v3129_v42, 7  ;;  %v3128_v26 = vsel %vm992_vm2, %v10745_v7, %v6241_v53  ;;  %v3127_v40 = vsel %vm992_vm2, %v10746_v46, %v6240_v2  ;;  %v6259_v51 = vpop.permute.xlu0 %6258  ;;  %v6246_v54 = vunpack.i.h.bf16 %v6244_v61  ;;  %v6556_v2 = vld [vmem:[#allocation2 + $0x130] sm:$0xff]  ;;  %v6557_v7 = vld [vmem:[#allocation2 + $0x128] sm:$0xff] }
 0x2a2   : > { %v3498_v60 = vsel %vm3325_vm3, %v10747_v8, %v3497_v43  ;;  %v3380_v47 = vrot.slane %v3128_v26, 7  ;;  %v3379_v10 = vrot.slane %v3127_v40, 7  ;;  %v6261_v57 = vunpack.i.h.bf16 %v6259_v51  ;;  %v6558_v8 = vld [vmem:[#allocation2 + $0x120] sm:$0xff] }
 0x2a3   : > { %v6260_v17 = vunpack.i.l.bf16 %v6259_v51  ;;  %v6245_v5 = vunpack.i.l.bf16 %v6244_v61  ;;  %v3795_v39 = vpack.c.bf16 %v3371_v28, %v3359_v35  ;;  %v3509_v27 = vsel %vm3325_vm3, %v3497_v43, %v3508_v34 }
 0x2a4   : > { %v9375_v53 = vsel %vm992_vm2, %v8943_v59, %v6256_v18  ;;  %v3054_v42 = vsel %vm992_vm2, %v6556_v2, %v6261_v57  ;;  %v3822_v46 = vpack.c.bf16 %v3509_v27, %v3498_v60  ;;  %v3052_v51 = vsel %vm992_vm2, %v6558_v8, %v6246_v54  ;;  %v6269_v34 = vpop.permute.xlu1 %6268 }
 0x2a5   : > { %v3053_v37 = vsel %vm992_vm2, %v6557_v7, %v6260_v17  ;;  %v3492_v26 = vrot.slane %v3054_v42, 7  ;;  %v3102_v35 = vsel %vm992_vm2, %v9008_v24, %v6245_v5  ;;  %4392 = vmatmul.mubr.bf16.gmra.mxu0 %v3795_v39  ;;  %v6264_v43 = vpop.permute.xlu0 %6263  ;;  %4279 = vmatmul.mubr.bf16.gmra.mxu1 %v9363_v19  ;;  %v3381_v17 = vsel %vm3325_vm3, %v3379_v10, %v3380_v47  ;;  %v6559_v7 = vld [vmem:[#allocation2 + $0x148] sm:$0xff] }
 0x2a6   : > { %v3483_v40 = vrot.slane %v3053_v37, 7  ;;  %v3528_v18 = vrot.slane %v3102_v35, 7  ;;  %4399 = vmatprep.mubr.bf16.mxu0 %v9279_v22  ;;  %v6266_v28 = vunpack.i.h.bf16 %v6264_v43  ;;  %v6265_v61 = vunpack.i.l.bf16 %v6264_v43  ;;  %4286 = vmatprep.mubr.bf16.mxu1 %v3822_v46  ;;  %v6560_v37 = vld [vmem:[#allocation2 + $0x140] sm:$0xff]  ;;  %v10750_v46 = vld [vmem:[#allocation60_spill] sm:$0xff] }
 0x2a7   : > { %v6271_v60 = vunpack.i.h.bf16 %v6269_v34  ;;  %v6270_v57 = vunpack.i.l.bf16 %v6269_v34  ;;  %v3391_v54 = vsel %vm3325_vm3, %v3380_v47, %v3390_v12  ;;  %v10748_v27 = vrot.slane %v9330_v16, 7 }
 0x2a8   : > { %v10749_v5 = vrot.slane %v9337_v32, 7  ;;  %v3536_v2 = vrot.slane %v9375_v53, 7  ;;  %v3482_v42 = vrot.slane %v3052_v51, 7  ;;  %v9393_v22 = vsel %vm992_vm2, %v6559_v7, %v6266_v28  ;;  %v6279_v47 = vpop.permute.xlu1 %6278  ;;  %v6561_v7 = vld [vmem:[#allocation2 + $0x150] sm:$0xff] }
 0x2a9   : > { %v3055_v10 = vsel %vm992_vm2, %v6560_v37, %v6265_v61  ;;  %v3130_v8 = vsel %vm992_vm2, %v10750_v46, %v6271_v60  ;;  %v6274_v12 = vpop.permute.xlu0 %6273  ;;  %v3799_v35 = vpack.c.bf16 %v3391_v54, %v3381_v17  ;;  %v10751_v32 = vmov %v10748_v27  ;;  %v10752_v46 = vld [vmem:[#allocation68_spill] sm:$0xff]  ;;  %v10753_v54 = vld [vmem:[#allocation26_spill] sm:$0xff] }
 0x2aa   : > { %v3518_v39 = vsel %vm3325_vm3, %v10749_v5, %v10748_v27  ;;  %v3529_v43 = vsel %vm3325_vm3, %v10751_v32, %v3528_v18  ;;  %v3493_v53 = vsel %vm3325_vm3, %v3483_v40, %v3492_v26  ;;  %v3503_v51 = vrot.slane %v9393_v22, 7 }
 0x2ab   : > { %v3502_v34 = vrot.slane %v3055_v10, 7  ;;  %v6276_v28 = vunpack.i.h.bf16 %v6274_v12  ;;  %v6275_v27 = vunpack.i.l.bf16 %v6274_v12  ;;  %v3399_v5 = vrot.slane %v3130_v8, 7  ;;  %v10754_v8 = vld [vmem:[#allocation92_spill] sm:$0xff] }
 0x2ac   : > { %v3057_v61 = vsel %vm992_vm2, %v6561_v7, %v6270_v57  ;;  %v6281_v37 = vunpack.i.h.bf16 %v6279_v47  ;;  %v6280_v60 = vunpack.i.l.bf16 %v6279_v47  ;;  %v3826_v18 = vpack.c.bf16 %v3529_v43, %v3518_v39  ;;  %v6284_v47 = vpop.permute.xlu1 %6283 }
 0x2ad   : > { %v3132_v17 = vsel %vm992_vm2, %v10752_v46, %v6276_v28  ;;  %v3131_v16 = vsel %vm992_vm2, %v10753_v54, %v6275_v27  ;;  %v3484_v26 = vsel %vm3325_vm3, %v3482_v42, %v3483_v40  ;;  %4400 = vmatmul.mubr.bf16.gmra.mxu0 %v3799_v35  ;;  %v6289_v57 = vpop.permute.xlu0 %6288  ;;  %4287 = vmatmul.mubr.bf16.gmra.mxu1 %v9357_v9  ;;  %v6286_v40 = vunpack.i.h.bf16 %v6284_v47 }
 0x2ae   : > { %v3410_v32 = vrot.slane %v3132_v17, 7  ;;  %v3400_v22 = vrot.slane %v3131_v16, 7  ;;  %v3105_v10 = vsel %vm992_vm2, %v9020_v20, %v6281_v37  ;;  %v3104_v12 = vsel %vm992_vm2, %v10754_v8, %v6280_v60  ;;  %4407 = vmatprep.mubr.bf16.mxu0 %v9311_v25  ;;  %4294 = vmatprep.mubr.bf16.mxu1 %v3826_v18  ;;  %v6562_v17 = vld [vmem:[#allocation2 + $0x160] sm:$0xff] }
 0x2af   : > { %v3548_v7 = vrot.slane %v3105_v10, 7  ;;  %v3537_v59 = vrot.slane %v3104_v12, 7  ;;  %v6291_v39 = vunpack.i.h.bf16 %v6289_v57  ;;  %v6290_v43 = vunpack.i.l.bf16 %v6289_v57 }
 0x2b0   : > { %v6285_v42 = vunpack.i.l.bf16 %v6284_v47  ;;  %v3401_v28 = vsel %vm3325_vm3, %v3399_v5, %v3400_v22  ;;  %v3411_v27 = vsel %vm3325_vm3, %v3400_v22, %v3410_v32  ;;  %v3512_v37 = vrot.slane %v3057_v61, 7  ;;  %v6299_v18 = vpop.permute.xlu1 %6298 }
 0x2b1   : > { %v3108_v35 = vsel %vm992_vm2, %v9030_v3, %v6290_v43  ;;  %v9419_v60 = vpack.c.bf16 %v3493_v53, %v3484_v26  ;;  %v3504_v46 = vsel %vm3325_vm3, %v3502_v34, %v3503_v51  ;;  %v3058_v25 = vsel %vm992_vm2, %v6562_v17, %v6291_v39  ;;  %v6294_v5 = vpop.permute.xlu0 %6293  ;;  %v10755_v39 = vld [vmem:[#allocation9_spill] sm:$0xff] }
 0x2b2   : > { %v3107_v54 = vsel %vm992_vm2, %v9012_v29, %v6286_v40  ;;  %v3106_v16 = vsel %vm992_vm2, %v8977_v55, %v6285_v42  ;;  %v3803_v32 = vpack.c.bf16 %v3411_v27, %v3401_v28  ;;  %v3568_v61 = vrot.slane %v3108_v35, 7  ;;  %v10756_v40 = vld [vmem:[#allocation42_spill] sm:$0xff] }
 0x2b3   : > { %v6296_v22 = vunpack.i.h.bf16 %v6294_v5  ;;  %v6295_v10 = vunpack.i.l.bf16 %v6294_v5  ;;  %v3538_v53 = vsel %vm3325_vm3, %v3536_v2, %v3537_v59  ;;  %v3557_v26 = vrot.slane %v3107_v54, 7  ;;  %v10757_v35 = vld [vmem:[#allocation58_spill] sm:$0xff] }
 0x2b4   : > { %v6301_v12 = vunpack.i.h.bf16 %v6299_v18  ;;  %v6300_v34 = vunpack.i.l.bf16 %v6299_v18  ;;  %v3549_v57 = vsel %vm3325_vm3, %v3537_v59, %v3548_v7  ;;  %v3556_v47 = vrot.slane %v3106_v16, 7  ;;  %v6304_v18 = vpop.permute.xlu1 %6303 }
 0x2b5   : > { %v3134_v43 = vsel %vm992_vm2, %v10755_v39, %v6296_v22  ;;  %v3133_v42 = vsel %vm992_vm2, %v10756_v40, %v6295_v10  ;;  %v3513_v17 = vsel %vm3325_vm3, %v3503_v51, %v3512_v37  ;;  %4408 = vmatmul.mubr.bf16.gmra.mxu0 %v3803_v32  ;;  %v3830_v2 = vpack.c.bf16 %v3549_v57, %v3538_v53  ;;  %v6314_v54 = vpop.permute.xlu0 %6313  ;;  %v10758_v57 = vld [vmem:[#allocation62_spill] sm:$0xff]  ;;  %v6563_v39 = vld [vmem:[#allocation2 + $0x190] sm:$0xff] }
 0x2b6   : > { %v3420_v28 = vrot.slane %v3134_v43, 7  ;;  %v3419_v27 = vrot.slane %v3133_v42, 7  ;;  %v3135_v5 = vsel %vm992_vm2, %v10757_v35, %v6300_v34  ;;  %v3522_v55 = vrot.slane %v3058_v25, 7  ;;  %4295 = vmatmul.mubr.bf16.gmra.mxu1 %v9419_v60  ;;  %4415 = vmatprep.mubr.bf16.mxu0 %v9332_v23 }
 0x2b7   : > { %v3430_v59 = vrot.slane %v3135_v5, 7  ;;  %v6316_v7 = vunpack.i.h.bf16 %v6314_v54  ;;  %v6315_v16 = vunpack.i.l.bf16 %v6314_v54  ;;  %v3109_v51 = vsel %vm992_vm2, %v8981_v62, %v6301_v12  ;;  %4302 = vmatprep.mubr.bf16.mxu1 %v3830_v2  ;;  %v6564_v12 = vld [vmem:[#allocation2 + $0x170] sm:$0xff] }
 0x2b8   : > { %v6306_v37 = vunpack.i.h.bf16 %v6304_v18  ;;  %v6305_v22 = vunpack.i.l.bf16 %v6304_v18  ;;  %v9440_v10 = vpack.c.bf16 %v3513_v17, %v3504_v46  ;;  %v3421_v32 = vsel %vm3325_vm3, %v3419_v27, %v3420_v28  ;;  %v6565_v46 = vld [vmem:[#allocation2 + $0x168] sm:$0xff]  ;;  %v6309_v27 = vpop.permute.xlu1 %6308 }
 0x2b9   : > { %v3431_v53 = vsel %vm3325_vm3, %v3420_v28, %v3430_v59  ;;  %v3558_v25 = vsel %vm3325_vm3, %v3556_v47, %v3557_v26  ;;  %v3569_v34 = vsel %vm3325_vm3, %v3557_v26, %v3568_v61  ;;  %v3136_v23 = vsel %vm992_vm2, %v10758_v57, %v6316_v7  ;;  %v6324_v17 = vpop.permute.xlu0 %6323  ;;  %v6566_v57 = vld [vmem:[#allocation2 + $0x188] sm:$0xff] }
 0x2ba   : > { %v9449_v43 = vsel %vm992_vm2, %v6563_v39, %v6315_v16  ;;  %v3060_v40 = vsel %vm992_vm2, %v6564_v12, %v6306_v37  ;;  %v3059_v42 = vsel %vm992_vm2, %v6565_v46, %v6305_v22  ;;  %v6326_v47 = vunpack.i.h.bf16 %v6324_v17  ;;  %v6567_v12 = vld [vmem:[#allocation2 + $0x180] sm:$0xff] }
 0x2bb   : > { %v3532_v28 = vrot.slane %v3060_v40, 7  ;;  %v3523_v35 = vrot.slane %v3059_v42, 7  ;;  %v6325_v5 = vunpack.i.l.bf16 %v6324_v17  ;;  %v6311_v61 = vunpack.i.h.bf16 %v6309_v27 }
 0x2bc   : > { %v6310_v26 = vunpack.i.l.bf16 %v6309_v27  ;;  %v3807_v2 = vpack.c.bf16 %v3431_v53, %v3421_v32  ;;  %v3834_v54 = vpack.c.bf16 %v3569_v34, %v3558_v25  ;;  %v3111_v18 = vsel %vm992_vm2, %v9027_v15, %v6326_v47  ;;  %v6319_v53 = vpop.permute.xlu1 %6318 }
 0x2bd   : > { %v3110_v59 = vsel %vm992_vm2, %v9024_v31, %v6325_v5  ;;  %v3524_v7 = vsel %vm3325_vm3, %v3522_v55, %v3523_v35  ;;  %v3533_v16 = vsel %vm3325_vm3, %v3523_v35, %v3532_v28  ;;  %v3588_v37 = vrot.slane %v3111_v18, 7  ;;  %v6329_v32 = vpop.permute.xlu0 %6328 }
 0x2be   : > { %v3577_v22 = vrot.slane %v3110_v59, 7  ;;  %v3062_v39 = vsel %vm992_vm2, %v6566_v57, %v6311_v61  ;;  %v3061_v40 = vsel %vm992_vm2, %v6567_v12, %v6310_v26  ;;  %4416 = vmatmul.mubr.bf16.gmra.mxu0 %v3807_v2  ;;  %v3576_v25 = vrot.slane %v3109_v51, 7  ;;  %4303 = vmatmul.mubr.bf16.gmra.mxu1 %v9440_v10  ;;  %v10759_v61 = vld [vmem:[#allocation47_spill] sm:$0xff] }
 0x2bf   : > { %v3543_v34 = vrot.slane %v3062_v39, 7  ;;  %4423 = vmatprep.mubr.bf16.mxu0 %v9363_v19  ;;  %v6331_v55 = vunpack.i.h.bf16 %v6329_v32  ;;  %v3542_v46 = vrot.slane %v3061_v40, 7  ;;  %4310 = vmatprep.mubr.bf16.mxu1 %v3834_v54  ;;  %v6330_v42 = vunpack.i.l.bf16 %v6329_v32  ;;  %v10760_v19 = vld [vmem:[#allocation8_spill] sm:$0xff] }
 0x2c0   : > { %v6321_v17 = vunpack.i.h.bf16 %v6319_v53  ;;  %v6320_v27 = vunpack.i.l.bf16 %v6319_v53  ;;  %v3439_v28 = vrot.slane %v3136_v23, 7  ;;  %v3552_v35 = vrot.slane %v9449_v43, 7  ;;  %v6334_v18 = vpop.permute.xlu1 %6333 }
 0x2c1   : > { %v9464_v47 = vpack.c.bf16 %v3533_v16, %v3524_v7  ;;  %v3578_v5 = vsel %vm3325_vm3, %v3576_v25, %v3577_v22  ;;  %v3113_v51 = vsel %vm992_vm2, %v9034_v49, %v6331_v55  ;;  %v6344_v54 = vpop.permute.xlu0 %6343  ;;  %v3589_v59 = vsel %vm3325_vm3, %v3577_v22, %v3588_v37  ;;  %v6569_v22 = vld [vmem:[#allocation2 + $0x1a8] sm:$0xff] }
 0x2c2   : > { %v3138_v26 = vsel %vm992_vm2, %v10759_v61, %v6321_v17  ;;  %v3137_v2 = vsel %vm992_vm2, %v10760_v19, %v6320_v27  ;;  %v6346_v43 = vunpack.i.h.bf16 %v6344_v54  ;;  %v6345_v7 = vunpack.i.l.bf16 %v6344_v54  ;;  %v6568_v17 = vld [vmem:[#allocation2 + $0x1b0] sm:$0xff]  ;;  %v6570_v61 = vld [vmem:[#allocation2 + $0x1a0] sm:$0xff] }
 0x2c3   : > { %v3450_v23 = vrot.slane %v3138_v26, 7  ;;  %v3440_v57 = vrot.slane %v3137_v2, 7  ;;  %v3112_v16 = vsel %vm992_vm2, %v8989_v44, %v6330_v42  ;;  %v6336_v39 = vunpack.i.h.bf16 %v6334_v18 }
 0x2c4   : > { %v6335_v12 = vunpack.i.l.bf16 %v6334_v18  ;;  %v3544_v40 = vsel %vm3325_vm3, %v3542_v46, %v3543_v34  ;;  %v3597_v32 = vrot.slane %v3113_v51, 7  ;;  %v3838_v53 = vpack.c.bf16 %v3589_v59, %v3578_v5  ;;  %v6339_v5 = vpop.permute.xlu1 %6338 }
 0x2c5   : > { %v3441_v25 = vsel %vm3325_vm3, %v3439_v28, %v3440_v57  ;;  %v3451_v55 = vsel %vm3325_vm3, %v3440_v57, %v3450_v23  ;;  %v9480_v37 = vsel %vm992_vm2, %v6568_v17, %v6346_v43  ;;  %v9483_v27 = vsel %vm992_vm2, %v6569_v22, %v6345_v7  ;;  %v6349_v51 = vpop.permute.xlu0 %6348  ;;  %v10762_v22 = vld [vmem:[#allocation56_spill] sm:$0xff] }
 0x2c6   : > { %v3064_v42 = vsel %vm992_vm2, %v6570_v61, %v6336_v39  ;;  %v3114_v46 = vsel %vm992_vm2, %v9045_v58, %v6335_v12  ;;  %v3596_v26 = vrot.slane %v3112_v16, 7  ;;  %4311 = vmatmul.mubr.bf16.gmra.mxu1 %v9464_v47  ;;  %v6351_v19 = vunpack.i.h.bf16 %v6349_v51  ;;  %v10761_v39 = vld [vmem:[#allocation64_spill] sm:$0xff]  ;;  %v10763_v61 = vld [vmem:[#allocation6_spill] sm:$0xff] }
 0x2c7   : > { %v3608_v28 = vrot.slane %v3114_v46, 7  ;;  %v6350_v2 = vunpack.i.l.bf16 %v6349_v51  ;;  %4318 = vmatprep.mubr.bf16.mxu1 %v3838_v53  ;;  %v6341_v54 = vunpack.i.h.bf16 %v6339_v5  ;;  %v6340_v18 = vunpack.i.l.bf16 %v6339_v5 }
 0x2c8   : > { %v3811_v59 = vpack.c.bf16 %v3451_v55, %v3441_v25  ;;  %v3553_v23 = vsel %vm3325_vm3, %v3543_v34, %v3552_v35  ;;  %v3572_v57 = vrot.slane %v9480_v37, 7  ;;  %v3563_v43 = vrot.slane %v9483_v27, 7  ;;  %v6359_v35 = vpop.permute.xlu1 %6358 }
 0x2c9   : > { %v3562_v7 = vrot.slane %v3064_v42, 7  ;;  %v3141_v12 = vsel %vm992_vm2, %v10761_v39, %v6350_v2  ;;  %v3115_v16 = vsel %vm992_vm2, %v9049_v1, %v6351_v19  ;;  %v3140_v53 = vsel %vm992_vm2, %v10762_v22, %v6341_v54  ;;  %v6354_v34 = vpop.permute.xlu0 %6353  ;;  %v6571_v39 = vld [vmem:[#allocation2 + $0x1c8] sm:$0xff] }
 0x2ca   : > { %v3470_v17 = vrot.slane %v3141_v12, 7  ;;  %v3139_v25 = vsel %vm992_vm2, %v10763_v61, %v6340_v18  ;;  %4424 = vmatmul.mubr.bf16.gmra.mxu0 %v3811_v59  ;;  %v3460_v55 = vrot.slane %v3140_v53, 7  ;;  %v6356_v27 = vunpack.i.h.bf16 %v6354_v34 }
 0x2cb   : > { %v3459_v37 = vrot.slane %v3139_v25, 7  ;;  %4431 = vmatprep.mubr.bf16.mxu0 %v9357_v9  ;;  %v3609_v42 = vsel %vm3325_vm3, %v3597_v32, %v3608_v28  ;;  %v6361_v46 = vunpack.i.h.bf16 %v6359_v35  ;;  %v6360_v51 = vunpack.i.l.bf16 %v6359_v35 }
 0x2cc   : > { %v9502_v5 = vpack.c.bf16 %v3553_v23, %v3544_v40  ;;  %v3598_v19 = vsel %vm3325_vm3, %v3596_v26, %v3597_v32  ;;  %v3616_v2 = vrot.slane %v3115_v16, 7  ;;  %v6355_v54 = vunpack.i.l.bf16 %v6354_v34  ;;  %v6364_v22 = vpop.permute.xlu1 %6363 }
 0x2cd   : > { %v3461_v18 = vsel %vm3325_vm3, %v3459_v37, %v3460_v55  ;;  %v3471_v59 = vsel %vm3325_vm3, %v3460_v55, %v3470_v17  ;;  %v9508_v12 = vsel %vm992_vm2, %v6571_v39, %v6356_v27  ;;  %v3117_v9 = vsel %vm992_vm2, %v9077_v38, %v6361_v46  ;;  %v6369_v23 = vpop.permute.xlu0 %6368  ;;  %v6572_v55 = vld [vmem:[#allocation2 + $0x1c0] sm:$0xff] }
 0x2ce   : > { %v3116_v28 = vsel %vm992_vm2, %v9072_v21, %v6360_v51  ;;  %v3842_v40 = vpack.c.bf16 %v3609_v42, %v3598_v19  ;;  %4319 = vmatmul.mubr.bf16.gmra.mxu1 %v9502_v5  ;;  %v6371_v26 = vunpack.i.h.bf16 %v6369_v23  ;;  %v6370_v16 = vunpack.i.l.bf16 %v6369_v23  ;;  %v10764_v27 = vld [vmem:[#allocation7_spill] sm:$0xff] }
 0x2cf   : > { %v3617_v32 = vrot.slane %v3116_v28, 7  ;;  %v3564_v17 = vsel %vm3325_vm3, %v3562_v7, %v3563_v43  ;;  %v3628_v53 = vrot.slane %v3117_v9, 7  ;;  %v6366_v61 = vunpack.i.h.bf16 %v6364_v22  ;;  %v10765_v46 = vld [vmem:[#allocation63_spill] sm:$0xff] }
 0x2d0   : > { %4326 = vmatprep.mubr.bf16.mxu1 %v3842_v40  ;;  %v6365_v25 = vunpack.i.l.bf16 %v6364_v22  ;;  %v3815_v34 = vpack.c.bf16 %v3471_v59, %v3461_v18  ;;  %v3583_v35 = vrot.slane %v9508_v12, 7  ;;  %v3067_v37 = vsel %vm992_vm2, %v6572_v55, %v6355_v54  ;;  %v10766_v28 = vld [vmem:[#allocation3_spill] sm:$0xff]  ;;  %v6374_v40 = vpop.permute.xlu1 %6373  ;;  %v6573_v12 = vld [vmem:[#allocation2 + $0x1d0] sm:$0xff] }
 0x2d1   : > { %v3144_v42 = vsel %vm992_vm2, %v10764_v27, %v6371_v26  ;;  %v3143_v51 = vsel %vm992_vm2, %v10765_v46, %v6370_v16  ;;  %v3142_v7 = vsel %vm992_vm2, %v10766_v28, %v6366_v61  ;;  %v6379_v9 = vpop.permute.xlu0 %6378  ;;  %v3573_v18 = vsel %vm3325_vm3, %v3563_v43, %v3572_v57 }
 0x2d2   : > { %v3490_v19 = vrot.slane %v3144_v42, 7  ;;  %v3480_v39 = vrot.slane %v3143_v51, 7  ;;  %4432 = vmatmul.mubr.bf16.gmra.mxu0 %v3815_v34  ;;  %v3479_v59 = vrot.slane %v3142_v7, 7  ;;  %v3069_v54 = vsel %vm992_vm2, %v6573_v12, %v6365_v25  ;;  %v10768_v12 = vld [vmem:[#allocation4_spill] sm:$0xff] }
 0x2d3   : > { %4439 = vmatprep.mubr.bf16.mxu0 %v9419_v60  ;;  %v6380_v23 = vunpack.i.l.bf16 %v6379_v9  ;;  %v3618_v22 = vsel %vm3325_vm3, %v3616_v2, %v3617_v32  ;;  %v3582_v26 = vrot.slane %v3067_v37, 7  ;;  %v6376_v16 = vunpack.i.h.bf16 %v6374_v40 }
 0x2d4   : > { %v6375_v55 = vunpack.i.l.bf16 %v6374_v40  ;;  %v3629_v27 = vsel %vm3325_vm3, %v3617_v32, %v3628_v53  ;;  %v9531_v34 = vpack.c.bf16 %v3573_v18, %v3564_v17  ;;  %v3481_v57 = vsel %vm3325_vm3, %v3479_v59, %v3480_v39  ;;  %v6389_v46 = vpop.permute.xlu1 %6388  ;;  %v10767_v18 = vld [vmem:[#allocation5_spill] sm:$0xff] }
 0x2d5   : > { %v3120_v61 = vsel %vm992_vm2, %v9094_v45, %v6380_v23  ;;  %v3491_v43 = vsel %vm3325_vm3, %v3480_v39, %v3490_v19  ;;  %v3592_v25 = vrot.slane %v3069_v54, 7  ;;  %v3119_v60 = vsel %vm992_vm2, %v9085_v30, %v6376_v16  ;;  %v6384_v42 = vpop.permute.xlu0 %6383 }
 0x2d6   : > { %v3118_v2 = vsel %vm992_vm2, %v9056_v13, %v6375_v55  ;;  %v3846_v37 = vpack.c.bf16 %v3629_v27, %v3618_v22  ;;  %v3637_v32 = vrot.slane %v3119_v60, 7  ;;  %4327 = vmatmul.mubr.bf16.gmra.mxu1 %v9531_v34  ;;  %v6386_v17 = vunpack.i.h.bf16 %v6384_v42 }
 0x2d7   : > { %v3636_v53 = vrot.slane %v3118_v2, 7  ;;  %v6385_v51 = vunpack.i.l.bf16 %v6384_v42  ;;  %v3648_v28 = vrot.slane %v3120_v61, 7  ;;  %v6391_v7 = vunpack.i.h.bf16 %v6389_v46  ;;  %v6574_v2 = vld [vmem:[#allocation2 + $0x1f0] sm:$0xff] }
 0x2d8   : > { %4334 = vmatprep.mubr.bf16.mxu1 %v3846_v37  ;;  %v6390_v19 = vunpack.i.l.bf16 %v6389_v46  ;;  %v3819_v39 = vpack.c.bf16 %v3491_v43, %v3481_v57  ;;  %v6381_v40 = vunpack.i.h.bf16 %v6379_v9  ;;  %v3146_v59 = vsel %vm992_vm2, %v10767_v18, %v6386_v17  ;;  %v2905_v22 = vpop.permute.xlu1 %2904  ;;  %v6575_v57 = vld [vmem:[#allocation2 + $0x1e8] sm:$0xff]  ;;  %v10769_v46 = vld [vmem:[#allocation27_spill] sm:$0xff] }
 0x2d9   : > { %v3145_v54 = vsel %vm992_vm2, %v10768_v12, %v6385_v51  ;;  %v6394_v23 = vpop.permute.xlu0 %6393  ;;  %v3584_v16 = vsel %vm3325_vm3, %v3582_v26, %v3583_v35  ;;  %v3593_v55 = vsel %vm3325_vm3, %v3583_v35, %v3592_v25  ;;  %v3638_v27 = vsel %vm3325_vm3, %v3636_v53, %v3637_v32  ;;  %v6576_v35 = vld [vmem:[#allocation2 + $0x1e0] sm:$0xff] }
 0x2da   : > { %4440 = vmatmul.mubr.bf16.gmra.mxu0 %v3819_v39  ;;  %v3500_v61 = vrot.slane %v3146_v59, 7  ;;  %v3499_v60 = vrot.slane %v3145_v54, 7  ;;  %v3072_v9 = vsel %vm992_vm2, %v6574_v2, %v6391_v7  ;;  %v3071_v43 = vsel %vm992_vm2, %v6575_v57, %v6390_v19  ;;  %v10770_v54 = vld [vmem:[#allocation41_spill] sm:$0xff] }
 0x2db   : > { %4447 = vmatprep.mubr.bf16.mxu0 %v9440_v10  ;;  %v6396_v37 = vunpack.i.h.bf16 %v6394_v23  ;;  %v6395_v42 = vunpack.i.l.bf16 %v6394_v23  ;;  %v3147_v17 = vsel %vm992_vm2, %v10769_v46, %v2905_v22  ;;  %v3649_v26 = vsel %vm3325_vm3, %v3637_v32, %v3648_v28  ;;  %v10771_v23 = vld [vmem:[#allocation10_spill] sm:$0xff] }
 0x2dc   : > { %v3070_v25 = vsel %vm992_vm2, %v6576_v35, %v6381_v40  ;;  %v3510_v53 = vrot.slane %v3147_v17, 7  ;;  %v9554_v51 = vpack.c.bf16 %v3593_v55, %v3584_v16  ;;  %v3349_v7 = vrot.slane %v8669_v56, 7  ;;  %v2911_v59 = vpop.permute.xlu1 %2910  ;;  %v10772_v56 = vld [vmem:[#allocation43_spill] sm:$0xff] }
 0x2dd   : > { %v3612_v39 = vrot.slane %v3072_v9, 7  ;;  %v3603_v18 = vrot.slane %v3071_v43, 7  ;;  %v3850_v19 = vpack.c.bf16 %v3649_v26, %v3638_v27  ;;  %v3339_v10 = vrot.slane %v8666_v48, 7  ;;  %v6399_v27 = vpop.permute.xlu0 %6398 }
 0x2de   : > { %v3511_v12 = vsel %vm3325_vm3, %v3500_v61, %v3510_v53  ;;  %4335 = vmatmul.mubr.bf16.gmra.mxu1 %v9554_v51  ;;  %v3150_v32 = vsel %vm992_vm2, %v10770_v54, %v2911_v59  ;;  %v3501_v28 = vsel %vm3325_vm3, %v3499_v60, %v3500_v61  ;;  %v3602_v40 = vrot.slane %v3070_v25, 7 }
 0x2df   : > { %v3149_v22 = vsel %vm992_vm2, %v10771_v23, %v6396_v37  ;;  %v3148_v16 = vsel %vm992_vm2, %v10772_v56, %v6395_v42  ;;  %4342 = vmatprep.mubr.bf16.mxu1 %v3850_v19  ;;  %v3823_v55 = vpack.c.bf16 %v3511_v12, %v3501_v28  ;;  %v3530_v48 = vrot.slane %v3150_v32, 7  ;;  %v10774_v12 = vld [vmem:[#allocation30_spill] sm:$0xff]  ;;  %v10775_v32 = vld [vmem:[#allocation17_spill] sm:$0xff] }
 0x2e0   : > { %v3338_v2 = vrot.slane %v8641_v4, 7  ;;  %v3604_v9 = vsel %vm3325_vm3, %v3602_v40, %v3603_v18  ;;  %v3613_v57 = vsel %vm3325_vm3, %v3603_v18, %v3612_v39  ;;  %v3520_v43 = vrot.slane %v3149_v22, 7  ;;  %v10773_v39 = vld [vmem:[#allocation21_spill] sm:$0xff] }
 0x2e1   : > { %v3519_v61 = vrot.slane %v3148_v16, 7  ;;  %v3350_v42 = vsel %vm3325_vm3, %v3339_v10, %v3349_v7  ;;  %v6401_v46 = vunpack.i.h.bf16 %v6399_v27  ;;  %v6400_v17 = vunpack.i.l.bf16 %v6399_v27 }
 0x2e2   : > { %4448 = vmatmul.mubr.bf16.gmra.mxu0 %v3823_v55  ;;  %v6404_v60 = vpop.permute.xlu1 %6403  ;;  %v3340_v37 = vsel %vm3325_vm3, %v3338_v2, %v3339_v10  ;;  %v3364_v35 = vrot.slane %v8688_v52, 7  ;;  %v3531_v4 = vsel %vm3325_vm3, %v3520_v43, %v3530_v48  ;;  %v9575_v25 = vpack.c.bf16 %v3613_v57, %v3604_v9  ;;  %v6409_v10 = vpop.permute.xlu0 %6408 }
 0x2e3   : > { %4455 = vmatprep.mubr.bf16.mxu0 %v9464_v47  ;;  %v6405_v26 = vunpack.i.l.bf16 %v6404_v60  ;;  %v3374_v53 = vrot.slane %v8684_v6, 7  ;;  %v3792_v19 = vpack.c.bf16 %v3350_v42, %v3340_v37  ;;  %v3363_v47 = vrot.slane %v8677_v36, 7  ;;  %v10776_v37 = vld [vmem:[#allocation13_spill] sm:$0xff] }
 0x2e4   : > { %v3394_v59 = vrot.slane %v8740_v50, 7  ;;  %v3386_v7 = vrot.slane %v8737_v41, 7  ;;  %v3521_v52 = vsel %vm3325_vm3, %v3519_v61, %v3520_v43  ;;  %v3152_v54 = vsel %vm992_vm2, %v10774_v12, %v6401_v46 }
 0x2e5   : > { %v3153_v18 = vsel %vm992_vm2, %v10773_v39, %v6405_v26  ;;  %v3151_v6 = vsel %vm992_vm2, %v10775_v32, %v6400_v17  ;;  %v3827_v28 = vpack.c.bf16 %v3531_v4, %v3521_v52  ;;  %v3365_v36 = vsel %vm3325_vm3, %v3363_v47, %v3364_v35  ;;  %v10778_v17 = vld [vmem:[#allocation59_spill] sm:$0xff] }
 0x2e6   : > { %4343 = vmatmul.mubr.bf16.gmra.mxu1 %v9575_v25  ;;  %v3550_v40 = vrot.slane %v3153_v18, 7  ;;  %v3385_v50 = vrot.slane %v8729_v0, 7  ;;  %v3375_v41 = vsel %vm3325_vm3, %v3364_v35, %v3374_v53  ;;  %v6411_v23 = vunpack.i.h.bf16 %v6409_v10  ;;  %v6414_v9 = vpop.permute.xlu1 %6413  ;;  %v9598_v43 = vpop.permute.xlu0 %6418  ;;  %v10779_v35 = vld [vmem:[#allocation73_spill] sm:$0xff]  ;;  %v10780_v53 = vld [vmem:[#allocation72_spill] sm:$0xff] }
 0x2e7   : > { %5794 = vmatprep.mubr.msk.bf16.mxu1 %vm992_vm2, %v3792_v19  ;;  %v6410_v22 = vunpack.i.l.bf16 %v6409_v10  ;;  %v6406_v56 = vunpack.i.h.bf16 %v6404_v60  ;;  %v3540_v16 = vrot.slane %v3152_v54, 7  ;;  %v3539_v55 = vrot.slane %v3151_v6, 7 }
 0x2e8   : > { %v3387_v27 = vsel %vm3325_vm3, %v3385_v50, %v3386_v7  ;;  %v3395_v48 = vsel %vm3325_vm3, %v3386_v7, %v3394_v59  ;;  %v3406_v2 = vrot.slane %v8770_v63, 7  ;;  %v3797_v57 = vpack.c.bf16 %v3375_v41, %v3365_v36  ;;  %v10781_v7 = vld [vmem:[#allocation57_spill] sm:$0xff]  ;;  %v10782_v41 = vld [vmem:[#allocation80_spill] sm:$0xff] }
 0x2e9   : > { %v3414_v0 = vrot.slane %v8773_v33, 7  ;;  %v3551_v61 = vsel %vm3325_vm3, %v3540_v16, %v3550_v40  ;;  %v3405_v60 = vrot.slane %v8763_v11, 7  ;;  %v3156_v42 = vsel %vm992_vm2, %v10776_v37, %v6411_v23 }
 0x2ea   : > { %4456 = vmatmul.mubr.bf16.gmra.mxu0 %v3827_v28  ;;  %v3154_v26 = vsel %vm992_vm2, %v10778_v17, %v6406_v56  ;;  %v3801_v63 = vpack.c.bf16 %v3395_v48, %v3387_v27  ;;  %v3434_v4 = vrot.slane %v10779_v35, 7  ;;  %v3426_v33 = vrot.slane %v10780_v53, 7  ;;  %v6424_v32 = vpop.permute.xlu1 %6423  ;;  %v9618_v36 = vpop.permute.xlu0 %6428 }
 0x2eb   : > { %4463 = vmatprep.mubr.bf16.mxu0 %v9502_v5  ;;  %v10777_v5 = vld [vmem:[#allocation34_spill] sm:$0xff]  ;;  %v3541_v39 = vsel %vm3325_vm3, %v3539_v55, %v3540_v16  ;;  %v3407_v18 = vsel %vm3325_vm3, %v3405_v60, %v3406_v2  ;;  %v3570_v19 = vrot.slane %v3156_v42, 7  ;;  %v3559_v59 = vrot.slane %v3154_v26, 7  ;;  %v10784_v55 = vld [vmem:[#allocation87_spill] sm:$0xff]  ;;  %v10788_v42 = vld [vmem:[#allocation89_spill] sm:$0xff] }
 0x2ec   : > { %v3155_v46 = vsel %vm992_vm2, %v10777_v5, %v6410_v22  ;;  %v3831_v11 = vpack.c.bf16 %v3551_v61, %v3541_v39  ;;  %v3425_v10 = vrot.slane %v10781_v7, 7  ;;  %v6420_v52 = vunpack.i.l.bf16 %v9598_v43  ;;  %v10783_v22 = vld [vmem:[#allocation81_spill] sm:$0xff]  ;;  %v10787_v61 = vld [vmem:[#allocation75_spill] sm:$0xff] }
 0x2ed   : > { %v3560_v47 = vrot.slane %v3155_v46, 7  ;;  %v6416_v12 = vunpack.i.h.bf16 %v6414_v9  ;;  %v6415_v54 = vunpack.i.l.bf16 %v6414_v9  ;;  %v3415_v6 = vsel %vm3325_vm3, %v3406_v2, %v3414_v0  ;;  %v10785_v9 = vld [vmem:[#allocation74_spill] sm:$0xff] }
 0x2ee   : > { %5795 = vmatmul.mubr.msk.bf16.vlgmr.msra.gmra.mxu1 %vm992_vm2, %v3797_v57  ;;  %v3486_v28 = vrot.slane %v10738_v14, 7  ;;  %v3427_v40 = vsel %vm3325_vm3, %v3425_v10, %v3426_v33  ;;  %v3435_v50 = vsel %vm3325_vm3, %v3426_v33, %v3434_v4  ;;  %v3454_v23 = vrot.slane %v10782_v41, 7  ;;  %v10786_v57 = vld [vmem:[#allocation77_spill] sm:$0xff]  ;;  %v10790_v33 = vld [vmem:[#allocation79_spill] sm:$0xff] }
 0x2ef   : > { %5798 = vmatprep.mubr.msk.bf16.mxu1 %vm992_vm2, %v3801_v63  ;;  %v3446_v56 = vrot.slane %v10783_v22, 7  ;;  %v3494_v16 = vrot.slane %v9008_v24, 7  ;;  %v3485_v27 = vrot.slane %v10784_v55, 7  ;;  %v3805_v48 = vpack.c.bf16 %v3415_v6, %v3407_v18  ;;  %v10789_v24 = vld [vmem:[#allocation88_spill] sm:$0xff] }
 0x2f0   : > { %v3561_v2 = vsel %vm3325_vm3, %v3559_v59, %v3560_v47  ;;  %v3571_v14 = vsel %vm3325_vm3, %v3560_v47, %v3570_v19  ;;  %v3158_v0 = vsel %vm992_vm2, %v10786_v57, %v6416_v12  ;;  %v3157_v60 = vsel %vm992_vm2, %v10787_v61, %v6415_v54  ;;  %v9646_v4 = vpop.permute.xlu1 %6433  ;;  %v9650_v19 = vpop.permute.xlu0 %6438  ;;  %v10791_v47 = vld [vmem:[#allocation85_spill] sm:$0xff]  ;;  %v10795_v61 = vld [vmem:[#allocation83_spill] sm:$0xff] }
 0x2f1   : > { %v3809_v37 = vpack.c.bf16 %v3435_v50, %v3427_v40  ;;  %v3474_v5 = vrot.slane %v10788_v42, 7  ;;  %v3466_v46 = vrot.slane %v10789_v24, 7  ;;  %v3506_v17 = vrot.slane %v10754_v8, 7  ;;  %v6579_v24 = vld [vmem:[#allocation2 + $0x200] sm:$0xff] }
 0x2f2   : > { %4464 = vmatmul.mubr.bf16.gmra.mxu0 %v3831_v11  ;;  %v9639_v26 = vsel %vm3325_vm3, %v3485_v27, %v3486_v28  ;;  %v9643_v63 = vsel %vm3325_vm3, %v3486_v28, %v3494_v16  ;;  %v3526_v35 = vrot.slane %v9012_v29, 7  ;;  %v3835_v53 = vpack.c.bf16 %v3571_v14, %v3561_v2  ;;  %v10792_v16 = vld [vmem:[#allocation82_spill] sm:$0xff]  ;;  %v10793_v27 = vld [vmem:[#allocation84_spill] sm:$0xff] }
 0x2f3   : > { %4471 = vmatprep.mubr.bf16.mxu0 %v9531_v34  ;;  %v3159_v34 = vsel %vm992_vm2, %v10785_v9, %v6420_v52  ;;  %v3445_v39 = vrot.slane %v10790_v33, 7  ;;  %v3580_v18 = vrot.slane %v3158_v0, 7  ;;  %v3579_v8 = vrot.slane %v3157_v60, 7  ;;  %v10794_v14 = vld [vmem:[#allocation86_spill] sm:$0xff] }
 0x2f4   : > { %v3590_v11 = vrot.slane %v3159_v34, 7  ;;  %v3465_v59 = vrot.slane %v10791_v47, 7  ;;  %v6426_v7 = vunpack.i.h.bf16 %v6424_v32  ;;  %v6425_v10 = vunpack.i.l.bf16 %v6424_v32  ;;  %v6577_v34 = vld [vmem:[#allocation2 + $0x210] sm:$0xff]  ;;  %v9676_v57 = vpop.permute.xlu0 %6448 }
 0x2f5   : > { %v3447_v52 = vsel %vm3325_vm3, %v3445_v39, %v3446_v56  ;;  %v3455_v12 = vsel %vm3325_vm3, %v3446_v56, %v3454_v23  ;;  %v3514_v54 = vrot.slane %v9020_v20, 7  ;;  %v6435_v6 = vunpack.i.l.bf16 %v9646_v4 }
 0x2f6   : > { %5799 = vmatmul.mubr.msk.bf16.gmra.mxu1 %vm992_vm2, %v3805_v48  ;;  %v3467_v28 = vsel %vm3325_vm3, %v3465_v59, %v3466_v46  ;;  %v3475_v40 = vsel %vm3325_vm3, %v3466_v46, %v3474_v5  ;;  %v3821_v50 = vpack.c.bf16 %v9643_v63, %v9639_v26  ;;  %v3554_v32 = vrot.slane %v9027_v15, 7  ;;  %v6444_v5 = vpop.permute.xlu1 %6443 }
 0x2f7   : > { %5802 = vmatprep.mubr.msk.bf16.mxu1 %vm992_vm2, %v3809_v37  ;;  %v6421_v41 = vunpack.i.h.bf16 %v9598_v43  ;;  %v6431_v22 = vunpack.i.h.bf16 %v9618_v36  ;;  %v6430_v23 = vunpack.i.l.bf16 %v9618_v36  ;;  %v3813_v20 = vpack.c.bf16 %v3455_v12, %v3447_v52  ;;  %v6578_v37 = vld [vmem:[#allocation2 + $0x208] sm:$0xff]  ;;  %v2261_v12 = vld [vmem:[#allocation2 + $0x220] sm:$0xff] }
 0x2f8   : > { %v3581_v56 = vsel %vm3325_vm3, %v3579_v8, %v3580_v18  ;;  %v3162_v55 = vsel %vm992_vm2, %v10792_v16, %v6426_v7  ;;  %v3161_v48 = vsel %vm992_vm2, %v10793_v27, %v6425_v10  ;;  %v3817_v2 = vpack.c.bf16 %v3475_v40, %v3467_v28  ;;  %v9709_v16 = vld [vmem:[#allocation2 + $0x228] sm:$0xff] }
 0x2f9   : > { %v3505_v15 = vrot.slane %v10794_v14, 7  ;;  %v3546_v43 = vrot.slane %v9024_v31, 7  ;;  %v3534_v9 = vrot.slane %v9030_v3, 7  ;;  %v3171_v36 = vsel %vm992_vm2, %v6577_v34, %v6435_v6 }
 0x2fa   : > { %4472 = vmatmul.mubr.bf16.gmra.mxu0 %v3835_v53  ;;  %v3515_v0 = vsel %vm3325_vm3, %v3506_v17, %v3514_v54  ;;  %v3160_v60 = vsel %vm992_vm2, %v10795_v61, %v6421_v41  ;;  %v3170_v42 = vsel %vm992_vm2, %v6578_v37, %v6431_v22  ;;  %v3169_v46 = vsel %vm992_vm2, %v6579_v24, %v6430_v23  ;;  %v10797_v54 = vld [vmem:[#allocation91_spill] sm:$0xff]  ;;  %v10799_v23 = vld [vmem:[#allocation94_spill] sm:$0xff] }
 0x2fb   : > { %4479 = vmatprep.mubr.bf16.mxu0 %v9554_v51  ;;  %v3591_v51 = vsel %vm3325_vm3, %v3580_v18, %v3590_v11  ;;  %v3507_v3 = vsel %vm3325_vm3, %v3505_v15, %v3506_v17  ;;  %v3610_v26 = vrot.slane %v3162_v55, 7  ;;  %v3600_v63 = vrot.slane %v3161_v48, 7  ;;  %v10796_v17 = vld [vmem:[#allocation93_spill] sm:$0xff]  ;;  %v6454_v48 = vpop.permute.xlu1 %6453 }
 0x2fc   : > { %v3839_v31 = vpack.c.bf16 %v3591_v51, %v3581_v56  ;;  %v6441_v53 = vunpack.i.h.bf16 %v9650_v19  ;;  %v6440_v33 = vunpack.i.l.bf16 %v9650_v19  ;;  %v6436_v39 = vunpack.i.h.bf16 %v9646_v4  ;;  %v9704_v56 = vld [vmem:[#allocation2 + $0x230] sm:$0xff] }
 0x2fd   : > { %v3632_v11 = vrot.slane %v3171_v36, 7  ;;  %v6450_v18 = vunpack.i.l.bf16 %v9676_v57  ;;  %v3599_v8 = vrot.slane %v3160_v60, 7  ;;  %v6446_v47 = vunpack.i.h.bf16 %v6444_v5 }
 0x2fe   : > { %5803 = vmatmul.mubr.msk.bf16.gmra.mxu1 %vm992_vm2, %v3813_v20  ;;  %v6445_v59 = vunpack.i.l.bf16 %v6444_v5  ;;  %v3525_v7 = vrot.slane %v10796_v17, 7  ;;  %v3623_v10 = vrot.slane %v3170_v42, 7  ;;  %v3622_v52 = vrot.slane %v3169_v46, 7 }
 0x2ff   : > { %5806 = vmatprep.mubr.msk.bf16.mxu1 %vm992_vm2, %v3817_v2  ;;  %v3535_v19 = vsel %vm3325_vm3, %v3526_v35, %v3534_v9  ;;  %v3545_v4 = vrot.slane %v8981_v62, 7  ;;  %v3165_v6 = vsel %vm992_vm2, %v10797_v54, %v6441_v53  ;;  %v3825_v28 = vpack.c.bf16 %v3515_v0, %v3507_v3  ;;  %v10801_v53 = vld [vmem:[#allocation98_spill] sm:$0xff] }
 0x300   : > { %v3601_v40 = vsel %vm3325_vm3, %v3599_v8, %v3600_v63  ;;  %v3611_v41 = vsel %vm3325_vm3, %v3600_v63, %v3610_v26  ;;  %v3163_v20 = vsel %vm992_vm2, %v10799_v23, %v6436_v39  ;;  %v3174_v51 = vsel %vm992_vm2, %v9704_v56, %v6450_v18  ;;  %v10800_v26 = vld [vmem:[#allocation96_spill] sm:$0xff] }
 0x301   : > { %v3633_v62 = vsel %vm3325_vm3, %v3623_v10, %v3632_v11  ;;  %v3173_v55 = vsel %vm992_vm2, %v9709_v16, %v6446_v47  ;;  %v3172_v27 = vsel %vm992_vm2, %v2261_v12, %v6445_v59  ;;  %v3527_v2 = vsel %vm3325_vm3, %v3525_v7, %v3526_v35  ;;  %v10802_v11 = vld [vmem:[#allocation97_spill] sm:$0xff] }
 0x302   : > { %4480 = vmatmul.mubr.bf16.gmra.mxu0 %v3839_v31  ;;  %v3555_v14 = vsel %vm3325_vm3, %v3546_v43, %v3554_v32  ;;  %v3630_v15 = vrot.slane %v3165_v6, 7  ;;  %v3843_v9 = vpack.c.bf16 %v3611_v41, %v3601_v40  ;;  %v3624_v34 = vsel %vm3325_vm3, %v3622_v52, %v3623_v10  ;;  %v2264_v52 = vld [vmem:[#allocation2 + $0x238] sm:$0xff] }
 0x303   : > { %4487 = vmatprep.mubr.bf16.mxu0 %v9575_v25  ;;  %v10798_v25 = vld [vmem:[#allocation95_spill] sm:$0xff]  ;;  %v3547_v36 = vsel %vm3325_vm3, %v3545_v4, %v3546_v43  ;;  %v3619_v61 = vrot.slane %v3163_v20, 7  ;;  %v3652_v60 = vrot.slane %v3174_v51, 7  ;;  %v3848_v37 = vpack.c.bf16 %v3633_v62, %v3624_v34 }
 0x304   : > { %v3164_v22 = vsel %vm992_vm2, %v10798_v25, %v6440_v33  ;;  %v3643_v42 = vrot.slane %v3173_v55, 7  ;;  %v6456_v5 = vunpack.i.h.bf16 %v6454_v48  ;;  %v6455_v29 = vunpack.i.l.bf16 %v6454_v48  ;;  %v10803_v48 = vld [vmem:[#allocation76_spill] sm:$0xff] }
 0x305   : > { %v3620_v0 = vrot.slane %v3164_v22, 7  ;;  %v3574_v35 = vrot.slane %v9045_v58, 7  ;;  %v3566_v32 = vrot.slane %v9034_v49, 7  ;;  %v6451_v31 = vunpack.i.h.bf16 %v9676_v57 }
 0x306   : > { %5807 = vmatmul.mubr.msk.bf16.gmra.mxu1 %vm992_vm2, %v3821_v50  ;;  %v3642_v50 = vrot.slane %v3172_v27, 7  ;;  %v3829_v3 = vpack.c.bf16 %v3535_v19, %v3527_v2  ;;  %v3833_v24 = vpack.c.bf16 %v3555_v14, %v3547_v36  ;;  %v3168_v63 = vsel %vm992_vm2, %v10800_v26, %v6456_v5  ;;  %v10804_v2 = vld [vmem:[#allocation78_spill] sm:$0xff] }
 0x307   : > { %5810 = vmatprep.mubr.msk.bf16.mxu1 %vm992_vm2, %v3825_v28  ;;  %v3621_v43 = vsel %vm3325_vm3, %v3619_v61, %v3620_v0  ;;  %v3631_v46 = vsel %vm3325_vm3, %v3620_v0, %v3630_v15  ;;  %v3167_v33 = vsel %vm992_vm2, %v10801_v53, %v6455_v29  ;;  %v3653_v58 = vsel %vm3325_vm3, %v3643_v42, %v3652_v60 }
 0x308   : > { %v3644_v39 = vsel %vm3325_vm3, %v3642_v50, %v3643_v42  ;;  %v3594_v49 = vrot.slane %v9077_v38, 7  ;;  %v3586_v57 = vrot.slane %v9072_v21, 7  ;;  %v3166_v18 = vsel %vm992_vm2, %v10802_v11, %v6451_v31 }
 0x309   : > { %v3847_v8 = vpack.c.bf16 %v3631_v46, %v3621_v43  ;;  %v3565_v47 = vrot.slane %v8989_v44, 7  ;;  %v3650_v59 = vrot.slane %v3168_v63, 7  ;;  %v3640_v17 = vrot.slane %v3167_v33, 7 }
 0x30a   : > { %4488 = vmatmul.mubr.bf16.gmra.mxu0 %v3843_v9  ;;  %v3852_v7 = vpack.c.bf16 %v3653_v58, %v3644_v39  ;;  %v3585_v10 = vrot.slane %v9049_v1, 7  ;;  %v3575_v21 = vsel %vm3325_vm3, %v3566_v32, %v3574_v35  ;;  %v3639_v12 = vrot.slane %v3166_v18, 7 }
 0x30b   : > { %4495 = vmatprep.mubr.bf16.mxu0 %v3848_v37  ;;  %v3567_v38 = vsel %vm3325_vm3, %v3565_v47, %v3566_v32  ;;  %v3595_v4 = vsel %vm3325_vm3, %v3586_v57, %v3594_v49  ;;  %v3021_v54 = vrot.slane %v9704_v56, 2  ;;  %v3020_v44 = vrot.slane %v9709_v16, 2 }
 0x30c   : > { %v3587_v19 = vsel %vm3325_vm3, %v3585_v10, %v3586_v57  ;;  %v3837_v6 = vpack.c.bf16 %v3575_v21, %v3567_v38  ;;  %v3641_v28 = vsel %vm3325_vm3, %v3639_v12, %v3640_v17  ;;  %v3651_v1 = vsel %vm3325_vm3, %v3640_v17, %v3650_v59 }
 0x30d   : > { %v3023_v40 = vrot.slane %v2264_v52, 2  ;;  %v3614_v41 = vrot.slane %v9094_v45, 7  ;;  %v3606_v25 = vrot.slane %v9085_v30, 7  ;;  %v3841_v22 = vpack.c.bf16 %v3595_v4, %v3587_v19 }
 0x30e   : > { %5811 = vmatmul.mubr.msk.bf16.gmra.mxu1 %vm992_vm2, %v3829_v3  ;;  %v3851_v23 = vpack.c.bf16 %v3651_v1, %v3641_v28  ;;  %v3605_v20 = vrot.slane %v9056_v13, 7  ;;  %v3022_v56 = vsel %vm613_vm1, %v3020_v44, %v3021_v54  ;;  %v3645_v45 = vrot.slane %v3020_v44, 7 }
 0x30f   : > { %5814 = vmatprep.mubr.msk.bf16.mxu1 %vm992_vm2, %v3833_v24  ;;  %v3024_v51 = vsel %vm613_vm1, %v3021_v54, %v3023_v40  ;;  %v3615_v16 = vsel %vm3325_vm3, %v3606_v25, %v3614_v41  ;;  %v3646_v55 = vrot.slane %v3022_v56, 7  ;;  %v10805_v14 = vpack.c.bf16 %v10803_v48, %v10804_v2 }
 0x310   : > { %v3607_v62 = vsel %vm3325_vm3, %v3605_v20, %v3606_v25  ;;  %v3654_v30 = vrot.slane %v3024_v51, 7 }
 0x311   : > { %v3845_v27 = vpack.c.bf16 %v3615_v16, %v3607_v62  ;;  %v3647_v13 = vsel %vm3325_vm3, %v3645_v45, %v3646_v55 }
 0x312   : > { %4496 = vmatmul.mubr.bf16.gmra.mxu0 %v3847_v8  ;;  %v3655_v15 = vsel %vm3325_vm3, %v3646_v55, %v3654_v30 }
 0x313   : > { %4503 = vmatprep.mubr.bf16.mxu0 %v3852_v7  ;;  %v3853_v9 = vpack.c.bf16 %v3655_v15, %v3647_v13 }
 0x316   : > { %5815 = vmatmul.mubr.msk.bf16.gmra.mxu1 %vm992_vm2, %v3837_v6 }
 0x317   : > { %5818 = vmatprep.mubr.msk.bf16.mxu1 %vm992_vm2, %v3841_v22 }
 0x31a   : > { %4504 = vmatmul.mubr.bf16.gmra.mxu0 %v3851_v23 }
 0x31e   : > { %5819 = vmatmul.mubr.msk.bf16.gmra.mxu1 %vm992_vm2, %v3845_v27 }
 0x31f   : > { %5822 = vmatprep.mubr.msk.bf16.mxu1 %vm992_vm2, %v10805_v14 }
 0x326   : > { %5823 = vmatmul.mubr.msk.bf16.gmra.mxu1 %vm992_vm2, %v3853_v9 }
 0x32b   : > { %v5518_v34 = vpop.f32.mrf.mxu1 }
 0x32d   : > { %v5519_v36 = vpop.f32.mrf.mxu1 }
 0x32e   : > { %v5520_v0 = vadd.f32 %v5519_v36, %v5518_v34 }
 0x32f   : > { %v5521_v61 = vpop.f32.mrf.mxu1 }
 0x331   : > { %v5522_v60 = vpop.f32.mrf.mxu1 }
 0x332   : > { %v5523_v37 = vadd.f32 %v5522_v60, %v5521_v61 }
 0x333   : > { %v5524_v42 = vpop.f32.mrf.mxu1 }
 0x335   : > { %v5525_v50 = vpop.f32.mrf.mxu1 }
 0x336   : > { %v9766_v5 = vadd.f32 %v5525_v50, %v5524_v42 }
 0x337   : > { %v5527_v29 = vpop.f32.mrf.mxu1 }
 0x339   : > { %v5528_v35 = vpop.f32.mrf.mxu1 }
 0x33a   : > { %v9768_v32 = vadd.f32 %v5528_v35, %v5527_v29 }
 0x33b   : > { %v5530_v31 = vpop.f32.mrf.mxu1 }
 0x33d   : > { %v5531_v3 = vpop.f32.mrf.mxu1 }
 0x33e   : > { %v9770_v24 = vadd.f32 %v5531_v3, %v5530_v31 }
 0x33f   : > { %v5533_v43 = vpop.f32.mrf.mxu1 }
 0x341   : > { %v5534_v46 = vpop.f32.mrf.mxu1 }
 0x342   : > { %v9772_v26 = vadd.f32 %v5534_v46, %v5533_v43 }
 0x344   : > { %v5536_v63 = vpop.f32.mrf.mxu1 }
 0x346   : > { %v5537_v53 = vpop.f32.mrf.mxu1 }
 0x347   : > { %v9774_v33 = vadd.f32 %v5537_v53, %v5536_v63 }
 0x348   : > { %v5539_v39 = vpop.f32.mrf.mxu1 }
 0x34a   : > { %v5540_v58 = vpop.f32.mrf.mxu1 }
 0x34b   : > { %v9776_v49 = vadd.f32 %v5540_v58, %v5539_v39 }
 0x34d   : > { %v5542_v57 = vpop.f32.mrf.mxu1 }
 0x34f   : > { %v5543_v11 = vpop.f32.mrf.mxu1 }
 0x350   : > { %v9778_v18 = vadd.f32 %v5543_v11, %v5542_v57 }
 0x351   : > { %v5545_v8 = vpop.f32.mrf.mxu1 }
 0x353   : > { %v5546_v47 = vpop.f32.mrf.mxu1 }
 0x354   : > { %v9780_v59 = vadd.f32 %v5546_v47, %v5545_v8 }
 0x355   : > { %v5548_v17 = vpop.f32.mrf.mxu1 }
 0x357   : > { %v5549_v7 = vpop.f32.mrf.mxu1 }
 0x358   : > { %v9782_v10 = vadd.f32 %v5549_v7, %v5548_v17 }
 0x359   : > { %v5630_v38 = vpop.f32.mrf.mxu0  ;;  %v5551_v21 = vpop.f32.mrf.mxu1 }
 0x35b   : > { %v5631_v52 = vpop.f32.mrf.mxu0  ;;  %v5552_v19 = vpop.f32.mrf.mxu1 }
 0x35c   : > { %v5632_v12 = vadd.f32 %v5631_v52, %v5630_v38  ;;  %v9784_v4 = vadd.f32 %v5552_v19, %v5551_v21 }
 0x35d   : > { %v5633_v54 = vpop.f32.mrf.mxu0  ;;  %v5554_v44 = vpop.f32.mrf.mxu1 }
 0x35e   : > { %v9786_v6 = vadd.f32 %v5632_v12, %v5520_v0 }
 0x35f   : > { %v5634_v28 = vpop.f32.mrf.mxu0  ;;  %v5555_v40 = vpop.f32.mrf.mxu1 }
 0x360   : > { %v5635_v1 = vadd.f32 %v5634_v28, %v5633_v54  ;;  %v9788_v41 = vadd.f32 %v5555_v40, %v5554_v44 }
 0x361   : > { %v5557_v25 = vpop.f32.mrf.mxu1 }
 0x362   : > { %v9790_v22 = vadd.f32 %v5635_v1, %v5523_v37 }
 0x363   : > { %v5558_v23 = vpop.f32.mrf.mxu1 }
 0x364   : > { %v9792_v20 = vadd.f32 %v5558_v23, %v5557_v25 }
 0x365   : > { %v9794_v56 = vpop.f32.mrf.mxu0  ;;  %v5560_v51 = vpop.f32.mrf.mxu1 }
 0x367   : > { %v9796_v62 = vpop.f32.mrf.mxu0  ;;  %v5561_v16 = vpop.f32.mrf.mxu1 }
 0x368   : > { %v9798_v45 = vadd.f32 %v5561_v16, %v5560_v51 }
 0x369   : > { %v9800_v55 = vpop.f32.mrf.mxu0  ;;  %v5563_v30 = vpop.f32.mrf.mxu1 }
 0x36b   : > { %v9802_v27 = vpop.f32.mrf.mxu0  ;;  %v5564_v48 = vpop.f32.mrf.mxu1 }
 0x36c   : > { %v9804_v2 = vadd.f32 %v5564_v48, %v5563_v30 }
 0x36d   : > { %v9806_v14 = vpop.f32.mrf.mxu0  ;;  %v5566_v13 = vpop.f32.mrf.mxu1 }
 0x36f   : > { %v9808_v15 = vpop.f32.mrf.mxu0  ;;  %v5567_v9 = vpop.f32.mrf.mxu1 }
 0x370   : > { %v9810_v34 = vadd.f32 %v5567_v9, %v5566_v13 }
 0x371   : > { %v9812_v36 = vpop.f32.mrf.mxu0  ;;  %v5569_v0 = vpop.f32.mrf.mxu1 }
 0x373   : > { %v9814_v61 = vpop.f32.mrf.mxu0  ;;  %v5570_v60 = vpop.f32.mrf.mxu1 }
 0x374   : > { %v9816_v37 = vadd.f32 %v5570_v60, %v5569_v0 }
 0x375   : > { %v9818_v42 = vpop.f32.mrf.mxu0 }
 0x376   : > { %10806 = vst [vmem:[#allocation65_spill] sm:$0xff] %v9816_v37  ;;  %v5572_v50 = vpop.f32.mrf.mxu1 }
 0x377   : > { %v9820_v29 = vpop.f32.mrf.mxu0 }
 0x378   : > { %v5573_v35 = vpop.f32.mrf.mxu1 }
 0x379   : > { %v9822_v31 = vadd.f32 %v5573_v35, %v5572_v50  ;;  %v9824_v3 = vpop.f32.mrf.mxu0 }
 0x37a   : > { %v5575_v43 = vpop.f32.mrf.mxu1 }
 0x37b   : > { %10807 = vst [vmem:[#allocation50_spill] sm:$0xff] %v9822_v31  ;;  %v9826_v46 = vpop.f32.mrf.mxu0 }
 0x37c   : > { %v5576_v63 = vpop.f32.mrf.mxu1 }
 0x37d   : > { %v9828_v53 = vadd.f32 %v5576_v63, %v5575_v43 }
 0x37e   : > { %v9830_v39 = vpop.f32.mrf.mxu0  ;;  %v5578_v58 = vpop.f32.mrf.mxu1 }
 0x37f   : > { %10808 = vst [vmem:[#allocation66_spill] sm:$0xff] %v9828_v53 }
 0x380   : > { %v9832_v57 = vpop.f32.mrf.mxu0  ;;  %v5579_v11 = vpop.f32.mrf.mxu1 }
 0x381   : > { %v9834_v8 = vadd.f32 %v5579_v11, %v5578_v58 }
 0x382   : > { %v5581_v47 = vpop.f32.mrf.mxu1  ;;  %v9836_v17 = vpop.f32.mrf.mxu0 }
 0x383   : > { %10809 = vst [vmem:[#allocation51_spill] sm:$0xff] %v9834_v8 }
 0x384   : > { %v5582_v7 = vpop.f32.mrf.mxu1  ;;  %v9840_v52 = vpop.f32.mrf.mxu0 }
 0x385   : > { %v9838_v38 = vadd.f32 %v5582_v7, %v5581_v47 }
 0x386   : > { %v5584_v21 = vpop.f32.mrf.mxu1 }
 0x387   : > { %10810 = vst [vmem:[#allocation90_spill] sm:$0xff] %v9838_v38 }
 0x388   : > { %v5585_v12 = vpop.f32.mrf.mxu1 }
 0x389   : > { %v9842_v19 = vadd.f32 %v5585_v12, %v5584_v21 }
 0x38a   : > { %v9844_v54 = vpop.f32.mrf.mxu0  ;;  %v5587_v44 = vpop.f32.mrf.mxu1 }
 0x38b   : > { %10811 = vst [vmem:[#allocation67_spill] sm:$0xff] %v9842_v19 }
 0x38c   : > { %v9846_v28 = vpop.f32.mrf.mxu0  ;;  %v5588_v1 = vpop.f32.mrf.mxu1 }
 0x38d   : > { %v9848_v40 = vadd.f32 %v5588_v1, %v5587_v44 }
 0x38e   : > { %v9850_v25 = vpop.f32.mrf.mxu0  ;;  %v5590_v23 = vpop.f32.mrf.mxu1 }
 0x38f   : > { %10812 = vst [vmem:[#allocation69_spill] sm:$0xff] %v9848_v40 }
 0x390   : > { %v9852_v51 = vpop.f32.mrf.mxu0  ;;  %v5591_v16 = vpop.f32.mrf.mxu1 }
 0x391   : > { %v9854_v30 = vadd.f32 %v5591_v16, %v5590_v23 }
 0x392   : > { %v9856_v48 = vpop.f32.mrf.mxu0  ;;  %v5593_v13 = vpop.f32.mrf.mxu1 }
 0x393   : > { %10813 = vst [vmem:[#allocation61_spill] sm:$0xff] %v9854_v30 }
 0x394   : > { %v9858_v9 = vpop.f32.mrf.mxu0  ;;  %v5594_v0 = vpop.f32.mrf.mxu1 }
 0x395   : > { %v9860_v60 = vadd.f32 %v5594_v0, %v5593_v13 }
 0x396   : > { %v9862_v50 = vpop.f32.mrf.mxu0  ;;  %v5596_v35 = vpop.f32.mrf.mxu1 }
 0x397   : > { %10814 = vst [vmem:[#allocation33_spill] sm:$0xff] %v9860_v60 }
 0x398   : > { %v9864_v43 = vpop.f32.mrf.mxu0  ;;  %v5597_v63 = vpop.f32.mrf.mxu1 }
 0x399   : > { %v9866_v58 = vadd.f32 %v5597_v63, %v5596_v35 }
 0x39a   : > { %v9868_v11 = vpop.f32.mrf.mxu0  ;;  %v5599_v47 = vpop.f32.mrf.mxu1 }
 0x39b   : > { %10815 = vst [vmem:[#allocation70_spill] sm:$0xff] %v9866_v58 }
 0x39c   : > { %v9870_v7 = vpop.f32.mrf.mxu0  ;;  %v5600_v21 = vpop.f32.mrf.mxu1 }
 0x39d   : > { %v9872_v12 = vadd.f32 %v5600_v21, %v5599_v47 }
 0x39e   : > { %v9874_v44 = vpop.f32.mrf.mxu0  ;;  %v5602_v1 = vpop.f32.mrf.mxu1 }
 0x39f   : > { %10816 = vst [vmem:[#allocation60_spill] sm:$0xff] %v9872_v12 }
 0x3a0   : > { %v9876_v23 = vpop.f32.mrf.mxu0  ;;  %v5603_v16 = vpop.f32.mrf.mxu1 }
 0x3a1   : > { %v9878_v13 = vadd.f32 %v5603_v16, %v5602_v1  ;;  %v5638_v1 = vadd.f32 %v9796_v62, %v9794_v56  ;;  %v9912_v56 = vld [vmem:[%s10223_s5] ss:$0 sm:$0xff] }
 0x3a2   : > { %v9880_v0 = vpop.f32.mrf.mxu0  ;;  %v5605_v35 = vpop.f32.mrf.mxu1 }
 0x3a3   : > { %10817 = vst [vmem:[#allocation68_spill] sm:$0xff] %v9878_v13 }
 0x3a4   : > { %v9882_v63 = vpop.f32.mrf.mxu0  ;;  %v5606_v60 = vpop.f32.mrf.mxu1 }
 0x3a5   : > { %v9884_v30 = vadd.f32 %v5606_v60, %v5605_v35  ;;  %v5641_v60 = vadd.f32 %v9802_v27, %v9800_v55  ;;  %v4394_v35 = vadd.f32 %v5638_v1, %v9766_v5 }
 0x3a6   : > { %v9886_v58 = vpop.f32.mrf.mxu0  ;;  %v9888_v47 = vpop.f32.mrf.mxu1 }
 0x3a7   : > { %10818 = vst [vmem:[#allocation26_spill] sm:$0xff] %v9884_v30  ;;  %10819 = vst [vmem:[#allocation92_spill] sm:$0xff] %v9888_v47  ;;  %v4397_v1 = vadd.f32 %v5641_v60, %v9768_v32  ;;  %v5653_v32 = vadd.f32 %v9826_v46, %v9824_v3  ;;  %v10824_v3 = vld [vmem:[#allocation11_spill] sm:$0xff] }
 0x3a8   : > { %v9890_v21 = vpop.f32.mrf.mxu0  ;;  %v9892_v12 = vpop.f32.mrf.mxu1 }
 0x3a9   : > { %10820 = vst [vmem:[#allocation9_spill] sm:$0xff] %v9892_v12 }
 0x3aa   : > { %v9896_v16 = vpop.f32.mrf.mxu0  ;;  %v9898_v13 = vpop.f32.mrf.mxu1 }
 0x3ab   : > { %10821 = vst [vmem:[#allocation42_spill] sm:$0xff] %v9898_v13 }
 0x3ac   : > { %v9900_v40 = vpop.f32.mrf.mxu0  ;;  %v9902_v38 = vpop.f32.mrf.mxu1 }
 0x3ad   : > { %10822 = vst [vmem:[#allocation58_spill] sm:$0xff] %v9902_v38  ;;  %v9919_v38 = vld [vmem:[%s10224_s6] ss:$0 sm:$0xff] }
 0x3ae   : > { %v9907_v30 = vpop.f32.mrf.mxu0  ;;  %v5796_v8 = vpop.f32.mrf.mxu1 }
 0x3af   : > { %v4555_v62 = vadd.f32 %v5796_v8, %v4394_v35  ;;  %v5644_v8 = vadd.f32 %v9808_v15, %v9806_v14  ;;  %v5650_v35 = vadd.f32 %v9820_v29, %v9818_v42  ;;  %v10823_v14 = vld [vmem:[#allocation14_spill] sm:$0xff] }
 0x3b0   : > { %v9914_v19 = vpop.f32.mrf.mxu0  ;;  %v4546_v55 = vpop.f32.mrf.mxu1 }
 0x3b1   : > { %v4682_v5 = vmul.f32 %v9912_v56, %v4555_v62  ;;  %v4547_v27 = vadd.f32 %v4546_v55, %v9786_v6  ;;  %v5647_v6 = vadd.f32 %v9814_v61, %v9812_v36  ;;  %v4402_v36 = vadd.f32 %v5644_v8, %v9770_v24 }
 0x3b2   : > { %v9924_v13 = vpop.f32.mrf.mxu0  ;;  %v5797_v37 = vpop.f32.mrf.mxu1 }
 0x3b3   : > { %v4721_v53 = vadd.f32 %v9919_v38, %v4682_v5  ;;  %v4680_v31 = vmul.f32 %v9912_v56, %v4547_v27  ;;  %v4558_v12 = vadd.f32 %v5797_v37, %v4397_v1  ;;  %v4410_v37 = vadd.f32 %v5650_v35, %v9774_v33 }
 0x3b4   : > { %v9932_v47 = vpop.f32.mrf.mxu0  ;;  %v4549_v60 = vpop.f32.mrf.mxu1  ;;  %v4405_v1 = vadd.f32 %v5647_v6, %v9772_v26 }
 0x3b5   : > { %v4753_v15 = vadd.f32 %v4721_v53, %v10823_v14  ;;  %v4719_v42 = vadd.f32 %v9919_v38, %v4680_v31  ;;  %v4683_v29 = vmul.f32 %v9912_v56, %v4558_v12  ;;  %v4550_v62 = vadd.f32 %v4549_v60, %v9790_v22  ;;  %v10825_v60 = vld [vmem:[#allocation15_spill] sm:$0xff] }
 0x3b6   : > { %v9943_v55 = vpop.f32.mrf.mxu0  ;;  %v5800_v5 = vpop.f32.mrf.mxu1  ;;  %v5662_v22 = vadd.f32 %v9846_v28, %v9844_v54  ;;  %v4413_v12 = vadd.f32 %v5653_v32, %v9776_v49  ;;  %v5656_v54 = vadd.f32 %v9832_v57, %v9830_v39  ;;  %v5659_v28 = vadd.f32 %v9840_v52, %v9836_v17 }
 0x3b7   : > { %v4785_v61 = vmax.f32 %v4753_v15, 0.0  ;;  %v4751_v46 = vadd.f32 %v4719_v42, %v10824_v3  ;;  %v4722_v27 = vadd.f32 %v9919_v38, %v4683_v29  ;;  %v4681_v53 = vmul.f32 %v9912_v56, %v4550_v62  ;;  %v10826_v62 = vld [vmem:[#allocation12_spill] sm:$0xff] }
 0x3b8   : > { %v9950_v31 = vpop.f32.mrf.mxu0  ;;  %v4571_v33 = vadd.f32 %v5800_v5, %v4410_v37  ;;  %v4562_v24 = vpop.f32.mrf.mxu1  ;;  %v5665_v39 = vadd.f32 %v9852_v51, %v9850_v25 }
 0x3b9   : > { %v5184_v8 = vpack.c.bf16 %v4785_v61, %v4785_v61  ;;  %v4783_v35 = vmax.f32 %v4751_v46, 0.0  ;;  %v4754_v14 = vadd.f32 %v4722_v27, %v10825_v60  ;;  %v4720_v15 = vadd.f32 %v9919_v38, %v4681_v53 }
 0x3ba   : > { %v9963_v42 = vpop.f32.mrf.mxu0  ;;  %v4686_v29 = vmul.f32 %v9912_v56, %v4571_v33  ;;  %v4563_v49 = vadd.f32 %v4562_v24, %v4402_v36  ;;  %v5801_v32 = vpop.f32.mrf.mxu1  ;;  %v4426_v36 = vadd.f32 %v5662_v22, %v9782_v10  ;;  %v10827_v24 = vld [vmem:[#allocation19_spill] sm:$0xff] }
 0x3bb   : > { %4946 = vst.msk [vmem:[%s9957_s27 + $0x8] sm:$0xf] %vm4943_vm4, %v5184_v8  ;;  %v5182_v26 = vpack.c.bf16 %v4783_v35, %v4783_v35  ;;  %v4786_v6 = vmax.f32 %v4754_v14, 0.0  ;;  %v4752_v37 = vadd.f32 %v4720_v15, %v10826_v62  ;;  %v4574_v5 = vadd.f32 %v5801_v32, %v4413_v12 }
 0x3bc   : > { %v9973_v61 = vpop.f32.mrf.mxu0  ;;  %v4725_v57 = vadd.f32 %v9919_v38, %v4686_v29  ;;  %v4684_v17 = vmul.f32 %v9912_v56, %v4563_v49  ;;  %v4565_v52 = vpop.f32.mrf.mxu1  ;;  %v4418_v8 = vadd.f32 %v5656_v54, %v9778_v18  ;;  %v4421_v35 = vadd.f32 %v5659_v28, %v9780_v59  ;;  %v10828_v49 = vld [vmem:[#allocation16_spill] sm:$0xff] }
 0x3bd   : > { %4944 = vst.msk [vmem:[%s9957_s27] sm:$0xf] %vm4943_vm4, %v5182_v26  ;;  %v5185_v3 = vpack.c.bf16 %v4786_v6, %v4786_v6  ;;  %v4784_v46 = vmax.f32 %v4752_v37, 0.0  ;;  %v4687_v27 = vmul.f32 %v9912_v56, %v4574_v5  ;;  %v4566_v53 = vadd.f32 %v4565_v52, %v4405_v1  ;;  %v10829_v59 = vld [vmem:[#allocation20_spill] sm:$0xff] }
 0x3be   : > { %v9983_v33 = vpop.f32.mrf.mxu0  ;;  %v4757_v12 = vadd.f32 %v4725_v57, %v10827_v24  ;;  %v4723_v25 = vadd.f32 %v9919_v38, %v4684_v17  ;;  %v5804_v51 = vpop.f32.mrf.mxu1  ;;  %v5674_v15 = vadd.f32 %v9870_v7, %v9868_v11  ;;  %v4429_v18 = vadd.f32 %v5665_v39, %v9784_v4  ;;  %v10830_v17 = vld [vmem:[#allocation18_spill] sm:$0xff] }
 0x3bf   : > { %4947 = vst.msk [vmem:[%s9957_s27 + $0xc] sm:$0xf] %vm4943_vm4, %v5185_v3  ;;  %v5183_v10 = vpack.c.bf16 %v4784_v46, %v4784_v46  ;;  %v4726_v22 = vadd.f32 %v9919_v38, %v4687_v27  ;;  %v4685_v60 = vmul.f32 %v9912_v56, %v4566_v53  ;;  %v4587_v1 = vadd.f32 %v5804_v51, %v4426_v36 }
 0x3c0   : > { %v9993_v14 = vpop.f32.mrf.mxu0  ;;  %v4789_v29 = vmax.f32 %v4757_v12, 0.0  ;;  %v4755_v32 = vadd.f32 %v4723_v25, %v10828_v49  ;;  %v4578_v26 = vpop.f32.mrf.mxu1  ;;  %v5668_v11 = vadd.f32 %v9858_v9, %v9856_v48  ;;  %v5671_v7 = vadd.f32 %v9864_v43, %v9862_v50  ;;  %v10831_v12 = vld [vmem:[#allocation24_spill] sm:$0xff] }
 0x3c1   : > { %4945 = vst.msk [vmem:[%s9957_s27 + $0x4] sm:$0xf] %vm4943_vm4, %v5183_v10  ;;  %v4758_v54 = vadd.f32 %v4726_v22, %v10829_v59  ;;  %v4724_v28 = vadd.f32 %v9919_v38, %v4685_v60  ;;  %v4690_v6 = vmul.f32 %v9912_v56, %v4587_v1  ;;  %v4579_v62 = vadd.f32 %v4578_v26, %v4418_v8 }
 0x3c2   : > { %v10004_v37 = vpop.f32.mrf.mxu0  ;;  %v5188_v5 = vpack.c.bf16 %v4789_v29, %v4789_v29  ;;  %v4787_v4 = vmax.f32 %v4755_v32, 0.0  ;;  %v5805_v39 = vpop.f32.mrf.mxu1  ;;  %v5677_v27 = vadd.f32 %v9876_v23, %v9874_v44  ;;  %v4442_v43 = vadd.f32 %v5674_v15, %v9798_v45  ;;  %v10832_v15 = vld [vmem:[#allocation22_spill] sm:$0xff] }
 0x3c3   : > { %v4790_v57 = vmax.f32 %v4758_v54, 0.0  ;;  %v4756_v52 = vadd.f32 %v4724_v28, %v10830_v17  ;;  %v4729_v36 = vadd.f32 %v9919_v38, %v4690_v6  ;;  %v4688_v3 = vmul.f32 %v9912_v56, %v4579_v62 }
 0x3c4   : > { %v10013_v46 = vpop.f32.mrf.mxu0  ;;  %4950 = vst.msk [vmem:[%s9957_s27 + $0x18] sm:$0xf] %vm4943_vm4, %v5188_v5  ;;  %v5186_v48 = vpack.c.bf16 %v4787_v4, %v4787_v4  ;;  %v4590_v9 = vadd.f32 %v5805_v39, %v4429_v18  ;;  %v4581_v50 = vpop.f32.mrf.mxu1  ;;  %v5680_v10 = vadd.f32 %v9882_v63, %v9880_v0  ;;  %v4434_v45 = vadd.f32 %v5668_v11, %v9788_v41  ;;  %v10833_v11 = vld [vmem:[#allocation25_spill] sm:$0xff] }
 0x3c5   : > { %v5189_v53 = vpack.c.bf16 %v4790_v57, %v4790_v57  ;;  %v4788_v24 = vmax.f32 %v4756_v52, 0.0  ;;  %v4761_v25 = vadd.f32 %v4729_v36, %v10831_v12  ;;  %v4727_v51 = vadd.f32 %v9919_v38, %v4688_v3  ;;  %v10834_v3 = vld [vmem:[#allocation23_spill] sm:$0xff] }
 0x3c6   : > { %v10022_v8 = vpop.f32.mrf.mxu0  ;;  %4948 = vst.msk [vmem:[%s9957_s27 + $0x10] sm:$0xf] %vm4943_vm4, %v5186_v48  ;;  %v4691_v44 = vmul.f32 %v9912_v56, %v4590_v9  ;;  %v4582_v23 = vadd.f32 %v4581_v50, %v4421_v35  ;;  %v5808_v22 = vpop.f32.mrf.mxu1  ;;  %v4445_v35 = vadd.f32 %v5677_v27, %v9804_v2  ;;  %v4437_v18 = vadd.f32 %v5671_v7, %v9792_v20  ;;  %v10835_v48 = vld [vmem:[#allocation31_spill] sm:$0xff] }
 0x3c7   : > { %4951 = vst.msk [vmem:[%s9957_s27 + $0x1c] sm:$0xf] %vm4943_vm4, %v5189_v53  ;;  %v5187_v60 = vpack.c.bf16 %v4788_v24, %v4788_v24  ;;  %v4793_v1 = vmax.f32 %v4761_v25, 0.0  ;;  %v4759_v29 = vadd.f32 %v4727_v51, %v10832_v15  ;;  %v4603_v49 = vadd.f32 %v5808_v22, %v4442_v43  ;;  %v10838_v25 = vld [vmem:[#allocation50_spill] sm:$0xff] }
 0x3c8   : > { %v10033_v32 = vpop.f32.mrf.mxu0  ;;  %v4730_v0 = vadd.f32 %v9919_v38, %v4691_v44  ;;  %v4689_v63 = vmul.f32 %v9912_v56, %v4582_v23  ;;  %v4594_v26 = vpop.f32.mrf.mxu1  ;;  %v5686_v62 = vadd.f32 %v9900_v40, %v9896_v16  ;;  %v4450_v20 = vadd.f32 %v5680_v10, %v9810_v34  ;;  %v10839_v23 = vld [vmem:[#allocation28_spill] sm:$0xff] }
 0x3c9   : > { %4949 = vst.msk [vmem:[%s9957_s27 + $0x14] sm:$0xf] %vm4943_vm4, %v5187_v60  ;;  %v5192_v41 = vpack.c.bf16 %v4793_v1, %v4793_v1  ;;  %v4791_v59 = vmax.f32 %v4759_v29, 0.0  ;;  %v4694_v54 = vmul.f32 %v9912_v56, %v4603_v49  ;;  %v4595_v28 = vadd.f32 %v4594_v26, %v4434_v45 }
 0x3ca   : > { %v10042_v6 = vpop.f32.mrf.mxu0  ;;  %v4762_v5 = vadd.f32 %v4730_v0, %v10833_v11  ;;  %v4728_v4 = vadd.f32 %v9919_v38, %v4689_v63  ;;  %v5809_v2 = vpop.f32.mrf.mxu1  ;;  %v5683_v40 = vadd.f32 %v9890_v21, %v9886_v58  ;;  %v5689_v16 = vadd.f32 %v9914_v19, %v9907_v30  ;;  %v10836_v58 = vld [vmem:[#allocation92_spill] sm:$0xff]  ;;  %v10837_v21 = vld [vmem:[#allocation9_spill] sm:$0xff]  ;;  %v10840_v63 = vld [vmem:[#allocation66_spill] sm:$0xff] }
 0x3cb   : > { %4954 = vst.msk [vmem:[%s9957_s27 + $0x28] sm:$0xf] %vm4943_vm4, %v5192_v41  ;;  %v5190_v7 = vpack.c.bf16 %v4791_v59, %v4791_v59  ;;  %v4733_v39 = vadd.f32 %v9919_v38, %v4694_v54  ;;  %v4692_v57 = vmul.f32 %v9912_v56, %v4595_v28  ;;  %v4606_v17 = vadd.f32 %v5809_v2, %v4445_v35  ;;  %v10841_v41 = vld [vmem:[#allocation32_spill] sm:$0xff] }
 0x3cc   : > { %v10053_v52 = vpop.f32.mrf.mxu0  ;;  %v4794_v36 = vmax.f32 %v4762_v5, 0.0  ;;  %v4760_v27 = vadd.f32 %v4728_v4, %v10834_v3  ;;  %v4597_v34 = vpop.f32.mrf.mxu1  ;;  %v10069_v12 = vadd.f32 %v10837_v21, %v10836_v58  ;;  %v4458_v51 = vadd.f32 %v5686_v62, %v10838_v25  ;;  %v10842_v5 = vld [vmem:[#allocation65_spill] sm:$0xff]  ;;  %v10844_v3 = vld [vmem:[#allocation67_spill] sm:$0xff] }
 0x3cd   : > { %4952 = vst.msk [vmem:[%s9957_s27 + $0x20] sm:$0xf] %vm4943_vm4, %v5190_v7  ;;  %v4765_v9 = vadd.f32 %v4733_v39, %v10835_v48  ;;  %v4731_v50 = vadd.f32 %v9919_v38, %v4692_v57  ;;  %v4695_v43 = vmul.f32 %v9912_v56, %v4606_v17  ;;  %v4598_v53 = vadd.f32 %v4597_v34, %v4437_v18  ;;  %v10843_v39 = vld [vmem:[#allocation29_spill] sm:$0xff]  ;;  %v10846_v21 = vld [vmem:[#allocation51_spill] sm:$0xff] }
 0x3ce   : > { %v10065_v24 = vpop.f32.mrf.mxu0  ;;  %v5193_v19 = vpack.c.bf16 %v4794_v36, %v4794_v36  ;;  %v4792_v30 = vmax.f32 %v4760_v27, 0.0  ;;  %v5812_v10 = vpop.f32.mrf.mxu1  ;;  %v5698_v15 = vadd.f32 %v9973_v61, %v9963_v42  ;;  %v4461_v26 = vadd.f32 %v5689_v16, %v10840_v63 }
 0x3cf   : > { %v4797_v44 = vmax.f32 %v4765_v9, 0.0  ;;  %v4763_v22 = vadd.f32 %v4731_v50, %v10839_v23  ;;  %v4734_v45 = vadd.f32 %v9919_v38, %v4695_v43  ;;  %v4693_v60 = vmul.f32 %v9912_v56, %v4598_v53  ;;  %v10847_v23 = vld [vmem:[#allocation35_spill] sm:$0xff] }
 0x3d0   : > { %v10075_v1 = vpop.f32.mrf.mxu0  ;;  %4955 = vst.msk [vmem:[%s9957_s27 + $0x2c] sm:$0xf] %vm4943_vm4, %v5193_v19  ;;  %v5191_v29 = vpack.c.bf16 %v4792_v30, %v4792_v30  ;;  %v4619_v49 = vadd.f32 %v5812_v10, %v4458_v51  ;;  %v4610_v0 = vpop.f32.mrf.mxu1  ;;  %v5692_v62 = vadd.f32 %v9932_v47, %v9924_v13  ;;  %v4453_v4 = vadd.f32 %v5683_v40, %v10842_v5 }
 0x3d1   : > { %v5196_v35 = vpack.c.bf16 %v4797_v44, %v4797_v44  ;;  %v4795_v18 = vmax.f32 %v4763_v22, 0.0  ;;  %v4766_v59 = vadd.f32 %v4734_v45, %v10841_v41  ;;  %v4732_v54 = vadd.f32 %v9919_v38, %v4693_v60  ;;  %v10848_v60 = vld [vmem:[#allocation90_spill] sm:$0xff]  ;;  %v10850_v41 = vld [vmem:[#allocation69_spill] sm:$0xff] }
 0x3d2   : > { %v10084_v28 = vpop.f32.mrf.mxu0  ;;  %4953 = vst.msk [vmem:[%s9957_s27 + $0x24] sm:$0xf] %vm4943_vm4, %v5191_v29  ;;  %v4698_v42 = vmul.f32 %v9912_v56, %v4619_v49  ;;  %v4611_v61 = vadd.f32 %v4610_v0, %v4450_v20  ;;  %v5813_v11 = vpop.f32.mrf.mxu1  ;;  %v5695_v13 = vadd.f32 %v9950_v31, %v9943_v55  ;;  %v4474_v40 = vadd.f32 %v5698_v15, %v10844_v3  ;;  %v10845_v31 = vld [vmem:[#allocation37_spill] sm:$0xff]  ;;  %v10849_v29 = vld [vmem:[#allocation38_spill] sm:$0xff] }
 0x3d3   : > { %4958 = vst.msk [vmem:[%s9957_s27 + $0x38] sm:$0xf] %vm4943_vm4, %v5196_v35  ;;  %v5194_v2 = vpack.c.bf16 %v4795_v18, %v4795_v18  ;;  %v4798_v7 = vmax.f32 %v4766_v59, 0.0  ;;  %v4764_v57 = vadd.f32 %v4732_v54, %v10843_v39  ;;  %v4622_v17 = vadd.f32 %v5813_v11, %v4461_v26  ;;  %v10852_v39 = vld [vmem:[#allocation70_spill] sm:$0xff] }
 0x3d4   : > { %v10095_v16 = vpop.f32.mrf.mxu0  ;;  %v4737_v47 = vadd.f32 %v9919_v38, %v4698_v42  ;;  %v4696_v20 = vmul.f32 %v9912_v56, %v4611_v61  ;;  %v4613_v36 = vpop.f32.mrf.mxu1  ;;  %v5701_v55 = vadd.f32 %v9993_v14, %v9983_v33  ;;  %v4466_v19 = vadd.f32 %v5692_v62, %v10846_v21  ;;  %v10851_v42 = vld [vmem:[#allocation36_spill] sm:$0xff]  ;;  %v10857_v21 = vld [vmem:[#allocation58_spill] sm:$0xff] }
 0x3d5   : > { %4956 = vst.msk [vmem:[%s9957_s27 + $0x30] sm:$0xf] %vm4943_vm4, %v5194_v2  ;;  %v5197_v27 = vpack.c.bf16 %v4798_v7, %v4798_v7  ;;  %v4796_v34 = vmax.f32 %v4764_v57, 0.0  ;;  %v4699_v48 = vmul.f32 %v9912_v56, %v4622_v17  ;;  %v4614_v9 = vadd.f32 %v4613_v36, %v4453_v4 }
 0x3d6   : > { %v10105_v50 = vpop.f32.mrf.mxu0  ;;  %v4769_v43 = vadd.f32 %v4737_v47, %v10845_v31  ;;  %v4735_v53 = vadd.f32 %v9919_v38, %v4696_v20  ;;  %v5816_v58 = vpop.f32.mrf.mxu1  ;;  %v5710_v33 = vadd.f32 %v10053_v52, %v10042_v6  ;;  %v4469_v15 = vadd.f32 %v5695_v13, %v10848_v60  ;;  %v10853_v47 = vld [vmem:[#allocation44_spill] sm:$0xff]  ;;  %v10855_v31 = vld [vmem:[#allocation39_spill] sm:$0xff] }
 0x3d7   : > { %4959 = vst.msk [vmem:[%s9957_s27 + $0x3c] sm:$0xf] %vm4943_vm4, %v5197_v27  ;;  %v5195_v30 = vpack.c.bf16 %v4796_v34, %v4796_v34  ;;  %v4738_v25 = vadd.f32 %v9919_v38, %v4699_v48  ;;  %v4697_v51 = vmul.f32 %v9912_v56, %v4614_v9  ;;  %v4635_v10 = vadd.f32 %v5816_v58, %v4474_v40  ;;  %v10854_v34 = vld [vmem:[#allocation61_spill] sm:$0xff]  ;;  %v10856_v58 = vld [vmem:[#allocation42_spill] sm:$0xff] }
 0x3d8   : > { %v10116_v44 = vpop.f32.mrf.mxu0  ;;  %v4801_v14 = vmax.f32 %v4769_v43, 0.0  ;;  %v4767_v22 = vadd.f32 %v4735_v53, %v10847_v23  ;;  %v4626_v45 = vpop.f32.mrf.mxu1  ;;  %v5704_v6 = vadd.f32 %v10013_v46, %v10004_v37  ;;  %v4477_v59 = vadd.f32 %v5701_v55, %v10850_v41 }
 0x3d9   : > { %4957 = vst.msk [vmem:[%s9957_s27 + $0x34] sm:$0xf] %vm4943_vm4, %v5195_v30  ;;  %v4770_v49 = vadd.f32 %v4738_v25, %v10849_v29  ;;  %v4736_v0 = vadd.f32 %v9919_v38, %v4697_v51  ;;  %v4702_v63 = vmul.f32 %v9912_v56, %v4635_v10  ;;  %v4627_v26 = vadd.f32 %v4626_v45, %v4466_v19  ;;  %v10858_v25 = vld [vmem:[#allocation60_spill] sm:$0xff]  ;;  %v10859_v45 = vld [vmem:[#allocation45_spill] sm:$0xff] }
 0x3da   : > { %v5720_v35 = vpop.f32.mrf.mxu0  ;;  %v5200_v52 = vpack.c.bf16 %v4801_v14, %v4801_v14  ;;  %v4799_v18 = vmax.f32 %v4767_v22, 0.0  ;;  %v5817_v54 = vpop.f32.mrf.mxu1  ;;  %v5713_v37 = vadd.f32 %v10075_v1, %v10065_v24  ;;  %v4490_v57 = vadd.f32 %v5710_v33, %v10852_v39 }
 0x3db   : > { %v4802_v62 = vmax.f32 %v4770_v49, 0.0  ;;  %v4768_v61 = vadd.f32 %v4736_v0, %v10851_v42  ;;  %v4741_v11 = vadd.f32 %v9919_v38, %v4702_v63  ;;  %v4700_v5 = vmul.f32 %v9912_v56, %v4627_v26  ;;  %v10860_v0 = vld [vmem:[#allocation33_spill] sm:$0xff] }
 0x3dc   : > { %v5721_v4 = vpop.f32.mrf.mxu0  ;;  %4962 = vst.msk [vmem:[%s9957_s27 + $0x48] sm:$0xf] %vm4943_vm4, %v5200_v52  ;;  %v5198_v2 = vpack.c.bf16 %v4799_v18, %v4799_v18  ;;  %v4638_v46 = vadd.f32 %v5817_v54, %v4477_v59  ;;  %v4629_v7 = vpop.f32.mrf.mxu1  ;;  %v5707_v40 = vadd.f32 %v10033_v32, %v10022_v8  ;;  %v4482_v48 = vadd.f32 %v5704_v6, %v10854_v34  ;;  %v10861_v54 = vld [vmem:[#allocation40_spill] sm:$0xff] }
 0x3dd   : > { %v5201_v17 = vpack.c.bf16 %v4802_v62, %v4802_v62  ;;  %v4800_v13 = vmax.f32 %v4768_v61, 0.0  ;;  %v4773_v20 = vadd.f32 %v4741_v11, %v10853_v47  ;;  %v4739_v36 = vadd.f32 %v9919_v38, %v4700_v5  ;;  %v10862_v61 = vld [vmem:[#allocation52_spill] sm:$0xff] }
 0x3de   : > { %v5723_v3 = vpop.f32.mrf.mxu0  ;;  %4960 = vst.msk [vmem:[%s9957_s27 + $0x40] sm:$0xf] %vm4943_vm4, %v5198_v2  ;;  %v4703_v27 = vmul.f32 %v9912_v56, %v4638_v46  ;;  %v4630_v24 = vadd.f32 %v4629_v7, %v4469_v15  ;;  %v5820_v1 = vpop.f32.mrf.mxu1  ;;  %v5613_v19 = vadd.f32 %v10857_v21, %v10856_v58  ;;  %v4493_v51 = vadd.f32 %v5713_v37, %v10858_v25  ;;  %v10867_v21 = vld [vmem:[#allocation49_spill] sm:$0xff] }
 0x3df   : > { %4963 = vst.msk [vmem:[%s9957_s27 + $0x4c] sm:$0xf] %vm4943_vm4, %v5201_v17  ;;  %v5199_v9 = vpack.c.bf16 %v4800_v13, %v4800_v13  ;;  %v4805_v55 = vmax.f32 %v4773_v20, 0.0  ;;  %v4771_v43 = vadd.f32 %v4739_v36, %v10855_v31  ;;  %v4651_v53 = vadd.f32 %v5820_v1, %v4490_v57  ;;  %v10863_v57 = vld [vmem:[#allocation48_spill] sm:$0xff]  ;;  %v10866_v31 = vld [vmem:[#allocation26_spill] sm:$0xff] }
 0x3e0   : > { %v4742_v8 = vadd.f32 %v9919_v38, %v4703_v27  ;;  %v4701_v32 = vmul.f32 %v9912_v56, %v4630_v24  ;;  %v4642_v30 = vpop.f32.mrf.mxu1  ;;  %v5724_v22 = vpop.f32.mrf.mxu0  ;;  %v5722_v29 = vadd.f32 %v5721_v4, %v5720_v35  ;;  %v4485_v63 = vadd.f32 %v5707_v40, %v10860_v0  ;;  %v10865_v24 = vld [vmem:[#allocation53_spill] sm:$0xff]  ;;  %v10869_v0 = vld [vmem:[#allocation54_spill] sm:$0xff] }
 0x3e1   : > { %4961 = vst.msk [vmem:[%s9957_s27 + $0x44] sm:$0xf] %vm4943_vm4, %v5199_v9  ;;  %v5204_v10 = vpack.c.bf16 %v4805_v55, %v4805_v55  ;;  %v4803_v33 = vmax.f32 %v4771_v43, 0.0  ;;  %v4706_v14 = vmul.f32 %v9912_v56, %v4651_v53  ;;  %v4643_v23 = vadd.f32 %v4642_v30, %v4482_v48 }
 0x3e2   : > { %v4774_v60 = vadd.f32 %v4742_v8, %v10859_v45  ;;  %v4740_v15 = vadd.f32 %v9919_v38, %v4701_v32  ;;  %v5821_v49 = vpop.f32.mrf.mxu1  ;;  %v5716_v41 = vadd.f32 %v10095_v16, %v10084_v28  ;;  %v5725_v42 = vadd.f32 %v5724_v22, %v5723_v3  ;;  %v10864_v3 = vld [vmem:[#allocation68_spill] sm:$0xff] }
 0x3e3   : > { %4966 = vst.msk [vmem:[%s9957_s27 + $0x58] sm:$0xf] %vm4943_vm4, %v5204_v10  ;;  %v5202_v26 = vpack.c.bf16 %v4803_v33, %v4803_v33  ;;  %v4745_v6 = vadd.f32 %v9919_v38, %v4706_v14  ;;  %v4704_v52 = vmul.f32 %v9912_v56, %v4643_v23  ;;  %v4654_v18 = vadd.f32 %v5821_v49, %v4493_v51  ;;  %v10868_v23 = vld [vmem:[#allocation46_spill] sm:$0xff] }
 0x3e4   : > { %v4806_v59 = vmax.f32 %v4774_v60, 0.0  ;;  %v4772_v62 = vadd.f32 %v4740_v15, %v10861_v54  ;;  %v4645_v35 = vpop.f32.mrf.mxu1  ;;  %v5719_v37 = vadd.f32 %v10116_v44, %v10105_v50  ;;  %v4506_v16 = vadd.f32 %v5722_v29, %v10069_v12  ;;  %v10871_v54 = vld [vmem:[#allocation55_spill] sm:$0xff] }
 0x3e5   : > { %4964 = vst.msk [vmem:[%s9957_s27 + $0x50] sm:$0xf] %vm4943_vm4, %v5202_v26  ;;  %v4777_v11 = vadd.f32 %v4745_v6, %v10862_v61  ;;  %v4743_v5 = vadd.f32 %v9919_v38, %v4704_v52  ;;  %v4707_v4 = vmul.f32 %v9912_v56, %v4654_v18  ;;  %v4646_v2 = vadd.f32 %v4645_v35, %v4485_v63  ;;  %v10870_v26 = vld [vmem:[#allocation71_spill] sm:$0xff] }
 0x3e6   : > { %v5205_v46 = vpack.c.bf16 %v4806_v59, %v4806_v59  ;;  %v4804_v28 = vmax.f32 %v4772_v62, 0.0  ;;  %v5824_v7 = vpop.f32.mrf.mxu1  ;;  %v4498_v50 = vadd.f32 %v5716_v41, %v10864_v3  ;;  %v4509_v40 = vadd.f32 %v5725_v42, %v5613_v19 }
 0x3e7   : > { %v4809_v39 = vmax.f32 %v4777_v11, 0.0  ;;  %v4775_v17 = vadd.f32 %v4743_v5, %v10863_v57  ;;  %v4746_v13 = vadd.f32 %v9919_v38, %v4707_v4  ;;  %v4705_v47 = vmul.f32 %v9912_v56, %v4646_v2 }
 0x3e8   : > { %4967 = vst.msk [vmem:[%s9957_s27 + $0x5c] sm:$0xf] %vm4943_vm4, %v5205_v46  ;;  %v5203_v20 = vpack.c.bf16 %v4804_v28, %v4804_v28  ;;  %v4667_v36 = vadd.f32 %v5824_v7, %v4506_v16  ;;  %v4658_v44 = vpop.f32.mrf.mxu1  ;;  %v4501_v43 = vadd.f32 %v5719_v37, %v10866_v31 }
 0x3e9   : > { %v5208_v27 = vpack.c.bf16 %v4809_v39, %v4809_v39  ;;  %v4807_v12 = vmax.f32 %v4775_v17, 0.0  ;;  %v4778_v1 = vadd.f32 %v4746_v13, %v10865_v24  ;;  %v4744_v34 = vadd.f32 %v9919_v38, %v4705_v47 }
 0x3ea   : > { %4965 = vst.msk [vmem:[%s9957_s27 + $0x54] sm:$0xf] %vm4943_vm4, %v5203_v20  ;;  %v4710_v48 = vmul.f32 %v9912_v56, %v4667_v36  ;;  %v4659_v9 = vadd.f32 %v4658_v44, %v4498_v50  ;;  %v5825_v55 = vpop.f32.mrf.mxu1 }
 0x3eb   : > { %4970 = vst.msk [vmem:[%s9957_s27 + $0x68] sm:$0xf] %vm4943_vm4, %v5208_v27  ;;  %v5206_v53 = vpack.c.bf16 %v4807_v12, %v4807_v12  ;;  %v4810_v58 = vmax.f32 %v4778_v1, 0.0  ;;  %v4776_v19 = vadd.f32 %v4744_v34, %v10867_v21  ;;  %v4670_v8 = vadd.f32 %v5825_v55, %v4509_v40 }
 0x3ec   : > { %v4749_v32 = vadd.f32 %v9919_v38, %v4710_v48  ;;  %v4708_v30 = vmul.f32 %v9912_v56, %v4659_v9  ;;  %v4661_v25 = vpop.f32.mrf.mxu1 }
 0x3ed   : > { %4968 = vst.msk [vmem:[%s9957_s27 + $0x60] sm:$0xf] %vm4943_vm4, %v5206_v53  ;;  %v5209_v51 = vpack.c.bf16 %v4810_v58, %v4810_v58  ;;  %v4808_v10 = vmax.f32 %v4776_v19, 0.0  ;;  %v4711_v33 = vmul.f32 %v9912_v56, %v4670_v8  ;;  %v4662_v14 = vadd.f32 %v4661_v25, %v4501_v43 }
 0x3ee   : > { %v4781_v22 = vadd.f32 %v4749_v32, %v10868_v23  ;;  %v4747_v45 = vadd.f32 %v9919_v38, %v4708_v30 }
 0x3ef   : > { %4971 = vst.msk [vmem:[%s9957_s27 + $0x6c] sm:$0xf] %vm4943_vm4, %v5209_v51  ;;  %v5207_v60 = vpack.c.bf16 %v4808_v10, %v4808_v10  ;;  %v4750_v15 = vadd.f32 %v9919_v38, %v4711_v33  ;;  %v4709_v29 = vmul.f32 %v9912_v56, %v4662_v14 }
 0x3f0   : > { %v4813_v49 = vmax.f32 %v4781_v22, 0.0  ;;  %v4779_v63 = vadd.f32 %v4747_v45, %v10869_v0 }
 0x3f1   : > { %4969 = vst.msk [vmem:[%s9957_s27 + $0x64] sm:$0xf] %vm4943_vm4, %v5207_v60  ;;  %v4782_v6 = vadd.f32 %v4750_v15, %v10870_v26  ;;  %v4748_v52 = vadd.f32 %v9919_v38, %v4709_v29 }
 0x3f2   : > { %v5212_v18 = vpack.c.bf16 %v4813_v49, %v4813_v49  ;;  %v4811_v41 = vmax.f32 %v4779_v63, 0.0 }
 0x3f3   : > { %v4814_v59 = vmax.f32 %v4782_v6, 0.0  ;;  %v4780_v62 = vadd.f32 %v4748_v52, %v10871_v54 }
 0x3f4   : > { %4974 = vst.msk [vmem:[%s9957_s27 + $0x78] sm:$0xf] %vm4943_vm4, %v5212_v18  ;;  %v5210_v42 = vpack.c.bf16 %v4811_v41, %v4811_v41 }
 0x3f5   : > { %v5213_v35 = vpack.c.bf16 %v4814_v59, %v4814_v59  ;;  %v4812_v56 = vmax.f32 %v4780_v62, 0.0 }
 0x3f6   : > { %4972 = vst.msk [vmem:[%s9957_s27 + $0x70] sm:$0xf] %vm4943_vm4, %v5210_v42 }
 0x3f7   : > { %4975 = vst.msk [vmem:[%s9957_s27 + $0x7c] sm:$0xf] %vm4943_vm4, %v5213_v35  ;;  %v5211_v61 = vpack.c.bf16 %v4812_v56, %v4812_v56 }
 0x3f9   : > { %4973 = vst.msk [vmem:[%s9957_s27 + $0x74] sm:$0xf] %vm4943_vm4, %v5211_v61 }
 0x3fa PF: > { %s17_s24 = sadd.s32 1, %s6588_s24  }
 0x3fb   : > { %p14_p4 = scmp.ge.s32.totalorder %s17_s24, 4  }
 0x3fd   :  { %16 = sbr.rel (!%p14_p4) target bundleno = 1 (0x1), region = 79 }

// kernel: encoder_forward.9
= control target key start
LH: loop header
LB: loop body
LE: loop exit
PB: predicated region body
PF: predicated region fallthrough
CT: control target
= control target key end

     0   :  { %s3480_s24 = smov 0   ;;  %s4384_s0 = inlined_call_operand.vmem [shape: bf16[2,10,10,128], index: 0, kind: input, shape index: {}]   ;;  %s4385_s1 = inlined_call_operand.vmem [shape: bf16[1152,128], index: 1, kind: input, shape index: {}]   ;;  %s4386_s2 = inlined_call_operand.vmem [shape: f32[1,128], index: 2, kind: input, shape index: {}]   ;;  %s4387_s3 = inlined_call_operand.vmem [shape: f32[1,128], index: 3, kind: input, shape index: {}]   ;;  %s4388_s4 = inlined_call_operand.vmem [shape: bf16[1152,128], index: 4, kind: input, shape index: {}]   ;;  %s4389_s5 = inlined_call_operand.vmem [shape: f32[1,128], index: 5, kind: input, shape index: {}]   ;;  %s4390_s6 = inlined_call_operand.vmem [shape: f32[1,128], index: 6, kind: input, shape index: {}]   ;;  %s4391_s7 = inlined_call_operand.vmem [shape: bf16[2,8,8,128], index: 7, kind: output, shape index: {}]  }
   0x1 LB: > { %s2683_s25 = sadd.s32 4294967295, %s3437_s24   ;;  %p2687_p0 = scmp.ge.s32.totalorder %s3437_s24, 1  ;;  %s3437_s24 = sphi %s3480_s24, %s17_s24  }
   0x2   : > { %p237_p1 = scmp.lt.s32.totalorder %s3437_s24, 3 }
   0x4   : > { %p238_p2 = pnand %p2687_p0, %p237_p1 }
   0x6   : > { %241 = sbr.rel (%p238_p2) target bundleno = 605 (0x25d), region = 48 }
   0xb   : > { %v3278_v0 = vld [vmem:[%s4385_s1 + $0x78] sm:$0xff]   ;;  %v3282_v4 = vld [vmem:[%s4385_s1 + $0x70] sm:$0xff]   ;;  %v3286_v8 = vld [vmem:[%s4385_s1 + $0x68] sm:$0xff]   ;;  %p269_p3 = scmp.lt.s32.totalorder %s2683_s25, 1  ;;  %vm336_vm0 = vcmask 1046528   ;;  %vm369_vm1 = vcmask 1045504  }
   0xc   : > { %v3279_v1 = vld [vmem:[%s4385_s1 + $0xf8] sm:$0xff]   ;;  %2876 = vmatprep.subr.bf16.mxu0 %v3278_v0  ;;  %v3283_v5 = vld [vmem:[%s4385_s1 + $0xf0] sm:$0xff]   ;;  %v3287_v9 = vld [vmem:[%s4385_s1 + $0xe8] sm:$0xff]   ;;  %vm1527_vm2 = vcmask 1040384  }
   0xd   : > { %v3280_v2 = vld [vmem:[%s4385_s1 + $0x38] sm:$0xff]   ;;  %2916 = vmatprep.subr.bf16.mxu1 %v3279_v1  ;;  %v3284_v6 = vld [vmem:[%s4385_s1 + $0x30] sm:$0xff]   ;;  %v3288_v10 = vld [vmem:[%s4385_s1 + $0x28] sm:$0xff]   ;;  %s4443_s25 = smov (!%p269_p3, %s2683_s25), 1 }
   0xe   : > { %v3281_v3 = vld [vmem:[%s4385_s1 + $0xb8] sm:$0xff]   ;;  %2877 = vmatpush3.bf16.msra.mxu0 %v3280_v2  ;;  %v3285_v7 = vld [vmem:[%s4385_s1 + $0xb0] sm:$0xff]   ;;  %v3289_v11 = vld [vmem:[%s4385_s1 + $0xa8] sm:$0xff]   ;;  %s3268_s13 = smul.u32 80, %s4443_s25  ;;  %s2852_s12 = sshll.u32 %s4443_s25, 5 }
   0xf   : > { %2917 = vmatpush3.bf16.msra.mxu1 %v3281_v3  ;;  %2878 = vmatprep.subr.bf16.mxu0 %v3282_v4  ;;  %v3290_v12 = vld [vmem:[%s4385_s1 + $0x60] sm:$0xff]   ;;  %v3294_v16 = vld [vmem:[%s4385_s1 + $0x58] sm:$0xff]   ;;  %v3298_v20 = vld [vmem:[%s4385_s1 + $0x50] sm:$0xff]   ;;  %s278_s15 = scalar_lea.vmem %s4391_s7, %s2852_s12 }
  0x10   : > { %2918 = vmatprep.subr.bf16.mxu1 %v3283_v5  ;;  %v3291_v13 = vld [vmem:[%s4385_s1 + $0xe0] sm:$0xff]   ;;  %v3295_v17 = vld [vmem:[%s4385_s1 + $0xd8] sm:$0xff]   ;;  %v3299_v21 = vld [vmem:[%s4385_s1 + $0xd0] sm:$0xff]   ;;  %s3588_s26 = scalar_lea.vmem %s4384_s0, %s3268_s13 }
  0x11   : > { %v3292_v14 = vld [vmem:[%s4385_s1 + $0x20] sm:$0xff]   ;;  %v3296_v18 = vld [vmem:[%s4385_s1 + $0x18] sm:$0xff]   ;;  %v3300_v22 = vld [vmem:[%s4385_s1 + $0x10] sm:$0xff]  }
  0x12   : > { %2879 = vmatpush3.bf16.msra.mxu0 %v3284_v6  ;;  %v3293_v15 = vld [vmem:[%s4385_s1 + $0xa0] sm:$0xff]   ;;  %v3297_v19 = vld [vmem:[%s4385_s1 + $0x98] sm:$0xff]   ;;  %v3301_v23 = vld [vmem:[%s4385_s1 + $0x90] sm:$0xff]  }
  0x13   : > { %2919 = vmatpush3.bf16.msra.mxu1 %v3285_v7  ;;  %2880 = vmatprep.subr.bf16.mxu0 %v3286_v8  ;;  %v3302_v24 = vld [vmem:[%s4385_s1 + $0x48] sm:$0xff]   ;;  %v3306_v28 = vld [vmem:[%s4385_s1 + $0x40] sm:$0xff]   ;;  %v284_v39 = vld [vmem:[%s3588_s26 + $0x10] sm:$0xf] }
  0x14   : > { %2920 = vmatprep.subr.bf16.mxu1 %v3287_v9  ;;  %v3303_v25 = vld [vmem:[%s4385_s1 + $0xc8] sm:$0xff]   ;;  %v3307_v29 = vld [vmem:[%s4385_s1 + $0xc0] sm:$0xff]   ;;  %v3312_v42 = vld [vmem:[%s4385_s1 + $0x178] sm:$0xff]   ;;  %v304_v48 = vunpack.c.l.bf16 %v284_v39 }
  0x15   : > { %v3304_v26 = vld [vmem:[%s4385_s1 + $0x8] sm:$0xff]   ;;  %v3308_v30 = vld [vmem:[%s4385_s1] sm:$0xff]   ;;  %v3314_v50 = vld [vmem:[%s4385_s1 + $0x1f8] sm:$0xff]  }
  0x16   : > { %2881 = vmatpush3.bf16.msra.mxu0 %v3288_v10  ;;  %v3305_v27 = vld [vmem:[%s4385_s1 + $0x88] sm:$0xff]   ;;  %v3309_v31 = vld [vmem:[%s4385_s1 + $0x80] sm:$0xff]   ;;  %v3313_v57 = vld [vmem:[%s4385_s1 + $0x138] sm:$0xff]   ;;  %v343_v61 = vrot.slane %v304_v48, 1  ;;  %v376_v0 = vrot.slane %v304_v48, 2 }
  0x17   : > { %2921 = vmatpush3.bf16.msra.mxu1 %v3289_v11  ;;  %2882 = vmatprep.subr.bf16.mxu0 %v3290_v12  ;;  %v280_v32 = vld [vmem:[%s3588_s26] sm:$0xf]  ;;  %v281_v33 = vld [vmem:[%s3588_s26 + $0x4] sm:$0x1]  ;;  %v282_v34 = vld [vmem:[%s3588_s26 + $0x8] sm:$0xf] }
  0x18   : > { %2922 = vmatprep.subr.bf16.mxu1 %v3291_v13  ;;  %v283_v35 = vld [vmem:[%s3588_s26 + $0xc] sm:$0x1]  ;;  %v300_v36 = vunpack.c.l.bf16 %v280_v32  ;;  %v301_v37 = vunpack.c.l.bf16 %v281_v33  ;;  %v302_v38 = vunpack.c.l.bf16 %v282_v34  ;;  %v2692_v41 = vcombine.low %v282_v34, %v284_v39  ;;  %v3315_v60 = vld [vmem:[%s4385_s1 + $0x1b8] sm:$0xff]   ;;  %v3316_v63 = vld [vmem:[%s4385_s1 + $0x170] sm:$0xff]  }
  0x19   : > { %v303_v40 = vunpack.c.l.bf16 %v283_v35  ;;  %v2691_v55 = vcombine.low %v280_v32, %v282_v34  ;;  %v3317_v1 = vld [vmem:[%s4385_s1 + $0x130] sm:$0xff]   ;;  %v286_v4 = vld [vmem:[%s3588_s26 + $0x18] sm:$0xf]  ;;  %v287_v5 = vld [vmem:[%s3588_s26 + $0x1c] sm:$0x1] }
  0x1a   : > { %2883 = vmatpush3.bf16.msra.mxu0 %v3292_v14  ;;  %v337_v43 = vrot.slane %v300_v36, 1  ;;  %v338_v44 = vrot.slane %v301_v37, 1  ;;  %v340_v45 = vrot.slane %v302_v38, 1  ;;  %v370_v46 = vrot.slane %v300_v36, 2  ;;  %1122 = vmatprep.mubr.bf16.mxu1 %v2692_v41  ;;  %v3318_v2 = vld [vmem:[%s4385_s1 + $0x1f0] sm:$0xff]   ;;  %v3327_v32 = vld [vmem:[%s4385_s1 + $0x120] sm:$0xff]  }
  0x1b   : > { %2923 = vmatpush3.bf16.msra.mxu1 %v3293_v15  ;;  %2884 = vmatprep.subr.bf16.mxu0 %v3294_v16  ;;  %v341_v47 = vrot.slane %v303_v40, 1  ;;  %v371_v49 = vrot.slane %v301_v37, 2  ;;  %v373_v52 = vrot.slane %v302_v38, 2  ;;  %v374_v53 = vrot.slane %v303_v40, 2  ;;  %v285_v3 = vld [vmem:[%s3588_s26 + $0x14] sm:$0x1] }
  0x1c   : > { %2924 = vmatprep.subr.bf16.mxu1 %v3295_v17  ;;  %v339_v51 = vsel %vm336_vm0, %v337_v43, %v338_v44  ;;  %v305_v6 = vunpack.c.l.bf16 %v285_v3  ;;  %v306_v7 = vunpack.c.l.bf16 %v286_v4  ;;  %v307_v8 = vunpack.c.l.bf16 %v287_v5  ;;  %v288_v9 = vld [vmem:[%s3588_s26 + $0x20] sm:$0xf]  ;;  %v3320_v11 = vld [vmem:[%s4385_s1 + $0x1b0] sm:$0xff]   ;;  %v3322_v16 = vld [vmem:[%s4385_s1 + $0x168] sm:$0xff]  }
  0x1d   : > { %v3609_v54 = vsel %vm336_vm0, %v340_v45, %v341_v47  ;;  %v372_v56 = vsel %vm369_vm1, %v370_v46, %v371_v49  ;;  %v3617_v59 = vsel %vm369_vm1, %v373_v52, %v374_v53  ;;  %v2694_v10 = vcombine.low %v286_v4, %v288_v9  ;;  %v3328_v33 = vld [vmem:[%s4385_s1 + $0x1e0] sm:$0xff]   ;;  %v290_v36 = vld [vmem:[%s3588_s26 + $0x28] sm:$0xf]  ;;  %v291_v37 = vld [vmem:[%s3588_s26 + $0x2c] sm:$0x1] }
  0x1e   : > { %2885 = vmatpush3.bf16.msra.mxu0 %v3296_v18  ;;  %4400 = vst [vmem:[#allocation3_spill] sm:$0xff] %v3609_v54  ;;  %v423_v58 = vpack.c.bf16 %v3609_v54, %v339_v51  ;;  %v424_v62 = vpack.c.bf16 %v3617_v59, %v372_v56  ;;  %v344_v12 = vrot.slane %v305_v6, 1  ;;  %v346_v13 = vrot.slane %v306_v7, 1  ;;  %v289_v35 = vld [vmem:[%s3588_s26 + $0x24] sm:$0x1]  ;;  %v3332_v48 = vld [vmem:[%s4385_s1 + $0x158] sm:$0xff]  }
  0x1f   : > { %2925 = vmatpush3.bf16.msra.mxu1 %v3297_v19  ;;  %2886 = vmatprep.subr.bf16.mxu0 %v3298_v20  ;;  %v347_v14 = vrot.slane %v307_v8, 1  ;;  %v377_v15 = vrot.slane %v305_v6, 2  ;;  %v308_v17 = vunpack.c.l.bf16 %v288_v9  ;;  %v3642_v18 = vcombine.low %v284_v39, %v286_v4  ;;  %v292_v41 = vld [vmem:[%s3588_s26 + $0x30] sm:$0xf]  ;;  %v3330_v43 = vld [vmem:[%s4385_s1 + $0x1a0] sm:$0xff]   ;;  %v3333_v53 = vld [vmem:[%s4385_s1 + $0x118] sm:$0xff]  }
  0x20   : > { %2926 = vmatprep.subr.bf16.mxu1 %v3299_v21  ;;  %1057 = vmatprep.mubr.bf16.mxu0 %v423_v58  ;;  %v379_v19 = vrot.slane %v306_v7, 2  ;;  %v380_v20 = vrot.slane %v307_v8, 2  ;;  %v3323_v21 = vld [vmem:[%s4385_s1 + $0x128] sm:$0xff]   ;;  %v309_v38 = vunpack.c.l.bf16 %v289_v35  ;;  %v310_v39 = vunpack.c.l.bf16 %v290_v36  ;;  %v3338_v3 = vld [vmem:[%s4385_s1 + $0x1d0] sm:$0xff]   ;;  %v294_v6 = vld [vmem:[%s3588_s26 + $0x38] sm:$0xf] }
  0x21   : > { %v382_v34 = vrot.slane %v308_v17, 2  ;;  %v311_v40 = vunpack.c.l.bf16 %v291_v37  ;;  %v312_v49 = vunpack.c.l.bf16 %v292_v41  ;;  %v293_v5 = vld [vmem:[%s3588_s26 + $0x34] sm:$0x1]  ;;  %v295_v7 = vld [vmem:[%s3588_s26 + $0x3c] sm:$0x1] }
  0x22   : > { %2887 = vmatpush3.bf16.msra.mxu0 %v3300_v22  ;;  %v3324_v22 = vld [vmem:[%s4385_s1 + $0x1e8] sm:$0xff]   ;;  %v350_v44 = vrot.slane %v309_v38, 1  ;;  %v352_v45 = vrot.slane %v310_v39, 1  ;;  %v383_v47 = vrot.slane %v309_v38, 2  ;;  %v385_v51 = vrot.slane %v310_v39, 2  ;;  %v3346_v39 = vld [vmem:[%s4385_s1 + $0x140] sm:$0xff]  }
  0x23   : > { %2927 = vmatpush3.bf16.msra.mxu1 %v3301_v23  ;;  %2888 = vmatprep.subr.bf16.mxu0 %v3302_v24  ;;  %v3651_v23 = vsel %vm336_vm0, %v343_v61, %v344_v12  ;;  %v3654_v24 = vsel %vm336_vm0, %v346_v13, %v347_v14  ;;  %v353_v46 = vrot.slane %v311_v40, 1  ;;  %v386_v52 = vrot.slane %v311_v40, 2  ;;  %v3340_v13 = vld [vmem:[%s4385_s1 + $0x190] sm:$0xff]   ;;  %v3347_v40 = vld [vmem:[%s4385_s1 + $0x100] sm:$0xff]  }
  0x24   : > { %2928 = vmatprep.subr.bf16.mxu1 %v3303_v25  ;;  %4401 = vst [vmem:[#allocation4_spill] sm:$0xff] %v3651_v23  ;;  %4402 = vst [vmem:[#allocation5_spill] sm:$0xff] %v3654_v24  ;;  %v3657_v25 = vsel %vm369_vm1, %v376_v0, %v377_v15  ;;  %v3710_v58 = vsel %vm369_vm1, %v382_v34, %v383_v47  ;;  %v3336_v0 = vld [vmem:[%s4385_s1 + $0x150] sm:$0xff]   ;;  %v388_v4 = vrot.slane %v312_v49, 2  ;;  %v313_v8 = vunpack.c.l.bf16 %v293_v5 }
  0x25   : > { %v3717_v61 = vsel %vm369_vm1, %v385_v51, %v386_v52  ;;  %v427_v37 = vpack.c.bf16 %v3657_v25, %v3617_v59  ;;  %v3348_v59 = vld [vmem:[%s4385_s1 + $0x1c0] sm:$0xff]   ;;  %v3352_v51 = vld [vmem:[%s4385_s1 + $0x228] sm:$0xff]  }
  0x26   : > { %2889 = vmatpush3.bf16.msra.mxu0 %v3304_v26  ;;  %v3661_v26 = vpack.c.bf16 %v3654_v24, %v3651_v23  ;;  %v356_v14 = vrot.slane %v313_v8, 1 }
  0x27   : > { %2929 = vmatpush3.bf16.msra.mxu1 %v3305_v27  ;;  %2890 = vmatprep.subr.bf16.mxu0 %v3306_v28  ;;  %v3664_v27 = vsel %vm369_vm1, %v379_v19, %v380_v20  ;;  %v3325_v28 = vld [vmem:[%s4385_s1 + $0x1a8] sm:$0xff]  }
  0x28   : > { %2930 = vmatprep.subr.bf16.mxu1 %v3307_v29  ;;  %v3671_v29 = vpack.c.bf16 %v3664_v27, %v3657_v25  ;;  %v3342_v19 = vld [vmem:[%s4385_s1 + $0x148] sm:$0xff]   ;;  %v3349_v25 = vld [vmem:[%s4385_s1 + $0x180] sm:$0xff]  }
  0x29   : > { %v3343_v20 = vld [vmem:[%s4385_s1 + $0x108] sm:$0xff]  }
  0x2a   : > { %2891 = vmatpush3.bf16.msra.mxu0 %v3308_v30  ;;  %v3326_v30 = vld [vmem:[%s4385_s1 + $0x160] sm:$0xff]  }
  0x2b   : > { %2931 = vmatpush3.bf16.msra.mxu1 %v3309_v31  ;;  %2956 = vmatprep.subr.bf16.mxu0 %v3312_v42  ;;  %v349_v31 = vrot.slane %v308_v17, 1  ;;  %v2696_v42 = vcombine.low %v290_v36, %v292_v41  ;;  %v389_v17 = vrot.slane %v313_v8, 2 }
  0x2c   : > { %2996 = vmatprep.subr.bf16.mxu1 %v3314_v50  ;;  %v3695_v50 = vcombine.low %v288_v9, %v290_v36  ;;  %v314_v9 = vunpack.c.l.bf16 %v294_v6  ;;  %v3345_v36 = vld [vmem:[%s4385_s1 + $0x188] sm:$0xff]  }
  0x2d   : > { %1058 = vmatmul.mubr.bf16.vlgmr.msra.gmra.mxu0 %v2691_v55  ;;  %v3334_v55 = vld [vmem:[%s4385_s1 + $0x1d8] sm:$0xff]   ;;  %v3704_v56 = vsel %vm336_vm0, %v349_v31, %v350_v44  ;;  %v433_v44 = vpack.c.bf16 %v3710_v58, %v3664_v27 }
  0x2e   : > { %1123 = vmatmul.mubr.bf16.vlgmr.msra.gmra.mxu1 %v424_v62  ;;  %2957 = vmatpush3.bf16.msra.mxu0 %v3313_v57  ;;  %4403 = vst [vmem:[#allocation6_spill] sm:$0xff] %v3704_v56  ;;  %v3707_v57 = vsel %vm336_vm0, %v352_v45, %v353_v46  ;;  %v3335_v62 = vld [vmem:[%s4385_s1 + $0x198] sm:$0xff]   ;;  %v358_v15 = vrot.slane %v314_v9, 1  ;;  %v3351_v45 = vld [vmem:[%s4385_s1 + $0x230] sm:$0xff]   ;;  %v297_v46 = vld [vmem:[%s3588_s26 + $0x44] sm:$0x1] }
  0x2f   : > { %2997 = vmatpush3.bf16.msra.mxu1 %v3315_v60  ;;  %2958 = vmatprep.subr.bf16.mxu0 %v3316_v63  ;;  %4404 = vst [vmem:[#allocation7_spill] sm:$0xff] %v3707_v57  ;;  %v3714_v60 = vpack.c.bf16 %v3707_v57, %v3704_v56  ;;  %v3724_v63 = vpack.c.bf16 %v3717_v61, %v3710_v58 }
  0x30   : > { %2998 = vmatprep.subr.bf16.mxu1 %v3318_v2  ;;  %1130 = vmatprep.mubr.bf16.mxu1 %v2694_v10  ;;  %v3337_v2 = vld [vmem:[%s4385_s1 + $0x110] sm:$0xff]   ;;  %v315_v10 = vunpack.c.l.bf16 %v295_v7 }
  0x31   : > { %1065 = vmatprep.mubr.bf16.mxu0 %v3661_v26 }
  0x32   : > { %2959 = vmatpush3.bf16.msra.mxu0 %v3317_v1  ;;  %v355_v1 = vrot.slane %v312_v49, 1  ;;  %v299_v49 = vld [vmem:[%s3588_s26 + $0x4c] sm:$0x1] }
  0x33   : > { %2999 = vmatpush3.bf16.msra.mxu1 %v3320_v11  ;;  %2960 = vmatprep.subr.bf16.mxu0 %v3322_v16  ;;  %v3742_v11 = vld [vmem:[%s3588_s26 + $0x40] sm:$0xf]  ;;  %v359_v16 = vrot.slane %v315_v10, 1 }
  0x34   : > { %3000 = vmatprep.subr.bf16.mxu1 %v3324_v22  ;;  %v2698_v12 = vcombine.low %v294_v6, %v3742_v11  ;;  %v392_v22 = vrot.slane %v315_v10, 2  ;;  %v3356_v10 = vld [vmem:[%s4385_s1 + $0x208] sm:$0xff]  }
  0x35   : > { %1066 = vmatmul.mubr.bf16.gmra.mxu0 %v3642_v18  ;;  %v3761_v31 = vsel %vm336_vm0, %v358_v15, %v359_v16  ;;  %v3359_v16 = vld [vmem:[%s4388_s4 + $0x78] sm:$0xff]  }
  0x36   : > { %1131 = vmatmul.mubr.bf16.gmra.mxu1 %v3671_v29  ;;  %2961 = vmatpush3.bf16.msra.mxu0 %v3323_v21  ;;  %v391_v21 = vrot.slane %v314_v9, 2  ;;  %4406 = vst [vmem:[#allocation9_spill] sm:$0xff] %v3761_v31 }
  0x37   : > { %3001 = vmatpush3.bf16.msra.mxu1 %v3325_v28  ;;  %2962 = vmatprep.subr.bf16.mxu0 %v3326_v30  ;;  %v3344_v28 = vld [vmem:[%s4385_s1 + $0x1c8] sm:$0xff]   ;;  %v3758_v30 = vsel %vm336_vm0, %v355_v1, %v356_v14  ;;  %v3358_v14 = vld [vmem:[%s4385_s1 + $0x200] sm:$0xff]  }
  0x38   : > { %3002 = vmatprep.subr.bf16.mxu1 %v3328_v33  ;;  %1138 = vmatprep.mubr.bf16.mxu1 %v2696_v42  ;;  %4405 = vst [vmem:[#allocation8_spill] sm:$0xff] %v3758_v30  ;;  %v390_v33 = vsel %vm369_vm1, %v388_v4, %v389_v17  ;;  %v441_v34 = vpack.c.bf16 %v3761_v31, %v3758_v30  ;;  %v3360_v17 = vld [vmem:[%s4388_s4 + $0x38] sm:$0xff]  }
  0x39   : > { %1073 = vmatprep.mubr.bf16.mxu0 %v3714_v60  ;;  %v3769_v35 = vsel %vm369_vm1, %v391_v21, %v392_v22  ;;  %v426_v42 = vpack.c.bf16 %v3651_v23, %v3609_v54  ;;  %v439_v4 = vpack.c.bf16 %v390_v33, %v3717_v61  ;;  %v438_v61 = vpack.c.bf16 %v3758_v30, %v3707_v57  ;;  %v3365_v21 = vld [vmem:[%s4388_s4 + $0xf0] sm:$0xff]   ;;  %v3366_v22 = vld [vmem:[%s4388_s4 + $0x68] sm:$0xff]  }
  0x3a   : > { %2963 = vmatpush3.bf16.msra.mxu0 %v3327_v32  ;;  %v3763_v32 = vcombine.low %v292_v41, %v294_v6  ;;  %v3777_v38 = vpack.c.bf16 %v3769_v35, %v390_v33  ;;  %v3350_v41 = vld [vmem:[%s4385_s1 + $0x238] sm:$0xff]   ;;  %v3369_v33 = vld [vmem:[%s4388_s4 + $0xe8] sm:$0xff]  }
  0x3b   : > { %3003 = vmatpush3.bf16.msra.mxu1 %v3330_v43  ;;  %2964 = vmatprep.subr.bf16.mxu0 %v3332_v48  ;;  %v316_v43 = vunpack.c.l.bf16 %v3742_v11  ;;  %v298_v48 = vld [vmem:[%s3588_s26 + $0x48] sm:$0xf] }
  0x3c   : > { %3004 = vmatprep.subr.bf16.mxu1 %v3334_v55  ;;  %v318_v52 = vunpack.c.l.bf16 %v298_v48 }
  0x3d   : > { %1074 = vmatmul.mubr.bf16.gmra.mxu0 %v3695_v50  ;;  %v404_v47 = vrot.slane %v316_v43, 1  ;;  %v408_v27 = vrot.slane %v316_v43, 2  ;;  %v3381_v43 = vld [vmem:[%s4388_s4 + $0xd0] sm:$0xff]  }
  0x3e   : > { %2965 = vmatpush3.bf16.msra.mxu0 %v3333_v53  ;;  %1139 = vmatmul.mubr.bf16.gmra.mxu1 %v3724_v63  ;;  %v319_v53 = vunpack.c.l.bf16 %v299_v49  ;;  %v3388_v49 = vld [vmem:[%s4388_s4] sm:$0xff]  }
  0x3f   : > { %3005 = vmatpush3.bf16.msra.mxu1 %v3335_v62  ;;  %2966 = vmatprep.subr.bf16.mxu0 %v3336_v0  ;;  %v3353_v62 = vld [vmem:[%s4385_s1 + $0x220] sm:$0xff]   ;;  %v414_v0 = vrot.slane %v318_v52, 1 }
  0x40   : > { %3006 = vmatprep.subr.bf16.mxu1 %v3338_v3  ;;  %1146 = vmatprep.mubr.bf16.mxu1 %v2698_v12  ;;  %v415_v1 = vrot.slane %v319_v53, 1  ;;  %v419_v3 = vrot.slane %v319_v53, 2  ;;  %v3393_v53 = vld [vmem:[%s4388_s4 + $0x1f8] sm:$0xff]  }
  0x41   : > { %1081 = vmatprep.mubr.bf16.mxu0 %v441_v34 }
  0x42   : > { %2967 = vmatpush3.bf16.msra.mxu0 %v3337_v2  ;;  %v418_v2 = vrot.slane %v318_v52, 2  ;;  %v416_v7 = vsel %vm336_vm0, %v414_v0, %v415_v1  ;;  %v3391_v52 = vld [vmem:[%s4388_s4 + $0x178] sm:$0xff]  }
  0x43   : > { %3007 = vmatpush3.bf16.msra.mxu1 %v3340_v13  ;;  %2968 = vmatprep.subr.bf16.mxu0 %v3342_v19  ;;  %v2699_v13 = vcombine.low %v3742_v11, %v298_v48  ;;  %v3363_v19 = vld [vmem:[%s4388_s4 + $0xb8] sm:$0xff]   ;;  %v3387_v48 = vld [vmem:[%s4388_s4 + $0x88] sm:$0xff]  }
  0x44   : > { %3008 = vmatprep.subr.bf16.mxu1 %v3344_v28  ;;  %v420_v15 = vsel %vm369_vm1, %v418_v2, %v419_v3  ;;  %v3367_v28 = vld [vmem:[%s4388_s4 + $0xb0] sm:$0xff]  }
  0x45   : > { %1082 = vmatmul.mubr.bf16.gmra.mxu0 %v3763_v32 }
  0x46   : > { %2969 = vmatpush3.bf16.msra.mxu0 %v3343_v20  ;;  %1147 = vmatmul.mubr.bf16.gmra.mxu1 %v3777_v38  ;;  %v3364_v20 = vld [vmem:[%s4388_s4 + $0x30] sm:$0xff]  }
  0x47   : > { %3009 = vmatpush3.bf16.msra.mxu1 %v3345_v36  ;;  %2970 = vmatprep.subr.bf16.mxu0 %v3346_v39  ;;  %v3372_v36 = vld [vmem:[%s4388_s4 + $0x20] sm:$0xff]  }
  0x48   : > { %1187 = vmatprep.mubr.bf16.mxu0 %v427_v37  ;;  %3010 = vmatprep.subr.bf16.mxu1 %v3348_v59  ;;  %v3373_v37 = vld [vmem:[%s4388_s4 + $0xe0] sm:$0xff]   ;;  %v3377_v59 = vld [vmem:[%s4388_s4 + $0xd8] sm:$0xff]  }
  0x49   : > { %1252 = vmatprep.mubr.bf16.mxu1 %v3661_v26  ;;  %v317_v26 = vunpack.c.l.bf16 %v297_v46  ;;  %v3375_v39 = vld [vmem:[%s4388_s4 + $0xa0] sm:$0xff]   ;;  %v3384_v46 = vld [vmem:[%s4388_s4 + $0x8] sm:$0xff]  }
  0x4a   : > { %2971 = vmatpush3.bf16.msra.mxu0 %v3347_v40  ;;  %v3376_v40 = vld [vmem:[%s4388_s4 + $0x18] sm:$0xff]  }
  0x4b   : > { %3011 = vmatpush3.bf16.msra.mxu1 %v3349_v25  ;;  %3220 = vmatprep.subr.bf16.mxu0 %v3350_v41  ;;  %v409_v55 = vrot.slane %v317_v26, 2  ;;  %v405_v58 = vrot.slane %v317_v26, 1  ;;  %v3378_v25 = vld [vmem:[%s4388_s4 + $0x50] sm:$0xff]   ;;  %v3386_v26 = vld [vmem:[%s4388_s4 + $0x40] sm:$0xff]  }
  0x4c   : > { %3048 = vmatprep.subr.bf16.mxu1 %v3359_v16 }
  0x4d   : > { %1188 = vmatmul.mubr.bf16.vlgmr.msra.gmra.mxu0 %v426_v42  ;;  %v410_v5 = vsel %vm369_vm1, %v408_v27, %v409_v55  ;;  %v3825_v6 = vsel %vm336_vm0, %v404_v47, %v405_v58  ;;  %v3380_v42 = vld [vmem:[%s4388_s4 + $0x10] sm:$0xff]   ;;  %v3385_v47 = vld [vmem:[%s4388_s4 + $0xc8] sm:$0xff]   ;;  %v3390_v27 = vld [vmem:[%s4388_s4 + $0x80] sm:$0xff]  }
  0x4e   : > { %1253 = vmatmul.mubr.bf16.vlgmr.msra.gmra.mxu1 %v3642_v18  ;;  %3221 = vmatpush3.bf16.msra.mxu0 %v3350_v41  ;;  %v432_v18 = vpack.c.bf16 %v3704_v56, %v3654_v24  ;;  %4407 = vst [vmem:[#allocation10_spill] sm:$0xff] %v3825_v6  ;;  %v445_v8 = vpack.c.bf16 %v410_v5, %v3769_v35  ;;  %v3371_v35 = vld [vmem:[%s4388_s4 + $0xa8] sm:$0xff]   ;;  %v3379_v41 = vld [vmem:[%s4388_s4 + $0x98] sm:$0xff]  }
  0x4f   : > { %1195 = vmatprep.mubr.bf16.mxu0 %v433_v44  ;;  %3222 = vmatprep.subr.bf16.mxu0 %v3351_v45  ;;  %v447_v9 = vpack.c.bf16 %v416_v7, %v3825_v6  ;;  %v444_v12 = vpack.c.bf16 %v3825_v6, %v3761_v31  ;;  %v448_v11 = vpack.c.bf16 %v420_v15, %v410_v5  ;;  %v3382_v44 = vld [vmem:[%s4388_s4 + $0x48] sm:$0xff]  }
  0x50   : > { %1260 = vmatprep.mubr.bf16.mxu1 %v3714_v60  ;;  %v3354_v60 = vld [vmem:[%s4385_s1 + $0x218] sm:$0xff]   ;;  %3049 = vmatpush3.bf16.msra.mxu1 %v3360_v17 }
  0x52   : > { %3223 = vmatpush3.bf16.msra.mxu0 %v3351_v45  ;;  %v3383_v45 = vld [vmem:[%s4388_s4 + $0x90] sm:$0xff]  }
  0x53   : > { %3224 = vmatprep.subr.bf16.mxu0 %v3352_v51 }
  0x55   : > { %1196 = vmatmul.mubr.bf16.gmra.mxu0 %v432_v18 }
  0x56   : > { %1261 = vmatmul.mubr.bf16.gmra.mxu1 %v3695_v50  ;;  %3225 = vmatpush3.bf16.msra.mxu0 %v3352_v51  ;;  %v3355_v50 = vld [vmem:[%s4385_s1 + $0x210] sm:$0xff]   ;;  %v3389_v51 = vld [vmem:[%s4388_s4 + $0xc0] sm:$0xff]  }
  0x57   : > { %1203 = vmatprep.mubr.bf16.mxu0 %v439_v4  ;;  %3226 = vmatprep.subr.bf16.mxu0 %v3353_v62 }
  0x58   : > { %1268 = vmatprep.mubr.bf16.mxu1 %v441_v34  ;;  %v3370_v34 = vld [vmem:[%s4388_s4 + $0x60] sm:$0xff]  }
  0x5a   : > { %3227 = vmatpush3.bf16.msra.mxu0 %v3353_v62 }
  0x5b   : > { %3228 = vmatprep.subr.bf16.mxu0 %v3354_v60 }
  0x5d   : > { %1204 = vmatmul.mubr.bf16.gmra.mxu0 %v438_v61 }
  0x5e   : > { %1269 = vmatmul.mubr.bf16.gmra.mxu1 %v3763_v32  ;;  %3229 = vmatpush3.bf16.msra.mxu0 %v3354_v60  ;;  %v3368_v32 = vld [vmem:[%s4388_s4 + $0x28] sm:$0xff]  }
  0x5f   : > { %1211 = vmatprep.mubr.bf16.mxu0 %v445_v8  ;;  %3230 = vmatprep.subr.bf16.mxu0 %v3355_v50 }
  0x60   : > { %1276 = vmatprep.mubr.bf16.mxu1 %v447_v9 }
  0x62   : > { %3231 = vmatpush3.bf16.msra.mxu0 %v3355_v50 }
  0x63   : > { %3232 = vmatprep.subr.bf16.mxu0 %v3356_v10 }
  0x65   : > { %1212 = vmatmul.mubr.bf16.gmra.mxu0 %v444_v12 }
  0x66   : > { %1277 = vmatmul.mubr.bf16.gmra.mxu1 %v2699_v13  ;;  %3233 = vmatpush3.bf16.msra.mxu0 %v3356_v10 }
  0x67   : > { %3236 = vmatprep.mubr.bf16.mxu0 %v3671_v29  ;;  %3234 = vmatprep.subr.bf16.mxu0 %v3358_v14  ;;  %v3361_v29 = vld [vmem:[%s4388_s4 + $0xf8] sm:$0xff]  }
  0x6a   : > { %3235 = vmatpush3.bf16.msra.mxu0 %v3358_v14 }
  0x6b   : > { %3088 = vmatprep.subr.bf16.mxu0 %v3361_v29 }
  0x6d   : > { %3237 = vmatmul.mubr.bf16.vlgmr.msra.gmra.mxu0 %v3724_v63  ;;  %v3362_v63 = vld [vmem:[%s4388_s4 + $0x70] sm:$0xff]  }
  0x6e   : > { %3240 = vmatprep.mubr.bf16.mxu0 %v3777_v38  ;;  %3050 = vmatprep.subr.bf16.mxu1 %v3362_v63  ;;  %v3374_v38 = vld [vmem:[%s4388_s4 + $0x58] sm:$0xff]  }
  0x6f   : > { %3089 = vmatpush3.bf16.msra.mxu0 %v3363_v19  ;;  %3051 = vmatpush3.bf16.msra.mxu1 %v3364_v20 }
  0x70   : > { %3090 = vmatprep.subr.bf16.mxu0 %v3365_v21  ;;  %3052 = vmatprep.subr.bf16.mxu1 %v3366_v22 }
  0x73   : > { %3091 = vmatpush3.bf16.msra.mxu0 %v3367_v28  ;;  %3053 = vmatpush3.bf16.msra.mxu1 %v3368_v32 }
  0x74   : > { %3092 = vmatprep.subr.bf16.mxu0 %v3369_v33  ;;  %3054 = vmatprep.subr.bf16.mxu1 %v3370_v34 }
  0x75   : > { %3241 = vmatmul.mubr.bf16.gmra.mxu0 %v448_v11 }
  0x77   : > { %3093 = vmatpush3.bf16.msra.mxu0 %v3371_v35  ;;  %3055 = vmatpush3.bf16.msra.mxu1 %v3372_v36 }
  0x78   : > { %3094 = vmatprep.subr.bf16.mxu0 %v3373_v37  ;;  %3056 = vmatprep.subr.bf16.mxu1 %v3374_v38 }
  0x7b   : > { %3095 = vmatpush3.bf16.msra.mxu0 %v3375_v39  ;;  %3057 = vmatpush3.bf16.msra.mxu1 %v3376_v40 }
  0x7c   : > { %3096 = vmatprep.subr.bf16.mxu0 %v3377_v59  ;;  %3058 = vmatprep.subr.bf16.mxu1 %v3378_v25 }
  0x7f   : > { %3097 = vmatpush3.bf16.msra.mxu0 %v3379_v41  ;;  %3059 = vmatpush3.bf16.msra.mxu1 %v3380_v42 }
  0x80   : > { %3098 = vmatprep.subr.bf16.mxu0 %v3381_v43  ;;  %3060 = vmatprep.subr.bf16.mxu1 %v3382_v44 }
  0x83   : > { %3099 = vmatpush3.bf16.msra.mxu0 %v3383_v45  ;;  %3061 = vmatpush3.bf16.msra.mxu1 %v3384_v46 }
  0x84   : > { %3100 = vmatprep.subr.bf16.mxu0 %v3385_v47  ;;  %3062 = vmatprep.subr.bf16.mxu1 %v3386_v26 }
  0x87   : > { %3101 = vmatpush3.bf16.msra.mxu0 %v3387_v48  ;;  %3063 = vmatpush3.bf16.msra.mxu1 %v3388_v49 }
  0x88   : > { %3102 = vmatprep.subr.bf16.mxu0 %v3389_v51  ;;  %3128 = vmatprep.subr.bf16.mxu1 %v3391_v52 }
  0x8b   : > { %3103 = vmatpush3.bf16.msra.mxu0 %v3390_v27 }
  0x8c   : > { %3168 = vmatprep.subr.bf16.mxu0 %v3393_v53 }
  0xed   : > { %v2892_v18 = vpop.f32.mrf.mxu0 }
  0xee   : > { %v2932_v55 = vpop.f32.mrf.mxu1 }
  0xef   : > { %v2893_v58 = vpop.f32.mrf.mxu0 }
  0xf0   : > { %v2933_v62 = vpop.f32.mrf.mxu1  ;;  %v2894_v6 = vadd.f32 %v2893_v58, %v2892_v18 }
  0xf1   : > { %v3951_v0 = vpop.f32.mrf.mxu0  ;;  %v2934_v31 = vadd.f32 %v2933_v62, %v2932_v55 }
  0xf2   : > { %v3953_v1 = vpop.f32.mrf.mxu1 }
  0xf3   : > { %v2896_v2 = vpop.f32.mrf.mxu0 }
  0xf4   : > { %v2936_v3 = vpop.f32.mrf.mxu1 }
  0xf5   : > { %v2898_v4 = vpop.f32.mrf.mxu0 }
  0xf6   : > { %v2938_v60 = vpop.f32.mrf.mxu1 }
  0xf7   : > { %v2899_v5 = vpop.f32.mrf.mxu0 }
  0xf8   : > { %v2939_v7 = vpop.f32.mrf.mxu1  ;;  %v2900_v52 = vadd.f32 %v2899_v5, %v2898_v4 }
  0xf9   : > { %v2901_v61 = vpop.f32.mrf.mxu0  ;;  %v2940_v53 = vadd.f32 %v2939_v7, %v2938_v60 }
  0xfa   : > { %v2941_v50 = vpop.f32.mrf.mxu1 }
  0xfb   : > { %v2902_v8 = vpop.f32.mrf.mxu0 }
  0xfc   : > { %v2942_v9 = vpop.f32.mrf.mxu1  ;;  %v2903_v56 = vadd.f32 %v2902_v8, %v2901_v61 }
  0xfd   : > { %v2904_v10 = vpop.f32.mrf.mxu0  ;;  %v2943_v54 = vadd.f32 %v2942_v9, %v2941_v50 }
  0xfe   : > { %v2944_v12 = vpop.f32.mrf.mxu1 }
  0xff   : > { %v2905_v13 = vpop.f32.mrf.mxu0 }
 0x100   : > { %v2945_v14 = vpop.f32.mrf.mxu1  ;;  %v2906_v58 = vadd.f32 %v2905_v13, %v2904_v10 }
 0x101   : > { %v3955_v15 = vpop.f32.mrf.mxu0  ;;  %v2946_v62 = vadd.f32 %v2945_v14, %v2944_v12 }
 0x102   : > { %v3957_v11 = vpop.f32.mrf.mxu1 }
 0x103   : > { %4408 = vst [vmem:[#allocation11_spill] sm:$0xff] %v3957_v11  ;;  %v3959_v16 = vpop.f32.mrf.mxu0  ;;  %v1141_v10 = vadd.f32 %v2946_v62, %v2906_v58 }
 0x104   : > { %4409 = vst [vmem:[#allocation12_spill] sm:$0xff] %v3959_v16  ;;  %v3961_v17 = vpop.f32.mrf.mxu1 }
 0x105   : > { %4410 = vst [vmem:[#allocation13_spill] sm:$0xff] %v3961_v17  ;;  %v2910_v29 = vpop.f32.mrf.mxu0 }
 0x106   : > { %v2950_v63 = vpop.f32.mrf.mxu1 }
 0x107   : > { %v2911_v19 = vpop.f32.mrf.mxu0 }
 0x108   : > { %v2951_v20 = vpop.f32.mrf.mxu1  ;;  %v2912_v9 = vadd.f32 %v2911_v19, %v2910_v29  ;;  %v3985_v19 = vld [vmem:[%s4387_s3] ss:$0 sm:$0xff] }
 0x109   : > { %v2913_v21 = vpop.f32.mrf.mxu0 }
 0x10a   : > { %v2953_v22 = vpop.f32.mrf.mxu1 }
 0x10b   : > { %v2914_v28 = vpop.f32.mrf.mxu0  ;;  %v4416_v14 = vld [vmem:[#allocation12_spill] sm:$0xff] }
 0x10c   : > { %v2954_v32 = vpop.f32.mrf.mxu1 }
 0x10d   : > { %v2972_v33 = vpop.f32.mrf.mxu0 }
 0x10e   : > { %v3012_v34 = vpop.f32.mrf.mxu1 }
 0x10f   : > { %v2973_v35 = vpop.f32.mrf.mxu0 }
 0x110   : > { %v3013_v36 = vpop.f32.mrf.mxu1  ;;  %v2974_v11 = vadd.f32 %v2973_v35, %v2972_v33  ;;  %v2952_v33 = vadd.f32 %v2951_v20, %v2950_v63  ;;  %v4418_v20 = vld [vmem:[#allocation13_spill] sm:$0xff] }
 0x111   : > { %v2975_v37 = vpop.f32.mrf.mxu0  ;;  %v3014_v50 = vadd.f32 %v3013_v36, %v3012_v34 }
 0x112   : > { %v3015_v38 = vpop.f32.mrf.mxu1 }
 0x113   : > { %v2976_v39 = vpop.f32.mrf.mxu0 }
 0x114   : > { %v3016_v40 = vpop.f32.mrf.mxu1  ;;  %v2977_v18 = vadd.f32 %v2976_v39, %v2975_v37 }
 0x115   : > { %v2978_v59 = vpop.f32.mrf.mxu0 }
 0x116   : > { %v3018_v25 = vpop.f32.mrf.mxu1 }
 0x117   : > { %v2979_v41 = vpop.f32.mrf.mxu0 }
 0x118   : > { %v3019_v42 = vpop.f32.mrf.mxu1  ;;  %v2980_v23 = vadd.f32 %v2979_v41, %v2978_v59  ;;  %v3017_v59 = vadd.f32 %v3016_v40, %v3015_v38 }
 0x119   : > { %v2981_v43 = vpop.f32.mrf.mxu0  ;;  %v3020_v60 = vadd.f32 %v3019_v42, %v3018_v25 }
 0x11a   : > { %v3021_v44 = vpop.f32.mrf.mxu1 }
 0x11b   : > { %v2982_v45 = vpop.f32.mrf.mxu0 }
 0x11c   : > { %v3022_v46 = vpop.f32.mrf.mxu1  ;;  %v2983_v5 = vadd.f32 %v2982_v45, %v2981_v43 }
 0x11d   : > { %v2984_v47 = vpop.f32.mrf.mxu0 }
 0x11e   : > { %v3963_v26 = vpop.f32.mrf.mxu1 }
 0x11f   : > { %4411 = vst [vmem:[#allocation14_spill] sm:$0xff] %v3963_v26  ;;  %v2985_v48 = vpop.f32.mrf.mxu0  ;;  %v1133_v26 = vadd.f32 %v2940_v53, %v2900_v52 }
 0x120   : > { %v3965_v49 = vpop.f32.mrf.mxu1  ;;  %v2986_v29 = vadd.f32 %v2985_v48, %v2984_v47 }
 0x121   : > { %4412 = vst [vmem:[#allocation15_spill] sm:$0xff] %v3965_v49  ;;  %v3967_v51 = vpop.f32.mrf.mxu0  ;;  %v2897_v49 = vadd.f32 %v2896_v2, %v3951_v0  ;;  %v1198_v4 = vadd.f32 %v2980_v23, %v1133_v26  ;;  %v2915_v0 = vadd.f32 %v2914_v28, %v2913_v21  ;;  %v2955_v23 = vadd.f32 %v2954_v32, %v2953_v22 }
 0x122   : > { %4413 = vst [vmem:[#allocation16_spill] sm:$0xff] %v3967_v51  ;;  %v3969_v27 = vpop.f32.mrf.mxu1  ;;  %v2937_v51 = vadd.f32 %v2936_v3, %v3953_v1  ;;  %v3023_v1 = vadd.f32 %v3022_v46, %v3021_v44  ;;  %v1206_v45 = vadd.f32 %v2986_v29, %v1141_v10 }
 0x123   : > { %4414 = vst [vmem:[#allocation17_spill] sm:$0xff] %v3969_v27  ;;  %v2988_v30 = vpop.f32.mrf.mxu0  ;;  %v1125_v27 = vadd.f32 %v2934_v31, %v2894_v6  ;;  %v1263_v31 = vadd.f32 %v3020_v60, %v1198_v4  ;;  %v1152_v36 = vadd.f32 %v2955_v23, %v2915_v0 }
 0x124   : > { %v3971_v57 = vpop.f32.mrf.mxu1  ;;  %v1128_v8 = vadd.f32 %v2937_v51, %v2897_v49 }
 0x125   : > { %4415 = vst [vmem:[#allocation18_spill] sm:$0xff] %v3971_v57  ;;  %v2990_v24 = vpop.f32.mrf.mxu0  ;;  %v1136_v57 = vadd.f32 %v2943_v54, %v2903_v56  ;;  %v1190_v61 = vadd.f32 %v2974_v11, %v1125_v27  ;;  %v3978_v56 = vld [vmem:[%s4386_s2] ss:$0 sm:$0xff]  ;;  %v2909_v11 = vadd.f32 %v4416_v14, %v3955_v15 }
 0x126   : > { %v3030_v17 = vpop.f32.mrf.mxu1  ;;  %v1193_v6 = vadd.f32 %v2977_v18, %v1128_v8  ;;  %v4420_v46 = vld [vmem:[#allocation14_spill] sm:$0xff]  ;;  %v3439_v18 = vmov 0.0  }
 0x127   : > { %v2991_v16 = vpop.f32.mrf.mxu0  ;;  %v1201_v2 = vadd.f32 %v2983_v5, %v1136_v57  ;;  %v1255_v13 = vadd.f32 %v3014_v50, %v1190_v61  ;;  %v1149_v57 = vadd.f32 %v2952_v33, %v2912_v9  ;;  %v4003_v58 = vrot.slane %v3439_v18, 7 }
 0x128   : > { %v3031_v7 = vpop.f32.mrf.mxu1  ;;  %v2992_v25 = vadd.f32 %v2991_v16, %v2990_v24  ;;  %v4417_v16 = vld [vmem:[#allocation11_spill] sm:$0xff]  ;;  %v1258_v39 = vadd.f32 %v3017_v59, %v1193_v6 }
 0x129   : > { %v2993_v55 = vpop.f32.mrf.mxu0  ;;  %v2949_v21 = vadd.f32 %v4418_v20, %v4417_v16  ;;  %v1266_v34 = vadd.f32 %v3023_v1, %v1201_v2  ;;  %v3032_v15 = vadd.f32 %v3031_v7, %v3030_v17  ;;  %v4419_v40 = vld [vmem:[#allocation16_spill] sm:$0xff]  ;;  %v4421_v47 = vld [vmem:[#allocation15_spill] sm:$0xff] }
 0x12a   : > { %v3033_v3 = vpop.f32.mrf.mxu1  ;;  %v1214_v37 = vadd.f32 %v2992_v25, %v1149_v57  ;;  %v2989_v41 = vadd.f32 %v2988_v30, %v4419_v40  ;;  %v3026_v26 = vadd.f32 %v4421_v47, %v4420_v46  ;;  %v4422_v4 = vld [vmem:[#allocation17_spill] sm:$0xff] }
 0x12b   : > { %v2994_v35 = vpop.f32.mrf.mxu0  ;;  %v1144_v27 = vadd.f32 %v2949_v21, %v2909_v11 }
 0x12c   : > { %v2995_v63 = vadd.f32 %v2994_v35, %v2993_v55  ;;  %v3034_v22 = vpop.f32.mrf.mxu1  ;;  %v4423_v30 = vld [vmem:[#allocation18_spill] sm:$0xff]  ;;  %v1279_v5 = vadd.f32 %v3032_v15, %v1214_v37  ;;  %v4000_v55 = vrot.slane %v3439_v18, 2  ;;  %v1271_v33 = vadd.f32 %v3026_v26, %v1206_v45 }
 0x12d   : > { %v3238_v54 = vpop.f32.mrf.mxu0  ;;  %v3035_v49 = vadd.f32 %v3034_v22, %v3033_v3  ;;  %v3029_v60 = vadd.f32 %v4423_v30, %v4422_v4  ;;  %v1209_v62 = vadd.f32 %v2989_v41, %v1144_v27  ;;  %v3394_v41 = vld [vmem:[%s4388_s4 + $0x170] sm:$0xff]   ;;  %v3395_v30 = vld [vmem:[%s4388_s4 + $0x1b8] sm:$0xff]  }
 0x12e   : > { %v1328_v12 = vadd.f32 %v3238_v54, %v1263_v31  ;;  %v1217_v48 = vadd.f32 %v2995_v63, %v1152_v36  ;;  %v1533_v54 = vrot.slane %v4000_v55, 7  ;;  %v3392_v36 = vld [vmem:[%s4388_s4 + $0x138] sm:$0xff]   ;;  %v3396_v27 = vld [vmem:[%s4388_s4 + $0x130] sm:$0xff]  }
 0x12f   : > { %v1319_v24 = vpop.f32.mrf.mxu0 }
 0x130   : > { %v1359_v28 = vmul.f32 %v3978_v56, %v1328_v12  ;;  %v1320_v32 = vadd.f32 %v1319_v24, %v1255_v13  ;;  %v1282_v0 = vadd.f32 %v3035_v49, %v1217_v48  ;;  %v1274_v13 = vadd.f32 %v3029_v60, %v1209_v62  ;;  %v3398_v62 = vld [vmem:[%s4388_s4 + $0x168] sm:$0xff]  }
 0x131   : > { %v3239_v38 = vpop.f32.mrf.mxu0 }
 0x132   : > { %v1374_v42 = vadd.f32 %v3985_v19, %v1359_v28  ;;  %v1357_v43 = vmul.f32 %v3978_v56, %v1320_v32  ;;  %v1331_v44 = vadd.f32 %v3239_v38, %v1266_v34 }
 0x133   : > { %v1322_v51 = vpop.f32.mrf.mxu0 }
 0x134   : > { %v1372_v52 = vadd.f32 %v3985_v19, %v1357_v43  ;;  %v1360_v17 = vmul.f32 %v3978_v56, %v1331_v44  ;;  %v1323_v53 = vadd.f32 %v1322_v51, %v1258_v39  ;;  %v4005_v61 = vmax.f32 %v1374_v42, 0.0 }
 0x135   : > { %v3242_v7 = vpop.f32.mrf.mxu0 }
 0x136   : > { %v1380_v50 = vmax.f32 %v1372_v52, 0.0  ;;  %v1358_v8 = vmul.f32 %v3978_v56, %v1323_v53  ;;  %v1344_v9 = vadd.f32 %v3242_v7, %v1279_v5  ;;  %v1375_v3 = vadd.f32 %v3985_v19, %v1360_v17  ;;  %v3397_v7 = vld [vmem:[%s4388_s4 + $0x1f0] sm:$0xff]  }
 0x137   : > { %v1335_v35 = vpop.f32.mrf.mxu0  ;;  %v1468_v14 = vrot.slane %v4005_v61, 1  ;;  %v1553_v24 = vrot.slane %v4005_v61, 7  ;;  %v1490_v48 = vrot.slane %v4005_v61, 2 }
 0x138   : > { %v1484_v2 = vrot.slane %v1380_v50, 2  ;;  %v1537_v1 = vrot.slane %v1380_v50, 7  ;;  %v1373_v31 = vadd.f32 %v3985_v19, %v1358_v8  ;;  %v1363_v23 = vmul.f32 %v3978_v56, %v1344_v9 }
 0x139   : > { %v1336_v6 = vadd.f32 %v1335_v35, %v1271_v33  ;;  %v3243_v59 = vpop.f32.mrf.mxu0  ;;  %v1466_v25 = vrot.slane %v1380_v50, 1  ;;  %v4019_v20 = vmax.f32 %v1375_v3, 0.0  ;;  %v4038_v44 = vrot.slane %v1468_v14, 7 }
 0x13a   : > { %v1381_v10 = vmax.f32 %v1373_v31, 0.0  ;;  %v1347_v12 = vadd.f32 %v3243_v59, %v1282_v0  ;;  %v1538_v63 = vsel %vm1527_vm2, %v4003_v58, %v1537_v1  ;;  %v1541_v16 = vrot.slane %v1484_v2, 7  ;;  %v3400_v0 = vld [vmem:[%s4388_s4 + $0x128] sm:$0xff]   ;;  %v3399_v31 = vld [vmem:[%s4388_s4 + $0x1b0] sm:$0xff]  }
 0x13b   : > { %v1361_v11 = vmul.f32 %v3978_v56, %v1336_v6  ;;  %v1338_v57 = vpop.f32.mrf.mxu0  ;;  %v4014_v29 = vrot.slane %v1466_v25, 7  ;;  %v1378_v21 = vadd.f32 %v3985_v19, %v1363_v23  ;;  %v1638_v38 = vpack.c.bf16 %v1538_v63, %v4003_v58 }
 0x13c   : > { %v1339_v22 = vadd.f32 %v1338_v57, %v1274_v13  ;;  %v1364_v32 = vmul.f32 %v3978_v56, %v1347_v12  ;;  %v1545_v37 = vrot.slane %v1381_v10, 7  ;;  %v1467_v39 = vrot.slane %v1381_v10, 1  ;;  %v3401_v12 = vld [vmem:[%s4388_s4 + $0x1e8] sm:$0xff]  }
 0x13d   : > { %v1376_v28 = vadd.f32 %v3985_v19, %v1361_v11  ;;  %v1639_v34 = vpack.c.bf16 %v4014_v29, %v3439_v18  ;;  %v1486_v40 = vsel %vm369_vm1, %v1484_v2, %v4000_v55  ;;  %v1487_v42 = vrot.slane %v1381_v10, 2  ;;  %v3402_v11 = vld [vmem:[%s4388_s4 + $0x160] sm:$0xff]  }
 0x13e   : > { %v1362_v15 = vmul.f32 %v3978_v56, %v1339_v22  ;;  %v1546_v43 = vsel %vm1527_vm2, %v4003_v58, %v1545_v37  ;;  %v1542_v45 = vrot.slane %v1486_v40, 7  ;;  %v4043_v26 = vrot.slane %v1467_v39, 7 }
 0x13f   : > { %2273 = vmatprep.mubr.bf16.mxu1 %v1639_v34  ;;  %v4040_v46 = vmax.f32 %v1376_v28, 0.0  ;;  %v1641_v47 = vpack.c.bf16 %v1546_v43, %v1538_v63  ;;  %v1561_v51 = vrot.slane %v4019_v20, 7  ;;  %v4053_v52 = vmax.f32 %v1378_v21, 0.0  ;;  %v3404_v21 = vld [vmem:[%s4388_s4 + $0x120] sm:$0xff]  }
 0x140   : > { %v1377_v56 = vadd.f32 %v3985_v19, %v1362_v15  ;;  %2274 = vmatmul.mubr.bf16.vlgmr.msra.gmra.mxu1 %v1638_v38  ;;  %v4047_v49 = vsel %vm1527_vm2, %v1541_v16, %v1542_v45  ;;  %v1379_v17 = vadd.f32 %v3985_v19, %v1364_v32  ;;  %v4058_v53 = vpack.c.bf16 %v4038_v44, %v4043_v26  ;;  %v3403_v32 = vld [vmem:[%s4388_s4 + $0x1a8] sm:$0xff]   ;;  %v3405_v15 = vld [vmem:[%s4388_s4 + $0x1e0] sm:$0xff]   ;;  %v3406_v38 = vld [vmem:[%s4388_s4 + $0x158] sm:$0xff]  }
 0x141   : > { %3129 = vmatpush3.bf16.msra.mxu1 %v3392_v36  ;;  %2338 = vmatprep.mubr.bf16.mxu0 %v1641_v47  ;;  %v1554_v4 = vsel %vm1527_vm2, %v4003_v58, %v1553_v24  ;;  %v1640_v5 = vpack.c.bf16 %v4047_v49, %v1533_v54  ;;  %v4072_v19 = vsel %vm1527_vm2, %v4003_v58, %v1561_v51  ;;  %v1469_v61 = vrot.slane %v4019_v20, 1  ;;  %v3407_v51 = vld [vmem:[%s4388_s4 + $0x1a0] sm:$0xff]  }
 0x142   : > { %3130 = vmatprep.subr.bf16.mxu1 %v3394_v41  ;;  %v4065_v60 = vmax.f32 %v1377_v56, 0.0  ;;  %v1496_v50 = vrot.slane %v4040_v46, 2  ;;  %2281 = vmatprep.mubr.bf16.mxu1 %v4058_v53  ;;  %v1647_v8 = vpack.c.bf16 %v4072_v19, %v1554_v4  ;;  %v1470_v9 = vrot.slane %v4040_v46, 1  ;;  %v3408_v56 = vld [vmem:[%s4388_s4 + $0x118] sm:$0xff]  }
 0x143   : > { %v1489_v33 = vsel %vm369_vm1, %v1487_v42, %v4000_v55  ;;  %2339 = vmatmul.mubr.bf16.vlgmr.msra.gmra.mxu0 %v1640_v5  ;;  %v4087_v35 = vpack.c.bf16 %v1554_v4, %v1546_v43  ;;  %v1492_v2 = vsel %vm369_vm1, %v1490_v48, %v4000_v55  ;;  %v1549_v1 = vrot.slane %v1487_v42, 7  ;;  %v3410_v4 = vld [vmem:[%s4388_s4 + $0x150] sm:$0xff]   ;;  %v3409_v5 = vld [vmem:[%s4388_s4 + $0x1d8] sm:$0xff]  }
 0x144   : > { %v1550_v3 = vrot.slane %v1489_v33, 7  ;;  %2346 = vmatprep.mubr.bf16.mxu0 %v1647_v8  ;;  %3169 = vmatpush3.bf16.msra.mxu0 %v3395_v30  ;;  %v4097_v23 = vrot.slane %v1469_v61, 7  ;;  %v4099_v6 = vrot.slane %v1470_v9, 7  ;;  %v1557_v59 = vrot.slane %v1490_v48, 7  ;;  %v3412_v61 = vld [vmem:[%s4388_s4 + $0x110] sm:$0xff]   ;;  %v3411_v8 = vld [vmem:[%s4388_s4 + $0x198] sm:$0xff]  }
 0x145   : > { %3131 = vmatpush3.bf16.msra.mxu1 %v3396_v27  ;;  %v1558_v25 = vrot.slane %v1492_v2, 7  ;;  %v1493_v10 = vrot.slane %v4019_v20, 2  ;;  %3170 = vmatprep.subr.bf16.mxu0 %v3397_v7  ;;  %v1569_v13 = vrot.slane %v4040_v46, 7  ;;  %v1577_v14 = vrot.slane %v4065_v60, 7  ;;  %v3414_v2 = vld [vmem:[%s4388_s4 + $0x148] sm:$0xff]  }
 0x146   : > { %3132 = vmatprep.subr.bf16.mxu1 %v3398_v62  ;;  %v1471_v57 = vrot.slane %v4065_v60, 1  ;;  %v4114_v63 = vpack.c.bf16 %v4099_v6, %v4097_v23  ;;  %v4117_v24 = vsel %vm1527_vm2, %v1549_v1, %v1550_v3  ;;  %v4119_v16 = vmax.f32 %v1379_v17, 0.0 }
 0x147   : > { %v4123_v20 = vsel %vm1527_vm2, %v4003_v58, %v1577_v14  ;;  %v1472_v22 = vrot.slane %v4053_v52, 1  ;;  %v4131_v28 = vsel %vm1527_vm2, %v1557_v59, %v1558_v25  ;;  %v1498_v34 = vsel %vm369_vm1, %v1496_v50, %v4000_v55  ;;  %v3416_v25 = vld [vmem:[%s4388_s4 + $0x108] sm:$0xff]  }
 0x148   : > { %2282 = vmatmul.mubr.bf16.gmra.mxu1 %v4087_v35  ;;  %3171 = vmatpush3.bf16.msra.mxu0 %v3399_v31  ;;  %v4140_v36 = vpack.c.bf16 %v4131_v28, %v4117_v24  ;;  %v1570_v37 = vsel %vm1527_vm2, %v4003_v58, %v1569_v13  ;;  %v4150_v39 = vrot.slane %v1471_v57, 7  ;;  %v1495_v40 = vsel %vm369_vm1, %v1493_v10, %v4000_v55 }
 0x149   : > { %3133 = vmatpush3.bf16.msra.mxu1 %v3400_v0  ;;  %2289 = vmatprep.mubr.bf16.mxu1 %v4114_v63  ;;  %v1653_v41 = vpack.c.bf16 %v4123_v20, %v1570_v37  ;;  %v1573_v42 = vrot.slane %v1496_v50, 7  ;;  %v1574_v43 = vrot.slane %v1498_v34, 7  ;;  %v1499_v45 = vrot.slane %v4065_v60, 2  ;;  %v3413_v0 = vld [vmem:[%s4388_s4 + $0x1d0] sm:$0xff]   ;;  %v3421_v34 = vld [vmem:[%s4388_s4 + $0x1c0] sm:$0xff]  }
 0x14a   : > { %3172 = vmatprep.subr.bf16.mxu0 %v3401_v12  ;;  %3134 = vmatprep.subr.bf16.mxu1 %v3402_v11  ;;  %v4157_v46 = vrot.slane %v1472_v22, 7  ;;  %v1593_v47 = vrot.slane %v4119_v16, 7  ;;  %v4164_v48 = vpack.c.bf16 %v1570_v37, %v4072_v19  ;;  %v1565_v27 = vrot.slane %v1493_v10, 7  ;;  %v3415_v12 = vld [vmem:[%s4388_s4 + $0x190] sm:$0xff]   ;;  %v3418_v11 = vld [vmem:[%s4388_s4 + $0x140] sm:$0xff]   ;;  %v3423_v37 = vld [vmem:[%s4388_s4 + $0x238] sm:$0xff]  }
 0x14b   : > { %2347 = vmatmul.mubr.bf16.gmra.mxu0 %v4140_v36  ;;  %v1566_v17 = vrot.slane %v1495_v40, 7  ;;  %v1502_v30 = vrot.slane %v4053_v52, 2  ;;  %v1585_v19 = vrot.slane %v4053_v52, 7  ;;  %v4183_v7 = vsel %vm1527_vm2, %v1573_v42, %v1574_v43  ;;  %v3420_v22 = vld [vmem:[%s4388_s4 + $0x100] sm:$0xff]   ;;  %v3424_v40 = vld [vmem:[%s4388_s4 + $0x230] sm:$0xff]  }
 0x14c   : > { %2354 = vmatprep.mubr.bf16.mxu0 %v1653_v41  ;;  %3173 = vmatpush3.bf16.msra.mxu0 %v3403_v32  ;;  %v4175_v60 = vpack.c.bf16 %v4157_v46, %v4150_v39  ;;  %v4188_v62 = vsel %vm1527_vm2, %v4003_v58, %v1593_v47  ;;  %v1501_v50 = vsel %vm369_vm1, %v1499_v45, %v4000_v55  ;;  %v1581_v31 = vrot.slane %v1499_v45, 7  ;;  %v3428_v47 = vld [vmem:[%s4388_s4 + $0x210] sm:$0xff]  }
 0x14d   : > { %3135 = vmatpush3.bf16.msra.mxu1 %v3404_v21  ;;  %3174 = vmatprep.subr.bf16.mxu0 %v3405_v15  ;;  %v1567_v52 = vsel %vm1527_vm2, %v1565_v27, %v1566_v17  ;;  %v1586_v33 = vsel %vm1527_vm2, %v4003_v58, %v1585_v19  ;;  %v1504_v1 = vsel %vm369_vm1, %v1502_v30, %v4000_v55  ;;  %v1582_v59 = vrot.slane %v1501_v50, 7 }
 0x14e   : > { %3136 = vmatprep.subr.bf16.mxu1 %v3406_v38  ;;  %v4200_v9 = vpack.c.bf16 %v4183_v7, %v1567_v52  ;;  %v1659_v3 = vpack.c.bf16 %v4188_v62, %v1586_v33  ;;  %v4218_v10 = vpack.c.bf16 %v1586_v33, %v4123_v20  ;;  %v1589_v13 = vrot.slane %v1502_v30, 7  ;;  %v3417_v20 = vld [vmem:[%s4388_s4 + $0x1c8] sm:$0xff]   ;;  %v3422_v38 = vld [vmem:[%s4388_s4 + $0x180] sm:$0xff]  }
 0x14f   : > { %v1590_v14 = vrot.slane %v1504_v1, 7  ;;  %v1643_v57 = vpack.c.bf16 %v4117_v24, %v4047_v49  ;;  %v1583_v21 = vsel %vm1527_vm2, %v1581_v31, %v1582_v59  ;;  %v3419_v49 = vld [vmem:[%s4388_s4 + $0x188] sm:$0xff]   ;;  %v1642_v15 = vpack.c.bf16 %v4043_v26, %v4014_v29 }
 0x150   : > { %2290 = vmatmul.mubr.bf16.gmra.mxu1 %v4164_v48  ;;  %3175 = vmatpush3.bf16.msra.mxu0 %v3407_v51  ;;  %v1649_v41 = vpack.c.bf16 %v1567_v52, %v4131_v28  ;;  %v1508_v42 = vrot.slane %v4119_v16, 2  ;;  %v3425_v29 = vld [vmem:[%s4388_s4 + $0x228] sm:$0xff]   ;;  %v3426_v28 = vld [vmem:[%s4388_s4 + $0x220] sm:$0xff]   ;;  %v1655_v43 = vpack.c.bf16 %v1583_v21, %v4183_v7  ;;  %v1662_v17 = vpack.c.bf16 %v4003_v58, %v4188_v62 }
 0x151   : > { %2297 = vmatprep.mubr.bf16.mxu1 %v4175_v60  ;;  %3137 = vmatpush3.bf16.msra.mxu1 %v3408_v56  ;;  %v1591_v32 = vsel %vm1527_vm2, %v1589_v13, %v1590_v14 }
 0x152   : > { %3138 = vmatprep.subr.bf16.mxu1 %v3410_v4  ;;  %3176 = vmatprep.subr.bf16.mxu0 %v3409_v5  ;;  %v4240_v24 = vpack.c.bf16 %v1591_v32, %v1583_v21  ;;  %v1510_v26 = vsel %vm369_vm1, %v1508_v42, %v4000_v55  ;;  %v1597_v45 = vrot.slane %v1508_v42, 7 }
 0x153   : > { %2355 = vmatmul.mubr.bf16.gmra.mxu0 %v4200_v9  ;;  %v1598_v56 = vrot.slane %v1510_v26, 7 }
 0x154   : > { %2362 = vmatprep.mubr.bf16.mxu0 %v1659_v3  ;;  %3177 = vmatpush3.bf16.msra.mxu0 %v3411_v8 }
 0x155   : > { %3139 = vmatpush3.bf16.msra.mxu1 %v3412_v61  ;;  %3178 = vmatprep.subr.bf16.mxu0 %v3413_v0 }
 0x156   : > { %3140 = vmatprep.subr.bf16.mxu1 %v3414_v2 }
 0x158   : > { %2298 = vmatmul.mubr.bf16.gmra.mxu1 %v4218_v10  ;;  %3179 = vmatpush3.bf16.msra.mxu0 %v3415_v12 }
 0x159   : > { %3141 = vmatpush3.bf16.msra.mxu1 %v3416_v25  ;;  %2403 = vmatprep.mubr.bf16.mxu1 %v1643_v57 }
 0x15a   : > { %3142 = vmatprep.subr.bf16.mxu1 %v3418_v11  ;;  %3180 = vmatprep.subr.bf16.mxu0 %v3417_v20 }
 0x15b   : > { %2363 = vmatmul.mubr.bf16.gmra.mxu0 %v4240_v24 }
 0x15c   : > { %3181 = vmatpush3.bf16.msra.mxu0 %v3419_v49  ;;  %2468 = vmatprep.mubr.bf16.mxu0 %v4058_v53  ;;  %v1648_v53 = vpack.c.bf16 %v4097_v23, %v4038_v44  ;;  %v1506_v44 = vrot.slane %v4119_v16, 1  ;;  %v1654_v23 = vpack.c.bf16 %v4150_v39, %v4099_v6  ;;  %v3429_v16 = vld [vmem:[%s4388_s4 + $0x208] sm:$0xff]   ;;  %v3430_v39 = vld [vmem:[%s4388_s4 + $0x200] sm:$0xff]  }
 0x15d   : > { %3143 = vmatpush3.bf16.msra.mxu1 %v3420_v22  ;;  %3182 = vmatprep.subr.bf16.mxu0 %v3421_v34 }
 0x15e   : > { %3244 = vmatprep.subr.bf16.mxu1 %v3423_v37  ;;  %v1595_v27 = vrot.slane %v1506_v44, 7 }
 0x160   : > { %2404 = vmatmul.mubr.bf16.vlgmr.msra.gmra.mxu1 %v1642_v15  ;;  %3183 = vmatpush3.bf16.msra.mxu0 %v3422_v38  ;;  %v1660_v6 = vpack.c.bf16 %v1595_v27, %v4157_v46 }
 0x161   : > { %2411 = vmatprep.mubr.bf16.mxu1 %v1649_v41  ;;  %3245 = vmatpush3.bf16.msra.mxu1 %v3423_v37 }
 0x162   : > { %3246 = vmatprep.subr.bf16.mxu1 %v3424_v40 }
 0x163   : > { %2469 = vmatmul.mubr.bf16.vlgmr.msra.gmra.mxu0 %v4087_v35  ;;  %v3427_v35 = vld [vmem:[%s4388_s4 + $0x218] sm:$0xff]  }
 0x164   : > { %2476 = vmatprep.mubr.bf16.mxu0 %v4114_v63  ;;  %v1599_v63 = vsel %vm1527_vm2, %v1597_v45, %v1598_v56 }
 0x165   : > { %3247 = vmatpush3.bf16.msra.mxu1 %v3424_v40  ;;  %v1661_v51 = vpack.c.bf16 %v1599_v63, %v1591_v32 }
 0x166   : > { %3248 = vmatprep.subr.bf16.mxu1 %v3425_v29 }
 0x168   : > { %2412 = vmatmul.mubr.bf16.gmra.mxu1 %v1648_v53 }
 0x169   : > { %2419 = vmatprep.mubr.bf16.mxu1 %v1655_v43  ;;  %3249 = vmatpush3.bf16.msra.mxu1 %v3425_v29 }
 0x16a   : > { %3250 = vmatprep.subr.bf16.mxu1 %v3426_v28 }
 0x16b   : > { %2477 = vmatmul.mubr.bf16.gmra.mxu0 %v4164_v48  ;;  %v1663_v48 = vpack.c.bf16 %v3439_v18, %v1595_v27  ;;  %v1664_v18 = vpack.c.bf16 %v1533_v54, %v1599_v63 }
 0x16c   : > { %2484 = vmatprep.mubr.bf16.mxu0 %v4175_v60 }
 0x16d   : > { %3251 = vmatpush3.bf16.msra.mxu1 %v3426_v28 }
 0x16e   : > { %3252 = vmatprep.subr.bf16.mxu1 %v3427_v35 }
 0x170   : > { %2420 = vmatmul.mubr.bf16.gmra.mxu1 %v1654_v23 }
 0x171   : > { %2427 = vmatprep.mubr.bf16.mxu1 %v1661_v51  ;;  %3253 = vmatpush3.bf16.msra.mxu1 %v3427_v35 }
 0x172   : > { %3254 = vmatprep.subr.bf16.mxu1 %v3428_v47 }
 0x173   : > { %2485 = vmatmul.mubr.bf16.gmra.mxu0 %v4218_v10 }
 0x174   : > { %2492 = vmatprep.mubr.bf16.mxu0 %v1663_v48 }
 0x175   : > { %3255 = vmatpush3.bf16.msra.mxu1 %v3428_v47 }
 0x176   : > { %3256 = vmatprep.subr.bf16.mxu1 %v3429_v16 }
 0x178   : > { %2428 = vmatmul.mubr.bf16.gmra.mxu1 %v1660_v6 }
 0x179   : > { %3257 = vmatpush3.bf16.msra.mxu1 %v3429_v16  ;;  %3260 = vmatprep.mubr.bf16.mxu1 %v4140_v36 }
 0x17a   : > { %3258 = vmatprep.subr.bf16.mxu1 %v3430_v39 }
 0x17b   : > { %2493 = vmatmul.mubr.bf16.gmra.mxu0 %v1662_v17 }
 0x17d   : > { %3259 = vmatpush3.bf16.msra.mxu1 %v3430_v39 }
 0x180   : > { %3261 = vmatmul.mubr.bf16.vlgmr.msra.gmra.mxu1 %v4200_v9 }
 0x181   : > { %3264 = vmatprep.mubr.bf16.mxu1 %v4240_v24 }
 0x188   : > { %3265 = vmatmul.mubr.bf16.gmra.mxu1 %v1664_v18 }
 0x200   : > { %v3064_v46 = vpop.f32.mrf.mxu1 }
 0x202   : > { %v3065_v4 = vpop.f32.mrf.mxu1 }
 0x203   : > { %v3104_v60 = vpop.f32.mrf.mxu0  ;;  %v3066_v16 = vadd.f32 %v3065_v4, %v3064_v46 }
 0x204   : > { %v4301_v30 = vpop.f32.mrf.mxu1 }
 0x205   : > { %v3105_v5 = vpop.f32.mrf.mxu0 }
 0x206   : > { %v3068_v36 = vpop.f32.mrf.mxu1  ;;  %v3106_v44 = vadd.f32 %v3105_v5, %v3104_v60 }
 0x207   : > { %v3107_v7 = vpop.f32.mrf.mxu0 }
 0x208   : > { %v3070_v19 = vpop.f32.mrf.mxu1 }
 0x209   : > { %v3108_v62 = vpop.f32.mrf.mxu0 }
 0x20a   : > { %v3071_v58 = vpop.f32.mrf.mxu1  ;;  %v3109_v6 = vadd.f32 %v3108_v62, %v3107_v7 }
 0x20b   : > { %v3110_v50 = vpop.f32.mrf.mxu0  ;;  %v3072_v47 = vadd.f32 %v3071_v58, %v3070_v19 }
 0x20c   : > { %v3073_v61 = vpop.f32.mrf.mxu1 }
 0x20d   : > { %v3111_v8 = vpop.f32.mrf.mxu0 }
 0x20e   : > { %v3074_v52 = vpop.f32.mrf.mxu1  ;;  %v3112_v35 = vadd.f32 %v3111_v8, %v3110_v50 }
 0x20f   : > { %v3113_v55 = vpop.f32.mrf.mxu0  ;;  %v3075_v8 = vadd.f32 %v3074_v52, %v3073_v61 }
 0x210   : > { %v4303_v9 = vpop.f32.mrf.mxu1  ;;  %v2349_v39 = vadd.f32 %v3112_v35, %v3072_v47 }
 0x211   : > { %v3114_v33 = vpop.f32.mrf.mxu0 }
 0x212   : > { %v4305_v54 = vpop.f32.mrf.mxu1  ;;  %v3115_v17 = vadd.f32 %v3114_v33, %v3113_v55 }
 0x213   : > { %v3116_v2 = vpop.f32.mrf.mxu0  ;;  %v3078_v33 = vadd.f32 %v4305_v54, %v4303_v9 }
 0x214   : > { %v4307_v0 = vpop.f32.mrf.mxu1  ;;  %v2352_v4 = vadd.f32 %v3115_v17, %v3075_v8 }
 0x215   : > { %4424 = vst [vmem:[#allocation12_spill] sm:$0xff] %v4307_v0  ;;  %v3117_v3 = vpop.f32.mrf.mxu0  ;;  %v2341_v0 = vadd.f32 %v3106_v44, %v3066_v16 }
 0x216   : > { %v4309_v1 = vpop.f32.mrf.mxu1 }
 0x217   : > { %4425 = vst [vmem:[#allocation11_spill] sm:$0xff] %v4309_v1  ;;  %v4311_v59 = vpop.f32.mrf.mxu0 }
 0x218   : > { %v3082_v31 = vpop.f32.mrf.mxu1 }
 0x219   : > { %v4313_v10 = vpop.f32.mrf.mxu0 }
 0x21a   : > { %v3083_v25 = vpop.f32.mrf.mxu1 }
 0x21b   : > { %v3122_v13 = vpop.f32.mrf.mxu0 }
 0x21c   : > { %v4315_v12 = vpop.f32.mrf.mxu1  ;;  %v4430_v44 = vld [vmem:[#allocation12_spill] sm:$0xff] }
 0x21d   : > { %v3123_v11 = vpop.f32.mrf.mxu0 }
 0x21e   : > { %v4317_v14 = vpop.f32.mrf.mxu1  ;;  %v4431_v47 = vld [vmem:[#allocation11_spill] sm:$0xff] }
 0x21f   : > { %v3125_v20 = vpop.f32.mrf.mxu0  ;;  %v3087_v9 = vadd.f32 %v4317_v14, %v4315_v12 }
 0x220   : > { %v3144_v57 = vpop.f32.mrf.mxu1 }
 0x221   : > { %v3126_v22 = vpop.f32.mrf.mxu0 }
 0x222   : > { %v3145_v21 = vpop.f32.mrf.mxu1  ;;  %v3127_v61 = vadd.f32 %v3126_v22, %v3125_v20  ;;  %v4344_v20 = vld [vmem:[%s4390_s6] ss:$0 sm:$0xff] }
 0x223   : > { %v3184_v49 = vpop.f32.mrf.mxu0  ;;  %v3146_v18 = vadd.f32 %v3145_v21, %v3144_v57  ;;  %v3118_v57 = vadd.f32 %v3117_v3, %v3116_v2  ;;  %v3084_v21 = vadd.f32 %v3083_v25, %v3082_v31  ;;  %v3121_v25 = vadd.f32 %v4313_v10, %v4311_v59 }
 0x224   : > { %v3147_v32 = vpop.f32.mrf.mxu1 }
 0x225   : > { %v3185_v34 = vpop.f32.mrf.mxu0  ;;  %v2406_v7 = vadd.f32 %v3146_v18, %v2341_v0  ;;  %v4335_v0 = vld [vmem:[%s4389_s5] ss:$0 sm:$0xff]  ;;  %v2357_v31 = vadd.f32 %v3118_v57, %v3078_v33 }
 0x226   : > { %v3148_v24 = vpop.f32.mrf.mxu1  ;;  %v3186_v62 = vadd.f32 %v3185_v34, %v3184_v49  ;;  %v2368_v49 = vadd.f32 %v3127_v61, %v3087_v9 }
 0x227   : > { %v3187_v15 = vpop.f32.mrf.mxu0  ;;  %v3149_v19 = vadd.f32 %v3148_v24, %v3147_v32 }
 0x228   : > { %v3150_v37 = vpop.f32.mrf.mxu1  ;;  %v2471_v3 = vadd.f32 %v3186_v62, %v2406_v7 }
 0x229   : > { %v3188_v40 = vpop.f32.mrf.mxu0 }
 0x22a   : > { %v3151_v38 = vpop.f32.mrf.mxu1  ;;  %v3189_v32 = vadd.f32 %v3188_v40, %v3187_v15 }
 0x22b   : > { %v3190_v42 = vpop.f32.mrf.mxu0  ;;  %v3152_v51 = vadd.f32 %v3151_v38, %v3150_v37 }
 0x22c   : > { %v3153_v41 = vpop.f32.mrf.mxu1 }
 0x22d   : > { %v3191_v26 = vpop.f32.mrf.mxu0 }
 0x22e   : > { %v3154_v29 = vpop.f32.mrf.mxu1  ;;  %v3192_v60 = vadd.f32 %v3191_v26, %v3190_v42 }
 0x22f   : > { %v3193_v28 = vpop.f32.mrf.mxu0  ;;  %v3155_v5 = vadd.f32 %v3154_v29, %v3153_v41 }
 0x230   : > { %v3156_v53 = vpop.f32.mrf.mxu1 }
 0x231   : > { %v3194_v45 = vpop.f32.mrf.mxu0  ;;  %v2417_v52 = vadd.f32 %v3155_v5, %v2352_v4  ;;  %v4434_v5 = vld [vmem:[#allocation5_spill] sm:$0xff] }
 0x232   : > { %v3157_v43 = vpop.f32.mrf.mxu1  ;;  %v3195_v37 = vadd.f32 %v3194_v45, %v3193_v28 }
 0x233   : > { %v4321_v63 = vpop.f32.mrf.mxu0  ;;  %v3158_v24 = vadd.f32 %v3157_v43, %v3156_v53 }
 0x234   : > { %v4319_v56 = vpop.f32.mrf.mxu1  ;;  %4427 = vst [vmem:[#allocation16_spill] sm:$0xff] %v4321_v63  ;;  %v2414_v63 = vadd.f32 %v3152_v51, %v2349_v39  ;;  %v2482_v14 = vadd.f32 %v3195_v37, %v2417_v52  ;;  %v3081_v51 = vadd.f32 %v4431_v47, %v4430_v44  ;;  %v4436_v52 = vld [vmem:[#allocation6_spill] sm:$0xff] }
 0x235   : > { %4426 = vst [vmem:[#allocation13_spill] sm:$0xff] %v4319_v56  ;;  %v3197_v27 = vpop.f32.mrf.mxu0  ;;  %v3069_v56 = vadd.f32 %v3068_v36, %v4301_v30  ;;  %v3124_v30 = vadd.f32 %v3123_v11, %v3122_v13  ;;  %v2422_v40 = vadd.f32 %v3158_v24, %v2357_v31 }
 0x236   : > { %v4323_v23 = vpop.f32.mrf.mxu1  ;;  %v2479_v41 = vadd.f32 %v3192_v60, %v2414_v63  ;;  %v2360_v60 = vadd.f32 %v3121_v25, %v3081_v51 }
 0x237   : > { %4428 = vst [vmem:[#allocation14_spill] sm:$0xff] %v4323_v23  ;;  %v4325_v1 = vpop.f32.mrf.mxu0  ;;  %v2344_v46 = vadd.f32 %v3109_v6, %v3069_v56  ;;  %v2365_v13 = vadd.f32 %v3124_v30, %v3084_v21 }
 0x238   : > { %v3162_v48 = vpop.f32.mrf.mxu1 }
 0x239   : > { %v4328_v23 = vpop.f32.mrf.mxu0  ;;  %v2409_v42 = vadd.f32 %v3149_v19, %v2344_v46 }
 0x23a   : > { %v3163_v50 = vpop.f32.mrf.mxu1  ;;  %v3201_v33 = vadd.f32 %v4328_v23, %v4325_v1 }
 0x23b   : > { %v3202_v55 = vpop.f32.mrf.mxu0  ;;  %v3164_v29 = vadd.f32 %v3163_v50, %v3162_v48  ;;  %v2474_v45 = vadd.f32 %v3189_v32, %v2409_v42  ;;  %v4429_v59 = vld [vmem:[#allocation16_spill] sm:$0xff] }
 0x23c   : > { %v3165_v58 = vpop.f32.mrf.mxu1  ;;  %v3198_v10 = vadd.f32 %v3197_v27, %v4429_v59  ;;  %v4432_v16 = vld [vmem:[#allocation13_spill] sm:$0xff] }
 0x23d   : > { %v3203_v38 = vpop.f32.mrf.mxu0  ;;  %v2430_v53 = vadd.f32 %v3164_v29, %v2365_v13 }
 0x23e   : > { %v3166_v36 = vpop.f32.mrf.mxu1  ;;  %v3204_v28 = vadd.f32 %v3203_v38, %v3202_v55  ;;  %v4433_v48 = vld [vmem:[#allocation14_spill] sm:$0xff]  ;;  %v2487_v62 = vadd.f32 %v3198_v10, %v2422_v40 }
 0x23f   : > { %v3205_v54 = vpop.f32.mrf.mxu0  ;;  %v3167_v11 = vadd.f32 %v3166_v36, %v3165_v58  ;;  %v3161_v6 = vadd.f32 %v4433_v48, %v4432_v16  ;;  %v4435_v36 = vld [vmem:[#allocation3_spill] sm:$0xff] }
 0x240   : > { %v3262_v26 = vpop.f32.mrf.mxu1  ;;  %v2495_v58 = vadd.f32 %v3204_v28, %v2430_v53  ;;  %v4439_v53 = vld [vmem:[#allocation10_spill] sm:$0xff] }
 0x241   : > { %v2544_v2 = vadd.f32 %v3262_v26, %v2479_v41  ;;  %v3206_v15 = vpop.f32.mrf.mxu0  ;;  %v2433_v39 = vadd.f32 %v3167_v11, %v2368_v49  ;;  %v2425_v55 = vadd.f32 %v3161_v6, %v2360_v60  ;;  %v4437_v26 = vld [vmem:[#allocation4_spill] sm:$0xff] }
 0x242   : > { %v2535_v22 = vpop.f32.mrf.mxu1  ;;  %v3207_v17 = vadd.f32 %v3206_v15, %v3205_v54  ;;  %v4438_v15 = vld [vmem:[#allocation9_spill] sm:$0xff] }
 0x243   : > { %v2575_v34 = vmul.f32 %v4335_v0, %v2544_v2  ;;  %v2536_v12 = vadd.f32 %v2535_v22, %v2471_v3  ;;  %v2490_v2 = vadd.f32 %v3201_v33, %v2425_v55 }
 0x244   : > { %v3263_v43 = vpop.f32.mrf.mxu1  ;;  %v2498_v30 = vadd.f32 %v3207_v17, %v2433_v39 }
 0x245   : > { %v2590_v56 = vadd.f32 %v4344_v20, %v2575_v34  ;;  %v2573_v35 = vmul.f32 %v4335_v0, %v2536_v12  ;;  %v2547_v63 = vadd.f32 %v3263_v43, %v2482_v14  ;;  %v4440_v43 = vld [vmem:[#allocation7_spill] sm:$0xff] }
 0x246   : > { %v2538_v18 = vpop.f32.mrf.mxu1 }
 0x247   : > { %v2588_v50 = vadd.f32 %v4344_v20, %v2573_v35  ;;  %v2576_v8 = vmul.f32 %v4335_v0, %v2547_v63  ;;  %v2539_v27 = vadd.f32 %v2538_v18, %v2474_v45  ;;  %v2598_v19 = vadd.f32 %v2590_v56, %v4434_v5  ;;  %v4441_v35 = vld [vmem:[#allocation8_spill] sm:$0xff] }
 0x248   : > { %v3266_v46 = vpop.f32.mrf.mxu1 }
 0x249   : > { %v2591_v4 = vadd.f32 %v4344_v20, %v2576_v8  ;;  %v2574_v7 = vmul.f32 %v4335_v0, %v2539_v27  ;;  %v2560_v57 = vadd.f32 %v3266_v46, %v2495_v58  ;;  %v2596_v61 = vadd.f32 %v2588_v50, %v4435_v36 }
 0x24a   : > { %v2551_v21 = vpop.f32.mrf.mxu1  ;;  %v2606_v42 = vmax.f32 %v2598_v19, 0.0 }
 0x24b   : > { %v2599_v37 = vadd.f32 %v2591_v4, %v4436_v52  ;;  %v2589_v38 = vadd.f32 %v4344_v20, %v2574_v7  ;;  %v2552_v41 = vadd.f32 %v2551_v21, %v2487_v62  ;;  %v2579_v32 = vmul.f32 %v4335_v0, %v2560_v57 }
 0x24c   : > { %v3267_v24 = vpop.f32.mrf.mxu1  ;;  %v2604_v31 = vmax.f32 %v2596_v61, 0.0 }
 0x24d   : > { %v2607_v29 = vmax.f32 %v2599_v37, 0.0  ;;  %v2597_v9 = vadd.f32 %v2589_v38, %v4437_v26  ;;  %v2577_v1 = vmul.f32 %v4335_v0, %v2552_v41  ;;  %v2563_v23 = vadd.f32 %v3267_v24, %v2498_v30 }
 0x24e   : > { %v2594_v54 = vadd.f32 %v4344_v20, %v2579_v32  ;;  %v2554_v3 = vpop.f32.mrf.mxu1 }
 0x24f   : > { %v2861_v25 = vpack.c.bf16 %v2607_v29, %v2606_v42  ;;  %v2605_v13 = vmax.f32 %v2597_v9, 0.0  ;;  %v2580_v11 = vmul.f32 %v4335_v0, %v2563_v23  ;;  %v2592_v22 = vadd.f32 %v4344_v20, %v2577_v1 }
 0x250   : > { %v2555_v49 = vadd.f32 %v2554_v3, %v2490_v2  ;;  %v2602_v12 = vadd.f32 %v2594_v54, %v4438_v15 }
 0x251   : > { %2873 = vst [vmem:[%s278_s15 + $0x8] sm:$0xff] %v2861_v25   ;;  %v2856_v34 = vpack.c.bf16 %v2605_v13, %v2604_v31  ;;  %v2595_v14 = vadd.f32 %v4344_v20, %v2580_v11  ;;  %v2600_v45 = vadd.f32 %v2592_v22, %v4440_v43 }
 0x252   : > { %v2578_v40 = vmul.f32 %v4335_v0, %v2555_v49  ;;  %v2610_v10 = vmax.f32 %v2602_v12, 0.0 }
 0x253   : > { %2857 = vst [vmem:[%s278_s15] sm:$0xff] %v2856_v34   ;;  %v2603_v28 = vadd.f32 %v2595_v14, %v4439_v53  ;;  %v2608_v47 = vmax.f32 %v2600_v45, 0.0 }
 0x254   : > { %v2593_v59 = vadd.f32 %v4344_v20, %v2578_v40 }
 0x255   : > { %v2611_v56 = vmax.f32 %v2603_v28, 0.0 }
 0x256   : > { %v2601_v63 = vadd.f32 %v2593_v59, %v4441_v35 }
 0x257   : > { %v2871_v44 = vpack.c.bf16 %v2611_v56, %v2610_v10 }
 0x258   : > { %v2609_v51 = vmax.f32 %v2601_v63, 0.0 }
 0x259   : > { %2875 = vst [vmem:[%s278_s15 + $0x18] sm:$0xff] %v2871_v44  }
 0x25a   : > { %v2866_v16 = vpack.c.bf16 %v2609_v51, %v2608_v47 }
 0x25c   : > { %2874 = vst [vmem:[%s278_s15 + $0x10] sm:$0xff] %v2866_v16  }
 0x25d PF: > { %s17_s24 = sadd.s32 1, %s3437_s24  }
 0x25e   : > { %p14_p4 = scmp.ge.s32.totalorder %s17_s24, 4  }
 0x260   :  { %16 = sbr.rel (!%p14_p4) target bundleno = 1 (0x1), region = 79 }

</bundles_post_ra>
